<compile_context>
chip_gen: v7x
topology: tpu7x:2x2x1
jax: 0.10.0
libtpu: 0.0.40
codegen_flags: <defaults>
</compile_context>

<pallas_src>
import numpy as np

import jax
import jax.numpy as jnp
from jax.experimental import pallas as pl
from jax.experimental.pallas import tpu as pltpu


# ------------------------- constant packing (one-time) -----------------------

def _conv_toeplitz(w_oihw, w_out):
    """(Cout, Cin, 3, 3) conv weight -> (3, (w_out+2)*Cin, w_out*Cout).

    With activations laid out lane-dense as A[(h), w*Cin + ci]:
      sum_kh (A[i+kh, :] @ T[kh])[j*Cout + co]
        = sum_{kh,kw,ci} A[i+kh, (j+kw)*Cin + ci] * w[co, ci, kh, kw]
    i.e. a VALID 3x3 / stride-1 conv done as three 2-D MXU matmuls.
    """
    cout, cin, _, _ = w_oihw.shape
    w_in = w_out + 2
    t = np.zeros((3, w_in * cin, w_out * cout), np.float32)
    for kh in range(3):
        for kw in range(3):
            blk = w_oihw[:, :, kh, kw].T                      # (Cin, Cout)
            for j in range(w_out):
                t[kh, (j + kw) * cin:(j + kw + 1) * cin,
                  j * cout:(j + 1) * cout] = blk
    return t


def _pool_row_select(h_in):
    """(2, h_in//2, h_in): [0] picks even rows, [1] odd rows (floor pooling)."""
    h_out = h_in // 2
    s = np.zeros((2, h_out, h_in), np.float32)
    idx = np.arange(h_out)
    s[0, idx, 2 * idx] = 1.0
    s[1, idx, 2 * idx + 1] = 1.0
    return s


def _pool_col_select(w_in, c):
    """(2, w_in*c, (w_in//2)*c): picks even / odd W column-blocks of width c."""
    w_out = w_in // 2
    s = np.zeros((2, w_in * c, w_out * c), np.float32)
    wo = np.repeat(np.arange(w_out), c)
    cc = np.tile(np.arange(c), w_out)
    cols = wo * c + cc
    s[0, (2 * wo) * c + cc, cols] = 1.0
    s[1, (2 * wo + 1) * c + cc, cols] = 1.0
    return s


_CONST_KEYS = ("t1", "b1", "seo1", "ceo1",
               "t2", "b2", "seo2", "ceo2",
               "t3", "b3", "wfc", "bfc")


def pack_params(params):
    """Pre-pack PyTorch-layout weights into VMEM-resident kernel constants."""
    f32 = np.float32
    w1 = np.asarray(params["w1"], f32); b1 = np.asarray(params["b1"], f32)
    w2 = np.asarray(params["w2"], f32); b2 = np.asarray(params["b2"], f32)
    w3 = np.asarray(params["w3"], f32); b3 = np.asarray(params["b3"], f32)
    wfc = np.asarray(params["wfc"], f32); bfc = np.asarray(params["bfc"], f32)
    return {
        # stage 1: 28x28x1 -> conv(26x26x32) -> pool(13x13x32)
        "t1":   jnp.asarray(_conv_toeplitz(w1, 26), jnp.bfloat16),    # (3, 28, 832)
        "b1":   jnp.asarray(np.tile(b1, 26)[None, :], jnp.float32),   # (1, 832)
        "seo1": jnp.asarray(_pool_row_select(26), jnp.float32),       # (2, 13, 26)
        "ceo1": jnp.asarray(_pool_col_select(26, 32), jnp.bfloat16),  # (2, 832, 416)
        # stage 2: 13x13x32 -> conv(11x11x64) -> pool(5x5x64)
        "t2":   jnp.asarray(_conv_toeplitz(w2, 11), jnp.bfloat16),    # (3, 416, 704)
        "b2":   jnp.asarray(np.tile(b2, 11)[None, :], jnp.float32),   # (1, 704)
        "seo2": jnp.asarray(_pool_row_select(11), jnp.float32),       # (2, 5, 11)
        "ceo2": jnp.asarray(_pool_col_select(11, 64), jnp.bfloat16),  # (2, 704, 320)
        # stage 3: 5x5x64 -> conv(3x3x128) -> pool(1x1x128)
        "t3":   jnp.asarray(_conv_toeplitz(w3, 3), jnp.bfloat16),     # (3, 320, 384)
        "b3":   jnp.asarray(np.tile(b3, 3)[None, :], jnp.float32),    # (1, 384)
        # fc1 weight pre-transposed once: (128, 10)
        "wfc":  jnp.asarray(wfc.T, jnp.bfloat16),
        "bfc":  jnp.asarray(bfc[None, :], jnp.float32),               # (1, 10)
    }


# --------------------------------- kernel ------------------------------------

def _fused_cnn_kernel(x_ref,
                      t1_ref, b1_ref, seo1_ref, ceo1_ref,
                      t2_ref, b2_ref, seo2_ref, ceo2_ref,
                      t3_ref, b3_ref, wfc_ref, bfc_ref,
                      o_ref):
    f32 = jnp.float32
    bf16 = jnp.bfloat16

    def conv3x3_relu(a_bf16, t_ref, b_ref, h_out):
        # a_bf16: (h_out+2, Win*Cin) bf16 ; t_ref: (3, Win*Cin, Wout*Cout) bf16.
        z = jnp.dot(a_bf16[0:h_out, :], t_ref[0], preferred_element_type=f32)
        z = z + jnp.dot(a_bf16[1:h_out + 1, :], t_ref[1],
                        preferred_element_type=f32)
        z = z + jnp.dot(a_bf16[2:h_out + 2, :], t_ref[2],
                        preferred_element_type=f32)
        return jnp.maximum(z + b_ref[...], 0.0)                   # fused ReLU (f32)

    def maxpool_2x2(y, seo_ref, ceo_ref):
        # Exact 0/1 selection matmuls in f32: even/odd rows, even/odd W-blocks.
        m = jnp.maximum(
            jnp.dot(seo_ref[0], y, preferred_element_type=f32),
            jnp.dot(seo_ref[1], y, preferred_element_type=f32))
        return jnp.maximum(
            jnp.dot(m, ceo_ref[0].astype(f32), preferred_element_type=f32),
            jnp.dot(m, ceo_ref[1].astype(f32), preferred_element_type=f32))

    x = x_ref[0].astype(bf16)                                     # (28, 28)

    y1 = conv3x3_relu(x, t1_ref, b1_ref, 26)                      # (26, 26*32)
    p1 = maxpool_2x2(y1, seo1_ref, ceo1_ref)                      # (13, 13*32)

    y2 = conv3x3_relu(p1.astype(bf16), t2_ref, b2_ref, 11)        # (11, 11*64)
    p2 = maxpool_2x2(y2, seo2_ref, ceo2_ref)                      # (5, 5*64)

    y3 = conv3x3_relu(p2.astype(bf16), t3_ref, b3_ref, 3)         # (3, 3*128)
    m3 = jnp.maximum(y3[0:1, :], y3[1:2, :])                      # H-pool (row 2 dropped)
    feat = jnp.maximum(m3[:, 0:128], m3[:, 128:256])              # W-pool -> (1, 128)

    # Dropout(0.5): inference-mode identity.
    # TODO(synk): training-mode dropout would use pltpu.prng_seed/prng_random_bits.
    logits = jnp.dot(feat.astype(bf16), wfc_ref[...],
                     preferred_element_type=f32) + bfc_ref[...]   # (1, 10)
    o_ref[0] = logits.astype(o_ref.dtype)


# ------------------------------ forward wrapper -------------------------------

def forward(consts, x_nchw):
    """x_nchw: (B, 1, 28, 28) float32 -> logits (B, 10)."""
    assert x_nchw.shape[1:] == (1, 28, 28), x_nchw.shape
    x = x_nchw[:, 0, :, :].astype(jnp.float32)                    # (B, 28, 28)
    batch = x.shape[0]
    const_args = tuple(consts[k] for k in _CONST_KEYS)

    in_specs = [pl.BlockSpec((1, 28, 28), lambda i: (i, 0, 0))]
    for a in const_args:
        # Full-array blocks with a constant index map: DMA'd into VMEM once and
        # kept resident across the whole batch grid.
        in_specs.append(pl.BlockSpec(a.shape, lambda i, n=a.ndim: (0,) * n))

    out = pl.pallas_call(
        _fused_cnn_kernel,
        out_shape=jax.ShapeDtypeStruct((batch, 1, 10), jnp.float32),
        grid=(batch,),
        in_specs=in_specs,
        out_specs=pl.BlockSpec((1, 1, 10), lambda i: (i, 0, 0)),
        compiler_params=pltpu.CompilerParams(
            dimension_semantics=("parallel",),
            vmem_limit_bytes=32 * 1024 * 1024),
    )(x, *const_args)
    return out.reshape(batch, 10)


# ------------------------------- init / reference -----------------------------

def init_params(key):
    ks = jax.random.split(key, 8)
    s = 0.05
    return {
        "w1": jax.random.normal(ks[0], (32, 1, 3, 3), jnp.float32) * s,
        "b1": jax.random.normal(ks[1], (32,), jnp.float32) * s,
        "w2": jax.random.normal(ks[2], (64, 32, 3, 3), jnp.float32) * s,
        "b2": jax.random.normal(ks[3], (64,), jnp.float32) * s,
        "w3": jax.random.normal(ks[4], (128, 64, 3, 3), jnp.float32) * s,
        "b3": jax.random.normal(ks[5], (128,), jnp.float32) * s,
        "wfc": jax.random.normal(ks[6], (10, 128), jnp.float32) * s,
        "bfc": jax.random.normal(ks[7], (10,), jnp.float32) * s,
    }


def forward_ref(params, x_nchw):
    """Pure-JAX f32 reference matching the PyTorch module."""
    x = jnp.transpose(x_nchw, (0, 2, 3, 1))

    def conv(x, w, b):
        y = jax.lax.conv_general_dilated(
            x, jnp.transpose(w, (2, 3, 1, 0)), (1, 1), "VALID",
            dimension_numbers=("NHWC", "HWIO", "NHWC"))
        return jnp.maximum(y + b, 0.0)

    def pool(x):
        return jax.lax.reduce_window(
            x, -jnp.inf, jax.lax.max, (1, 2, 2, 1), (1, 2, 2, 1), "VALID")

    x = pool(conv(x, params["w1"], params["b1"]))
    x = pool(conv(x, params["w2"], params["b2"]))
    x = pool(conv(x, params["w3"], params["b3"]))
    x = x.reshape(x.shape[0], -1)
    return x @ params["wfc"].T + params["bfc"]


# ------------------------------------ main ------------------------------------

if __name__ == "__main__":
    key = jax.random.PRNGKey(0)
    k_param, k_x = jax.random.split(key)
    params = init_params(k_param)
    consts = pack_params(params)                       # one-time weight packing
    x = jax.random.normal(k_x, (2, 1, 28, 28), jnp.float32)   # NCHW like PyTorch

    out = jax.block_until_ready(jax.jit(forward)(consts, x))
    ref = jax.block_until_ready(forward_ref(params, x))

    assert out.shape == (2, 10), out.shape
    max_err = float(jnp.max(jnp.abs(out - ref)))
    # bf16 MXU inputs (f32 accumulation) => loosened tolerance vs f32 reference.
    assert jnp.allclose(out, ref, atol=3e-2, rtol=3e-2), max_err
    print("KERNEL_OK")
</pallas_src>

<mosaic_0001>
module attributes {stable_mosaic.version = 11 : i64} {
  func.func @_fused_cnn_kernel(%arg0: i32, %arg1: memref<1x28x28xf32, #tpu.memory_space<vmem>>, %arg2: memref<3x28x832xbf16, #tpu.memory_space<vmem>>, %arg3: memref<1x832xf32, #tpu.memory_space<vmem>>, %arg4: memref<2x13x26xf32, #tpu.memory_space<vmem>>, %arg5: memref<2x832x416xbf16, #tpu.memory_space<vmem>>, %arg6: memref<3x416x704xbf16, #tpu.memory_space<vmem>>, %arg7: memref<1x704xf32, #tpu.memory_space<vmem>>, %arg8: memref<2x5x11xf32, #tpu.memory_space<vmem>>, %arg9: memref<2x704x320xbf16, #tpu.memory_space<vmem>>, %arg10: memref<3x320x384xbf16, #tpu.memory_space<vmem>>, %arg11: memref<1x384xf32, #tpu.memory_space<vmem>>, %arg12: memref<128x10xbf16, #tpu.memory_space<vmem>>, %arg13: memref<1x10xf32, #tpu.memory_space<vmem>>, %arg14: memref<1x1x10xf32, #tpu.memory_space<vmem>>) attributes {dimension_semantics = [#tpu.dimension_semantics<parallel>], iteration_bounds = array<i64: 2>, scalar_prefetch = 0 : i64, scratch_operands = 0 : i64, tpu.core_type = #tpu.core_type<tc>, window_params = [{transform_indices = @transform_0, window_bounds = array<i64: 1, 28, 28>}, {pipeline_mode = #tpu.pipeline_mode<synchronous>, transform_indices = @transform_1, window_bounds = array<i64: 3, 28, 832>}, {pipeline_mode = #tpu.pipeline_mode<synchronous>, transform_indices = @transform_2, window_bounds = array<i64: 1, 832>}, {pipeline_mode = #tpu.pipeline_mode<synchronous>, transform_indices = @transform_3, window_bounds = array<i64: 2, 13, 26>}, {pipeline_mode = #tpu.pipeline_mode<synchronous>, transform_indices = @transform_4, window_bounds = array<i64: 2, 832, 416>}, {pipeline_mode = #tpu.pipeline_mode<synchronous>, transform_indices = @transform_5, window_bounds = array<i64: 3, 416, 704>}, {pipeline_mode = #tpu.pipeline_mode<synchronous>, transform_indices = @transform_6, window_bounds = array<i64: 1, 704>}, {pipeline_mode = #tpu.pipeline_mode<synchronous>, transform_indices = @transform_7, window_bounds = array<i64: 2, 5, 11>}, {pipeline_mode = #tpu.pipeline_mode<synchronous>, transform_indices = @transform_8, window_bounds = array<i64: 2, 704, 320>}, {pipeline_mode = #tpu.pipeline_mode<synchronous>, transform_indices = @transform_9, window_bounds = array<i64: 3, 320, 384>}, {pipeline_mode = #tpu.pipeline_mode<synchronous>, transform_indices = @transform_10, window_bounds = array<i64: 1, 384>}, {pipeline_mode = #tpu.pipeline_mode<synchronous>, transform_indices = @transform_11, window_bounds = array<i64: 128, 10>}, {pipeline_mode = #tpu.pipeline_mode<synchronous>, transform_indices = @transform_12, window_bounds = array<i64: 1, 10>}, {transform_indices = @transform_13, window_bounds = array<i64: 1, 1, 10>}]} {
    %c0 = arith.constant 0 : index
    %c0_0 = arith.constant 0 : index
    %c0_1 = arith.constant 0 : index
    %0 = vector.load %arg1[%c0, %c0_0, %c0_1] : memref<1x28x28xf32, #tpu.memory_space<vmem>>, vector<1x28x28xf32>
    %1 = vector.shape_cast %0 : vector<1x28x28xf32> to vector<28x28xf32>
    %2 = arith.truncf %1 : vector<28x28xf32> to vector<28x28xbf16>
    %3 = vector.extract_strided_slice %2 {offsets = [0, 0], sizes = [26, 28], strides = [1, 1]} : vector<28x28xbf16> to vector<26x28xbf16>
    %c0_2 = arith.constant 0 : index
    %c0_3 = arith.constant 0 : index
    %c0_4 = arith.constant 0 : index
    %4 = vector.load %arg2[%c0_2, %c0_3, %c0_4] : memref<3x28x832xbf16, #tpu.memory_space<vmem>>, vector<1x28x832xbf16>
    %5 = vector.shape_cast %4 : vector<1x28x832xbf16> to vector<28x832xbf16>
    %cst = arith.constant dense<0.000000e+00> : vector<26x832xf32>
    %6 = tpu.matmul %3, %5, %cst {dimension_numbers = #tpu.dot_dimension_numbers<[1], [0], [0], [1], [0, 0, 1, 1], [], []>} : vector<26x28xbf16>, vector<28x832xbf16>, vector<26x832xf32> -> vector<26x832xf32>
    %7 = vector.extract_strided_slice %2 {offsets = [1, 0], sizes = [26, 28], strides = [1, 1]} : vector<28x28xbf16> to vector<26x28xbf16>
    %c1 = arith.constant 1 : index
    %c0_5 = arith.constant 0 : index
    %c0_6 = arith.constant 0 : index
    %8 = vector.load %arg2[%c1, %c0_5, %c0_6] : memref<3x28x832xbf16, #tpu.memory_space<vmem>>, vector<1x28x832xbf16>
    %9 = vector.shape_cast %8 : vector<1x28x832xbf16> to vector<28x832xbf16>
    %cst_7 = arith.constant dense<0.000000e+00> : vector<26x832xf32>
    %10 = tpu.matmul %7, %9, %cst_7 {dimension_numbers = #tpu.dot_dimension_numbers<[1], [0], [0], [1], [0, 0, 1, 1], [], []>} : vector<26x28xbf16>, vector<28x832xbf16>, vector<26x832xf32> -> vector<26x832xf32>
    %11 = arith.addf %6, %10 : vector<26x832xf32>
    %12 = vector.extract_strided_slice %2 {offsets = [2, 0], sizes = [26, 28], strides = [1, 1]} : vector<28x28xbf16> to vector<26x28xbf16>
    %c2 = arith.constant 2 : index
    %c0_8 = arith.constant 0 : index
    %c0_9 = arith.constant 0 : index
    %13 = vector.load %arg2[%c2, %c0_8, %c0_9] : memref<3x28x832xbf16, #tpu.memory_space<vmem>>, vector<1x28x832xbf16>
    %14 = vector.shape_cast %13 : vector<1x28x832xbf16> to vector<28x832xbf16>
    %cst_10 = arith.constant dense<0.000000e+00> : vector<26x832xf32>
    %15 = tpu.matmul %12, %14, %cst_10 {dimension_numbers = #tpu.dot_dimension_numbers<[1], [0], [0], [1], [0, 0, 1, 1], [], []>} : vector<26x28xbf16>, vector<28x832xbf16>, vector<26x832xf32> -> vector<26x832xf32>
    %16 = arith.addf %11, %15 : vector<26x832xf32>
    %c0_11 = arith.constant 0 : index
    %c0_12 = arith.constant 0 : index
    %17 = vector.load %arg3[%c0_11, %c0_12] : memref<1x832xf32, #tpu.memory_space<vmem>>, vector<1x832xf32>
    %18 = vector.broadcast %17 : vector<1x832xf32> to vector<26x832xf32>
    %19 = arith.addf %16, %18 : vector<26x832xf32>
    %cst_13 = arith.constant 0.000000e+00 : f32
    %20 = vector.broadcast %cst_13 : f32 to vector<26x832xf32>
    %21 = arith.maximumf %19, %20 : vector<26x832xf32>
    %c0_14 = arith.constant 0 : index
    %c0_15 = arith.constant 0 : index
    %c0_16 = arith.constant 0 : index
    %22 = vector.load %arg4[%c0_14, %c0_15, %c0_16] : memref<2x13x26xf32, #tpu.memory_space<vmem>>, vector<1x13x26xf32>
    %23 = vector.shape_cast %22 : vector<1x13x26xf32> to vector<13x26xf32>
    %cst_17 = arith.constant dense<0.000000e+00> : vector<13x832xf32>
    %24 = tpu.matmul %23, %21, %cst_17 {dimension_numbers = #tpu.dot_dimension_numbers<[1], [0], [0], [1], [0, 0, 1, 1], [], []>} : vector<13x26xf32>, vector<26x832xf32>, vector<13x832xf32> -> vector<13x832xf32>
    %c1_18 = arith.constant 1 : index
    %c0_19 = arith.constant 0 : index
    %c0_20 = arith.constant 0 : index
    %25 = vector.load %arg4[%c1_18, %c0_19, %c0_20] : memref<2x13x26xf32, #tpu.memory_space<vmem>>, vector<1x13x26xf32>
    %26 = vector.shape_cast %25 : vector<1x13x26xf32> to vector<13x26xf32>
    %cst_21 = arith.constant dense<0.000000e+00> : vector<13x832xf32>
    %27 = tpu.matmul %26, %21, %cst_21 {dimension_numbers = #tpu.dot_dimension_numbers<[1], [0], [0], [1], [0, 0, 1, 1], [], []>} : vector<13x26xf32>, vector<26x832xf32>, vector<13x832xf32> -> vector<13x832xf32>
    %28 = arith.maximumf %24, %27 : vector<13x832xf32>
    %c0_22 = arith.constant 0 : index
    %c0_23 = arith.constant 0 : index
    %c0_24 = arith.constant 0 : index
    %29 = vector.load %arg5[%c0_22, %c0_23, %c0_24] : memref<2x832x416xbf16, #tpu.memory_space<vmem>>, vector<1x832x416xbf16>
    %30 = vector.shape_cast %29 : vector<1x832x416xbf16> to vector<832x416xbf16>
    %31 = arith.extf %30 : vector<832x416xbf16> to vector<832x416xf32>
    %cst_25 = arith.constant dense<0.000000e+00> : vector<13x416xf32>
    %32 = tpu.matmul %28, %31, %cst_25 {dimension_numbers = #tpu.dot_dimension_numbers<[1], [0], [0], [1], [0, 0, 1, 1], [], []>} : vector<13x832xf32>, vector<832x416xf32>, vector<13x416xf32> -> vector<13x416xf32>
    %c1_26 = arith.constant 1 : index
    %c0_27 = arith.constant 0 : index
    %c0_28 = arith.constant 0 : index
    %33 = vector.load %arg5[%c1_26, %c0_27, %c0_28] : memref<2x832x416xbf16, #tpu.memory_space<vmem>>, vector<1x832x416xbf16>
    %34 = vector.shape_cast %33 : vector<1x832x416xbf16> to vector<832x416xbf16>
    %35 = arith.extf %34 : vector<832x416xbf16> to vector<832x416xf32>
    %cst_29 = arith.constant dense<0.000000e+00> : vector<13x416xf32>
    %36 = tpu.matmul %28, %35, %cst_29 {dimension_numbers = #tpu.dot_dimension_numbers<[1], [0], [0], [1], [0, 0, 1, 1], [], []>} : vector<13x832xf32>, vector<832x416xf32>, vector<13x416xf32> -> vector<13x416xf32>
    %37 = arith.maximumf %32, %36 : vector<13x416xf32>
    %38 = arith.truncf %37 : vector<13x416xf32> to vector<13x416xbf16>
    %39 = vector.extract_strided_slice %38 {offsets = [0, 0], sizes = [11, 416], strides = [1, 1]} : vector<13x416xbf16> to vector<11x416xbf16>
    %c0_30 = arith.constant 0 : index
    %c0_31 = arith.constant 0 : index
    %c0_32 = arith.constant 0 : index
    %40 = vector.load %arg6[%c0_30, %c0_31, %c0_32] : memref<3x416x704xbf16, #tpu.memory_space<vmem>>, vector<1x416x704xbf16>
    %41 = vector.shape_cast %40 : vector<1x416x704xbf16> to vector<416x704xbf16>
    %cst_33 = arith.constant dense<0.000000e+00> : vector<11x704xf32>
    %42 = tpu.matmul %39, %41, %cst_33 {dimension_numbers = #tpu.dot_dimension_numbers<[1], [0], [0], [1], [0, 0, 1, 1], [], []>} : vector<11x416xbf16>, vector<416x704xbf16>, vector<11x704xf32> -> vector<11x704xf32>
    %43 = vector.extract_strided_slice %38 {offsets = [1, 0], sizes = [11, 416], strides = [1, 1]} : vector<13x416xbf16> to vector<11x416xbf16>
    %c1_34 = arith.constant 1 : index
    %c0_35 = arith.constant 0 : index
    %c0_36 = arith.constant 0 : index
    %44 = vector.load %arg6[%c1_34, %c0_35, %c0_36] : memref<3x416x704xbf16, #tpu.memory_space<vmem>>, vector<1x416x704xbf16>
    %45 = vector.shape_cast %44 : vector<1x416x704xbf16> to vector<416x704xbf16>
    %cst_37 = arith.constant dense<0.000000e+00> : vector<11x704xf32>
    %46 = tpu.matmul %43, %45, %cst_37 {dimension_numbers = #tpu.dot_dimension_numbers<[1], [0], [0], [1], [0, 0, 1, 1], [], []>} : vector<11x416xbf16>, vector<416x704xbf16>, vector<11x704xf32> -> vector<11x704xf32>
    %47 = arith.addf %42, %46 : vector<11x704xf32>
    %48 = vector.extract_strided_slice %38 {offsets = [2, 0], sizes = [11, 416], strides = [1, 1]} : vector<13x416xbf16> to vector<11x416xbf16>
    %c2_38 = arith.constant 2 : index
    %c0_39 = arith.constant 0 : index
    %c0_40 = arith.constant 0 : index
    %49 = vector.load %arg6[%c2_38, %c0_39, %c0_40] : memref<3x416x704xbf16, #tpu.memory_space<vmem>>, vector<1x416x704xbf16>
    %50 = vector.shape_cast %49 : vector<1x416x704xbf16> to vector<416x704xbf16>
    %cst_41 = arith.constant dense<0.000000e+00> : vector<11x704xf32>
    %51 = tpu.matmul %48, %50, %cst_41 {dimension_numbers = #tpu.dot_dimension_numbers<[1], [0], [0], [1], [0, 0, 1, 1], [], []>} : vector<11x416xbf16>, vector<416x704xbf16>, vector<11x704xf32> -> vector<11x704xf32>
    %52 = arith.addf %47, %51 : vector<11x704xf32>
    %c0_42 = arith.constant 0 : index
    %c0_43 = arith.constant 0 : index
    %53 = vector.load %arg7[%c0_42, %c0_43] : memref<1x704xf32, #tpu.memory_space<vmem>>, vector<1x704xf32>
    %54 = vector.broadcast %53 : vector<1x704xf32> to vector<11x704xf32>
    %55 = arith.addf %52, %54 : vector<11x704xf32>
    %cst_44 = arith.constant 0.000000e+00 : f32
    %56 = vector.broadcast %cst_44 : f32 to vector<11x704xf32>
    %57 = arith.maximumf %55, %56 : vector<11x704xf32>
    %c0_45 = arith.constant 0 : index
    %c0_46 = arith.constant 0 : index
    %c0_47 = arith.constant 0 : index
    %58 = vector.load %arg8[%c0_45, %c0_46, %c0_47] : memref<2x5x11xf32, #tpu.memory_space<vmem>>, vector<1x5x11xf32>
    %59 = vector.shape_cast %58 : vector<1x5x11xf32> to vector<5x11xf32>
    %cst_48 = arith.constant dense<0.000000e+00> : vector<5x704xf32>
    %60 = tpu.matmul %59, %57, %cst_48 {dimension_numbers = #tpu.dot_dimension_numbers<[1], [0], [0], [1], [0, 0, 1, 1], [], []>} : vector<5x11xf32>, vector<11x704xf32>, vector<5x704xf32> -> vector<5x704xf32>
    %c1_49 = arith.constant 1 : index
    %c0_50 = arith.constant 0 : index
    %c0_51 = arith.constant 0 : index
    %61 = vector.load %arg8[%c1_49, %c0_50, %c0_51] : memref<2x5x11xf32, #tpu.memory_space<vmem>>, vector<1x5x11xf32>
    %62 = vector.shape_cast %61 : vector<1x5x11xf32> to vector<5x11xf32>
    %cst_52 = arith.constant dense<0.000000e+00> : vector<5x704xf32>
    %63 = tpu.matmul %62, %57, %cst_52 {dimension_numbers = #tpu.dot_dimension_numbers<[1], [0], [0], [1], [0, 0, 1, 1], [], []>} : vector<5x11xf32>, vector<11x704xf32>, vector<5x704xf32> -> vector<5x704xf32>
    %64 = arith.maximumf %60, %63 : vector<5x704xf32>
    %c0_53 = arith.constant 0 : index
    %c0_54 = arith.constant 0 : index
    %c0_55 = arith.constant 0 : index
    %65 = vector.load %arg9[%c0_53, %c0_54, %c0_55] : memref<2x704x320xbf16, #tpu.memory_space<vmem>>, vector<1x704x320xbf16>
    %66 = vector.shape_cast %65 : vector<1x704x320xbf16> to vector<704x320xbf16>
    %67 = arith.extf %66 : vector<704x320xbf16> to vector<704x320xf32>
    %cst_56 = arith.constant dense<0.000000e+00> : vector<5x320xf32>
    %68 = tpu.matmul %64, %67, %cst_56 {dimension_numbers = #tpu.dot_dimension_numbers<[1], [0], [0], [1], [0, 0, 1, 1], [], []>} : vector<5x704xf32>, vector<704x320xf32>, vector<5x320xf32> -> vector<5x320xf32>
    %c1_57 = arith.constant 1 : index
    %c0_58 = arith.constant 0 : index
    %c0_59 = arith.constant 0 : index
    %69 = vector.load %arg9[%c1_57, %c0_58, %c0_59] : memref<2x704x320xbf16, #tpu.memory_space<vmem>>, vector<1x704x320xbf16>
    %70 = vector.shape_cast %69 : vector<1x704x320xbf16> to vector<704x320xbf16>
    %71 = arith.extf %70 : vector<704x320xbf16> to vector<704x320xf32>
    %cst_60 = arith.constant dense<0.000000e+00> : vector<5x320xf32>
    %72 = tpu.matmul %64, %71, %cst_60 {dimension_numbers = #tpu.dot_dimension_numbers<[1], [0], [0], [1], [0, 0, 1, 1], [], []>} : vector<5x704xf32>, vector<704x320xf32>, vector<5x320xf32> -> vector<5x320xf32>
    %73 = arith.maximumf %68, %72 : vector<5x320xf32>
    %74 = arith.truncf %73 : vector<5x320xf32> to vector<5x320xbf16>
    %75 = vector.extract_strided_slice %74 {offsets = [0, 0], sizes = [3, 320], strides = [1, 1]} : vector<5x320xbf16> to vector<3x320xbf16>
    %c0_61 = arith.constant 0 : index
    %c0_62 = arith.constant 0 : index
    %c0_63 = arith.constant 0 : index
    %76 = vector.load %arg10[%c0_61, %c0_62, %c0_63] : memref<3x320x384xbf16, #tpu.memory_space<vmem>>, vector<1x320x384xbf16>
    %77 = vector.shape_cast %76 : vector<1x320x384xbf16> to vector<320x384xbf16>
    %cst_64 = arith.constant dense<0.000000e+00> : vector<3x384xf32>
    %78 = tpu.matmul %75, %77, %cst_64 {dimension_numbers = #tpu.dot_dimension_numbers<[1], [0], [0], [1], [0, 0, 1, 1], [], []>} : vector<3x320xbf16>, vector<320x384xbf16>, vector<3x384xf32> -> vector<3x384xf32>
    %79 = vector.extract_strided_slice %74 {offsets = [1, 0], sizes = [3, 320], strides = [1, 1]} : vector<5x320xbf16> to vector<3x320xbf16>
    %c1_65 = arith.constant 1 : index
    %c0_66 = arith.constant 0 : index
    %c0_67 = arith.constant 0 : index
    %80 = vector.load %arg10[%c1_65, %c0_66, %c0_67] : memref<3x320x384xbf16, #tpu.memory_space<vmem>>, vector<1x320x384xbf16>
    %81 = vector.shape_cast %80 : vector<1x320x384xbf16> to vector<320x384xbf16>
    %cst_68 = arith.constant dense<0.000000e+00> : vector<3x384xf32>
    %82 = tpu.matmul %79, %81, %cst_68 {dimension_numbers = #tpu.dot_dimension_numbers<[1], [0], [0], [1], [0, 0, 1, 1], [], []>} : vector<3x320xbf16>, vector<320x384xbf16>, vector<3x384xf32> -> vector<3x384xf32>
    %83 = arith.addf %78, %82 : vector<3x384xf32>
    %84 = vector.extract_strided_slice %74 {offsets = [2, 0], sizes = [3, 320], strides = [1, 1]} : vector<5x320xbf16> to vector<3x320xbf16>
    %c2_69 = arith.constant 2 : index
    %c0_70 = arith.constant 0 : index
    %c0_71 = arith.constant 0 : index
    %85 = vector.load %arg10[%c2_69, %c0_70, %c0_71] : memref<3x320x384xbf16, #tpu.memory_space<vmem>>, vector<1x320x384xbf16>
    %86 = vector.shape_cast %85 : vector<1x320x384xbf16> to vector<320x384xbf16>
    %cst_72 = arith.constant dense<0.000000e+00> : vector<3x384xf32>
    %87 = tpu.matmul %84, %86, %cst_72 {dimension_numbers = #tpu.dot_dimension_numbers<[1], [0], [0], [1], [0, 0, 1, 1], [], []>} : vector<3x320xbf16>, vector<320x384xbf16>, vector<3x384xf32> -> vector<3x384xf32>
    %88 = arith.addf %83, %87 : vector<3x384xf32>
    %c0_73 = arith.constant 0 : index
    %c0_74 = arith.constant 0 : index
    %89 = vector.load %arg11[%c0_73, %c0_74] : memref<1x384xf32, #tpu.memory_space<vmem>>, vector<1x384xf32>
    %90 = vector.broadcast %89 : vector<1x384xf32> to vector<3x384xf32>
    %91 = arith.addf %88, %90 : vector<3x384xf32>
    %cst_75 = arith.constant 0.000000e+00 : f32
    %92 = vector.broadcast %cst_75 : f32 to vector<3x384xf32>
    %93 = arith.maximumf %91, %92 : vector<3x384xf32>
    %94 = vector.extract_strided_slice %93 {offsets = [0, 0], sizes = [1, 384], strides = [1, 1]} : vector<3x384xf32> to vector<1x384xf32>
    %95 = vector.extract_strided_slice %93 {offsets = [1, 0], sizes = [1, 384], strides = [1, 1]} : vector<3x384xf32> to vector<1x384xf32>
    %96 = arith.maximumf %94, %95 : vector<1x384xf32>
    %97 = vector.extract_strided_slice %96 {offsets = [0, 0], sizes = [1, 128], strides = [1, 1]} : vector<1x384xf32> to vector<1x128xf32>
    %98 = vector.extract_strided_slice %96 {offsets = [0, 128], sizes = [1, 128], strides = [1, 1]} : vector<1x384xf32> to vector<1x128xf32>
    %99 = arith.maximumf %97, %98 : vector<1x128xf32>
    %100 = arith.truncf %99 : vector<1x128xf32> to vector<1x128xbf16>
    %c0_76 = arith.constant 0 : index
    %c0_77 = arith.constant 0 : index
    %101 = vector.load %arg12[%c0_76, %c0_77] : memref<128x10xbf16, #tpu.memory_space<vmem>>, vector<128x10xbf16>
    %cst_78 = arith.constant dense<0.000000e+00> : vector<1x10xf32>
    %102 = tpu.matmul %100, %101, %cst_78 {dimension_numbers = #tpu.dot_dimension_numbers<[1], [0], [0], [1], [0, 0, 1, 1], [], []>} : vector<1x128xbf16>, vector<128x10xbf16>, vector<1x10xf32> -> vector<1x10xf32>
    %c0_79 = arith.constant 0 : index
    %c0_80 = arith.constant 0 : index
    %103 = vector.load %arg13[%c0_79, %c0_80] : memref<1x10xf32, #tpu.memory_space<vmem>>, vector<1x10xf32>
    %104 = arith.addf %102, %103 : vector<1x10xf32>
    %c0_81 = arith.constant 0 : index
    %c0_82 = arith.constant 0 : index
    %c0_83 = arith.constant 0 : index
    %105 = vector.load %arg14[%c0_81, %c0_82, %c0_83] : memref<1x1x10xf32, #tpu.memory_space<vmem>>, vector<1x1x10xf32>
    %106 = vector.shape_cast %105 : vector<1x1x10xf32> to vector<1x10xf32>
    %107 = vector.shape_cast %104 : vector<1x10xf32> to vector<1x1x10xf32>
    tpu.vector_store %arg14[%c0_81, %c0_82, %c0_83], %107 {strides = array<i32>} : memref<1x1x10xf32, #tpu.memory_space<vmem>>, vector<1x1x10xf32>,
    return
  }
  func.func @transform_0(%arg0: i32) -> (i32, i32, i32) {
    %c0_i32 = arith.constant 0 : i32
    %c0_i32_0 = arith.constant 0 : i32
    %c0_i32_1 = arith.constant 0 : i32
    return %arg0, %c0_i32, %c0_i32_0 : i32, i32, i32
  }
  func.func @transform_1(%arg0: i32) -> (i32, i32, i32) {
    %c0_i32 = arith.constant 0 : i32
    %c0_i32_0 = arith.constant 0 : i32
    %c0_i32_1 = arith.constant 0 : i32
    %c0_i32_2 = arith.constant 0 : i32
    return %c0_i32, %c0_i32_0, %c0_i32_1 : i32, i32, i32
  }
  func.func @transform_2(%arg0: i32) -> (i32, i32) {
    %c0_i32 = arith.constant 0 : i32
    %c0_i32_0 = arith.constant 0 : i32
    %c0_i32_1 = arith.constant 0 : i32
    return %c0_i32, %c0_i32_0 : i32, i32
  }
  func.func @transform_3(%arg0: i32) -> (i32, i32, i32) {
    %c0_i32 = arith.constant 0 : i32
    %c0_i32_0 = arith.constant 0 : i32
    %c0_i32_1 = arith.constant 0 : i32
    %c0_i32_2 = arith.constant 0 : i32
    return %c0_i32, %c0_i32_0, %c0_i32_1 : i32, i32, i32
  }
  func.func @transform_4(%arg0: i32) -> (i32, i32, i32) {
    %c0_i32 = arith.constant 0 : i32
    %c0_i32_0 = arith.constant 0 : i32
    %c0_i32_1 = arith.constant 0 : i32
    %c0_i32_2 = arith.constant 0 : i32
    return %c0_i32, %c0_i32_0, %c0_i32_1 : i32, i32, i32
  }
  func.func @transform_5(%arg0: i32) -> (i32, i32, i32) {
    %c0_i32 = arith.constant 0 : i32
    %c0_i32_0 = arith.constant 0 : i32
    %c0_i32_1 = arith.constant 0 : i32
    %c0_i32_2 = arith.constant 0 : i32
    return %c0_i32, %c0_i32_0, %c0_i32_1 : i32, i32, i32
  }
  func.func @transform_6(%arg0: i32) -> (i32, i32) {
    %c0_i32 = arith.constant 0 : i32
    %c0_i32_0 = arith.constant 0 : i32
    %c0_i32_1 = arith.constant 0 : i32
    return %c0_i32, %c0_i32_0 : i32, i32
  }
  func.func @transform_7(%arg0: i32) -> (i32, i32, i32) {
    %c0_i32 = arith.constant 0 : i32
    %c0_i32_0 = arith.constant 0 : i32
    %c0_i32_1 = arith.constant 0 : i32
    %c0_i32_2 = arith.constant 0 : i32
    return %c0_i32, %c0_i32_0, %c0_i32_1 : i32, i32, i32
  }
  func.func @transform_8(%arg0: i32) -> (i32, i32, i32) {
    %c0_i32 = arith.constant 0 : i32
    %c0_i32_0 = arith.constant 0 : i32
    %c0_i32_1 = arith.constant 0 : i32
    %c0_i32_2 = arith.constant 0 : i32
    return %c0_i32, %c0_i32_0, %c0_i32_1 : i32, i32, i32
  }
  func.func @transform_9(%arg0: i32) -> (i32, i32, i32) {
    %c0_i32 = arith.constant 0 : i32
    %c0_i32_0 = arith.constant 0 : i32
    %c0_i32_1 = arith.constant 0 : i32
    %c0_i32_2 = arith.constant 0 : i32
    return %c0_i32, %c0_i32_0, %c0_i32_1 : i32, i32, i32
  }
  func.func @transform_10(%arg0: i32) -> (i32, i32) {
    %c0_i32 = arith.constant 0 : i32
    %c0_i32_0 = arith.constant 0 : i32
    %c0_i32_1 = arith.constant 0 : i32
    return %c0_i32, %c0_i32_0 : i32, i32
  }
  func.func @transform_11(%arg0: i32) -> (i32, i32) {
    %c0_i32 = arith.constant 0 : i32
    %c0_i32_0 = arith.constant 0 : i32
    %c0_i32_1 = arith.constant 0 : i32
    return %c0_i32, %c0_i32_0 : i32, i32
  }
  func.func @transform_12(%arg0: i32) -> (i32, i32) {
    %c0_i32 = arith.constant 0 : i32
    %c0_i32_0 = arith.constant 0 : i32
    %c0_i32_1 = arith.constant 0 : i32
    return %c0_i32, %c0_i32_0 : i32, i32
  }
  func.func @transform_13(%arg0: i32) -> (i32, i32, i32) {
    %c0_i32 = arith.constant 0 : i32
    %c0_i32_0 = arith.constant 0 : i32
    %c0_i32_1 = arith.constant 0 : i32
    return %arg0, %c0_i32, %c0_i32_0 : i32, i32, i32
  }
}

</mosaic_0001>

<bundles_post_ra>
// kernel: forward.1
= control target key start
LH: loop header
LB: loop body
LE: loop exit
PB: predicated region body
PF: predicated region fallthrough
CT: control target
= control target key end

     0   :  { %s22787_s0 = inlined_call_operand.vmem [shape: f32[2,28,28], index: 0, kind: input, shape index: {}]   ;;  %s22788_s1 = inlined_call_operand.vmem [shape: bf16[3,28,832], index: 1, kind: input, shape index: {}]   ;;  %s22789_s2 = inlined_call_operand.vmem [shape: f32[1,832], index: 2, kind: input, shape index: {}]   ;;  %s22790_s3 = inlined_call_operand.vmem [shape: f32[2,13,26], index: 3, kind: input, shape index: {}]   ;;  %s22791_s4 = inlined_call_operand.vmem [shape: bf16[2,832,416], index: 4, kind: input, shape index: {}]   ;;  %s22792_s5 = inlined_call_operand.vmem [shape: bf16[3,416,704], index: 5, kind: input, shape index: {}]   ;;  %s22793_s6 = inlined_call_operand.vmem [shape: f32[1,704], index: 6, kind: input, shape index: {}]   ;;  %s22794_s7 = inlined_call_operand.vmem [shape: f32[2,5,11], index: 7, kind: input, shape index: {}]   ;;  %s22795_s8 = inlined_call_operand.vmem [shape: bf16[2,704,320], index: 8, kind: input, shape index: {}]   ;;  %s22796_s9 = inlined_call_operand.vmem [shape: bf16[3,320,384], index: 9, kind: input, shape index: {}]   ;;  %s22797_s10 = inlined_call_operand.vmem [shape: f32[1,384], index: 10, kind: input, shape index: {}]   ;;  %s22798_s11 = inlined_call_operand.vmem [shape: bf16[128,10], index: 11, kind: input, shape index: {}]   ;;  %s22799_s12 = inlined_call_operand.vmem [shape: f32[1,10], index: 12, kind: input, shape index: {}]   ;;  %s22800_s13 = inlined_call_operand.hbm [shape: f32[2,1,10], index: 13, kind: output, shape index: {}]  }
   0x1   :  { %22804 = sst [smem:[#allocation8_spill]] %s22787_s0 }
   0x2   :  { %18 = vsyncpa [#allocation3], 0 }
   0x3   :  { %20 = vsyncpa [#allocation3 + $0x1], 0  ;;  %s18083_s25 = smov 0   ;;  %s18085_s26 = smov 0  }
   0x4   :  { %s18087_s27 = smov 0   ;;  %s18089_s28 = smov 0  }
   0x5 LB: > { %22805 = sst [smem:[#allocation5_spill]] %s18001_s27  ;;  %s18104_s29 = sadd.s32 4294967295, %s18005_s28   ;;  %s18005_s28 = sphi %s18089_s28, %s22815_s28   ;;  %s18001_s27 = sphi %s18087_s27, %s22817_s27   ;;  %s17997_s26 = sphi %s18085_s26, %s22819_s26   ;;  %s17993_s25 = sphi %s18083_s25, %s22818_s25  }
   0x6   : > { %s11814_s30 = sadd.s32 4294967294, %s18005_s28   ;;  %s18108_s14 = sadd.s32 1, %s18005_s28  }
   0x7   : > { %22806 = sst [smem:[#allocation6_spill]] %s18108_s14  ;;  %s311_s15 = sadd.s32 1, %s18001_s27 }
   0x8   : > { %s308_s16 = ssub.s32 %s18005_s28, %s18108_s14  ;;  %p321_p0 = scmp.ne.s32.totalorder %s18001_s27, %s17997_s26 }
   0x9   : > { %p309_p1 = scmp.eq.s32.totalorder %s308_s16, 0  ;;  %p322_p2 = scmp.eq.s32.totalorder %s18104_s29, 1 }
   0xa   : > { %p327_p3 = scmp.ne.s32.totalorder %s17997_s26, %s17993_s25  ;;  %p328_p4 = scmp.eq.s32.totalorder %s11814_s30, 1 }
   0xb   : > { %s18119_s17 = scalar_select %p309_p1, %s18001_s27, %s311_s15  }
   0xc   : > { %p18121_p5 = por %p322_p2, %p321_p0  ;;  %p18125_p6 = por %p328_p4, %p327_p3 }
   0xd   : > { %22807 = sst [smem:[#allocation7_spill]] %s18119_s17  ;;  %p11817_p7 = scmp.ge.s32.totalorder %s18005_s28, 1 }
   0xe   : > { %p390_p8 = scmp.lt.s32.totalorder %s18005_s28, 3 }
  0x10   : > { %p391_p9 = pnand %p11817_p7, %p390_p8 }
  0x11   : > { %v16016_v0 = vld [vmem:[%s22788_s1 + $0x74] ss:$28 sps:$4 sm:$0xff] (!%p391_p9)   ;;  %v16018_v1 = vld [vmem:[%s22788_s1 + $0x84] ss:$28 sps:$4 sm:$0xff] (!%p391_p9)   ;;  %v18007_v2 = vmov (!%p391_p9), 0   ;;  %p433_p10 = scmp.lt.s32.totalorder (!%p391_p9), %s18104_s29, 1 }
  0x12   : > { %394 = sbr.rel (%p391_p9) target bundleno = 3254 (0xcb6), region = 72  ;;  %620 = vmatprep.mubr.bf16.mxu1 (!%p391_p9), %v18007_v2  ;;  %726 = vmatprep.mubr.bf16.mxu0 (!%p391_p9), %v18007_v2  ;;  %v16020_v3 = vld [vmem:[%s22788_s1 + $0x70] ss:$28 sps:$4 sm:$0xff] (!%p391_p9)   ;;  %v16021_v4 = vld [vmem:[%s22788_s1 + $0x80] ss:$28 sps:$4 sm:$0xff] (!%p391_p9)   ;;  %vm566_vm0 = vcmask (!%p391_p9), 1045504  }
  0x13   : > { %588 = vmatprep.subr.bf16.mxu1 (!%p391_p9), %v16016_v0  ;;  %694 = vmatprep.subr.bf16.mxu0 (!%p391_p9), %v16018_v1  ;;  %v16022_v5 = vld [vmem:[%s22788_s1 + $0xac] ss:$28 sps:$4 sm:$0x3f] (!%p391_p9)   ;;  %v16024_v6 = vld [vmem:[%s22788_s1 + $0xbc] ss:$28 sps:$4 sm:$0x3f] (!%p391_p9)  }
  0x14   : > { %589 = vmatpush1.bf16.msra.mxu1 (!%p391_p9), %v16020_v3  ;;  %695 = vmatpush1.bf16.msra.mxu0 (!%p391_p9), %v16021_v4  ;;  %v16026_v7 = vld [vmem:[%s22788_s1 + $0xa8] ss:$28 sps:$4 sm:$0x3f] (!%p391_p9)   ;;  %v16027_v8 = vld [vmem:[%s22788_s1 + $0xb8] ss:$28 sps:$4 sm:$0x3f] (!%p391_p9)  }
  0x15   : > { %11850 = vmatprep.subr.msk.bf16.mxu1 (!%p391_p9), %vm566_vm0, %v16022_v5  ;;  %11856 = vmatprep.subr.msk.bf16.mxu0 (!%p391_p9), %vm566_vm0, %v16024_v6  ;;  %v568_v9 = vsel (!%p391_p9), %vm566_vm0, %v16026_v7, 0  ;;  %v580_v10 = vsel (!%p391_p9), %vm566_vm0, %v16027_v8, 0  ;;  %s22810_s0 = sld [smem:[#allocation8_spill]] (!%p391_p9)  ;;  %v16030_v11 = vld [vmem:[%s22788_s1 + $0x7c] ss:$28 sps:$4 sm:$0xff] (!%p391_p9)   ;;  %vm559_vm2 = vcmask (!%p391_p9), 228352  }
  0x16   : > { %v16033_v18 = vld [vmem:[%s22788_s1 + $0x4] ss:$28 sps:$4 sm:$0xff] (!%p391_p9)   ;;  %vm478_vm1 = vsmask.f32 (!%p391_p9), 7424  ;;  %v16028_v26 = vld [vmem:[%s22788_s1 + $0x78] ss:$28 sps:$4 sm:$0xff] (!%p391_p9)  }
  0x17   : > { %v16036_v24 = vld [vmem:[%s22788_s1 + $0xb0] ss:$28 sps:$4 sm:$0x3f] (!%p391_p9)   ;;  %v16037_v28 = vld [vmem:[%s22788_s1 + $0x3c] ss:$28 sps:$4 sm:$0x3f] (!%p391_p9)  }
  0x18   : > { %591 = vmatpush1.bf16.msra.mxu1 (!%p391_p9), %v568_v9  ;;  %697 = vmatpush1.bf16.msra.mxu0 (!%p391_p9), %v580_v10  ;;  %v16034_v27 = vld [vmem:[%s22788_s1 + $0xb4] ss:$28 sps:$4 sm:$0x3f] (!%p391_p9)   ;;  %v16031_v29 = vld [vmem:[%s22788_s1] ss:$28 sps:$4 sm:$0xff] (!%p391_p9)   ;;  %v574_v33 = vsel (!%p391_p9), %vm566_vm0, %v16036_v24, 0 }
  0x19   : > { %s434_s17 = scalar_select %p433_p10, %s18104_s29, 1  ;;  %641 = vmatprep.subr.bf16.mxu1 %v16030_v11  ;;  %886 = vmatprep.subr.bf16.mxu0 %v16033_v18  ;;  %v16039_v30 = vld [vmem:[%s22788_s1 + $0x38] ss:$28 sps:$4 sm:$0x3f]   ;;  %v16040_v34 = vld [vmem:[%s22788_s1 + $0x88] ss:$28 sps:$4 sm:$0xff]  }
  0x1a   : > { %v866_v35 = vsel %vm566_vm0, %v16039_v30, 0  ;;  %v16043_v36 = vld [vmem:[%s22788_s1 + $0x14] ss:$28 sps:$4 sm:$0xff]   ;;  %v16044_v39 = vld [vmem:[%s22788_s1 + $0xc0] ss:$28 sps:$4 sm:$0x3f]  }
  0x1b   : > { %s13377_s20 = sshll.u32 %s434_s17, 5  ;;  %v16041_v38 = vld [vmem:[%s22788_s1 + $0x10] ss:$28 sps:$4 sm:$0xff]   ;;  %v16047_v41 = vld [vmem:[%s22788_s1 + $0x48] ss:$28 sps:$4 sm:$0x3f]  }
  0x1c   : > { %s437_s23 = scalar_lea.vmem %s22810_s0, %s13377_s20  ;;  %v16045_v40 = vld [vmem:[%s22788_s1 + $0x4c] ss:$28 sps:$4 sm:$0x3f]   ;;  %v16056_v43 = vld [vmem:[%s22788_s1 + $0xe4] ss:$28 sps:$4 sm:$0xff]   ;;  %v586_v44 = vsel %vm566_vm0, %v16044_v39, 0 }
  0x1d   : > { %v439_v12 = vld [vmem:[%s437_s23] sm:$0xff]  ;;  %v440_v13 = vld [vmem:[%s437_s23 + $0x8] sm:$0xff]  ;;  %v441_v14 = vld [vmem:[%s437_s23 + $0x10] sm:$0xff]  ;;  %v878_v45 = vsel %vm566_vm0, %v16047_v41, 0  ;;  %vm1113_vm3 = vcmask 1046528   ;;  %v18008_v10 = vmov 0.0  }
  0x1e   : > { %v442_v15 = vld [vmem:[%s437_s23 + $0x18] sm:$0xf]  ;;  %v18169_v16 = vpack.c.bf16 %v440_v13, %v439_v12  ;;  %v16050_v42 = vld [vmem:[%s22788_s1 + $0xc] ss:$28 sps:$4 sm:$0xff]   ;;  %v16054_v49 = vld [vmem:[%s22788_s1 + $0xe0] ss:$28 sps:$4 sm:$0xff]  }
  0x1f   : > { %v18171_v17 = vpack.c.bf16 %v442_v15, %v441_v14  ;;  %v16048_v46 = vld [vmem:[%s22788_s1 + $0x8] ss:$28 sps:$4 sm:$0xff]   ;;  %v16053_v48 = vld [vmem:[%s22788_s1 + $0x40] ss:$28 sps:$4 sm:$0x3f]   ;;  %vm1540_vm4 = vcmask 211968  }
  0x20   : > { %v480_v19 = vshrl.u32 %v18169_v16, 16  ;;  %v482_v20 = vshll.u32 %v18169_v16, 16  ;;  %v16051_v47 = vld [vmem:[%s22788_s1 + $0x44] ss:$28 sps:$4 sm:$0x3f]   ;;  %v872_v53 = vsel %vm566_vm0, %v16053_v48, 0 }
  0x21   : > { %v487_v21 = vshll.u32 %v18171_v17, 16  ;;  %v491_v32 = vshrl.u32 %v18171_v17, 16  ;;  %v16058_v50 = vld [vmem:[%s22788_s1 + $0x11c] ss:$28 sps:$4 sm:$0x3f]   ;;  %v1114_v58 = vrot.slane %v18169_v16, 1 }
  0x22   : > { %v484_v22 = vrot.slane %v482_v20, 1  ;;  %v16060_v51 = vld [vmem:[%s22788_s1 + $0x118] ss:$28 sps:$4 sm:$0x3f]   ;;  %v16064_v57 = vld [vmem:[%s22788_s1 + $0xec] ss:$28 sps:$4 sm:$0xff]   ;;  %v1447_v20 = vlaneseq }
  0x23   : > { %v489_v23 = vrot.slane %v487_v21, 1  ;;  %v16057_v52 = vld [vmem:[%s22788_s1 + $0x18] ss:$28 sps:$4 sm:$0xff]   ;;  %v1189_v54 = vsel %vm566_vm0, %v16060_v51, 0  ;;  %v1115_v59 = vrot.slane %v18171_v17, 1  ;;  %v18350_v11 = vld [vmem:[%s22790_s3] sm:$0xff] }
  0x24   : > { %v485_v25 = vor.u32 %v484_v22, %v480_v19  ;;  %v16061_v55 = vld [vmem:[%s22788_s1 + $0x50] ss:$28 sps:$4 sm:$0x3f]   ;;  %v16073_v0 = vld [vmem:[%s22788_s1 + $0x128] ss:$28 sps:$4 sm:$0x3f]  }
  0x25   : > { %v493_v37 = vor.u32 %v491_v32, %v489_v23  ;;  %v16067_v56 = vld [vmem:[%s22788_s1 + $0xf4] ss:$28 sps:$4 sm:$0xff]   ;;  %v884_v60 = vsel %vm566_vm0, %v16061_v55, 0  ;;  %v1116_v62 = vsel %vm1113_vm3, %v1114_v58, %v1115_v59  ;;  %v16070_v63 = vld [vmem:[%s22788_s1 + $0x12c] ss:$28 sps:$4 sm:$0x3f]  }
  0x26   : > { %v490_v31 = vsel %vm478_vm1, %v485_v25, %v489_v23  ;;  %v16065_v61 = vld [vmem:[%s22788_s1 + $0xf0] ss:$28 sps:$4 sm:$0xff]   ;;  %v16062_v1 = vld [vmem:[%s22788_s1 + $0xe8] ss:$28 sps:$4 sm:$0xff]   ;;  %v1201_v3 = vsel %vm566_vm0, %v16073_v0, 0  ;;  %v18354_v21 = vshrl.u32 %v1447_v20, 7 }
  0x27   : > { %11851 = vmatmul.mubr.msk.bf16.vlgmr.msra.gmra.mrb[0].mxu1 %vm559_vm2, %v490_v31  ;;  %11857 = vmatmul.mubr.msk.bf16.vlgmr.msra.gmra.mrb[0].mxu0 %vm559_vm2, %v490_v31  ;;  %v16068_v4 = vld [vmem:[%s22788_s1 + $0x124] ss:$28 sps:$4 sm:$0x3f]   ;;  %v16074_v6 = vld [vmem:[%s22788_s1 + $0xf8] ss:$28 sps:$4 sm:$0xff]   ;;  %vm1547_vm5 = vcmask 1041408  }
  0x28   : > { %642 = vmatpush1.bf16.msra.mxu1 %v16028_v26  ;;  %630 = vmatprep.mubr.bf16.mxu1 %v18007_v2  ;;  %v16072_v5 = vld [vmem:[%s22788_s1 + $0x120] ss:$28 sps:$4 sm:$0x3f]   ;;  %v16075_v8 = vld [vmem:[%s22788_s1 + $0x130] ss:$28 sps:$4 sm:$0x3f]  }
  0x29   : > { %736 = vmatprep.mubr.bf16.mxu0 %v18007_v2  ;;  %887 = vmatpush1.bf16.msra.mxu0 %v16031_v29  ;;  %v1195_v7 = vsel %vm566_vm0, %v16072_v5, 0  ;;  %v1207_v9 = vsel %vm566_vm0, %v16075_v8, 0  ;;  %v18359_v22 = vld [vmem:[%s22789_s2] sm:$0x7f]  ;;  %v18362_v23 = vsub.s32 0, %v18354_v21  ;;  %v18365_v24 = vsub.s32 1, %v18354_v21 }
  0x2a   : > { %11853 = vmatprep.subr.msk.bf16.mxu1 %vm566_vm0, %v16034_v27  ;;  %11875 = vmatprep.subr.msk.bf16.mxu0 %vm566_vm0, %v16037_v28  ;;  %v1465_v48 = vsub.s32 4, %v18354_v21  ;;  %vm18009_vm6 = vmmov 1   ;;  %vm2828_vm8 = vcmask 523264   ;;  %vm5828_vm9 = vcmask 261120   ;;  %s431_s17 = sand.u32 1, %s17997_s26   ;;  %s13374_s14 = sshll.u32 %s18104_s29, 4 }
  0x2b   : > { %v1450_v25 = vrot.slane %v18359_v22, %v18362_v23  ;;  %v1454_v27 = vrot.slane %v18359_v22, %v18365_v24  ;;  %vm18376_vm7 = vmpackc.low %vm1547_vm5, %vm18009_vm6  ;;  %vm8412_vm10 = vcmask 1042432   ;;  %vm8408_vm12 = vcmask 89088   ;;  %s432_s30 = scalar_lea.vmem [#allocation2], %s431_s17  ;;  %s22745_s21 = scalar_lea.hbm %s22800_s13, %s13374_s14 }
  0x2c   : > { %644 = vmatpush1.bf16.msra.mxu1 %v574_v33  ;;  %vm21398_vm11 = vmpackc.low %vm8412_vm10, %vm18009_vm6  ;;  %vm18011_vm13 = vmmov 0   ;;  %s11759_s15 = sshll.u32 %s432_s30, 4  ;;  %vm11744_vm14 = vcmask 73728   ;;  %s11747_s29 = scalar_lea.sflag [#allocation3], %s431_s17  ;;  %s22747_s15 = int_to_ptr.vmem [resolvable:$true] %s11759_s15 }
  0x2d   : > { %889 = vmatpush1.bf16.msra.mxu0 %v866_v35  ;;  %13551 = vmatprep.subr.bf16.mxu1 %v16040_v34  ;;  %s17943_s22 = scalar_lea.vmem %s22747_s15, 16  ;;  %s18012_s0 = smov [#allocation2]  }
  0x2e   : > { %992 = vmatprep.subr.bf16.mxu0 %v16043_v36  ;;  %p17944_p11 = scmp.ne.s32.totalorder %s22747_s15, %s17943_s22  ;;  %s17947_s23 = sshll.u32 %s18012_s0, 4  ;;  %s17948_s23 = int_to_ptr.vmem [resolvable:$false] %s17947_s23 }
  0x2f   : > { %11852 = vmatmul.mubr.msk.bf16.gmra.mrb[4].mxu1 %vm559_vm2, %v493_v37  ;;  %11858 = vmatmul.mubr.msk.bf16.gmra.mrb[4].mxu0 %vm559_vm2, %v493_v37  ;;  %s17949_s24 = scalar_lea.vmem %s17948_s23, 32  ;;  %p17950_p0 = scmp.lt.s32.totalorder %s22747_s15, %s17948_s23 }
  0x30   : > { %673 = vmatprep.mubr.bf16.mxu1 %v18007_v2  ;;  %918 = vmatprep.mubr.bf16.mxu0 %v18007_v2  ;;  %p17945_p12 = pnand %p17944_p11, %p18121_p5  ;;  %p17951_p1 = scmp.lt.s32.totalorder %s17949_s24, %s17943_s22 }
  0x32   : > { %p17946_p13 = pneg %p17945_p12  ;;  %p17952_p2 = por %p17951_p1, %p17950_p0 }
  0x34   : > { %p17953_p3 = pnand %p17952_p2, %p17946_p13 }
  0x37   : > { %11854 = vmatmul.mubr.msk.bf16.vlgmr.msra.gmra.mrb[8].mxu1 %vm559_vm2, %v490_v31  ;;  %11876 = vmatmul.mubr.msk.bf16.vlgmr.msra.gmra.mrb[8].mxu0 %vm559_vm2, %v18169_v16 }
  0x38   : > { %13552 = vmatpush3.bf16.msra.mxu1 %v16040_v34  ;;  %683 = vmatprep.mubr.bf16.mxu1 %v18007_v2 }
  0x39   : > { %928 = vmatprep.mubr.bf16.mxu0 %v18007_v2  ;;  %993 = vmatpush1.bf16.msra.mxu0 %v16041_v38 }
  0x3a   : > { %15289 = vmatprep.subr.msk.bf16.mxu1 %vm566_vm0, %v16044_v39  ;;  %11881 = vmatprep.subr.msk.bf16.mxu0 %vm566_vm0, %v16045_v40 }
  0x3c   : > { %13554 = vmatpush3.bf16.msra.mxu1 %v586_v44 }
  0x3d   : > { %995 = vmatpush1.bf16.msra.mxu0 %v878_v45  ;;  %939 = vmatprep.subr.bf16.mxu1 %v16050_v42 }
  0x3e   : > { %1209 = vmatprep.subr.bf16.mxu0 %v16056_v43 }
  0x3f   : > { %11855 = vmatmul.mubr.msk.bf16.gmra.mrb[12].mxu1 %vm559_vm2, %v493_v37  ;;  %11877 = vmatmul.mubr.msk.bf16.gmra.mrb[12].mxu0 %vm559_vm2, %v18171_v17 }
  0x40   : > { %13555 = vmatprep.mubr.msk.bf16.mxu1 %vm559_vm2, %v490_v31  ;;  %1024 = vmatprep.mubr.bf16.mxu0 %v18007_v2 }
  0x47   : > { %13556 = vmatmul.mubr.msk.bf16.vlgmr.msra.gmra.mrb[16].mxu1 %vm559_vm2, %v493_v37  ;;  %11882 = vmatmul.mubr.msk.bf16.vlgmr.msra.gmra.mrb[0].mxu0 %vm559_vm2, %v18169_v16 }
  0x48   : > { %940 = vmatpush1.bf16.msra.mxu1 %v16048_v46  ;;  %971 = vmatprep.mubr.bf16.mxu1 %v18007_v2 }
  0x49   : > { %11878 = vmatprep.subr.msk.bf16.mxu1 %vm566_vm0, %v16051_v47  ;;  %1034 = vmatprep.mubr.bf16.mxu0 %v18007_v2  ;;  %v1457_v47 = vsub.s32 2, %v18354_v21 }
  0x4a   : > { %1210 = vmatpush1.bf16.msra.mxu0 %v16054_v49  ;;  %v16091_v49 = vld [vmem:[%s22791_s4 + $0x4c] ss:$16 sps:$4 sm:$0xff]  }
  0x4b   : > { %11916 = vmatprep.subr.msk.bf16.mxu0 %vm566_vm0, %v16058_v50 }
  0x4c   : > { %942 = vmatpush1.bf16.msra.mxu1 %v872_v53  ;;  %v1461_v53 = vsub.s32 3, %v18354_v21 }
  0x4d   : > { %13559 = vmatprep.subr.bf16.mxu1 %v16057_v52 }
  0x4e   : > { %1212 = vmatpush1.bf16.msra.mxu0 %v1189_v54  ;;  %v1469_v54 = vsub.s32 5, %v18354_v21  ;;  %v1462_v0 = vrot.slane %v18359_v22, %v1461_v53 }
  0x4f   : > { %11879 = vmatmul.mubr.msk.bf16.vlgmr.msra.gmra.mrb[8].mxu1 %vm559_vm2, %v18169_v16  ;;  %11883 = vmatmul.mubr.msk.bf16.gmra.mrb[4].mxu0 %vm559_vm2, %v18171_v17 }
  0x50   : > { %13560 = vmatpush3.bf16.msra.mxu1 %v16057_v52  ;;  %981 = vmatprep.mubr.bf16.mxu1 %v18007_v2 }
  0x51   : > { %1241 = vmatprep.mubr.bf16.mxu0 %v18007_v2  ;;  %15290 = vmatprep.subr.msk.bf16.mxu1 %vm566_vm0, %v16061_v55 }
  0x52   : > { %1315 = vmatprep.subr.bf16.mxu0 %v16067_v56 }
  0x54   : > { %13562 = vmatpush3.bf16.msra.mxu1 %v884_v60 }
  0x55   : > { %1262 = vmatprep.subr.bf16.mxu1 %v16064_v57 }
  0x57   : > { %11880 = vmatmul.mubr.msk.bf16.gmra.mrb[12].mxu1 %vm559_vm2, %v18171_v17  ;;  %11917 = vmatmul.mubr.msk.bf16.vlgmr.msra.gmra.mrb[8].mxu0 %vm559_vm2, %v1116_v62 }
  0x58   : > { %13563 = vmatprep.mubr.msk.bf16.mxu1 %vm559_vm2, %v18169_v16  ;;  %1251 = vmatprep.mubr.bf16.mxu0 %v18007_v2 }
  0x59   : > { %1316 = vmatpush1.bf16.msra.mxu0 %v16065_v61  ;;  %v1458_v61 = vrot.slane %v18359_v22, %v1457_v47 }
  0x5a   : > { %11922 = vmatprep.subr.msk.bf16.mxu0 %vm566_vm0, %v16070_v63 }
  0x5d   : > { %1318 = vmatpush1.bf16.msra.mxu0 %v1201_v3 }
  0x5f   : > { %13564 = vmatmul.mubr.msk.bf16.vlgmr.msra.gmra.mrb[16].mxu1 %vm559_vm2, %v18171_v17  ;;  %11918 = vmatmul.mubr.msk.bf16.gmra.mrb[12].mxu0 %vm559_vm2, %v1115_v59 }
  0x60   : > { %1263 = vmatpush1.bf16.msra.mxu1 %v16062_v1  ;;  %1294 = vmatprep.mubr.bf16.mxu1 %v18007_v2  ;;  %v1470_v1 = vrot.slane %v18359_v22, %v1469_v54 }
  0x61   : > { %11919 = vmatprep.subr.msk.bf16.mxu1 %vm566_vm0, %v16068_v4  ;;  %1347 = vmatprep.mubr.bf16.mxu0 %v18007_v2 }
  0x64   : > { %1265 = vmatpush1.bf16.msra.mxu1 %v1195_v7 }
  0x65   : > { %13567 = vmatprep.subr.bf16.mxu1 %v16074_v6 }
  0x67   : > { %11920 = vmatmul.mubr.msk.bf16.vlgmr.msra.gmra.mrb[8].mxu1 %vm559_vm2, %v1116_v62  ;;  %11923 = vmatmul.mubr.msk.bf16.vlgmr.msra.gmra.mrb[0].mxu0 %vm559_vm2, %v1116_v62 }
  0x68   : > { %1304 = vmatprep.mubr.bf16.mxu1 %v18007_v2  ;;  %1357 = vmatprep.mubr.bf16.mxu0 %v18007_v2 }
  0x69   : > { %13568 = vmatpush3.bf16.msra.mxu1 %v16074_v6 }
  0x6a   : > { %15291 = vmatprep.subr.msk.bf16.mxu1 %vm566_vm0, %v16075_v8 }
  0x6d   : > { %13570 = vmatpush3.bf16.msra.mxu1 %v1207_v9 }
  0x6f   : > { %11921 = vmatmul.mubr.msk.bf16.gmra.mrb[12].mxu1 %vm559_vm2, %v1115_v59  ;;  %11924 = vmatmul.mubr.msk.bf16.gmra.mrb[4].mxu0 %vm559_vm2, %v1115_v59 }
  0x70   : > { %13571 = vmatprep.mubr.msk.bf16.mxu1 %vm559_vm2, %v1116_v62  ;;  %13583 = vmatprep.mubr.msk.f32.mxu0 %vm1540_vm4, %v18350_v11  ;;  %v1466_v62 = vrot.slane %v18359_v22, %v1465_v48 }
  0x77   : > { %13572 = vmatmul.mubr.msk.bf16.vlgmr.msra.gmra.mrb[16].mxu1 %vm559_vm2, %v1115_v59 }
  0x78   : > { %1633 = vmatprep.mubr.f32.mxu1 %v18008_v10 }
  0xfa   : > { %v622_v12 = vpop.f32.mrb[0].mxu1 }
  0xfb   : > { %v624_v13 = vpop.f32.mrb[1].mxu1 }
  0xfc   : > { %v626_v14 = vpop.f32.mrb[2].mxu1 }
  0xfd   : > { %v628_v15 = vpop.f32.mrb[3].mxu1 }
 0x102   : > { %v632_v16 = vpop.f32.mrb[4].mxu1 }
 0x103   : > { %v634_v17 = vpop.f32.mrb[5].mxu1 }
 0x104   : > { %v636_v18 = vpop.f32.mrb[6].mxu1 }
 0x105   : > { %v638_v19 = vpop.f32.mrb[7].mxu1 }
 0x12a   : > { %v1243_v26 = vpop.f32.mrb[8].mxu0 }
 0x12b   : > { %v15117_v28 = vadd.f32 %v1243_v26, %v622_v12  ;;  %v1245_v29 = vpop.f32.mrb[9].mxu0 }
 0x12c   : > { %v15118_v30 = vadd.f32 %v1245_v29, %v624_v13  ;;  %v1247_v31 = vpop.f32.mrb[10].mxu0 }
 0x12d   : > { %v1482_v32 = vadd.f32 %v15117_v28, %v1450_v25  ;;  %v15119_v33 = vadd.f32 %v1247_v31, %v626_v14  ;;  %v1249_v34 = vpop.f32.mrb[11].mxu0 }
 0x12e   : > { %v1483_v35 = vadd.f32 %v15118_v30, %v1454_v27  ;;  %v15120_v36 = vadd.f32 %v1249_v34, %v628_v15 }
 0x12f   : > { %v1489_v37 = vadd.f32 %v15119_v33, %v1450_v25  ;;  %v1510_v39 = vmax.f32 %v1482_v32, 0.0 }
 0x130   : > { %v1490_v38 = vadd.f32 %v15120_v36, %v1454_v27  ;;  %v1511_v41 = vmax.f32 %v1483_v35, 0.0 }
 0x131   : > { %v1517_v40 = vmax.f32 %v1489_v37, 0.0 }
 0x132   : > { %v1518_v42 = vmax.f32 %v1490_v38, 0.0  ;;  %v1253_v43 = vpop.f32.mrb[12].mxu0 }
 0x133   : > { %v18371_v44 = vpack.c.bf16 %v1517_v40, %v1510_v39  ;;  %v15121_v45 = vadd.f32 %v1253_v43, %v632_v16  ;;  %v1255_v46 = vpop.f32.mrb[13].mxu0 }
 0x134   : > { %v15122_v50 = vadd.f32 %v1255_v46, %v634_v17  ;;  %v1257_v51 = vpop.f32.mrb[14].mxu0  ;;  %v18380_v52 = vpack.c.bf16 %v1518_v42, %v1511_v41  ;;  %v18415_v41 = vld [vmem:[%s22790_s3 + $0x8] sm:$0x1f] }
 0x135   : > { %v1496_v55 = vadd.f32 %v15121_v45, %v1450_v25  ;;  %v15123_v56 = vadd.f32 %v1257_v51, %v636_v18  ;;  %v1259_v57 = vpop.f32.mrb[15].mxu0 }
 0x136   : > { %v1497_v58 = vadd.f32 %v15122_v50, %v1454_v27  ;;  %v15124_v59 = vadd.f32 %v1259_v57, %v638_v19  ;;  %13618 = vmatprep.subr.bf16.mxu1 %v18380_v52  ;;  %v1473_v57 = vsub.s32 6, %v18354_v21 }
 0x137   : > { %v1503_v60 = vadd.f32 %v15123_v56, %v1450_v25  ;;  %13620 = vmatpush1.bf16.msra.mxu1 %v18371_v44  ;;  %v1524_v3 = vmax.f32 %v1496_v55, 0.0 }
 0x138   : > { %v1504_v63 = vadd.f32 %v15124_v59, %v1454_v27  ;;  %v1525_v4 = vmax.f32 %v1497_v58, 0.0 }
 0x139   : > { %v1531_v5 = vmax.f32 %v1503_v60, 0.0 }
 0x13a   : > { %v1532_v6 = vmax.f32 %v1504_v63, 0.0  ;;  %v1296_v7 = vpop.f32.mrb[8].mxu1  ;;  %v1349_v8 = vpop.f32.mrb[0].mxu0 }
 0x13b   : > { %v18398_v9 = vpack.c.bf16 %v1531_v5, %v1524_v3  ;;  %v1484_v12 = vadd.f32 %v1458_v61, %v1296_v7  ;;  %v1486_v13 = vadd.f32 %v1466_v62, %v1349_v8  ;;  %v1298_v14 = vpop.f32.mrb[9].mxu1  ;;  %v1351_v15 = vpop.f32.mrb[1].mxu0 }
 0x13c   : > { %v18400_v16 = vpack.c.bf16 %v1532_v6, %v1525_v4  ;;  %v1485_v17 = vadd.f32 %v1462_v0, %v1298_v14  ;;  %v1487_v18 = vadd.f32 %v1470_v1, %v1351_v15  ;;  %v1300_v19 = vpop.f32.mrb[10].mxu1  ;;  %v1353_v20 = vpop.f32.mrb[2].mxu0 }
 0x13d   : > { %v1491_v25 = vadd.f32 %v1458_v61, %v1300_v19  ;;  %v1493_v26 = vadd.f32 %v1466_v62, %v1353_v20  ;;  %v1302_v27 = vpop.f32.mrb[11].mxu1  ;;  %v1355_v28 = vpop.f32.mrb[3].mxu0  ;;  %v1512_v29 = vmax.f32 %v1484_v12, 0.0  ;;  %v1514_v30 = vmax.f32 %v1486_v13, 0.0 }
 0x13e   : > { %v1492_v31 = vadd.f32 %v1462_v0, %v1302_v27  ;;  %v1494_v32 = vadd.f32 %v1470_v1, %v1355_v28  ;;  %13623 = vmatprep.subr.msk.bf16.mxu1 %vm18376_vm7, %v18400_v16  ;;  %v1513_v33 = vmax.f32 %v1485_v17, 0.0  ;;  %v1515_v36 = vmax.f32 %v1487_v18, 0.0 }
 0x13f   : > { %v1519_v34 = vmax.f32 %v1491_v25, 0.0  ;;  %v1521_v35 = vmax.f32 %v1493_v26, 0.0  ;;  %13626 = vmatpush1.bf16.msk.msra.mxu1 %vm18376_vm7, %v18398_v9  ;;  %v1474_v17 = vrot.slane %v18359_v22, %v1473_v57  ;;  %v16096_v57 = vld [vmem:[%s22791_s4 + $0x60] ss:$16 sps:$4 sm:$0xff]  }
 0x140   : > { %v1520_v37 = vmax.f32 %v1492_v31, 0.0  ;;  %v1522_v38 = vmax.f32 %v1494_v32, 0.0 }
 0x141   : > { %v18408_v39 = vpack.c.bf16 %v1519_v34, %v1512_v29  ;;  %v18410_v40 = vpack.c.bf16 %v1521_v35, %v1514_v30 }
 0x142   : > { %v18417_v42 = vpack.c.bf16 %v1520_v37, %v1513_v33  ;;  %v18419_v43 = vpack.c.bf16 %v1522_v38, %v1515_v36  ;;  %v1306_v45 = vpop.f32.mrb[12].mxu1  ;;  %v1359_v46 = vpop.f32.mrb[4].mxu0  ;;  %11929 = vmatmul.mubr.msk.f32.vlgmr.msra.gmra.mrb[20].mxu1 %vm1540_vm4, %v18350_v11  ;;  %v17942_v36 = vld [vmem:[%s22790_s3] sm:$0xff] }
 0x143   : > { %v1498_v50 = vadd.f32 %v1458_v61, %v1306_v45  ;;  %v1500_v51 = vadd.f32 %v1466_v62, %v1359_v46  ;;  %v1308_v55 = vpop.f32.mrb[13].mxu1  ;;  %v1361_v56 = vpop.f32.mrb[5].mxu0  ;;  %1639 = vmatprep.mubr.f32.mxu1 %v18008_v10  ;;  %v16088_v45 = vld [vmem:[%s22791_s4 + $0x44] ss:$16 sps:$4 sm:$0xff]   ;;  %v16087_v46 = vld [vmem:[%s22791_s4 + $0x28] ss:$16 sps:$4 sm:$0xff]  }
 0x144   : > { %v1499_v58 = vadd.f32 %v1462_v0, %v1308_v55  ;;  %v1501_v59 = vadd.f32 %v1470_v1, %v1361_v56  ;;  %v1310_v60 = vpop.f32.mrb[14].mxu1  ;;  %v1363_v63 = vpop.f32.mrb[6].mxu0  ;;  %13628 = vmatprep.subr.bf16.mxu1 %v18417_v42  ;;  %v16093_v55 = vld [vmem:[%s22791_s4 + $0x48] ss:$16 sps:$4 sm:$0xff]   ;;  %v16097_v56 = vld [vmem:[%s22791_s4 + $0x6c] ss:$16 sps:$4 sm:$0xff]  }
 0x145   : > { %v1505_v3 = vadd.f32 %v1458_v61, %v1310_v60  ;;  %v1507_v4 = vadd.f32 %v1466_v62, %v1363_v63  ;;  %v1312_v5 = vpop.f32.mrb[15].mxu1  ;;  %v1365_v6 = vpop.f32.mrb[7].mxu0  ;;  %13630 = vmatpush1.bf16.msra.mxu1 %v18408_v39  ;;  %v1526_v11 = vmax.f32 %v1498_v50, 0.0  ;;  %v1528_v7 = vmax.f32 %v1500_v51, 0.0  ;;  %v16090_v50 = vld [vmem:[%s22791_s4 + $0x40] ss:$16 sps:$4 sm:$0xff]  }
 0x146   : > { %v1506_v8 = vadd.f32 %v1462_v0, %v1312_v5  ;;  %v1508_v12 = vadd.f32 %v1470_v1, %v1365_v6  ;;  %11930 = vmatmul.mubr.msk.f32.gmra.mrb[22].mxu1 %vm1540_vm4, %v18415_v41  ;;  %v1527_v13 = vmax.f32 %v1499_v58, 0.0  ;;  %v1529_v61 = vmax.f32 %v1501_v59, 0.0  ;;  %v16094_v51 = vld [vmem:[%s22791_s4 + $0x64] ss:$16 sps:$4 sm:$0xff]   ;;  %v16099_v59 = vld [vmem:[%s22791_s4 + $0x68] ss:$16 sps:$4 sm:$0xff]  }
 0x147   : > { %v1533_v14 = vmax.f32 %v1505_v3, 0.0  ;;  %v1535_v15 = vmax.f32 %v1507_v4, 0.0  ;;  %1710 = vmatprep.mubr.f32.mxu1 %v18008_v10  ;;  %v16100_v58 = vld [vmem:[%s22791_s4 + $0x84] ss:$16 sps:$4 sm:$0xff]   ;;  %v16103_v60 = vld [vmem:[%s22791_s4 + $0x8c] ss:$16 sps:$4 sm:$0xff]  }
 0x148   : > { %v1534_v62 = vmax.f32 %v1506_v8, 0.0  ;;  %v1536_v18 = vmax.f32 %v1508_v12, 0.0  ;;  %v16102_v63 = vld [vmem:[%s22791_s4 + $0x80] ss:$16 sps:$4 sm:$0xff]   ;;  %v16106_v3 = vld [vmem:[%s22791_s4 + $0xa4] ss:$16 sps:$4 sm:$0xff]  }
 0x149   : > { %v13634_v19 = vpack.c.bf16 %v1533_v14, %v1526_v11  ;;  %v13644_v20 = vpack.c.bf16 %v1535_v15, %v1528_v7  ;;  %v16105_v4 = vld [vmem:[%s22791_s4 + $0x88] ss:$16 sps:$4 sm:$0xff]   ;;  %v16109_v5 = vld [vmem:[%s22791_s4 + $0xac] ss:$16 sps:$4 sm:$0xff]   ;;  %v16108_v6 = vld [vmem:[%s22791_s4 + $0xa0] ss:$16 sps:$4 sm:$0xff]  }
 0x14a   : > { %v13631_v25 = vpack.c.bf16 %v1534_v62, %v1527_v13  ;;  %v13641_v26 = vpack.c.bf16 %v1536_v18, %v1529_v61  ;;  %v13573_v27 = vpop.f32.mrb[16].mxu1  ;;  %v16112_v11 = vld [vmem:[%s22791_s4 + $0xc4] ss:$16 sps:$4 sm:$0xff]   ;;  %v16111_v7 = vld [vmem:[%s22791_s4 + $0xa8] ss:$16 sps:$4 sm:$0xff]  }
 0x14b   : > { %v1502_v0 = vadd.f32 %v13573_v27, %v1474_v17  ;;  %v1402_v1 = vpop.f32.mrb[17].mxu1  ;;  %v16115_v8 = vld [vmem:[%s22791_s4 + $0xcc] ss:$16 sps:$4 sm:$0xff]   ;;  %v16114_v12 = vld [vmem:[%s22791_s4 + $0xc0] ss:$16 sps:$4 sm:$0xff]  }
 0x14c   : > { %v1488_v28 = vadd.f32 %v1474_v17, %v1402_v1  ;;  %v13574_v29 = vpop.f32.mrb[18].mxu1  ;;  %13633 = vmatprep.subr.msk.bf16.mxu1 %vm18376_vm7, %v13631_v25  ;;  %v16118_v13 = vld [vmem:[%s22791_s4 + $0xe4] ss:$16 sps:$4 sm:$0xff]   ;;  %v16117_v14 = vld [vmem:[%s22791_s4 + $0xc8] ss:$16 sps:$4 sm:$0xff]  }
 0x14d   : > { %v1509_v30 = vadd.f32 %v13574_v29, %v1474_v17  ;;  %v1405_v31 = vpop.f32.mrb[19].mxu1  ;;  %13636 = vmatpush1.bf16.msk.msra.mxu1 %vm18376_vm7, %v13634_v19  ;;  %v1530_v32 = vmax.f32 %v1502_v0, 0.0  ;;  %v16121_v15 = vld [vmem:[%s22791_s4 + $0xec] ss:$16 sps:$4 sm:$0xff]   ;;  %v16124_v61 = vld [vmem:[%s22791_s4 + $0x104] ss:$16 sps:$4 sm:$0xff]  }
 0x14e   : > { %v1495_v22 = vadd.f32 %v1474_v17, %v1405_v31  ;;  %13638 = vmatprep.subr.bf16.mxu1 %v18419_v43  ;;  %v1516_v34 = vmax.f32 %v1488_v28, 0.0  ;;  %v16120_v17 = vld [vmem:[%s22791_s4 + $0xe0] ss:$16 sps:$4 sm:$0xff]   ;;  %v16123_v62 = vld [vmem:[%s22791_s4 + $0xe8] ss:$16 sps:$4 sm:$0xff]  }
 0x14f   : > { %v1537_v33 = vmax.f32 %v1509_v30, 0.0  ;;  %v16127_v18 = vld [vmem:[%s22791_s4 + $0x10c] ss:$16 sps:$4 sm:$0xff]   ;;  %v16135_v0 = vld [vmem:[%s22791_s4 + $0x128] ss:$16 sps:$4 sm:$0xff]  }
 0x150   : > { %v1523_v35 = vmax.f32 %v1495_v22, 0.0  ;;  %11933 = vmatmul.mubr.msk.f32.vlgmr.msra.gmra.mrb[24].mxu1 %vm1540_vm4, %v17942_v36  ;;  %v16133_v27 = vld [vmem:[%s22791_s4 + $0x12c] ss:$16 sps:$4 sm:$0xff]   ;;  %v16136_v1 = vld [vmem:[%s22791_s4 + $0x144] ss:$16 sps:$4 sm:$0xff]  }
 0x151   : > { %v13651_v37 = vpack.c.bf16 %v1537_v33, %v1530_v32  ;;  %13640 = vmatpush1.bf16.msra.mxu1 %v18410_v40  ;;  %1716 = vmatprep.mubr.f32.mxu1 %v18008_v10  ;;  %v16138_v28 = vld [vmem:[%s22791_s4 + $0x140] ss:$16 sps:$4 sm:$0xff]   ;;  %v16139_v29 = vld [vmem:[%s22791_s4 + $0x14c] ss:$16 sps:$4 sm:$0xff]   ;;  %v16141_v30 = vld [vmem:[%s22791_s4 + $0x148] ss:$16 sps:$4 sm:$0xff]  }
 0x152   : > { %v13647_v38 = vpack.c.bf16 %v1523_v35, %v1516_v34  ;;  %13643 = vmatprep.subr.msk.bf16.mxu1 %vm18376_vm7, %v13641_v26  ;;  %v16142_v31 = vld [vmem:[%s22791_s4 + $0x164] ss:$16 sps:$4 sm:$0xff]   ;;  %v16145_v22 = vld [vmem:[%s22791_s4 + $0x16c] ss:$16 sps:$4 sm:$0xff]   ;;  %v16144_v32 = vld [vmem:[%s22791_s4 + $0x160] ss:$16 sps:$4 sm:$0xff]  }
 0x153   : > { %v16147_v33 = vld [vmem:[%s22791_s4 + $0x168] ss:$16 sps:$4 sm:$0xff]   ;;  %v16148_v34 = vld [vmem:[%s22791_s4 + $0x184] ss:$16 sps:$4 sm:$0xff]   ;;  %v16151_v35 = vld [vmem:[%s22791_s4 + $0x18c] ss:$16 sps:$4 sm:$0xff]  }
 0x154   : > { %11934 = vmatmul.mubr.msk.f32.gmra.mrb[26].mxu1 %vm1540_vm4, %v18415_v41  ;;  %13648 = vmatprep.subr.bf16.mxu0 %v13647_v38 }
 0x155   : > { %13646 = vmatpush1.bf16.msk.msra.mxu1 %vm18376_vm7, %v13644_v20  ;;  %13650 = vmatpush3.bf16.msra.mxu0 %v13647_v38 }
 0x156   : > { %13653 = vmatprep.subr.msk.bf16.mxu0 %vm18376_vm7, %v13651_v37  ;;  %13658 = vmatprep.subr.bf16.mxu1 %v18380_v52  ;;  %v11942_v52 = vld [vmem:[%s22790_s3 + $0x10] sm:$0xff] }
 0x157   : > { %1787 = vmatprep.mubr.f32.mxu1 %v18008_v10 }
 0x158   : > { %11937 = vmatmul.mubr.msk.f32.vlgmr.msra.gmra.mrb[28].mxu1 %vm1540_vm4, %v17942_v36  ;;  %v16150_v36 = vld [vmem:[%s22791_s4 + $0x180] ss:$16 sps:$4 sm:$0xff]  }
 0x159   : > { %13656 = vmatpush3.bf16.msk.msra.mxu0 %vm18376_vm7, %v13651_v37  ;;  %13660 = vmatpush1.bf16.msra.mxu1 %v18371_v44  ;;  %v11943_v44 = vld [vmem:[%s22790_s3 + $0x18] sm:$0x1f] }
 0x15a   : > { %13663 = vmatprep.subr.msk.bf16.mxu1 %vm18376_vm7, %v18400_v16  ;;  %13668 = vmatprep.subr.bf16.mxu0 %v18417_v42  ;;  %v16079_v16 = vld [vmem:[%s22791_s4 + $0xc] ss:$16 sps:$4 sm:$0xff]  }
 0x15b   : > { %1793 = vmatprep.mubr.f32.mxu1 %v18008_v10  ;;  %v16085_v42 = vld [vmem:[%s22791_s4 + $0x2c] ss:$16 sps:$4 sm:$0xff]  }
 0x15c   : > { %11938 = vmatmul.mubr.msk.f32.gmra.mrb[30].mxu1 %vm1540_vm4, %v18415_v41  ;;  %13584 = vmatmul.mubr.msk.f32.vlgmr.msra.gmra.mrb[16].mxu0 %vm1540_vm4, %v18415_v41  ;;  %v16082_v41 = vld [vmem:[%s22791_s4 + $0x24] ss:$16 sps:$4 sm:$0xff]  }
 0x15d   : > { %13666 = vmatpush1.bf16.msk.msra.mxu1 %vm18376_vm7, %v18398_v9  ;;  %13670 = vmatpush1.bf16.msra.mxu0 %v18408_v39  ;;  %v16076_v9 = vld [vmem:[%s22791_s4 + $0x4] ss:$16 sps:$4 sm:$0xff]   ;;  %v16078_v39 = vld [vmem:[%s22791_s4] ss:$16 sps:$4 sm:$0xff]  }
 0x15e   : > { %13673 = vmatprep.subr.msk.bf16.mxu0 %vm18376_vm7, %v13631_v25  ;;  %13678 = vmatprep.subr.bf16.mxu1 %v18419_v43  ;;  %v16084_v43 = vld [vmem:[%s22791_s4 + $0x20] ss:$16 sps:$4 sm:$0xff]   ;;  %v16130_v25 = vld [vmem:[%s22791_s4 + $0x124] ss:$16 sps:$4 sm:$0xff]  }
 0x15f   : > { %1948 = vmatprep.mubr.f32.mxu1 %v18008_v10  ;;  %2025 = vmatprep.mubr.f32.mxu0 %v18008_v10 }
 0x160   : > { %11946 = vmatmul.mubr.msk.f32.vlgmr.msra.gmra.mrb[32].mxu1 %vm1540_vm4, %v11942_v52 }
 0x161   : > { %13676 = vmatpush1.bf16.msk.msra.mxu0 %vm18376_vm7, %v13634_v19  ;;  %13680 = vmatpush1.bf16.msra.mxu1 %v18410_v40  ;;  %v16081_v40 = vld [vmem:[%s22791_s4 + $0x8] ss:$16 sps:$4 sm:$0xff]   ;;  %v16126_v19 = vld [vmem:[%s22791_s4 + $0x100] ss:$16 sps:$4 sm:$0xff]  }
 0x162   : > { %13683 = vmatprep.subr.msk.bf16.mxu1 %vm18376_vm7, %v13641_v26  ;;  %13688 = vmatprep.subr.bf16.mxu0 %v13647_v38  ;;  %v16132_v26 = vld [vmem:[%s22791_s4 + $0x120] ss:$16 sps:$4 sm:$0xff]  }
 0x163   : > { %1954 = vmatprep.mubr.f32.mxu1 %v18008_v10 }
 0x164   : > { %11947 = vmatmul.mubr.msk.f32.gmra.mrb[34].mxu1 %vm1540_vm4, %v11943_v44  ;;  %11950 = vmatmul.mubr.msk.f32.vlgmr.msra.gmra.mrb[18].mxu0 %vm1540_vm4, %v11942_v52 }
 0x165   : > { %13686 = vmatpush1.bf16.msk.msra.mxu1 %vm18376_vm7, %v13644_v20  ;;  %13690 = vmatpush3.bf16.msra.mxu0 %v13647_v38  ;;  %v16129_v20 = vld [vmem:[%s22791_s4 + $0x108] ss:$16 sps:$4 sm:$0xff]   ;;  %v16154_v38 = vld [vmem:[%s22791_s4 + $0x1a4] ss:$16 sps:$4 sm:$0xff]  }
 0x166   : > { %13693 = vmatprep.subr.msk.bf16.mxu0 %vm18376_vm7, %v13651_v37  ;;  %2031 = vmatprep.mubr.f32.mxu0 %v18008_v10 }
 0x167   : > { %2102 = vmatprep.mubr.f32.mxu1 %v18008_v10  ;;  %13698 = vmatprep.subr.bf16.mxu1 %v16076_v9  ;;  %v16159_v9 = vld [vmem:[%s22791_s4 + $0x1a8] ss:$16 sps:$4 sm:$0xff]  }
 0x168   : > { %11951 = vmatmul.mubr.msk.f32.gmra.mrb[20].mxu0 %vm1540_vm4, %v11943_v44  ;;  %11954 = vmatmul.mubr.msk.f32.vlgmr.msra.gmra.mrb[36].mxu1 %vm1540_vm4, %v11942_v52 }
 0x169   : > { %13696 = vmatpush3.bf16.msk.msra.mxu0 %vm18376_vm7, %v13651_v37  ;;  %2108 = vmatprep.mubr.f32.mxu1 %v18008_v10  ;;  %v16153_v37 = vld [vmem:[%s22791_s4 + $0x188] ss:$16 sps:$4 sm:$0xff]  }
 0x16a   : > { %13594 = vmatprep.mubr.msk.f32.mxu0 %vm1540_vm4, %v11942_v52  ;;  %13906 = vmatprep.subr.bf16.mxu0 %v16079_v16  ;;  %v16157_v52 = vld [vmem:[%s22791_s4 + $0x1ac] ss:$16 sps:$4 sm:$0xff]   ;;  %v16160_v16 = vld [vmem:[%s22791_s4 + $0x1c4] ss:$16 sps:$4 sm:$0xff]  }
 0x16b   : > { %13700 = vmatpush1.bf16.msra.mxu1 %v16078_v39  ;;  %v16163_v39 = vld [vmem:[%s22791_s4 + $0x1cc] ss:$16 sps:$4 sm:$0xff]  }
 0x16c   : > { %11955 = vmatmul.mubr.msk.f32.gmra.mrb[38].mxu1 %vm1540_vm4, %v11943_v44  ;;  %13595 = vmatmul.mubr.msk.f32.vlgmr.msra.gmra.mrb[22].mxu0 %vm1540_vm4, %v11943_v44  ;;  %v16156_v44 = vld [vmem:[%s22791_s4 + $0x1a0] ss:$16 sps:$4 sm:$0xff]  }
 0x16d   : > { %13908 = vmatpush1.bf16.msra.mxu0 %v16081_v40  ;;  %13702 = vmatprep.subr.bf16.mxu1 %v16082_v41  ;;  %v16162_v40 = vld [vmem:[%s22791_s4 + $0x1c0] ss:$16 sps:$4 sm:$0xff]   ;;  %v16165_v41 = vld [vmem:[%s22791_s4 + $0x1c8] ss:$16 sps:$4 sm:$0xff]  }
 0x16e   : > { %13910 = vmatprep.subr.bf16.mxu0 %v16085_v42  ;;  %v16166_v42 = vld [vmem:[%s22791_s4 + $0x1e4] ss:$16 sps:$4 sm:$0xff]  }
 0x16f   : > { %13704 = vmatpush1.bf16.msra.mxu1 %v16084_v43  ;;  %v16169_v43 = vld [vmem:[%s22791_s4 + $0x1ec] ss:$16 sps:$4 sm:$0xff]  }
 0x170   : > { %13706 = vmatprep.subr.bf16.mxu1 %v16088_v45  ;;  %v16168_v45 = vld [vmem:[%s22791_s4 + $0x1e0] ss:$16 sps:$4 sm:$0xff]  }
 0x171   : > { %13912 = vmatpush1.bf16.msra.mxu0 %v16087_v46  ;;  %v16171_v46 = vld [vmem:[%s22791_s4 + $0x1e8] ss:$16 sps:$4 sm:$0xff]  }
 0x172   : > { %13914 = vmatprep.subr.bf16.mxu0 %v16091_v49  ;;  %v16172_v49 = vld [vmem:[%s22791_s4 + $0x204] ss:$16 sps:$4 sm:$0xff]  }
 0x173   : > { %13708 = vmatpush1.bf16.msra.mxu1 %v16090_v50  ;;  %v16175_v50 = vld [vmem:[%s22791_s4 + $0x20c] ss:$16 sps:$4 sm:$0xff]  }
 0x174   : > { %13710 = vmatprep.subr.bf16.mxu1 %v16094_v51 }
 0x175   : > { %13916 = vmatpush1.bf16.msra.mxu0 %v16093_v55 }
 0x176   : > { %13918 = vmatprep.subr.bf16.mxu0 %v16097_v56 }
 0x177   : > { %13712 = vmatpush1.bf16.msra.mxu1 %v16096_v57 }
 0x178   : > { %13714 = vmatprep.subr.bf16.mxu1 %v16100_v58 }
 0x179   : > { %13920 = vmatpush1.bf16.msra.mxu0 %v16099_v59 }
 0x17a   : > { %13922 = vmatprep.subr.bf16.mxu0 %v16103_v60 }
 0x17b   : > { %13716 = vmatpush1.bf16.msra.mxu1 %v16102_v63 }
 0x17c   : > { %13718 = vmatprep.subr.bf16.mxu1 %v16106_v3 }
 0x17d   : > { %13924 = vmatpush1.bf16.msra.mxu0 %v16105_v4 }
 0x17e   : > { %13926 = vmatprep.subr.bf16.mxu0 %v16109_v5 }
 0x17f   : > { %13720 = vmatpush1.bf16.msra.mxu1 %v16108_v6 }
 0x180   : > { %13722 = vmatprep.subr.bf16.mxu1 %v16112_v11 }
 0x181   : > { %13928 = vmatpush1.bf16.msra.mxu0 %v16111_v7 }
 0x182   : > { %13930 = vmatprep.subr.bf16.mxu0 %v16115_v8 }
 0x183   : > { %13724 = vmatpush1.bf16.msra.mxu1 %v16114_v12  ;;  %v16174_v12 = vld [vmem:[%s22791_s4 + $0x200] ss:$16 sps:$4 sm:$0xff]  }
 0x184   : > { %13726 = vmatprep.subr.bf16.mxu1 %v16118_v13  ;;  %v16177_v13 = vld [vmem:[%s22791_s4 + $0x208] ss:$16 sps:$4 sm:$0xff]  }
 0x185   : > { %13932 = vmatpush1.bf16.msra.mxu0 %v16117_v14 }
 0x186   : > { %13934 = vmatprep.subr.bf16.mxu0 %v16121_v15 }
 0x187   : > { %13728 = vmatpush1.bf16.msra.mxu1 %v16120_v17  ;;  %v16178_v17 = vld [vmem:[%s22791_s4 + $0x224] ss:$16 sps:$4 sm:$0xff]  }
 0x188   : > { %13730 = vmatprep.subr.bf16.mxu1 %v16124_v61  ;;  %v16181_v61 = vld [vmem:[%s22791_s4 + $0x22c] ss:$16 sps:$4 sm:$0xff]  }
 0x189   : > { %13936 = vmatpush1.bf16.msra.mxu0 %v16123_v62 }
 0x18a   : > { %13938 = vmatprep.subr.bf16.mxu0 %v16127_v18 }
 0x18b   : > { %13732 = vmatpush1.bf16.msra.mxu1 %v16126_v19 }
 0x18c   : > { %13734 = vmatprep.subr.bf16.mxu1 %v16130_v25 }
 0x18d   : > { %13940 = vmatpush1.bf16.msra.mxu0 %v16129_v20 }
 0x18e   : > { %13942 = vmatprep.subr.bf16.mxu0 %v16133_v27 }
 0x18f   : > { %13736 = vmatpush1.bf16.msra.mxu1 %v16132_v26 }
 0x190   : > { %13738 = vmatprep.subr.bf16.mxu1 %v16136_v1  ;;  %v16183_v1 = vld [vmem:[%s22791_s4 + $0x228] ss:$16 sps:$4 sm:$0xff]  }
 0x191   : > { %13944 = vmatpush1.bf16.msra.mxu0 %v16135_v0  ;;  %v16180_v0 = vld [vmem:[%s22791_s4 + $0x220] ss:$16 sps:$4 sm:$0xff]  }
 0x192   : > { %13946 = vmatprep.subr.bf16.mxu0 %v16139_v29 }
 0x193   : > { %13740 = vmatpush1.bf16.msra.mxu1 %v16138_v28 }
 0x194   : > { %13742 = vmatprep.subr.bf16.mxu1 %v16142_v31  ;;  %v16187_v31 = vld [vmem:[%s22791_s4 + $0x24c] ss:$16 sps:$4 sm:$0xff]  }
 0x195   : > { %13948 = vmatpush1.bf16.msra.mxu0 %v16141_v30  ;;  %v16184_v30 = vld [vmem:[%s22791_s4 + $0x244] ss:$16 sps:$4 sm:$0xff]  }
 0x196   : > { %13950 = vmatprep.subr.bf16.mxu0 %v16145_v22 }
 0x197   : > { %13744 = vmatpush1.bf16.msra.mxu1 %v16144_v32 }
 0x198   : > { %13746 = vmatprep.subr.bf16.mxu1 %v16148_v34 }
 0x199   : > { %13952 = vmatpush1.bf16.msra.mxu0 %v16147_v33 }
 0x19a   : > { %13954 = vmatprep.subr.bf16.mxu0 %v16151_v35 }
 0x19b   : > { %13748 = vmatpush1.bf16.msra.mxu1 %v16150_v36 }
 0x19c   : > { %13750 = vmatprep.subr.bf16.mxu1 %v16154_v38  ;;  %v16189_v38 = vld [vmem:[%s22791_s4 + $0x248] ss:$16 sps:$4 sm:$0xff]  }
 0x19d   : > { %13956 = vmatpush1.bf16.msra.mxu0 %v16153_v37  ;;  %v16186_v37 = vld [vmem:[%s22791_s4 + $0x240] ss:$16 sps:$4 sm:$0xff]  }
 0x19e   : > { %13958 = vmatprep.subr.bf16.mxu0 %v16157_v52 }
 0x19f   : > { %13752 = vmatpush1.bf16.msra.mxu1 %v16156_v44 }
 0x1a0   : > { %13754 = vmatprep.subr.bf16.mxu1 %v16160_v16  ;;  %v16193_v16 = vld [vmem:[%s22791_s4 + $0x26c] ss:$16 sps:$4 sm:$0xff]  }
 0x1a1   : > { %13960 = vmatpush1.bf16.msra.mxu0 %v16159_v9  ;;  %v16190_v9 = vld [vmem:[%s22791_s4 + $0x264] ss:$16 sps:$4 sm:$0xff]  }
 0x1a2   : > { %13962 = vmatprep.subr.bf16.mxu0 %v16163_v39 }
 0x1a3   : > { %13756 = vmatpush1.bf16.msra.mxu1 %v16162_v40  ;;  %v16192_v40 = vld [vmem:[%s22791_s4 + $0x260] ss:$16 sps:$4 sm:$0xff]  }
 0x1a4   : > { %13758 = vmatprep.subr.bf16.mxu1 %v16166_v42 }
 0x1a5   : > { %13964 = vmatpush1.bf16.msra.mxu0 %v16165_v41  ;;  %v16195_v41 = vld [vmem:[%s22791_s4 + $0x268] ss:$16 sps:$4 sm:$0xff]  }
 0x1a6   : > { %13966 = vmatprep.subr.bf16.mxu0 %v16169_v43 }
 0x1a7   : > { %13760 = vmatpush1.bf16.msra.mxu1 %v16168_v45 }
 0x1a8   : > { %13762 = vmatprep.subr.bf16.mxu1 %v16172_v49  ;;  %v16199_v49 = vld [vmem:[%s22791_s4 + $0x28c] ss:$16 sps:$4 sm:$0xff]  }
 0x1a9   : > { %13968 = vmatpush1.bf16.msra.mxu0 %v16171_v46  ;;  %v16196_v46 = vld [vmem:[%s22791_s4 + $0x284] ss:$16 sps:$4 sm:$0xff]  }
 0x1aa   : > { %13970 = vmatprep.subr.bf16.mxu0 %v16175_v50 }
 0x215   : > { %v1635_v51 = vpop.f32.mrb[20].mxu1 }
 0x216   : > { %v1637_v55 = vpop.f32.mrb[21].mxu1 }
 0x219   : > { %v1641_v56 = vpop.f32.mrb[22].mxu1 }
 0x21a   : > { %v1643_v57 = vpop.f32.mrb[23].mxu1 }
 0x223   : > { %v1712_v58 = vpop.f32.mrb[24].mxu1 }
 0x224   : > { %v1714_v59 = vpop.f32.mrb[25].mxu1 }
 0x227   : > { %v1718_v60 = vpop.f32.mrb[26].mxu1 }
 0x228   : > { %v1720_v63 = vpop.f32.mrb[27].mxu1 }
 0x22b   : > { %v1789_v3 = vpop.f32.mrb[28].mxu1 }
 0x22c   : > { %v1791_v4 = vpop.f32.mrb[29].mxu1 }
 0x22f   : > { %v1795_v5 = vpop.f32.mrb[30].mxu1  ;;  %v13585_v6 = vpop.f32.mrb[16].mxu0 }
 0x230   : > { %v1797_v11 = vpop.f32.mrb[31].mxu1  ;;  %v18701_v7 = vpop.f32.mrb[17].mxu0 }
 0x233   : > { %v1950_v8 = vpop.f32.mrb[32].mxu1 }
 0x234   : > { %v18709_v14 = vmax.f32 %v1635_v51, %v1950_v8  ;;  %v1952_v15 = vpop.f32.mrb[33].mxu1  ;;  %v16217_v8 = vld [vmem:[%s22791_s4 + $0x2ec] ss:$16 sps:$4 sm:$0xff]  }
 0x235   : > { %v18717_v62 = vmax.f32 %v1637_v55, %v1952_v15  ;;  %v16220_v15 = vld [vmem:[%s22791_s4 + $0x304] ss:$16 sps:$4 sm:$0xff]  }
 0x237   : > { %v1956_v18 = vpop.f32.mrb[34].mxu1  ;;  %v2027_v19 = vpop.f32.mrb[18].mxu0  ;;  %2899 = vmatprep.mubr.f32.mxu1 %v18717_v62  ;;  %3207 = vmatprep.mubr.f32.mxu0 %v18717_v62 }
 0x238   : > { %v18721_v20 = vmax.f32 %v1641_v56, %v1956_v18  ;;  %v18723_v25 = vmax.f32 %v1712_v58, %v2027_v19  ;;  %v1958_v26 = vpop.f32.mrb[35].mxu1  ;;  %v2029_v27 = vpop.f32.mrb[19].mxu0  ;;  %2900 = vmatmul.mubr.f32.vlgmr.msra.gmra.mrb[40].mxu1 %v18709_v14  ;;  %3208 = vmatmul.mubr.f32.vlgmr.msra.gmra.mrb[24].mxu0 %v18709_v14  ;;  %v16201_v58 = vld [vmem:[%s22791_s4 + $0x288] ss:$16 sps:$4 sm:$0xff]   ;;  %v16226_v19 = vld [vmem:[%s22791_s4 + $0x324] ss:$16 sps:$4 sm:$0xff]  }
 0x239   : > { %v18733_v28 = vmax.f32 %v1643_v57, %v1958_v26  ;;  %v18735_v29 = vmax.f32 %v1714_v59, %v2029_v27  ;;  %13764 = vmatpush1.bf16.msra.mxu1 %v16174_v12  ;;  %13972 = vmatpush1.bf16.msra.mxu0 %v16177_v13  ;;  %v16198_v57 = vld [vmem:[%s22791_s4 + $0x280] ss:$16 sps:$4 sm:$0xff]   ;;  %v16202_v59 = vld [vmem:[%s22791_s4 + $0x2a4] ss:$16 sps:$4 sm:$0xff]   ;;  %v16219_v13 = vld [vmem:[%s22791_s4 + $0x2e8] ss:$16 sps:$4 sm:$0xff]  }
 0x23a   : > { %13766 = vmatprep.subr.bf16.mxu1 %v16178_v17  ;;  %13974 = vmatprep.subr.bf16.mxu0 %v16181_v61  ;;  %v16216_v12 = vld [vmem:[%s22791_s4 + $0x2e0] ss:$16 sps:$4 sm:$0xff]   ;;  %v16223_v17 = vld [vmem:[%s22791_s4 + $0x30c] ss:$16 sps:$4 sm:$0xff]   ;;  %v16225_v18 = vld [vmem:[%s22791_s4 + $0x308] ss:$16 sps:$4 sm:$0xff]  }
 0x23b   : > { %v2033_v22 = vpop.f32.mrb[20].mxu0  ;;  %v2104_v32 = vpop.f32.mrb[36].mxu1  ;;  %2905 = vmatprep.mubr.f32.mxu1 %v18733_v28  ;;  %3213 = vmatprep.mubr.f32.mxu0 %v18733_v28  ;;  %v16222_v61 = vld [vmem:[%s22791_s4 + $0x300] ss:$16 sps:$4 sm:$0xff]   ;;  %v16229_v26 = vld [vmem:[%s22791_s4 + $0x32c] ss:$16 sps:$4 sm:$0xff]  }
 0x23c   : > { %v18745_v33 = vmax.f32 %v1718_v60, %v2033_v22  ;;  %v18747_v34 = vmax.f32 %v1789_v3, %v2104_v32  ;;  %v2035_v35 = vpop.f32.mrb[21].mxu0  ;;  %v2106_v36 = vpop.f32.mrb[37].mxu1  ;;  %2906 = vmatmul.mubr.f32.gmra.mrb[42].mxu1 %v18721_v20  ;;  %3214 = vmatmul.mubr.f32.gmra.mrb[26].mxu0 %v18721_v20  ;;  %v16205_v60 = vld [vmem:[%s22791_s4 + $0x2ac] ss:$16 sps:$4 sm:$0xff]   ;;  %v16207_v3 = vld [vmem:[%s22791_s4 + $0x2a8] ss:$16 sps:$4 sm:$0xff]  }
 0x23d   : > { %v18757_v52 = vmax.f32 %v1720_v63, %v2035_v35  ;;  %v18759_v44 = vmax.f32 %v1791_v4, %v2106_v36  ;;  %13768 = vmatpush1.bf16.msra.mxu1 %v16180_v0  ;;  %13976 = vmatpush1.bf16.msra.mxu0 %v16183_v1  ;;  %v16204_v63 = vld [vmem:[%s22791_s4 + $0x2a0] ss:$16 sps:$4 sm:$0xff]   ;;  %v16208_v4 = vld [vmem:[%s22791_s4 + $0x2c4] ss:$16 sps:$4 sm:$0xff]   ;;  %v16231_v0 = vld [vmem:[%s22791_s4 + $0x328] ss:$16 sps:$4 sm:$0xff]  }
 0x23e   : > { %2976 = vmatprep.mubr.f32.mxu1 %v18735_v29  ;;  %3284 = vmatprep.mubr.f32.mxu0 %v18735_v29  ;;  %v16228_v27 = vld [vmem:[%s22791_s4 + $0x320] ss:$16 sps:$4 sm:$0xff]   ;;  %v16232_v1 = vld [vmem:[%s22791_s4 + $0x344] ss:$16 sps:$4 sm:$0xff]   ;;  %v16237_v22 = vld [vmem:[%s22791_s4 + $0x348] ss:$16 sps:$4 sm:$0xff]  }
 0x23f   : > { %v2110_v39 = vpop.f32.mrb[38].mxu1  ;;  %13770 = vmatprep.subr.bf16.mxu1 %v16184_v30  ;;  %13978 = vmatprep.subr.bf16.mxu0 %v16187_v31  ;;  %v13596_v42 = vpop.f32.mrb[22].mxu0  ;;  %v16235_v30 = vld [vmem:[%s22791_s4 + $0x34c] ss:$16 sps:$4 sm:$0xff]   ;;  %v16234_v31 = vld [vmem:[%s22791_s4 + $0x340] ss:$16 sps:$4 sm:$0xff]  }
 0x240   : > { %v18775_v43 = vmax.f32 %v1795_v5, %v2110_v39  ;;  %v2112_v45 = vpop.f32.mrb[39].mxu1  ;;  %v18783_v50 = vmax.f32 %v13585_v6, %v13596_v42  ;;  %v2181_v51 = vpop.f32.mrb[23].mxu0  ;;  %v16211_v5 = vld [vmem:[%s22791_s4 + $0x2cc] ss:$16 sps:$4 sm:$0xff]   ;;  %v16210_v6 = vld [vmem:[%s22791_s4 + $0x2c0] ss:$16 sps:$4 sm:$0xff]  }
 0x241   : > { %v18785_v55 = vmax.f32 %v1797_v11, %v2112_v45  ;;  %13772 = vmatpush1.bf16.msra.mxu1 %v16186_v37  ;;  %13980 = vmatpush1.bf16.msra.mxu0 %v16189_v38  ;;  %v18788_v56 = vmax.f32 %v18701_v7, %v2181_v51  ;;  %v16213_v11 = vld [vmem:[%s22791_s4 + $0x2c8] ss:$16 sps:$4 sm:$0xff]   ;;  %v16214_v7 = vld [vmem:[%s22791_s4 + $0x2e4] ss:$16 sps:$4 sm:$0xff]   ;;  %v16241_v35 = vld [vmem:[%s22791_s4 + $0x36c] ss:$16 sps:$4 sm:$0xff]  }
 0x242   : > { %13774 = vmatprep.subr.bf16.mxu1 %v16190_v9  ;;  %13982 = vmatprep.subr.bf16.mxu0 %v16193_v16  ;;  %v16238_v32 = vld [vmem:[%s22791_s4 + $0x364] ss:$16 sps:$4 sm:$0xff]   ;;  %v16240_v36 = vld [vmem:[%s22791_s4 + $0x360] ss:$16 sps:$4 sm:$0xff]   ;;  %v16243_v37 = vld [vmem:[%s22791_s4 + $0x368] ss:$16 sps:$4 sm:$0xff]  }
 0x243   : > { %v16244_v38 = vld [vmem:[%s22791_s4 + $0x384] ss:$16 sps:$4 sm:$0xff]   ;;  %v16247_v9 = vld [vmem:[%s22791_s4 + $0x38c] ss:$16 sps:$4 sm:$0xff]   ;;  %v16246_v16 = vld [vmem:[%s22791_s4 + $0x380] ss:$16 sps:$4 sm:$0xff]  }
 0x244   : > { %v16249_v39 = vld [vmem:[%s22791_s4 + $0x388] ss:$16 sps:$4 sm:$0xff]   ;;  %v16252_v42 = vld [vmem:[%s22791_s4 + $0x3a0] ss:$16 sps:$4 sm:$0xff]  }
 0x245   : > { %13776 = vmatpush1.bf16.msra.mxu1 %v16192_v40  ;;  %13984 = vmatpush1.bf16.msra.mxu0 %v16195_v41  ;;  %v16250_v40 = vld [vmem:[%s22791_s4 + $0x3a4] ss:$16 sps:$4 sm:$0xff]   ;;  %v16253_v41 = vld [vmem:[%s22791_s4 + $0x3ac] ss:$16 sps:$4 sm:$0xff]   ;;  %v16255_v45 = vld [vmem:[%s22791_s4 + $0x3a8] ss:$16 sps:$4 sm:$0xff]  }
 0x246   : > { %13778 = vmatprep.subr.bf16.mxu1 %v16196_v46  ;;  %13986 = vmatprep.subr.bf16.mxu0 %v16199_v49  ;;  %v16256_v46 = vld [vmem:[%s22791_s4 + $0x3c4] ss:$16 sps:$4 sm:$0xff]   ;;  %v16259_v49 = vld [vmem:[%s22791_s4 + $0x3cc] ss:$16 sps:$4 sm:$0xff]   ;;  %v16258_v51 = vld [vmem:[%s22791_s4 + $0x3c0] ss:$16 sps:$4 sm:$0xff]  }
 0x249   : > { %13780 = vmatpush1.bf16.msra.mxu1 %v16198_v57  ;;  %13988 = vmatpush1.bf16.msra.mxu0 %v16201_v58  ;;  %v16261_v57 = vld [vmem:[%s22791_s4 + $0x3c8] ss:$16 sps:$4 sm:$0xff]   ;;  %v16262_v58 = vld [vmem:[%s22791_s4 + $0x3e4] ss:$16 sps:$4 sm:$0xff]  }
 0x24a   : > { %13782 = vmatprep.subr.bf16.mxu1 %v16202_v59  ;;  %13990 = vmatprep.subr.bf16.mxu0 %v16205_v60  ;;  %v16265_v59 = vld [vmem:[%s22791_s4 + $0x3ec] ss:$16 sps:$4 sm:$0xff]   ;;  %v16264_v60 = vld [vmem:[%s22791_s4 + $0x3e0] ss:$16 sps:$4 sm:$0xff]  }
 0x24d   : > { %13784 = vmatpush1.bf16.msra.mxu1 %v16204_v63  ;;  %13992 = vmatpush1.bf16.msra.mxu0 %v16207_v3  ;;  %v16267_v63 = vld [vmem:[%s22791_s4 + $0x3e8] ss:$16 sps:$4 sm:$0xff]   ;;  %v16268_v3 = vld [vmem:[%s22791_s4 + $0x404] ss:$16 sps:$4 sm:$0xff]  }
 0x24e   : > { %13786 = vmatprep.subr.bf16.mxu1 %v16208_v4  ;;  %13994 = vmatprep.subr.bf16.mxu0 %v16211_v5  ;;  %v16271_v4 = vld [vmem:[%s22791_s4 + $0x40c] ss:$16 sps:$4 sm:$0xff]   ;;  %v16270_v5 = vld [vmem:[%s22791_s4 + $0x400] ss:$16 sps:$4 sm:$0xff]  }
 0x251   : > { %13788 = vmatpush1.bf16.msra.mxu1 %v16210_v6  ;;  %13996 = vmatpush1.bf16.msra.mxu0 %v16213_v11  ;;  %v16273_v6 = vld [vmem:[%s22791_s4 + $0x408] ss:$16 sps:$4 sm:$0xff]   ;;  %v16274_v11 = vld [vmem:[%s22791_s4 + $0x424] ss:$16 sps:$4 sm:$0xff]  }
 0x252   : > { %13790 = vmatprep.subr.bf16.mxu1 %v16214_v7  ;;  %13998 = vmatprep.subr.bf16.mxu0 %v16217_v8  ;;  %v16277_v7 = vld [vmem:[%s22791_s4 + $0x42c] ss:$16 sps:$4 sm:$0xff]   ;;  %v16276_v8 = vld [vmem:[%s22791_s4 + $0x420] ss:$16 sps:$4 sm:$0xff]  }
 0x255   : > { %13792 = vmatpush1.bf16.msra.mxu1 %v16216_v12  ;;  %14000 = vmatpush1.bf16.msra.mxu0 %v16219_v13  ;;  %v16279_v12 = vld [vmem:[%s22791_s4 + $0x428] ss:$16 sps:$4 sm:$0xff]   ;;  %v16280_v13 = vld [vmem:[%s22791_s4 + $0x444] ss:$16 sps:$4 sm:$0xff]  }
 0x256   : > { %13794 = vmatprep.subr.bf16.mxu1 %v16220_v15  ;;  %14002 = vmatprep.subr.bf16.mxu0 %v16223_v17  ;;  %v16283_v15 = vld [vmem:[%s22791_s4 + $0x44c] ss:$16 sps:$4 sm:$0xff]   ;;  %v16282_v17 = vld [vmem:[%s22791_s4 + $0x440] ss:$16 sps:$4 sm:$0xff]  }
 0x259   : > { %13796 = vmatpush1.bf16.msra.mxu1 %v16222_v61  ;;  %14004 = vmatpush1.bf16.msra.mxu0 %v16225_v18  ;;  %v16285_v61 = vld [vmem:[%s22791_s4 + $0x448] ss:$16 sps:$4 sm:$0xff]   ;;  %v16286_v18 = vld [vmem:[%s22791_s4 + $0x464] ss:$16 sps:$4 sm:$0xff]  }
 0x25a   : > { %13798 = vmatprep.subr.bf16.mxu1 %v16226_v19  ;;  %14006 = vmatprep.subr.bf16.mxu0 %v16229_v26  ;;  %v16289_v19 = vld [vmem:[%s22791_s4 + $0x46c] ss:$16 sps:$4 sm:$0xff]   ;;  %v16288_v26 = vld [vmem:[%s22791_s4 + $0x460] ss:$16 sps:$4 sm:$0xff]  }
 0x25d   : > { %13800 = vmatpush1.bf16.msra.mxu1 %v16228_v27  ;;  %14008 = vmatpush1.bf16.msra.mxu0 %v16231_v0  ;;  %v16291_v27 = vld [vmem:[%s22791_s4 + $0x468] ss:$16 sps:$4 sm:$0xff]   ;;  %v16292_v0 = vld [vmem:[%s22791_s4 + $0x484] ss:$16 sps:$4 sm:$0xff]  }
 0x25e   : > { %13802 = vmatprep.subr.bf16.mxu1 %v16232_v1  ;;  %14010 = vmatprep.subr.bf16.mxu0 %v16235_v30  ;;  %v16295_v1 = vld [vmem:[%s22791_s4 + $0x48c] ss:$16 sps:$4 sm:$0xff]   ;;  %v16294_v30 = vld [vmem:[%s22791_s4 + $0x480] ss:$16 sps:$4 sm:$0xff]  }
 0x261   : > { %13804 = vmatpush1.bf16.msra.mxu1 %v16234_v31  ;;  %14012 = vmatpush1.bf16.msra.mxu0 %v16237_v22  ;;  %v16297_v31 = vld [vmem:[%s22791_s4 + $0x488] ss:$16 sps:$4 sm:$0xff]   ;;  %v16298_v22 = vld [vmem:[%s22791_s4 + $0x4a4] ss:$16 sps:$4 sm:$0xff]  }
 0x262   : > { %13806 = vmatprep.subr.bf16.mxu1 %v16238_v32  ;;  %14014 = vmatprep.subr.bf16.mxu0 %v16241_v35  ;;  %v16301_v32 = vld [vmem:[%s22791_s4 + $0x4ac] ss:$16 sps:$4 sm:$0xff]   ;;  %v16300_v35 = vld [vmem:[%s22791_s4 + $0x4a0] ss:$16 sps:$4 sm:$0xff]  }
 0x265   : > { %13808 = vmatpush1.bf16.msra.mxu1 %v16240_v36  ;;  %14016 = vmatpush1.bf16.msra.mxu0 %v16243_v37  ;;  %v16303_v36 = vld [vmem:[%s22791_s4 + $0x4a8] ss:$16 sps:$4 sm:$0xff]   ;;  %v16304_v37 = vld [vmem:[%s22791_s4 + $0x4c4] ss:$16 sps:$4 sm:$0xff]  }
 0x266   : > { %13810 = vmatprep.subr.bf16.mxu1 %v16244_v38  ;;  %14018 = vmatprep.subr.bf16.mxu0 %v16247_v9  ;;  %v16307_v38 = vld [vmem:[%s22791_s4 + $0x4cc] ss:$16 sps:$4 sm:$0xff]   ;;  %v16306_v9 = vld [vmem:[%s22791_s4 + $0x4c0] ss:$16 sps:$4 sm:$0xff]  }
 0x269   : > { %13812 = vmatpush1.bf16.msra.mxu1 %v16246_v16  ;;  %14020 = vmatpush1.bf16.msra.mxu0 %v16249_v39  ;;  %v16309_v16 = vld [vmem:[%s22791_s4 + $0x4c8] ss:$16 sps:$4 sm:$0xff]   ;;  %v16310_v39 = vld [vmem:[%s22791_s4 + $0x4e4] ss:$16 sps:$4 sm:$0xff]  }
 0x26a   : > { %13814 = vmatprep.subr.bf16.mxu1 %v16250_v40  ;;  %14022 = vmatprep.subr.bf16.mxu0 %v16253_v41  ;;  %v16313_v40 = vld [vmem:[%s22791_s4 + $0x4ec] ss:$16 sps:$4 sm:$0xff]   ;;  %v16312_v41 = vld [vmem:[%s22791_s4 + $0x4e0] ss:$16 sps:$4 sm:$0xff]  }
 0x26d   : > { %13816 = vmatpush1.bf16.msra.mxu1 %v16252_v42  ;;  %14024 = vmatpush1.bf16.msra.mxu0 %v16255_v45  ;;  %v16315_v42 = vld [vmem:[%s22791_s4 + $0x4e8] ss:$16 sps:$4 sm:$0xff]   ;;  %v16316_v45 = vld [vmem:[%s22791_s4 + $0x504] ss:$16 sps:$4 sm:$0xff]  }
 0x26e   : > { %13818 = vmatprep.subr.bf16.mxu1 %v16256_v46  ;;  %14026 = vmatprep.subr.bf16.mxu0 %v16259_v49  ;;  %v16319_v46 = vld [vmem:[%s22791_s4 + $0x50c] ss:$16 sps:$4 sm:$0xff]   ;;  %v16318_v49 = vld [vmem:[%s22791_s4 + $0x500] ss:$16 sps:$4 sm:$0xff]  }
 0x271   : > { %13820 = vmatpush1.bf16.msra.mxu1 %v16258_v51  ;;  %14028 = vmatpush1.bf16.msra.mxu0 %v16261_v57  ;;  %v16321_v51 = vld [vmem:[%s22791_s4 + $0x508] ss:$16 sps:$4 sm:$0xff]   ;;  %v16322_v57 = vld [vmem:[%s22791_s4 + $0x524] ss:$16 sps:$4 sm:$0xff]  }
 0x272   : > { %13822 = vmatprep.subr.bf16.mxu1 %v16262_v58  ;;  %14030 = vmatprep.subr.bf16.mxu0 %v16265_v59  ;;  %v16325_v58 = vld [vmem:[%s22791_s4 + $0x52c] ss:$16 sps:$4 sm:$0xff]   ;;  %v16324_v59 = vld [vmem:[%s22791_s4 + $0x520] ss:$16 sps:$4 sm:$0xff]  }
 0x275   : > { %13824 = vmatpush1.bf16.msra.mxu1 %v16264_v60  ;;  %14032 = vmatpush1.bf16.msra.mxu0 %v16267_v63  ;;  %v16327_v60 = vld [vmem:[%s22791_s4 + $0x528] ss:$16 sps:$4 sm:$0xff]   ;;  %v16328_v63 = vld [vmem:[%s22791_s4 + $0x544] ss:$16 sps:$4 sm:$0xff]  }
 0x276   : > { %13826 = vmatprep.subr.bf16.mxu1 %v16268_v3  ;;  %14034 = vmatprep.subr.bf16.mxu0 %v16271_v4  ;;  %v16331_v3 = vld [vmem:[%s22791_s4 + $0x54c] ss:$16 sps:$4 sm:$0xff]   ;;  %v16330_v4 = vld [vmem:[%s22791_s4 + $0x540] ss:$16 sps:$4 sm:$0xff]  }
 0x278   : > { %2977 = vmatmul.mubr.f32.vlgmr.msra.gmra.mrb[40].mxu1 %v18723_v25  ;;  %3285 = vmatmul.mubr.f32.vlgmr.msra.gmra.mrb[24].mxu0 %v18723_v25 }
 0x279   : > { %2982 = vmatprep.mubr.f32.mxu1 %v18757_v52  ;;  %13828 = vmatpush1.bf16.msra.mxu1 %v16270_v5  ;;  %v16333_v5 = vld [vmem:[%s22791_s4 + $0x548] ss:$16 sps:$4 sm:$0xff]  }
 0x27a   : > { %3290 = vmatprep.mubr.f32.mxu0 %v18757_v52  ;;  %14036 = vmatpush1.bf16.msra.mxu0 %v16273_v6  ;;  %v16334_v6 = vld [vmem:[%s22791_s4 + $0x564] ss:$16 sps:$4 sm:$0xff]  }
 0x27b   : > { %13830 = vmatprep.subr.bf16.mxu1 %v16274_v11  ;;  %14038 = vmatprep.subr.bf16.mxu0 %v16277_v7  ;;  %v16337_v11 = vld [vmem:[%s22791_s4 + $0x56c] ss:$16 sps:$4 sm:$0xff]   ;;  %v16336_v7 = vld [vmem:[%s22791_s4 + $0x560] ss:$16 sps:$4 sm:$0xff]  }
 0x27c   : > { %2983 = vmatmul.mubr.f32.gmra.mrb[42].mxu1 %v18745_v33  ;;  %3291 = vmatmul.mubr.f32.gmra.mrb[26].mxu0 %v18745_v33 }
 0x27d   : > { %13832 = vmatpush1.bf16.msra.mxu1 %v16276_v8  ;;  %3053 = vmatprep.mubr.f32.mxu1 %v18759_v44  ;;  %v16339_v8 = vld [vmem:[%s22791_s4 + $0x568] ss:$16 sps:$4 sm:$0xff]  }
 0x27e   : > { %14040 = vmatpush1.bf16.msra.mxu0 %v16279_v12  ;;  %3361 = vmatprep.mubr.f32.mxu0 %v18759_v44  ;;  %v16340_v12 = vld [vmem:[%s22791_s4 + $0x584] ss:$16 sps:$4 sm:$0xff]  }
 0x27f   : > { %13834 = vmatprep.subr.bf16.mxu1 %v16280_v13  ;;  %14042 = vmatprep.subr.bf16.mxu0 %v16283_v15  ;;  %v16343_v13 = vld [vmem:[%s22791_s4 + $0x58c] ss:$16 sps:$4 sm:$0xff]   ;;  %v16342_v15 = vld [vmem:[%s22791_s4 + $0x580] ss:$16 sps:$4 sm:$0xff]  }
 0x281   : > { %13836 = vmatpush1.bf16.msra.mxu1 %v16282_v17  ;;  %v16345_v17 = vld [vmem:[%s22791_s4 + $0x588] ss:$16 sps:$4 sm:$0xff]  }
 0x282   : > { %14044 = vmatpush1.bf16.msra.mxu0 %v16285_v61  ;;  %13838 = vmatprep.subr.bf16.mxu1 %v16286_v18  ;;  %v16346_v61 = vld [vmem:[%s22791_s4 + $0x5a4] ss:$16 sps:$4 sm:$0xff]   ;;  %v16349_v18 = vld [vmem:[%s22791_s4 + $0x5ac] ss:$16 sps:$4 sm:$0xff]  }
 0x283   : > { %14046 = vmatprep.subr.bf16.mxu0 %v16289_v19  ;;  %v16348_v19 = vld [vmem:[%s22791_s4 + $0x5a0] ss:$16 sps:$4 sm:$0xff]  }
 0x285   : > { %13840 = vmatpush1.bf16.msra.mxu1 %v16288_v26  ;;  %v16351_v26 = vld [vmem:[%s22791_s4 + $0x5a8] ss:$16 sps:$4 sm:$0xff]  }
 0x286   : > { %14048 = vmatpush1.bf16.msra.mxu0 %v16291_v27  ;;  %13842 = vmatprep.subr.bf16.mxu1 %v16292_v0  ;;  %v16352_v27 = vld [vmem:[%s22791_s4 + $0x5c4] ss:$16 sps:$4 sm:$0xff]   ;;  %v16355_v0 = vld [vmem:[%s22791_s4 + $0x5cc] ss:$16 sps:$4 sm:$0xff]  }
 0x287   : > { %14050 = vmatprep.subr.bf16.mxu0 %v16295_v1  ;;  %v16354_v1 = vld [vmem:[%s22791_s4 + $0x5c0] ss:$16 sps:$4 sm:$0xff]  }
 0x289   : > { %13844 = vmatpush1.bf16.msra.mxu1 %v16294_v30  ;;  %v16357_v30 = vld [vmem:[%s22791_s4 + $0x5c8] ss:$16 sps:$4 sm:$0xff]  }
 0x28a   : > { %14052 = vmatpush1.bf16.msra.mxu0 %v16297_v31  ;;  %13846 = vmatprep.subr.bf16.mxu1 %v16298_v22  ;;  %v16358_v31 = vld [vmem:[%s22791_s4 + $0x5e4] ss:$16 sps:$4 sm:$0xff]   ;;  %v16361_v22 = vld [vmem:[%s22791_s4 + $0x5ec] ss:$16 sps:$4 sm:$0xff]  }
 0x28b   : > { %14054 = vmatprep.subr.bf16.mxu0 %v16301_v32  ;;  %v16360_v32 = vld [vmem:[%s22791_s4 + $0x5e0] ss:$16 sps:$4 sm:$0xff]  }
 0x28d   : > { %13848 = vmatpush1.bf16.msra.mxu1 %v16300_v35  ;;  %v16363_v35 = vld [vmem:[%s22791_s4 + $0x5e8] ss:$16 sps:$4 sm:$0xff]  }
 0x28e   : > { %14056 = vmatpush1.bf16.msra.mxu0 %v16303_v36  ;;  %13850 = vmatprep.subr.bf16.mxu1 %v16304_v37  ;;  %v16364_v36 = vld [vmem:[%s22791_s4 + $0x604] ss:$16 sps:$4 sm:$0xff]   ;;  %v16367_v37 = vld [vmem:[%s22791_s4 + $0x60c] ss:$16 sps:$4 sm:$0xff]  }
 0x28f   : > { %14058 = vmatprep.subr.bf16.mxu0 %v16307_v38  ;;  %v16366_v38 = vld [vmem:[%s22791_s4 + $0x600] ss:$16 sps:$4 sm:$0xff]  }
 0x291   : > { %13852 = vmatpush1.bf16.msra.mxu1 %v16306_v9  ;;  %v16369_v9 = vld [vmem:[%s22791_s4 + $0x608] ss:$16 sps:$4 sm:$0xff]  }
 0x292   : > { %14060 = vmatpush1.bf16.msra.mxu0 %v16309_v16  ;;  %13854 = vmatprep.subr.bf16.mxu1 %v16310_v39  ;;  %v16370_v16 = vld [vmem:[%s22791_s4 + $0x624] ss:$16 sps:$4 sm:$0xff]   ;;  %v16373_v39 = vld [vmem:[%s22791_s4 + $0x62c] ss:$16 sps:$4 sm:$0xff]  }
 0x293   : > { %14062 = vmatprep.subr.bf16.mxu0 %v16313_v40  ;;  %v16372_v40 = vld [vmem:[%s22791_s4 + $0x620] ss:$16 sps:$4 sm:$0xff]  }
 0x295   : > { %13856 = vmatpush1.bf16.msra.mxu1 %v16312_v41  ;;  %v16375_v41 = vld [vmem:[%s22791_s4 + $0x628] ss:$16 sps:$4 sm:$0xff]  }
 0x296   : > { %14064 = vmatpush1.bf16.msra.mxu0 %v16315_v42  ;;  %13858 = vmatprep.subr.bf16.mxu1 %v16316_v45  ;;  %v16376_v42 = vld [vmem:[%s22791_s4 + $0x644] ss:$16 sps:$4 sm:$0xff]   ;;  %v16379_v45 = vld [vmem:[%s22791_s4 + $0x64c] ss:$16 sps:$4 sm:$0xff]  }
 0x297   : > { %14066 = vmatprep.subr.bf16.mxu0 %v16319_v46  ;;  %v16378_v46 = vld [vmem:[%s22791_s4 + $0x640] ss:$16 sps:$4 sm:$0xff]  }
 0x299   : > { %13860 = vmatpush1.bf16.msra.mxu1 %v16318_v49  ;;  %v16381_v49 = vld [vmem:[%s22791_s4 + $0x648] ss:$16 sps:$4 sm:$0xff]  }
 0x29a   : > { %14068 = vmatpush1.bf16.msra.mxu0 %v16321_v51  ;;  %13862 = vmatprep.subr.bf16.mxu1 %v16322_v57  ;;  %v16382_v51 = vld [vmem:[%s22791_s4 + $0x664] ss:$16 sps:$4 sm:$0xff]   ;;  %v16385_v57 = vld [vmem:[%s22791_s4 + $0x66c] ss:$16 sps:$4 sm:$0xff]  }
 0x29b   : > { %14070 = vmatprep.subr.bf16.mxu0 %v16325_v58  ;;  %v16384_v58 = vld [vmem:[%s22791_s4 + $0x660] ss:$16 sps:$4 sm:$0xff]  }
 0x29d   : > { %13864 = vmatpush1.bf16.msra.mxu1 %v16324_v59  ;;  %v16387_v59 = vld [vmem:[%s22791_s4 + $0x668] ss:$16 sps:$4 sm:$0xff]  }
 0x29e   : > { %14072 = vmatpush1.bf16.msra.mxu0 %v16327_v60  ;;  %13866 = vmatprep.subr.bf16.mxu1 %v16328_v63  ;;  %v16388_v60 = vld [vmem:[%s22791_s4 + $0x684] ss:$16 sps:$4 sm:$0xff]   ;;  %v16391_v63 = vld [vmem:[%s22791_s4 + $0x68c] ss:$16 sps:$4 sm:$0xff]  }
 0x29f   : > { %14074 = vmatprep.subr.bf16.mxu0 %v16331_v3  ;;  %v16390_v3 = vld [vmem:[%s22791_s4 + $0x680] ss:$16 sps:$4 sm:$0xff]  }
 0x2a1   : > { %13868 = vmatpush1.bf16.msra.mxu1 %v16330_v4  ;;  %v16393_v4 = vld [vmem:[%s22791_s4 + $0x688] ss:$16 sps:$4 sm:$0xff]  }
 0x2a2   : > { %14076 = vmatpush1.bf16.msra.mxu0 %v16333_v5  ;;  %13870 = vmatprep.subr.bf16.mxu1 %v16334_v6  ;;  %v16394_v5 = vld [vmem:[%s22791_s4 + $0x6a4] ss:$16 sps:$4 sm:$0xff]   ;;  %v16397_v6 = vld [vmem:[%s22791_s4 + $0x6ac] ss:$16 sps:$4 sm:$0xff]  }
 0x2a3   : > { %14078 = vmatprep.subr.bf16.mxu0 %v16337_v11  ;;  %v16396_v11 = vld [vmem:[%s22791_s4 + $0x6a0] ss:$16 sps:$4 sm:$0xff]  }
 0x2a5   : > { %13872 = vmatpush1.bf16.msra.mxu1 %v16336_v7  ;;  %v16399_v7 = vld [vmem:[%s22791_s4 + $0x6a8] ss:$16 sps:$4 sm:$0xff]  }
 0x2a6   : > { %14080 = vmatpush1.bf16.msra.mxu0 %v16339_v8  ;;  %13874 = vmatprep.subr.bf16.mxu1 %v16340_v12  ;;  %v16400_v8 = vld [vmem:[%s22791_s4 + $0x6c4] ss:$16 sps:$4 sm:$0xff]   ;;  %v16403_v12 = vld [vmem:[%s22791_s4 + $0x6cc] ss:$16 sps:$4 sm:$0xff]  }
 0x2a7   : > { %14082 = vmatprep.subr.bf16.mxu0 %v16343_v13  ;;  %v16402_v13 = vld [vmem:[%s22791_s4 + $0x6c0] ss:$16 sps:$4 sm:$0xff]  }
 0x2a9   : > { %13876 = vmatpush1.bf16.msra.mxu1 %v16342_v15  ;;  %v16405_v15 = vld [vmem:[%s22791_s4 + $0x6c8] ss:$16 sps:$4 sm:$0xff]  }
 0x2aa   : > { %14084 = vmatpush1.bf16.msra.mxu0 %v16345_v17  ;;  %13878 = vmatprep.subr.bf16.mxu1 %v16346_v61  ;;  %v16406_v17 = vld [vmem:[%s22791_s4 + $0x6e4] ss:$16 sps:$4 sm:$0xff]   ;;  %v16409_v61 = vld [vmem:[%s22791_s4 + $0x6ec] ss:$16 sps:$4 sm:$0xff]  }
 0x2ab   : > { %14086 = vmatprep.subr.bf16.mxu0 %v16349_v18  ;;  %v16408_v18 = vld [vmem:[%s22791_s4 + $0x6e0] ss:$16 sps:$4 sm:$0xff]  }
 0x2ad   : > { %13880 = vmatpush1.bf16.msra.mxu1 %v16348_v19  ;;  %v16411_v19 = vld [vmem:[%s22791_s4 + $0x6e8] ss:$16 sps:$4 sm:$0xff]  }
 0x2ae   : > { %14088 = vmatpush1.bf16.msra.mxu0 %v16351_v26  ;;  %13882 = vmatprep.subr.bf16.mxu1 %v16352_v27  ;;  %v16415_v26 = vld [vmem:[%s22791_s4 + $0x70c] ss:$16 sps:$4 sm:$0xff]   ;;  %v16414_v27 = vld [vmem:[%s22791_s4 + $0x700] ss:$16 sps:$4 sm:$0xff]  }
 0x2af   : > { %14090 = vmatprep.subr.bf16.mxu0 %v16355_v0  ;;  %v16417_v0 = vld [vmem:[%s22791_s4 + $0x708] ss:$16 sps:$4 sm:$0xff]  }
 0x2b1   : > { %13884 = vmatpush1.bf16.msra.mxu1 %v16354_v1  ;;  %v16418_v1 = vld [vmem:[%s22791_s4 + $0x724] ss:$16 sps:$4 sm:$0xff]  }
 0x2b2   : > { %14092 = vmatpush1.bf16.msra.mxu0 %v16357_v30  ;;  %13886 = vmatprep.subr.bf16.mxu1 %v16358_v31  ;;  %v16421_v30 = vld [vmem:[%s22791_s4 + $0x72c] ss:$16 sps:$4 sm:$0xff]   ;;  %v16420_v31 = vld [vmem:[%s22791_s4 + $0x720] ss:$16 sps:$4 sm:$0xff]  }
 0x2b3   : > { %14094 = vmatprep.subr.bf16.mxu0 %v16361_v22  ;;  %v16423_v22 = vld [vmem:[%s22791_s4 + $0x728] ss:$16 sps:$4 sm:$0xff]  }
 0x2b5   : > { %13888 = vmatpush1.bf16.msra.mxu1 %v16360_v32  ;;  %v16424_v32 = vld [vmem:[%s22791_s4 + $0x744] ss:$16 sps:$4 sm:$0xff]  }
 0x2b6   : > { %14096 = vmatpush1.bf16.msra.mxu0 %v16363_v35  ;;  %13890 = vmatprep.subr.bf16.mxu1 %v16364_v36  ;;  %v16427_v35 = vld [vmem:[%s22791_s4 + $0x74c] ss:$16 sps:$4 sm:$0xff]   ;;  %v16426_v36 = vld [vmem:[%s22791_s4 + $0x740] ss:$16 sps:$4 sm:$0xff]  }
 0x2b7   : > { %14098 = vmatprep.subr.bf16.mxu0 %v16367_v37  ;;  %v16429_v37 = vld [vmem:[%s22791_s4 + $0x748] ss:$16 sps:$4 sm:$0xff]  }
 0x2b8   : > { %3054 = vmatmul.mubr.f32.vlgmr.msra.gmra.mrb[40].mxu1 %v18747_v34 }
 0x2b9   : > { %3362 = vmatmul.mubr.f32.vlgmr.msra.gmra.mrb[24].mxu0 %v18747_v34  ;;  %3059 = vmatprep.mubr.f32.mxu1 %v18785_v55 }
 0x2ba   : > { %13892 = vmatpush1.bf16.msra.mxu1 %v16366_v38  ;;  %3367 = vmatprep.mubr.f32.mxu0 %v18785_v55  ;;  %v16430_v38 = vld [vmem:[%s22791_s4 + $0x764] ss:$16 sps:$4 sm:$0xff]  }
 0x2bb   : > { %14100 = vmatpush1.bf16.msra.mxu0 %v16369_v9  ;;  %13894 = vmatprep.subr.bf16.mxu1 %v16370_v16  ;;  %v16433_v9 = vld [vmem:[%s22791_s4 + $0x76c] ss:$16 sps:$4 sm:$0xff]   ;;  %v16432_v16 = vld [vmem:[%s22791_s4 + $0x760] ss:$16 sps:$4 sm:$0xff]  }
 0x2bc   : > { %3060 = vmatmul.mubr.f32.gmra.mrb[42].mxu1 %v18775_v43  ;;  %14102 = vmatprep.subr.bf16.mxu0 %v16373_v39  ;;  %v16435_v39 = vld [vmem:[%s22791_s4 + $0x768] ss:$16 sps:$4 sm:$0xff]  }
 0x2bd   : > { %3368 = vmatmul.mubr.f32.gmra.mrb[26].mxu0 %v18775_v43  ;;  %3130 = vmatprep.mubr.f32.mxu1 %v18008_v10 }
 0x2be   : > { %13896 = vmatpush1.bf16.msra.mxu1 %v16372_v40  ;;  %3438 = vmatprep.mubr.f32.mxu0 %v18008_v10  ;;  %v16436_v40 = vld [vmem:[%s22791_s4 + $0x784] ss:$16 sps:$4 sm:$0xff]  }
 0x2bf   : > { %14104 = vmatpush1.bf16.msra.mxu0 %v16375_v41  ;;  %13898 = vmatprep.subr.bf16.mxu1 %v16376_v42  ;;  %v16439_v41 = vld [vmem:[%s22791_s4 + $0x78c] ss:$16 sps:$4 sm:$0xff]   ;;  %v16438_v42 = vld [vmem:[%s22791_s4 + $0x780] ss:$16 sps:$4 sm:$0xff]  }
 0x2c0   : > { %14106 = vmatprep.subr.bf16.mxu0 %v16379_v45  ;;  %v16441_v45 = vld [vmem:[%s22791_s4 + $0x788] ss:$16 sps:$4 sm:$0xff]  }
 0x2c2   : > { %13900 = vmatpush1.bf16.msra.mxu1 %v16378_v46  ;;  %v16442_v46 = vld [vmem:[%s22791_s4 + $0x7a4] ss:$16 sps:$4 sm:$0xff]  }
 0x2c3   : > { %14108 = vmatpush1.bf16.msra.mxu0 %v16381_v49  ;;  %13902 = vmatprep.subr.bf16.mxu1 %v16382_v51  ;;  %v16445_v49 = vld [vmem:[%s22791_s4 + $0x7ac] ss:$16 sps:$4 sm:$0xff]   ;;  %v16444_v51 = vld [vmem:[%s22791_s4 + $0x7a0] ss:$16 sps:$4 sm:$0xff]  }
 0x2c4   : > { %14110 = vmatprep.subr.bf16.mxu0 %v16385_v57  ;;  %v16447_v57 = vld [vmem:[%s22791_s4 + $0x7a8] ss:$16 sps:$4 sm:$0xff]  }
 0x2c6   : > { %13904 = vmatpush1.bf16.msra.mxu1 %v16384_v58  ;;  %v16448_v58 = vld [vmem:[%s22791_s4 + $0x7c4] ss:$16 sps:$4 sm:$0xff]  }
 0x2c7   : > { %14112 = vmatpush1.bf16.msra.mxu0 %v16387_v59  ;;  %14114 = vmatprep.subr.bf16.mxu1 %v16388_v60  ;;  %v16451_v59 = vld [vmem:[%s22791_s4 + $0x7cc] ss:$16 sps:$4 sm:$0xff]   ;;  %v16450_v60 = vld [vmem:[%s22791_s4 + $0x7c0] ss:$16 sps:$4 sm:$0xff]  }
 0x2c8   : > { %14322 = vmatprep.subr.bf16.mxu0 %v16391_v63  ;;  %v16453_v63 = vld [vmem:[%s22791_s4 + $0x7c8] ss:$16 sps:$4 sm:$0xff]  }
 0x2c9   : > { %11959 = vmatmul.mubr.msk.f32.vlgmr.msra.gmra.mrb[40].mxu1 %vm2828_vm8, %v18788_v56 }
 0x2ca   : > { %11961 = vmatmul.mubr.msk.f32.vlgmr.msra.gmra.mrb[24].mxu0 %vm2828_vm8, %v18788_v56  ;;  %14116 = vmatpush1.bf16.msra.mxu1 %v16390_v3  ;;  %v16454_v3 = vld [vmem:[%s22791_s4 + $0x7e4] ss:$16 sps:$4 sm:$0xff]  }
 0x2cb   : > { %14324 = vmatpush1.bf16.msra.mxu0 %v16393_v4  ;;  %3136 = vmatprep.mubr.f32.mxu1 %v18008_v10  ;;  %v16457_v4 = vld [vmem:[%s22791_s4 + $0x7ec] ss:$16 sps:$4 sm:$0xff]  }
 0x2cc   : > { %3444 = vmatprep.mubr.f32.mxu0 %v18008_v10  ;;  %14118 = vmatprep.subr.bf16.mxu1 %v16394_v5  ;;  %v16456_v5 = vld [vmem:[%s22791_s4 + $0x7e0] ss:$16 sps:$4 sm:$0xff]  }
 0x2cd   : > { %11960 = vmatmul.mubr.msk.f32.gmra.mrb[42].mxu1 %vm2828_vm8, %v18783_v50  ;;  %14326 = vmatprep.subr.bf16.mxu0 %v16397_v6  ;;  %v16459_v6 = vld [vmem:[%s22791_s4 + $0x7e8] ss:$16 sps:$4 sm:$0xff]  }
 0x2ce   : > { %11962 = vmatmul.mubr.msk.f32.gmra.mrb[26].mxu0 %vm2828_vm8, %v18783_v50  ;;  %14120 = vmatpush1.bf16.msra.mxu1 %v16396_v11  ;;  %v16460_v11 = vld [vmem:[%s22791_s4 + $0x804] ss:$16 sps:$4 sm:$0xff]  }
 0x2cf   : > { %4140 = vmatprep.mubr.f32.mxu1 %v18717_v62  ;;  %14328 = vmatpush1.bf16.msra.mxu0 %v16399_v7  ;;  %v16463_v7 = vld [vmem:[%s22791_s4 + $0x80c] ss:$16 sps:$4 sm:$0xff]  }
 0x2d0   : > { %4448 = vmatprep.mubr.f32.mxu0 %v18717_v62  ;;  %14122 = vmatprep.subr.bf16.mxu1 %v16400_v8  ;;  %v16412_v62 = vld [vmem:[%s22791_s4 + $0x704] ss:$16 sps:$4 sm:$0xff]   ;;  %v16462_v8 = vld [vmem:[%s22791_s4 + $0x800] ss:$16 sps:$4 sm:$0xff]  }
 0x2d1   : > { %14330 = vmatprep.subr.bf16.mxu0 %v16403_v12  ;;  %v16465_v12 = vld [vmem:[%s22791_s4 + $0x808] ss:$16 sps:$4 sm:$0xff]  }
 0x2d2   : > { %14124 = vmatpush1.bf16.msra.mxu1 %v16402_v13  ;;  %v16466_v13 = vld [vmem:[%s22791_s4 + $0x824] ss:$16 sps:$4 sm:$0xff]  }
 0x2d3   : > { %14332 = vmatpush1.bf16.msra.mxu0 %v16405_v15  ;;  %14126 = vmatprep.subr.bf16.mxu1 %v16406_v17  ;;  %v16469_v15 = vld [vmem:[%s22791_s4 + $0x82c] ss:$16 sps:$4 sm:$0xff]   ;;  %v16468_v17 = vld [vmem:[%s22791_s4 + $0x820] ss:$16 sps:$4 sm:$0xff]  }
 0x2d4   : > { %14334 = vmatprep.subr.bf16.mxu0 %v16409_v61  ;;  %v16471_v61 = vld [vmem:[%s22791_s4 + $0x828] ss:$16 sps:$4 sm:$0xff]  }
 0x2d6   : > { %14128 = vmatpush1.bf16.msra.mxu1 %v16408_v18  ;;  %v16472_v18 = vld [vmem:[%s22791_s4 + $0x844] ss:$16 sps:$4 sm:$0xff]  }
 0x2d7   : > { %14336 = vmatpush1.bf16.msra.mxu0 %v16411_v19  ;;  %14130 = vmatprep.subr.bf16.mxu1 %v16412_v62  ;;  %v16475_v19 = vld [vmem:[%s22791_s4 + $0x84c] ss:$16 sps:$4 sm:$0xff]   ;;  %v16474_v62 = vld [vmem:[%s22791_s4 + $0x840] ss:$16 sps:$4 sm:$0xff]  }
 0x2d8   : > { %14338 = vmatprep.subr.bf16.mxu0 %v16415_v26  ;;  %v16477_v26 = vld [vmem:[%s22791_s4 + $0x848] ss:$16 sps:$4 sm:$0xff]  }
 0x2da   : > { %14132 = vmatpush1.bf16.msra.mxu1 %v16414_v27  ;;  %v16478_v27 = vld [vmem:[%s22791_s4 + $0x864] ss:$16 sps:$4 sm:$0xff]  }
 0x2db   : > { %14340 = vmatpush1.bf16.msra.mxu0 %v16417_v0  ;;  %14134 = vmatprep.subr.bf16.mxu1 %v16418_v1  ;;  %v16481_v0 = vld [vmem:[%s22791_s4 + $0x86c] ss:$16 sps:$4 sm:$0xff]   ;;  %v16480_v1 = vld [vmem:[%s22791_s4 + $0x860] ss:$16 sps:$4 sm:$0xff]  }
 0x2dc   : > { %14342 = vmatprep.subr.bf16.mxu0 %v16421_v30  ;;  %v16483_v30 = vld [vmem:[%s22791_s4 + $0x868] ss:$16 sps:$4 sm:$0xff]  }
 0x2de   : > { %14136 = vmatpush1.bf16.msra.mxu1 %v16420_v31  ;;  %v16484_v31 = vld [vmem:[%s22791_s4 + $0x884] ss:$16 sps:$4 sm:$0xff]  }
 0x2df   : > { %14344 = vmatpush1.bf16.msra.mxu0 %v16423_v22  ;;  %14138 = vmatprep.subr.bf16.mxu1 %v16424_v32  ;;  %v16487_v22 = vld [vmem:[%s22791_s4 + $0x88c] ss:$16 sps:$4 sm:$0xff]   ;;  %v16486_v32 = vld [vmem:[%s22791_s4 + $0x880] ss:$16 sps:$4 sm:$0xff]  }
 0x2e0   : > { %14346 = vmatprep.subr.bf16.mxu0 %v16427_v35  ;;  %v16489_v35 = vld [vmem:[%s22791_s4 + $0x888] ss:$16 sps:$4 sm:$0xff]  }
 0x2e2   : > { %14140 = vmatpush1.bf16.msra.mxu1 %v16426_v36  ;;  %v16490_v36 = vld [vmem:[%s22791_s4 + $0x8a4] ss:$16 sps:$4 sm:$0xff]  }
 0x2e3   : > { %14348 = vmatpush1.bf16.msra.mxu0 %v16429_v37  ;;  %14142 = vmatprep.subr.bf16.mxu1 %v16430_v38  ;;  %v16493_v37 = vld [vmem:[%s22791_s4 + $0x8ac] ss:$16 sps:$4 sm:$0xff]   ;;  %v16492_v38 = vld [vmem:[%s22791_s4 + $0x8a0] ss:$16 sps:$4 sm:$0xff]  }
 0x2e4   : > { %14350 = vmatprep.subr.bf16.mxu0 %v16433_v9  ;;  %v16495_v9 = vld [vmem:[%s22791_s4 + $0x8a8] ss:$16 sps:$4 sm:$0xff]  }
 0x2e6   : > { %14144 = vmatpush1.bf16.msra.mxu1 %v16432_v16  ;;  %v16496_v16 = vld [vmem:[%s22791_s4 + $0x8c4] ss:$16 sps:$4 sm:$0xff]  }
 0x2e7   : > { %14352 = vmatpush1.bf16.msra.mxu0 %v16435_v39  ;;  %14146 = vmatprep.subr.bf16.mxu1 %v16436_v40  ;;  %v16501_v39 = vld [vmem:[%s22791_s4 + $0x8c8] ss:$16 sps:$4 sm:$0xff]   ;;  %v16502_v40 = vld [vmem:[%s22791_s4 + $0x8e4] ss:$16 sps:$4 sm:$0xff]  }
 0x2e8   : > { %14354 = vmatprep.subr.bf16.mxu0 %v16439_v41  ;;  %v16507_v41 = vld [vmem:[%s22791_s4 + $0x8e8] ss:$16 sps:$4 sm:$0xff]  }
 0x2ea   : > { %14148 = vmatpush1.bf16.msra.mxu1 %v16438_v42  ;;  %v16508_v42 = vld [vmem:[%s22791_s4 + $0x904] ss:$16 sps:$4 sm:$0xff]  }
 0x2eb   : > { %14356 = vmatpush1.bf16.msra.mxu0 %v16441_v45  ;;  %14150 = vmatprep.subr.bf16.mxu1 %v16442_v46  ;;  %v16511_v45 = vld [vmem:[%s22791_s4 + $0x90c] ss:$16 sps:$4 sm:$0xff]   ;;  %v16510_v46 = vld [vmem:[%s22791_s4 + $0x900] ss:$16 sps:$4 sm:$0xff]  }
 0x2ec   : > { %14358 = vmatprep.subr.bf16.mxu0 %v16445_v49  ;;  %v16513_v49 = vld [vmem:[%s22791_s4 + $0x908] ss:$16 sps:$4 sm:$0xff]  }
 0x2ee   : > { %14152 = vmatpush1.bf16.msra.mxu1 %v16444_v51  ;;  %v16514_v51 = vld [vmem:[%s22791_s4 + $0x924] ss:$16 sps:$4 sm:$0xff]  }
 0x2ef   : > { %14360 = vmatpush1.bf16.msra.mxu0 %v16447_v57  ;;  %14154 = vmatprep.subr.bf16.mxu1 %v16448_v58  ;;  %v16517_v57 = vld [vmem:[%s22791_s4 + $0x92c] ss:$16 sps:$4 sm:$0xff]   ;;  %v16516_v58 = vld [vmem:[%s22791_s4 + $0x920] ss:$16 sps:$4 sm:$0xff]  }
 0x2f0   : > { %14362 = vmatprep.subr.bf16.mxu0 %v16451_v59  ;;  %v16519_v59 = vld [vmem:[%s22791_s4 + $0x928] ss:$16 sps:$4 sm:$0xff]  }
 0x2f2   : > { %14156 = vmatpush1.bf16.msra.mxu1 %v16450_v60  ;;  %v16520_v60 = vld [vmem:[%s22791_s4 + $0x944] ss:$16 sps:$4 sm:$0xff]  }
 0x2f3   : > { %14364 = vmatpush1.bf16.msra.mxu0 %v16453_v63  ;;  %14158 = vmatprep.subr.bf16.mxu1 %v16454_v3  ;;  %v16523_v63 = vld [vmem:[%s22791_s4 + $0x94c] ss:$16 sps:$4 sm:$0xff]   ;;  %v16522_v3 = vld [vmem:[%s22791_s4 + $0x940] ss:$16 sps:$4 sm:$0xff]  }
 0x2f4   : > { %14366 = vmatprep.subr.bf16.mxu0 %v16457_v4  ;;  %v16525_v4 = vld [vmem:[%s22791_s4 + $0x948] ss:$16 sps:$4 sm:$0xff]  }
 0x2f6   : > { %14160 = vmatpush1.bf16.msra.mxu1 %v16456_v5  ;;  %v16526_v5 = vld [vmem:[%s22791_s4 + $0x964] ss:$16 sps:$4 sm:$0xff]  }
 0x2f7   : > { %14368 = vmatpush1.bf16.msra.mxu0 %v16459_v6  ;;  %14162 = vmatprep.subr.bf16.mxu1 %v16460_v11  ;;  %v16529_v6 = vld [vmem:[%s22791_s4 + $0x96c] ss:$16 sps:$4 sm:$0xff]   ;;  %v16528_v11 = vld [vmem:[%s22791_s4 + $0x960] ss:$16 sps:$4 sm:$0xff]  }
 0x2f8   : > { %14370 = vmatprep.subr.bf16.mxu0 %v16463_v7  ;;  %v16531_v7 = vld [vmem:[%s22791_s4 + $0x968] ss:$16 sps:$4 sm:$0xff]  }
 0x2fa   : > { %14164 = vmatpush1.bf16.msra.mxu1 %v16462_v8  ;;  %v16532_v8 = vld [vmem:[%s22791_s4 + $0x984] ss:$16 sps:$4 sm:$0xff]  }
 0x2fb   : > { %14372 = vmatpush1.bf16.msra.mxu0 %v16465_v12  ;;  %14166 = vmatprep.subr.bf16.mxu1 %v16466_v13  ;;  %v16535_v12 = vld [vmem:[%s22791_s4 + $0x98c] ss:$16 sps:$4 sm:$0xff]   ;;  %v16534_v13 = vld [vmem:[%s22791_s4 + $0x980] ss:$16 sps:$4 sm:$0xff]  }
 0x2fc   : > { %14374 = vmatprep.subr.bf16.mxu0 %v16469_v15  ;;  %v16537_v15 = vld [vmem:[%s22791_s4 + $0x988] ss:$16 sps:$4 sm:$0xff]  }
 0x2fe   : > { %14168 = vmatpush1.bf16.msra.mxu1 %v16468_v17  ;;  %v16538_v17 = vld [vmem:[%s22791_s4 + $0x9a4] ss:$16 sps:$4 sm:$0xff]  }
 0x2ff   : > { %14376 = vmatpush1.bf16.msra.mxu0 %v16471_v61  ;;  %14170 = vmatprep.subr.bf16.mxu1 %v16472_v18  ;;  %v16541_v61 = vld [vmem:[%s22791_s4 + $0x9ac] ss:$16 sps:$4 sm:$0xff]   ;;  %v16540_v18 = vld [vmem:[%s22791_s4 + $0x9a0] ss:$16 sps:$4 sm:$0xff]  }
 0x300   : > { %14378 = vmatprep.subr.bf16.mxu0 %v16475_v19  ;;  %v16543_v19 = vld [vmem:[%s22791_s4 + $0x9a8] ss:$16 sps:$4 sm:$0xff]  }
 0x302   : > { %14172 = vmatpush1.bf16.msra.mxu1 %v16474_v62  ;;  %v16544_v62 = vld [vmem:[%s22791_s4 + $0x9c4] ss:$16 sps:$4 sm:$0xff]  }
 0x303   : > { %14380 = vmatpush1.bf16.msra.mxu0 %v16477_v26  ;;  %14174 = vmatprep.subr.bf16.mxu1 %v16478_v27  ;;  %v16547_v26 = vld [vmem:[%s22791_s4 + $0x9cc] ss:$16 sps:$4 sm:$0xff]   ;;  %v16546_v27 = vld [vmem:[%s22791_s4 + $0x9c0] ss:$16 sps:$4 sm:$0xff]  }
 0x304   : > { %14382 = vmatprep.subr.bf16.mxu0 %v16481_v0  ;;  %v16549_v0 = vld [vmem:[%s22791_s4 + $0x9c8] ss:$16 sps:$4 sm:$0xff]  }
 0x306   : > { %14176 = vmatpush1.bf16.msra.mxu1 %v16480_v1  ;;  %v16550_v1 = vld [vmem:[%s22791_s4 + $0x9e4] ss:$16 sps:$4 sm:$0xff]  }
 0x307   : > { %14384 = vmatpush1.bf16.msra.mxu0 %v16483_v30  ;;  %14178 = vmatprep.subr.bf16.mxu1 %v16484_v31  ;;  %v16553_v30 = vld [vmem:[%s22791_s4 + $0x9ec] ss:$16 sps:$4 sm:$0xff]   ;;  %v16552_v31 = vld [vmem:[%s22791_s4 + $0x9e0] ss:$16 sps:$4 sm:$0xff]  }
 0x308   : > { %14386 = vmatprep.subr.bf16.mxu0 %v16487_v22  ;;  %v16555_v22 = vld [vmem:[%s22791_s4 + $0x9e8] ss:$16 sps:$4 sm:$0xff]  }
 0x309   : > { %4141 = vmatmul.mubr.f32.vlgmr.msra.gmra.mrb[44].mxu1 %v18709_v14 }
 0x30a   : > { %4449 = vmatmul.mubr.f32.vlgmr.msra.gmra.mrb[28].mxu0 %v18709_v14  ;;  %4146 = vmatprep.mubr.f32.mxu1 %v18733_v28  ;;  %v16499_v14 = vld [vmem:[%s22791_s4 + $0x8cc] ss:$16 sps:$4 sm:$0xff]  }
 0x30b   : > { %14180 = vmatpush1.bf16.msra.mxu1 %v16486_v32  ;;  %4454 = vmatprep.mubr.f32.mxu0 %v18733_v28  ;;  %v16498_v28 = vld [vmem:[%s22791_s4 + $0x8c0] ss:$16 sps:$4 sm:$0xff]   ;;  %v16556_v32 = vld [vmem:[%s22791_s4 + $0xa04] ss:$16 sps:$4 sm:$0xff]  }
 0x30c   : > { %14388 = vmatpush1.bf16.msra.mxu0 %v16489_v35  ;;  %14182 = vmatprep.subr.bf16.mxu1 %v16490_v36  ;;  %v16559_v35 = vld [vmem:[%s22791_s4 + $0xa0c] ss:$16 sps:$4 sm:$0xff]   ;;  %v16558_v36 = vld [vmem:[%s22791_s4 + $0xa00] ss:$16 sps:$4 sm:$0xff]  }
 0x30d   : > { %4147 = vmatmul.mubr.f32.gmra.mrb[46].mxu1 %v18721_v20  ;;  %14390 = vmatprep.subr.bf16.mxu0 %v16493_v37  ;;  %v16561_v37 = vld [vmem:[%s22791_s4 + $0xa08] ss:$16 sps:$4 sm:$0xff]  }
 0x30e   : > { %4455 = vmatmul.mubr.f32.gmra.mrb[30].mxu0 %v18721_v20  ;;  %4217 = vmatprep.mubr.f32.mxu1 %v18735_v29  ;;  %v16505_v20 = vld [vmem:[%s22791_s4 + $0x8ec] ss:$16 sps:$4 sm:$0xff]  }
 0x30f   : > { %14184 = vmatpush1.bf16.msra.mxu1 %v16492_v38  ;;  %4525 = vmatprep.mubr.f32.mxu0 %v18735_v29  ;;  %v16504_v29 = vld [vmem:[%s22791_s4 + $0x8e0] ss:$16 sps:$4 sm:$0xff]   ;;  %v16562_v38 = vld [vmem:[%s22791_s4 + $0xa24] ss:$16 sps:$4 sm:$0xff]  }
 0x310   : > { %14392 = vmatpush1.bf16.msra.mxu0 %v16495_v9  ;;  %14186 = vmatprep.subr.bf16.mxu1 %v16496_v16  ;;  %v16565_v9 = vld [vmem:[%s22791_s4 + $0xa2c] ss:$16 sps:$4 sm:$0xff]   ;;  %v16564_v16 = vld [vmem:[%s22791_s4 + $0xa20] ss:$16 sps:$4 sm:$0xff]  }
 0x311   : > { %14394 = vmatprep.subr.bf16.mxu0 %v16499_v14  ;;  %v16567_v14 = vld [vmem:[%s22791_s4 + $0xa28] ss:$16 sps:$4 sm:$0xff]  }
 0x313   : > { %14188 = vmatpush1.bf16.msra.mxu1 %v16498_v28  ;;  %v16568_v28 = vld [vmem:[%s22791_s4 + $0xa44] ss:$16 sps:$4 sm:$0xff]  }
 0x314   : > { %14396 = vmatpush1.bf16.msra.mxu0 %v16501_v39  ;;  %14190 = vmatprep.subr.bf16.mxu1 %v16502_v40  ;;  %v16571_v39 = vld [vmem:[%s22791_s4 + $0xa4c] ss:$16 sps:$4 sm:$0xff]   ;;  %v16570_v40 = vld [vmem:[%s22791_s4 + $0xa40] ss:$16 sps:$4 sm:$0xff]  }
 0x315   : > { %14398 = vmatprep.subr.bf16.mxu0 %v16505_v20  ;;  %v16573_v20 = vld [vmem:[%s22791_s4 + $0xa48] ss:$16 sps:$4 sm:$0xff]  }
 0x317   : > { %14192 = vmatpush1.bf16.msra.mxu1 %v16504_v29  ;;  %v16574_v29 = vld [vmem:[%s22791_s4 + $0xa64] ss:$16 sps:$4 sm:$0xff]  }
 0x318   : > { %14400 = vmatpush1.bf16.msra.mxu0 %v16507_v41  ;;  %14194 = vmatprep.subr.bf16.mxu1 %v16508_v42  ;;  %v16577_v41 = vld [vmem:[%s22791_s4 + $0xa6c] ss:$16 sps:$4 sm:$0xff]   ;;  %v16576_v42 = vld [vmem:[%s22791_s4 + $0xa60] ss:$16 sps:$4 sm:$0xff]  }
 0x319   : > { %14402 = vmatprep.subr.bf16.mxu0 %v16511_v45  ;;  %v16579_v45 = vld [vmem:[%s22791_s4 + $0xa68] ss:$16 sps:$4 sm:$0xff]  }
 0x31b   : > { %14196 = vmatpush1.bf16.msra.mxu1 %v16510_v46  ;;  %v16580_v46 = vld [vmem:[%s22791_s4 + $0xa84] ss:$16 sps:$4 sm:$0xff]  }
 0x31c   : > { %14404 = vmatpush1.bf16.msra.mxu0 %v16513_v49  ;;  %14198 = vmatprep.subr.bf16.mxu1 %v16514_v51  ;;  %v16583_v49 = vld [vmem:[%s22791_s4 + $0xa8c] ss:$16 sps:$4 sm:$0xff]   ;;  %v16582_v51 = vld [vmem:[%s22791_s4 + $0xa80] ss:$16 sps:$4 sm:$0xff]  }
 0x31d   : > { %14406 = vmatprep.subr.bf16.mxu0 %v16517_v57  ;;  %v16585_v57 = vld [vmem:[%s22791_s4 + $0xa88] ss:$16 sps:$4 sm:$0xff]  }
 0x31f   : > { %14200 = vmatpush1.bf16.msra.mxu1 %v16516_v58  ;;  %v16586_v58 = vld [vmem:[%s22791_s4 + $0xaa4] ss:$16 sps:$4 sm:$0xff]  }
 0x320   : > { %14408 = vmatpush1.bf16.msra.mxu0 %v16519_v59  ;;  %14202 = vmatprep.subr.bf16.mxu1 %v16520_v60  ;;  %v16589_v59 = vld [vmem:[%s22791_s4 + $0xaac] ss:$16 sps:$4 sm:$0xff]   ;;  %v16588_v60 = vld [vmem:[%s22791_s4 + $0xaa0] ss:$16 sps:$4 sm:$0xff]  }
 0x321   : > { %14410 = vmatprep.subr.bf16.mxu0 %v16523_v63  ;;  %v16591_v63 = vld [vmem:[%s22791_s4 + $0xaa8] ss:$16 sps:$4 sm:$0xff]  }
 0x323   : > { %14204 = vmatpush1.bf16.msra.mxu1 %v16522_v3  ;;  %v16592_v3 = vld [vmem:[%s22791_s4 + $0xac4] ss:$16 sps:$4 sm:$0xff]  }
 0x324   : > { %14412 = vmatpush1.bf16.msra.mxu0 %v16525_v4  ;;  %14206 = vmatprep.subr.bf16.mxu1 %v16526_v5  ;;  %v16597_v4 = vld [vmem:[%s22791_s4 + $0xac8] ss:$16 sps:$4 sm:$0xff]   ;;  %v16598_v5 = vld [vmem:[%s22791_s4 + $0xae4] ss:$16 sps:$4 sm:$0xff]  }
 0x325   : > { %14414 = vmatprep.subr.bf16.mxu0 %v16529_v6  ;;  %v16603_v6 = vld [vmem:[%s22791_s4 + $0xae8] ss:$16 sps:$4 sm:$0xff]  }
 0x327   : > { %14208 = vmatpush1.bf16.msra.mxu1 %v16528_v11  ;;  %v16604_v11 = vld [vmem:[%s22791_s4 + $0xb04] ss:$16 sps:$4 sm:$0xff]  }
 0x328   : > { %14416 = vmatpush1.bf16.msra.mxu0 %v16531_v7  ;;  %14210 = vmatprep.subr.bf16.mxu1 %v16532_v8  ;;  %v16607_v7 = vld [vmem:[%s22791_s4 + $0xb0c] ss:$16 sps:$4 sm:$0xff]   ;;  %v16606_v8 = vld [vmem:[%s22791_s4 + $0xb00] ss:$16 sps:$4 sm:$0xff]  }
 0x329   : > { %14418 = vmatprep.subr.bf16.mxu0 %v16535_v12  ;;  %v16609_v12 = vld [vmem:[%s22791_s4 + $0xb08] ss:$16 sps:$4 sm:$0xff]  }
 0x32b   : > { %14212 = vmatpush1.bf16.msra.mxu1 %v16534_v13  ;;  %v16610_v13 = vld [vmem:[%s22791_s4 + $0xb24] ss:$16 sps:$4 sm:$0xff]  }
 0x32c   : > { %14420 = vmatpush1.bf16.msra.mxu0 %v16537_v15  ;;  %14214 = vmatprep.subr.bf16.mxu1 %v16538_v17  ;;  %v16613_v15 = vld [vmem:[%s22791_s4 + $0xb2c] ss:$16 sps:$4 sm:$0xff]   ;;  %v16612_v17 = vld [vmem:[%s22791_s4 + $0xb20] ss:$16 sps:$4 sm:$0xff]  }
 0x32d   : > { %14422 = vmatprep.subr.bf16.mxu0 %v16541_v61  ;;  %v16615_v61 = vld [vmem:[%s22791_s4 + $0xb28] ss:$16 sps:$4 sm:$0xff]  }
 0x32f   : > { %14216 = vmatpush1.bf16.msra.mxu1 %v16540_v18  ;;  %v16616_v18 = vld [vmem:[%s22791_s4 + $0xb44] ss:$16 sps:$4 sm:$0xff]  }
 0x330   : > { %14424 = vmatpush1.bf16.msra.mxu0 %v16543_v19  ;;  %14218 = vmatprep.subr.bf16.mxu1 %v16544_v62  ;;  %v16619_v19 = vld [vmem:[%s22791_s4 + $0xb4c] ss:$16 sps:$4 sm:$0xff]   ;;  %v16618_v62 = vld [vmem:[%s22791_s4 + $0xb40] ss:$16 sps:$4 sm:$0xff]  }
 0x331   : > { %14426 = vmatprep.subr.bf16.mxu0 %v16547_v26  ;;  %v16621_v26 = vld [vmem:[%s22791_s4 + $0xb48] ss:$16 sps:$4 sm:$0xff]  }
 0x333   : > { %14220 = vmatpush1.bf16.msra.mxu1 %v16546_v27  ;;  %v16622_v27 = vld [vmem:[%s22791_s4 + $0xb64] ss:$16 sps:$4 sm:$0xff]  }
 0x334   : > { %14428 = vmatpush1.bf16.msra.mxu0 %v16549_v0  ;;  %14222 = vmatprep.subr.bf16.mxu1 %v16550_v1  ;;  %v16625_v0 = vld [vmem:[%s22791_s4 + $0xb6c] ss:$16 sps:$4 sm:$0xff]   ;;  %v16624_v1 = vld [vmem:[%s22791_s4 + $0xb60] ss:$16 sps:$4 sm:$0xff]  }
 0x335   : > { %14430 = vmatprep.subr.bf16.mxu0 %v16553_v30  ;;  %v16627_v30 = vld [vmem:[%s22791_s4 + $0xb68] ss:$16 sps:$4 sm:$0xff]  }
 0x337   : > { %14224 = vmatpush1.bf16.msra.mxu1 %v16552_v31  ;;  %v16628_v31 = vld [vmem:[%s22791_s4 + $0xb84] ss:$16 sps:$4 sm:$0xff]  }
 0x338   : > { %14432 = vmatpush1.bf16.msra.mxu0 %v16555_v22  ;;  %14226 = vmatprep.subr.bf16.mxu1 %v16556_v32  ;;  %v16631_v22 = vld [vmem:[%s22791_s4 + $0xb8c] ss:$16 sps:$4 sm:$0xff]   ;;  %v16630_v32 = vld [vmem:[%s22791_s4 + $0xb80] ss:$16 sps:$4 sm:$0xff]  }
 0x339   : > { %14434 = vmatprep.subr.bf16.mxu0 %v16559_v35  ;;  %v16633_v35 = vld [vmem:[%s22791_s4 + $0xb88] ss:$16 sps:$4 sm:$0xff]  }
 0x33b   : > { %14228 = vmatpush1.bf16.msra.mxu1 %v16558_v36  ;;  %v16634_v36 = vld [vmem:[%s22791_s4 + $0xba4] ss:$16 sps:$4 sm:$0xff]  }
 0x33c   : > { %14436 = vmatpush1.bf16.msra.mxu0 %v16561_v37  ;;  %14230 = vmatprep.subr.bf16.mxu1 %v16562_v38  ;;  %v16637_v37 = vld [vmem:[%s22791_s4 + $0xbac] ss:$16 sps:$4 sm:$0xff]   ;;  %v16636_v38 = vld [vmem:[%s22791_s4 + $0xba0] ss:$16 sps:$4 sm:$0xff]  }
 0x33d   : > { %14438 = vmatprep.subr.bf16.mxu0 %v16565_v9  ;;  %v16639_v9 = vld [vmem:[%s22791_s4 + $0xba8] ss:$16 sps:$4 sm:$0xff]  }
 0x33f   : > { %14232 = vmatpush1.bf16.msra.mxu1 %v16564_v16  ;;  %v16640_v16 = vld [vmem:[%s22791_s4 + $0xbc4] ss:$16 sps:$4 sm:$0xff]  }
 0x340   : > { %14440 = vmatpush1.bf16.msra.mxu0 %v16567_v14  ;;  %14234 = vmatprep.subr.bf16.mxu1 %v16568_v28  ;;  %v16643_v14 = vld [vmem:[%s22791_s4 + $0xbcc] ss:$16 sps:$4 sm:$0xff]   ;;  %v16642_v28 = vld [vmem:[%s22791_s4 + $0xbc0] ss:$16 sps:$4 sm:$0xff]  }
 0x341   : > { %14442 = vmatprep.subr.bf16.mxu0 %v16571_v39  ;;  %v16645_v39 = vld [vmem:[%s22791_s4 + $0xbc8] ss:$16 sps:$4 sm:$0xff]  }
 0x343   : > { %14236 = vmatpush1.bf16.msra.mxu1 %v16570_v40  ;;  %v16646_v40 = vld [vmem:[%s22791_s4 + $0xbe4] ss:$16 sps:$4 sm:$0xff]  }
 0x344   : > { %14444 = vmatpush1.bf16.msra.mxu0 %v16573_v20  ;;  %14238 = vmatprep.subr.bf16.mxu1 %v16574_v29  ;;  %v16649_v20 = vld [vmem:[%s22791_s4 + $0xbec] ss:$16 sps:$4 sm:$0xff]   ;;  %v16648_v29 = vld [vmem:[%s22791_s4 + $0xbe0] ss:$16 sps:$4 sm:$0xff]  }
 0x345   : > { %14446 = vmatprep.subr.bf16.mxu0 %v16577_v41  ;;  %v16651_v41 = vld [vmem:[%s22791_s4 + $0xbe8] ss:$16 sps:$4 sm:$0xff]  }
 0x347   : > { %14240 = vmatpush1.bf16.msra.mxu1 %v16576_v42  ;;  %v16652_v42 = vld [vmem:[%s22791_s4 + $0xc04] ss:$16 sps:$4 sm:$0xff]  }
 0x348   : > { %14448 = vmatpush1.bf16.msra.mxu0 %v16579_v45  ;;  %14242 = vmatprep.subr.bf16.mxu1 %v16580_v46  ;;  %v16655_v45 = vld [vmem:[%s22791_s4 + $0xc0c] ss:$16 sps:$4 sm:$0xff]   ;;  %v16654_v46 = vld [vmem:[%s22791_s4 + $0xc00] ss:$16 sps:$4 sm:$0xff]  }
 0x349   : > { %14450 = vmatprep.subr.bf16.mxu0 %v16583_v49  ;;  %v16657_v49 = vld [vmem:[%s22791_s4 + $0xc08] ss:$16 sps:$4 sm:$0xff]  }
 0x34a   : > { %4218 = vmatmul.mubr.f32.vlgmr.msra.gmra.mrb[44].mxu1 %v18723_v25 }
 0x34b   : > { %4526 = vmatmul.mubr.f32.vlgmr.msra.gmra.mrb[28].mxu0 %v18723_v25  ;;  %4223 = vmatprep.mubr.f32.mxu1 %v18757_v52  ;;  %v16595_v25 = vld [vmem:[%s22791_s4 + $0xacc] ss:$16 sps:$4 sm:$0xff]  }
 0x34c   : > { %14244 = vmatpush1.bf16.msra.mxu1 %v16582_v51  ;;  %4531 = vmatprep.mubr.f32.mxu0 %v18757_v52  ;;  %v16594_v52 = vld [vmem:[%s22791_s4 + $0xac0] ss:$16 sps:$4 sm:$0xff]   ;;  %v16658_v51 = vld [vmem:[%s22791_s4 + $0xc24] ss:$16 sps:$4 sm:$0xff]  }
 0x34d   : > { %14452 = vmatpush1.bf16.msra.mxu0 %v16585_v57  ;;  %14246 = vmatprep.subr.bf16.mxu1 %v16586_v58  ;;  %v16661_v57 = vld [vmem:[%s22791_s4 + $0xc2c] ss:$16 sps:$4 sm:$0xff]   ;;  %v16660_v58 = vld [vmem:[%s22791_s4 + $0xc20] ss:$16 sps:$4 sm:$0xff]  }
 0x34e   : > { %4224 = vmatmul.mubr.f32.gmra.mrb[46].mxu1 %v18745_v33  ;;  %14454 = vmatprep.subr.bf16.mxu0 %v16589_v59  ;;  %v16663_v59 = vld [vmem:[%s22791_s4 + $0xc28] ss:$16 sps:$4 sm:$0xff]  }
 0x34f   : > { %4532 = vmatmul.mubr.f32.gmra.mrb[30].mxu0 %v18745_v33  ;;  %4294 = vmatprep.mubr.f32.mxu1 %v18759_v44  ;;  %v16601_v33 = vld [vmem:[%s22791_s4 + $0xaec] ss:$16 sps:$4 sm:$0xff]  }
 0x350   : > { %14248 = vmatpush1.bf16.msra.mxu1 %v16588_v60  ;;  %4602 = vmatprep.mubr.f32.mxu0 %v18759_v44  ;;  %v16600_v44 = vld [vmem:[%s22791_s4 + $0xae0] ss:$16 sps:$4 sm:$0xff]   ;;  %v16664_v60 = vld [vmem:[%s22791_s4 + $0xc44] ss:$16 sps:$4 sm:$0xff]  }
 0x351   : > { %14456 = vmatpush1.bf16.msra.mxu0 %v16591_v63  ;;  %14250 = vmatprep.subr.bf16.mxu1 %v16592_v3  ;;  %v16667_v63 = vld [vmem:[%s22791_s4 + $0xc4c] ss:$16 sps:$4 sm:$0xff]   ;;  %v16666_v3 = vld [vmem:[%s22791_s4 + $0xc40] ss:$16 sps:$4 sm:$0xff]  }
 0x352   : > { %14458 = vmatprep.subr.bf16.mxu0 %v16595_v25  ;;  %v16669_v25 = vld [vmem:[%s22791_s4 + $0xc48] ss:$16 sps:$4 sm:$0xff]  }
 0x354   : > { %14252 = vmatpush1.bf16.msra.mxu1 %v16594_v52  ;;  %v16670_v52 = vld [vmem:[%s22791_s4 + $0xc64] ss:$16 sps:$4 sm:$0xff]  }
 0x355   : > { %14460 = vmatpush1.bf16.msra.mxu0 %v16597_v4  ;;  %14254 = vmatprep.subr.bf16.mxu1 %v16598_v5  ;;  %v16673_v4 = vld [vmem:[%s22791_s4 + $0xc6c] ss:$16 sps:$4 sm:$0xff]   ;;  %v16672_v5 = vld [vmem:[%s22791_s4 + $0xc60] ss:$16 sps:$4 sm:$0xff]  }
 0x356   : > { %14462 = vmatprep.subr.bf16.mxu0 %v16601_v33  ;;  %v16675_v33 = vld [vmem:[%s22791_s4 + $0xc68] ss:$16 sps:$4 sm:$0xff]  }
 0x358   : > { %14256 = vmatpush1.bf16.msra.mxu1 %v16600_v44  ;;  %v16676_v44 = vld [vmem:[%s22791_s4 + $0xc84] ss:$16 sps:$4 sm:$0xff]  }
 0x359   : > { %14464 = vmatpush1.bf16.msra.mxu0 %v16603_v6  ;;  %14258 = vmatprep.subr.bf16.mxu1 %v16604_v11  ;;  %v16679_v6 = vld [vmem:[%s22791_s4 + $0xc8c] ss:$16 sps:$4 sm:$0xff]   ;;  %v16678_v11 = vld [vmem:[%s22791_s4 + $0xc80] ss:$16 sps:$4 sm:$0xff]  }
 0x35a   : > { %14466 = vmatprep.subr.bf16.mxu0 %v16607_v7  ;;  %v16681_v7 = vld [vmem:[%s22791_s4 + $0xc88] ss:$16 sps:$4 sm:$0xff]  }
 0x35c   : > { %14260 = vmatpush1.bf16.msra.mxu1 %v16606_v8  ;;  %v16682_v8 = vld [vmem:[%s22791_s4 + $0xca4] ss:$16 sps:$4 sm:$0xff]  }
 0x35d   : > { %14468 = vmatpush1.bf16.msra.mxu0 %v16609_v12  ;;  %14262 = vmatprep.subr.bf16.mxu1 %v16610_v13  ;;  %v16685_v12 = vld [vmem:[%s22791_s4 + $0xcac] ss:$16 sps:$4 sm:$0xff]   ;;  %v16684_v13 = vld [vmem:[%s22791_s4 + $0xca0] ss:$16 sps:$4 sm:$0xff]  }
 0x35e   : > { %14470 = vmatprep.subr.bf16.mxu0 %v16613_v15  ;;  %v16687_v15 = vld [vmem:[%s22791_s4 + $0xca8] ss:$16 sps:$4 sm:$0xff]  }
 0x360   : > { %14264 = vmatpush1.bf16.msra.mxu1 %v16612_v17  ;;  %v16688_v17 = vld [vmem:[%s22791_s4 + $0xcc4] ss:$16 sps:$4 sm:$0xff]  }
 0x361   : > { %14472 = vmatpush1.bf16.msra.mxu0 %v16615_v61  ;;  %14266 = vmatprep.subr.bf16.mxu1 %v16616_v18  ;;  %v16693_v61 = vld [vmem:[%s22791_s4 + $0xcc8] ss:$16 sps:$4 sm:$0xff]   ;;  %v16694_v18 = vld [vmem:[%s22791_s4 + $0xce4] ss:$16 sps:$4 sm:$0xff]  }
 0x362   : > { %14474 = vmatprep.subr.bf16.mxu0 %v16619_v19  ;;  %v16696_v19 = vld [vmem:[%s22791_s4 + $0xce0] ss:$16 sps:$4 sm:$0xff]  }
 0x364   : > { %14268 = vmatpush1.bf16.msra.mxu1 %v16618_v62  ;;  %v16699_v62 = vld [vmem:[%s22791_s4 + $0xce8] ss:$16 sps:$4 sm:$0xff]  }
 0x365   : > { %14476 = vmatpush1.bf16.msra.mxu0 %v16621_v26  ;;  %14270 = vmatprep.subr.bf16.mxu1 %v16622_v27  ;;  %v16702_v26 = vld [vmem:[%s22792_s5 + $0x4e4] ss:$24 sps:$4 sm:$0xff]  }
 0x366   : > { %14478 = vmatprep.subr.bf16.mxu0 %v16625_v0  ;;  %v16705_v27 = vld [vmem:[%s22792_s5 + $0x4ec] ss:$24 sps:$4 sm:$0xff]   ;;  %v16700_v0 = vld [vmem:[%s22792_s5 + $0x4e0] ss:$24 sps:$4 sm:$0xff]  }
 0x368   : > { %14272 = vmatpush1.bf16.msra.mxu1 %v16624_v1  ;;  %v16703_v1 = vld [vmem:[%s22792_s5 + $0x4e8] ss:$24 sps:$4 sm:$0xff]  }
 0x369   : > { %14480 = vmatpush1.bf16.msra.mxu0 %v16627_v30  ;;  %14274 = vmatprep.subr.bf16.mxu1 %v16628_v31  ;;  %v16708_v30 = vld [vmem:[%s22792_s5 + $0x514] ss:$24 sps:$4 sm:$0xff]  }
 0x36a   : > { %14482 = vmatprep.subr.bf16.mxu0 %v16631_v22  ;;  %v16711_v22 = vld [vmem:[%s22792_s5 + $0x51c] ss:$24 sps:$4 sm:$0xff]  }
 0x36c   : > { %14276 = vmatpush1.bf16.msra.mxu1 %v16630_v32 }
 0x36d   : > { %14484 = vmatpush1.bf16.msra.mxu0 %v16633_v35  ;;  %14278 = vmatprep.subr.bf16.mxu1 %v16634_v36 }
 0x36e   : > { %14486 = vmatprep.subr.bf16.mxu0 %v16637_v37  ;;  %v16706_v37 = vld [vmem:[%s22792_s5 + $0x510] ss:$24 sps:$4 sm:$0xff]  }
 0x370   : > { %14280 = vmatpush1.bf16.msra.mxu1 %v16636_v38  ;;  %v16714_v38 = vld [vmem:[%s22792_s5 + $0x544] ss:$24 sps:$4 sm:$0xff]  }
 0x371   : > { %14488 = vmatpush1.bf16.msra.mxu0 %v16639_v9  ;;  %14282 = vmatprep.subr.bf16.mxu1 %v16640_v16  ;;  %v16717_v16 = vld [vmem:[%s22792_s5 + $0x54c] ss:$24 sps:$4 sm:$0xff]  }
 0x372   : > { %14490 = vmatprep.subr.bf16.mxu0 %v16643_v14 }
 0x374   : > { %14284 = vmatpush1.bf16.msra.mxu1 %v16642_v28 }
 0x375   : > { %14492 = vmatpush1.bf16.msra.mxu0 %v16645_v39  ;;  %14286 = vmatprep.subr.bf16.mxu1 %v16646_v40  ;;  %v16712_v40 = vld [vmem:[%s22792_s5 + $0x540] ss:$24 sps:$4 sm:$0xff]  }
 0x376   : > { %14494 = vmatprep.subr.bf16.mxu0 %v16649_v20  ;;  %v16715_v20 = vld [vmem:[%s22792_s5 + $0x548] ss:$24 sps:$4 sm:$0xff]  }
 0x378   : > { %14288 = vmatpush1.bf16.msra.mxu1 %v16648_v29  ;;  %v16723_v29 = vld [vmem:[%s22792_s5 + $0x57c] ss:$24 sps:$4 sm:$0xff]  }
 0x379   : > { %14496 = vmatpush1.bf16.msra.mxu0 %v16651_v41  ;;  %14290 = vmatprep.subr.bf16.mxu1 %v16652_v42  ;;  %v16718_v41 = vld [vmem:[%s22792_s5 + $0x570] ss:$24 sps:$4 sm:$0xff]  }
 0x37a   : > { %14498 = vmatprep.subr.bf16.mxu0 %v16655_v45  ;;  %v16721_v42 = vld [vmem:[%s22792_s5 + $0x578] ss:$24 sps:$4 sm:$0xff]   ;;  %v16726_v45 = vld [vmem:[%s22792_s5 + $0x5a4] ss:$24 sps:$4 sm:$0xff]  }
 0x37c   : > { %14292 = vmatpush1.bf16.msra.mxu1 %v16654_v46  ;;  %v16729_v46 = vld [vmem:[%s22792_s5 + $0x5ac] ss:$24 sps:$4 sm:$0xff]  }
 0x37d   : > { %14500 = vmatpush1.bf16.msra.mxu0 %v16657_v49  ;;  %14294 = vmatprep.subr.bf16.mxu1 %v16658_v51  ;;  %v16724_v49 = vld [vmem:[%s22792_s5 + $0x5a0] ss:$24 sps:$4 sm:$0xff]  }
 0x37e   : > { %14502 = vmatprep.subr.bf16.mxu0 %v16661_v57  ;;  %v16727_v51 = vld [vmem:[%s22792_s5 + $0x5a8] ss:$24 sps:$4 sm:$0xff]   ;;  %v16732_v57 = vld [vmem:[%s22792_s5 + $0x5d4] ss:$24 sps:$4 sm:$0xff]  }
 0x380   : > { %14296 = vmatpush1.bf16.msra.mxu1 %v16660_v58  ;;  %v16735_v58 = vld [vmem:[%s22792_s5 + $0x5dc] ss:$24 sps:$4 sm:$0xff]  }
 0x381   : > { %14504 = vmatpush1.bf16.msra.mxu0 %v16663_v59  ;;  %14298 = vmatprep.subr.bf16.mxu1 %v16664_v60  ;;  %v16730_v59 = vld [vmem:[%s22792_s5 + $0x5d0] ss:$24 sps:$4 sm:$0xff]  }
 0x382   : > { %14506 = vmatprep.subr.bf16.mxu0 %v16667_v63  ;;  %v16733_v60 = vld [vmem:[%s22792_s5 + $0x5d8] ss:$24 sps:$4 sm:$0xff]   ;;  %v16738_v63 = vld [vmem:[%s22792_s5 + $0x604] ss:$24 sps:$4 sm:$0xff]  }
 0x384   : > { %14300 = vmatpush1.bf16.msra.mxu1 %v16666_v3  ;;  %v16741_v3 = vld [vmem:[%s22792_s5 + $0x60c] ss:$24 sps:$4 sm:$0xff]  }
 0x385   : > { %14508 = vmatpush1.bf16.msra.mxu0 %v16669_v25  ;;  %14302 = vmatprep.subr.bf16.mxu1 %v16670_v52  ;;  %v16736_v25 = vld [vmem:[%s22792_s5 + $0x600] ss:$24 sps:$4 sm:$0xff]  }
 0x386   : > { %14510 = vmatprep.subr.bf16.mxu0 %v16673_v4  ;;  %v16739_v52 = vld [vmem:[%s22792_s5 + $0x608] ss:$24 sps:$4 sm:$0xff]   ;;  %v16744_v4 = vld [vmem:[%s22792_s5 + $0x634] ss:$24 sps:$4 sm:$0xff]  }
 0x388   : > { %14304 = vmatpush1.bf16.msra.mxu1 %v16672_v5  ;;  %v16747_v5 = vld [vmem:[%s22792_s5 + $0x63c] ss:$24 sps:$4 sm:$0xff]  }
 0x389   : > { %14512 = vmatpush1.bf16.msra.mxu0 %v16675_v33  ;;  %14306 = vmatprep.subr.bf16.mxu1 %v16676_v44  ;;  %v16742_v33 = vld [vmem:[%s22792_s5 + $0x630] ss:$24 sps:$4 sm:$0xff]  }
 0x38a   : > { %14514 = vmatprep.subr.bf16.mxu0 %v16679_v6  ;;  %v16745_v44 = vld [vmem:[%s22792_s5 + $0x638] ss:$24 sps:$4 sm:$0xff]   ;;  %v16750_v6 = vld [vmem:[%s22792_s5 + $0x664] ss:$24 sps:$4 sm:$0xff]  }
 0x38b   : > { %4295 = vmatmul.mubr.f32.vlgmr.msra.gmra.mrb[44].mxu1 %v18747_v34 }
 0x38c   : > { %4603 = vmatmul.mubr.f32.vlgmr.msra.gmra.mrb[28].mxu0 %v18747_v34  ;;  %4300 = vmatprep.mubr.f32.mxu1 %v18785_v55  ;;  %v16691_v34 = vld [vmem:[%s22791_s4 + $0xccc] ss:$16 sps:$4 sm:$0xff]  }
 0x38d   : > { %14308 = vmatpush1.bf16.msra.mxu1 %v16678_v11  ;;  %4608 = vmatprep.mubr.f32.mxu0 %v18785_v55  ;;  %v16690_v55 = vld [vmem:[%s22791_s4 + $0xcc0] ss:$16 sps:$4 sm:$0xff]   ;;  %v16753_v11 = vld [vmem:[%s22792_s5 + $0x66c] ss:$24 sps:$4 sm:$0xff]  }
 0x38e   : > { %14516 = vmatpush1.bf16.msra.mxu0 %v16681_v7  ;;  %14310 = vmatprep.subr.bf16.mxu1 %v16682_v8  ;;  %v16748_v7 = vld [vmem:[%s22792_s5 + $0x660] ss:$24 sps:$4 sm:$0xff]  }
 0x38f   : > { %4301 = vmatmul.mubr.f32.gmra.mrb[46].mxu1 %v18775_v43  ;;  %14518 = vmatprep.subr.bf16.mxu0 %v16685_v12  ;;  %v16751_v8 = vld [vmem:[%s22792_s5 + $0x668] ss:$24 sps:$4 sm:$0xff]   ;;  %v16756_v12 = vld [vmem:[%s22792_s5 + $0x694] ss:$24 sps:$4 sm:$0xff]  }
 0x390   : > { %4609 = vmatmul.mubr.f32.gmra.mrb[30].mxu0 %v18775_v43  ;;  %4371 = vmatprep.mubr.f32.mxu1 %v18008_v10  ;;  %v16697_v43 = vld [vmem:[%s22791_s4 + $0xcec] ss:$16 sps:$4 sm:$0xff]  }
 0x391   : > { %14312 = vmatpush1.bf16.msra.mxu1 %v16684_v13  ;;  %4679 = vmatprep.mubr.f32.mxu0 %v18008_v10  ;;  %v16759_v13 = vld [vmem:[%s22792_s5 + $0x69c] ss:$24 sps:$4 sm:$0xff]  }
 0x392   : > { %14520 = vmatpush1.bf16.msra.mxu0 %v16687_v15  ;;  %14314 = vmatprep.subr.bf16.mxu1 %v16688_v17  ;;  %v16754_v15 = vld [vmem:[%s22792_s5 + $0x690] ss:$24 sps:$4 sm:$0xff]  }
 0x393   : > { %14522 = vmatprep.subr.bf16.mxu0 %v16691_v34  ;;  %v16757_v17 = vld [vmem:[%s22792_s5 + $0x698] ss:$24 sps:$4 sm:$0xff]   ;;  %v16762_v34 = vld [vmem:[%s22792_s5 + $0x6c4] ss:$24 sps:$4 sm:$0xff]  }
 0x395   : > { %14316 = vmatpush1.bf16.msra.mxu1 %v16690_v55  ;;  %v16765_v55 = vld [vmem:[%s22792_s5 + $0x6cc] ss:$24 sps:$4 sm:$0xff]  }
 0x396   : > { %14524 = vmatpush1.bf16.msra.mxu0 %v16693_v61  ;;  %14318 = vmatprep.subr.bf16.mxu1 %v16694_v18  ;;  %v16760_v61 = vld [vmem:[%s22792_s5 + $0x6c0] ss:$24 sps:$4 sm:$0xff]  }
 0x397   : > { %14526 = vmatprep.subr.bf16.mxu0 %v16697_v43  ;;  %v16763_v18 = vld [vmem:[%s22792_s5 + $0x6c8] ss:$24 sps:$4 sm:$0xff]   ;;  %v16768_v43 = vld [vmem:[%s22792_s5 + $0x6f4] ss:$24 sps:$4 sm:$0xff]  }
 0x399   : > { %14320 = vmatpush1.bf16.msra.mxu1 %v16696_v19  ;;  %v16771_v19 = vld [vmem:[%s22792_s5 + $0x6fc] ss:$24 sps:$4 sm:$0xff]  }
 0x39a   : > { %14528 = vmatpush1.bf16.msra.mxu0 %v16699_v62  ;;  %5832 = vmatprep.subr.bf16.mxu1 %v16702_v26  ;;  %v16766_v62 = vld [vmem:[%s22792_s5 + $0x6f0] ss:$24 sps:$4 sm:$0xff]  }
 0x39b   : > { %5918 = vmatprep.subr.bf16.mxu0 %v16705_v27  ;;  %v16769_v26 = vld [vmem:[%s22792_s5 + $0x6f8] ss:$24 sps:$4 sm:$0xff]   ;;  %v16774_v27 = vld [vmem:[%s22792_s5 + $0x724] ss:$24 sps:$4 sm:$0xff]  }
 0x39c   : > { %12171 = vmatmul.mubr.msk.f32.vlgmr.msra.gmra.mrb[44].mxu1 %vm2828_vm8, %v18788_v56  ;;  %v19861_v31 = vpop.f32.mrb[40].mxu1 }
 0x39d   : > { %12173 = vmatmul.mubr.msk.f32.vlgmr.msra.gmra.mrb[28].mxu0 %vm2828_vm8, %v18788_v56  ;;  %v19868_v32 = vpop.f32.mrb[24].mxu0  ;;  %4377 = vmatprep.mubr.f32.mxu1 %v18008_v10  ;;  %v19871_v35 = vpop.f32.mrb[41].mxu1  ;;  %v16709_v56 = vld [vmem:[%s22792_s5 + $0x518] ss:$24 sps:$4 sm:$0xff]  }
 0x39e   : > { %4685 = vmatprep.mubr.f32.mxu0 %v18008_v10  ;;  %v19874_v36 = vpop.f32.mrb[25].mxu0  ;;  %5833 = vmatpush1.bf16.msra.mxu1 %v16700_v0  ;;  %v16777_v0 = vld [vmem:[%s22792_s5 + $0x72c] ss:$24 sps:$4 sm:$0xff]  }
 0x39f   : > { %5919 = vmatpush1.bf16.msra.mxu0 %v16703_v1  ;;  %5834 = vmatprep.subr.bf16.mxu1 %v16708_v30  ;;  %v16772_v1 = vld [vmem:[%s22792_s5 + $0x720] ss:$24 sps:$4 sm:$0xff]  }
 0x3a0   : > { %12172 = vmatmul.mubr.msk.f32.gmra.mrb[46].mxu1 %vm2828_vm8, %v18783_v50  ;;  %v19887_v9 = vpop.f32.mrb[42].mxu1  ;;  %5920 = vmatprep.subr.bf16.mxu0 %v16711_v22  ;;  %v16775_v30 = vld [vmem:[%s22792_s5 + $0x728] ss:$24 sps:$4 sm:$0xff]   ;;  %v16780_v22 = vld [vmem:[%s22792_s5 + $0x754] ss:$24 sps:$4 sm:$0xff]  }
 0x3a1   : > { %12174 = vmatmul.mubr.msk.f32.gmra.mrb[30].mxu0 %vm2828_vm8, %v18783_v50  ;;  %v19894_v14 = vpop.f32.mrb[26].mxu0  ;;  %v19896_v28 = vpop.f32.mrb[43].mxu1  ;;  %v16720_v50 = vld [vmem:[%s22792_s5 + $0x574] ss:$24 sps:$4 sm:$0xff]  }
 0x3a2   : > { %v19898_v39 = vpop.f32.mrb[27].mxu0  ;;  %5835 = vmatpush1.bf16.msra.mxu1 %v16706_v37  ;;  %v16783_v37 = vld [vmem:[%s22792_s5 + $0x75c] ss:$24 sps:$4 sm:$0xff]  }
 0x3a3   : > { %5921 = vmatpush1.bf16.msra.mxu0 %v16709_v56  ;;  %5836 = vmatprep.subr.bf16.mxu1 %v16714_v38  ;;  %v16778_v56 = vld [vmem:[%s22792_s5 + $0x750] ss:$24 sps:$4 sm:$0xff]  }
 0x3a4   : > { %5922 = vmatprep.subr.bf16.mxu0 %v16717_v16  ;;  %v16781_v38 = vld [vmem:[%s22792_s5 + $0x758] ss:$24 sps:$4 sm:$0xff]   ;;  %v16786_v16 = vld [vmem:[%s22792_s5 + $0x784] ss:$24 sps:$4 sm:$0xff]  }
 0x3a6   : > { %5837 = vmatpush1.bf16.msra.mxu1 %v16712_v40  ;;  %v16789_v40 = vld [vmem:[%s22792_s5 + $0x78c] ss:$24 sps:$4 sm:$0xff]  }
 0x3a7   : > { %5923 = vmatpush1.bf16.msra.mxu0 %v16715_v20  ;;  %5838 = vmatprep.subr.bf16.mxu1 %v16720_v50  ;;  %v16784_v20 = vld [vmem:[%s22792_s5 + $0x780] ss:$24 sps:$4 sm:$0xff]  }
 0x3a8   : > { %5924 = vmatprep.subr.bf16.mxu0 %v16723_v29  ;;  %v16787_v50 = vld [vmem:[%s22792_s5 + $0x788] ss:$24 sps:$4 sm:$0xff]   ;;  %v16792_v29 = vld [vmem:[%s22792_s5 + $0x7b4] ss:$24 sps:$4 sm:$0xff]  }
 0x3aa   : > { %5839 = vmatpush1.bf16.msra.mxu1 %v16718_v41  ;;  %v16790_v41 = vld [vmem:[%s22792_s5 + $0x7b0] ss:$24 sps:$4 sm:$0xff]  }
 0x3ab   : > { %5925 = vmatpush1.bf16.msra.mxu0 %v16721_v42  ;;  %5840 = vmatprep.subr.bf16.mxu1 %v16726_v45  ;;  %v16793_v42 = vld [vmem:[%s22792_s5 + $0x7b8] ss:$24 sps:$4 sm:$0xff]   ;;  %v16795_v45 = vld [vmem:[%s22792_s5 + $0x7bc] ss:$24 sps:$4 sm:$0xff]  }
 0x3ac   : > { %5926 = vmatprep.subr.bf16.mxu0 %v16729_v46  ;;  %v16798_v46 = vld [vmem:[%s22792_s5 + $0x7e4] ss:$24 sps:$4 sm:$0xff]  }
 0x3ae   : > { %5841 = vmatpush1.bf16.msra.mxu1 %v16724_v49  ;;  %v16801_v49 = vld [vmem:[%s22792_s5 + $0x7ec] ss:$24 sps:$4 sm:$0xff]  }
 0x3af   : > { %5927 = vmatpush1.bf16.msra.mxu0 %v16727_v51  ;;  %5842 = vmatprep.subr.bf16.mxu1 %v16732_v57 }
 0x3b0   : > { %5928 = vmatprep.subr.bf16.mxu0 %v16735_v58 }
 0x3b2   : > { %5843 = vmatpush1.bf16.msra.mxu1 %v16730_v59 }
 0x3b3   : > { %5929 = vmatpush1.bf16.msra.mxu0 %v16733_v60  ;;  %5844 = vmatprep.subr.bf16.mxu1 %v16738_v63 }
 0x3b4   : > { %5930 = vmatprep.subr.bf16.mxu0 %v16741_v3 }
 0x3b6   : > { %5845 = vmatpush1.bf16.msra.mxu1 %v16736_v25 }
 0x3b7   : > { %5931 = vmatpush1.bf16.msra.mxu0 %v16739_v52  ;;  %5846 = vmatprep.subr.bf16.mxu1 %v16744_v4 }
 0x3b8   : > { %5932 = vmatprep.subr.bf16.mxu0 %v16747_v5 }
 0x3ba   : > { %5847 = vmatpush1.bf16.msra.mxu1 %v16742_v33 }
 0x3bb   : > { %5933 = vmatpush1.bf16.msra.mxu0 %v16745_v44  ;;  %5848 = vmatprep.subr.bf16.mxu1 %v16750_v6 }
 0x3bc   : > { %5934 = vmatprep.subr.bf16.mxu0 %v16753_v11 }
 0x3be   : > { %5849 = vmatpush1.bf16.msra.mxu1 %v16748_v7 }
 0x3bf   : > { %5935 = vmatpush1.bf16.msra.mxu0 %v16751_v8  ;;  %5850 = vmatprep.subr.bf16.mxu1 %v16756_v12 }
 0x3c0   : > { %5936 = vmatprep.subr.bf16.mxu0 %v16759_v13 }
 0x3c2   : > { %5851 = vmatpush1.bf16.msra.mxu1 %v16754_v15 }
 0x3c3   : > { %5937 = vmatpush1.bf16.msra.mxu0 %v16757_v17  ;;  %5852 = vmatprep.subr.bf16.mxu1 %v16762_v34  ;;  %v16796_v34 = vld [vmem:[%s22792_s5 + $0x7e0] ss:$24 sps:$4 sm:$0xff]  }
 0x3c4   : > { %5938 = vmatprep.subr.bf16.mxu0 %v16765_v55  ;;  %v16799_v55 = vld [vmem:[%s22792_s5 + $0x7e8] ss:$24 sps:$4 sm:$0xff]  }
 0x3c6   : > { %5853 = vmatpush1.bf16.msra.mxu1 %v16760_v61 }
 0x3c7   : > { %5939 = vmatpush1.bf16.msra.mxu0 %v16763_v18  ;;  %5854 = vmatprep.subr.bf16.mxu1 %v16768_v43  ;;  %v16804_v43 = vld [vmem:[%s22792_s5 + $0x814] ss:$24 sps:$4 sm:$0xff]  }
 0x3c8   : > { %5940 = vmatprep.subr.bf16.mxu0 %v16771_v19  ;;  %v16807_v19 = vld [vmem:[%s22792_s5 + $0x81c] ss:$24 sps:$4 sm:$0xff]  }
 0x3ca   : > { %5855 = vmatpush1.bf16.msra.mxu1 %v16766_v62 }
 0x3cb   : > { %5941 = vmatpush1.bf16.msra.mxu0 %v16769_v26  ;;  %5856 = vmatprep.subr.bf16.mxu1 %v16774_v27  ;;  %v16802_v26 = vld [vmem:[%s22792_s5 + $0x810] ss:$24 sps:$4 sm:$0xff]  }
 0x3cc   : > { %5942 = vmatprep.subr.bf16.mxu0 %v16777_v0  ;;  %v16805_v27 = vld [vmem:[%s22792_s5 + $0x818] ss:$24 sps:$4 sm:$0xff]   ;;  %v16810_v0 = vld [vmem:[%s22792_s5 + $0x844] ss:$24 sps:$4 sm:$0xff]  }
 0x3ce   : > { %5857 = vmatpush1.bf16.msra.mxu1 %v16772_v1  ;;  %v16813_v1 = vld [vmem:[%s22792_s5 + $0x84c] ss:$24 sps:$4 sm:$0xff]  }
 0x3cf   : > { %5943 = vmatpush1.bf16.msra.mxu0 %v16775_v30  ;;  %5858 = vmatprep.subr.bf16.mxu1 %v16780_v22  ;;  %v16808_v30 = vld [vmem:[%s22792_s5 + $0x840] ss:$24 sps:$4 sm:$0xff]  }
 0x3d0   : > { %5944 = vmatprep.subr.bf16.mxu0 %v16783_v37  ;;  %v16811_v22 = vld [vmem:[%s22792_s5 + $0x848] ss:$24 sps:$4 sm:$0xff]   ;;  %v16816_v37 = vld [vmem:[%s22792_s5 + $0x874] ss:$24 sps:$4 sm:$0xff]  }
 0x3d2   : > { %5859 = vmatpush1.bf16.msra.mxu1 %v16778_v56  ;;  %v16819_v56 = vld [vmem:[%s22792_s5 + $0x87c] ss:$24 sps:$4 sm:$0xff]  }
 0x3d3   : > { %5945 = vmatpush1.bf16.msra.mxu0 %v16781_v38  ;;  %5860 = vmatprep.subr.bf16.mxu1 %v16786_v16  ;;  %v16814_v38 = vld [vmem:[%s22792_s5 + $0x870] ss:$24 sps:$4 sm:$0xff]  }
 0x3d4   : > { %5946 = vmatprep.subr.bf16.mxu0 %v16789_v40  ;;  %v16817_v16 = vld [vmem:[%s22792_s5 + $0x878] ss:$24 sps:$4 sm:$0xff]   ;;  %v16822_v40 = vld [vmem:[%s22792_s5 + $0x8a4] ss:$24 sps:$4 sm:$0xff]  }
 0x3d6   : > { %5861 = vmatpush1.bf16.msra.mxu1 %v16784_v20  ;;  %v16825_v20 = vld [vmem:[%s22792_s5 + $0x8ac] ss:$24 sps:$4 sm:$0xff]  }
 0x3d7   : > { %5947 = vmatpush1.bf16.msra.mxu0 %v16787_v50  ;;  %5862 = vmatprep.subr.bf16.mxu1 %v16792_v29  ;;  %v16820_v50 = vld [vmem:[%s22792_s5 + $0x8a0] ss:$24 sps:$4 sm:$0xff]  }
 0x3d8   : > { %5948 = vmatprep.subr.bf16.mxu0 %v16795_v45  ;;  %v16823_v29 = vld [vmem:[%s22792_s5 + $0x8a8] ss:$24 sps:$4 sm:$0xff]  }
 0x3d9   : > { %v16826_v45 = vld [vmem:[%s22792_s5 + $0x8d0] ss:$24 sps:$4 sm:$0xff]  }
 0x3da   : > { %5863 = vmatpush1.bf16.msra.mxu1 %v16790_v41  ;;  %v16828_v41 = vld [vmem:[%s22792_s5 + $0x8d4] ss:$24 sps:$4 sm:$0xff]  }
 0x3db   : > { %5949 = vmatpush1.bf16.msra.mxu0 %v16793_v42  ;;  %5875 = vmatprep.subr.bf16.mxu1 %v16798_v46  ;;  %v16831_v42 = vld [vmem:[%s22792_s5 + $0x8dc] ss:$24 sps:$4 sm:$0xff]   ;;  %v16829_v46 = vld [vmem:[%s22792_s5 + $0x8d8] ss:$24 sps:$4 sm:$0xff]  }
 0x3dc   : > { %5961 = vmatprep.subr.bf16.mxu0 %v16801_v49  ;;  %v16834_v49 = vld [vmem:[%s22792_s5 + $0x904] ss:$24 sps:$4 sm:$0xff]  }
 0x46f   : > { %v4373_v51 = vpop.f32.mrb[44].mxu1 }
 0x470   : > { %v4692_v57 = vmax.f32 %v19861_v31, %v4373_v51  ;;  %v4681_v58 = vpop.f32.mrb[28].mxu0  ;;  %v4375_v59 = vpop.f32.mrb[45].mxu1  ;;  %v16837_v51 = vld [vmem:[%s22792_s5 + $0x90c] ss:$24 sps:$4 sm:$0xff]  }
 0x471   : > { %v4694_v60 = vmax.f32 %v19868_v32, %v4681_v58  ;;  %v4693_v63 = vmax.f32 %v19871_v35, %v4375_v59  ;;  %v4683_v3 = vpop.f32.mrb[29].mxu0  ;;  %v16835_v58 = vld [vmem:[%s22792_s5 + $0x908] ss:$24 sps:$4 sm:$0xff]   ;;  %v16840_v59 = vld [vmem:[%s22792_s5 + $0x934] ss:$24 sps:$4 sm:$0xff]  }
 0x472   : > { %v4695_v25 = vmax.f32 %v19874_v36, %v4683_v3  ;;  %v16841_v3 = vld [vmem:[%s22792_s5 + $0x938] ss:$24 sps:$4 sm:$0xff]  }
 0x473   : > { %v4379_v52 = vpop.f32.mrb[46].mxu1 }
 0x474   : > { %v4696_v4 = vmax.f32 %v19887_v9, %v4379_v52  ;;  %v4687_v5 = vpop.f32.mrb[30].mxu0  ;;  %v4381_v33 = vpop.f32.mrb[47].mxu1  ;;  %v16849_v52 = vld [vmem:[%s22792_s5 + $0x96c] ss:$24 sps:$4 sm:$0xff]  }
 0x475   : > { %v4698_v44 = vmax.f32 %v19894_v14, %v4687_v5  ;;  %v4697_v6 = vmax.f32 %v19896_v28, %v4381_v33  ;;  %v4689_v11 = vpop.f32.mrb[31].mxu0  ;;  %v16847_v5 = vld [vmem:[%s22792_s5 + $0x968] ss:$24 sps:$4 sm:$0xff]   ;;  %v16852_v33 = vld [vmem:[%s22792_s5 + $0x994] ss:$24 sps:$4 sm:$0xff]  }
 0x476   : > { %v20075_v31 = vpack.c.bf16 %v4696_v4, %v4692_v57  ;;  %v4699_v7 = vmax.f32 %v19898_v39, %v4689_v11  ;;  %v16832_v57 = vld [vmem:[%s22792_s5 + $0x900] ss:$24 sps:$4 sm:$0xff]   ;;  %v16850_v11 = vld [vmem:[%s22792_s5 + $0x990] ss:$24 sps:$4 sm:$0xff]  }
 0x477   : > { %v20078_v32 = vpack.c.bf16 %v4698_v44, %v4694_v60  ;;  %v20080_v35 = vpack.c.bf16 %v4697_v6, %v4693_v63  ;;  %v16843_v60 = vld [vmem:[%s22792_s5 + $0x93c] ss:$24 sps:$4 sm:$0xff]   ;;  %v16838_v63 = vld [vmem:[%s22792_s5 + $0x930] ss:$24 sps:$4 sm:$0xff]   ;;  %v16844_v4 = vld [vmem:[%s22792_s5 + $0x960] ss:$24 sps:$4 sm:$0xff]  }
 0x478   : > { %v20082_v8 = vpack.c.bf16 %v4699_v7, %v4695_v25  ;;  %v5020_v36 = vshll.u32 %v20075_v31, 16  ;;  %v5018_v15 = vshrl.u32 %v20075_v31, 16  ;;  %v16846_v25 = vld [vmem:[%s22792_s5 + $0x964] ss:$24 sps:$4 sm:$0xff]   ;;  %v16853_v7 = vld [vmem:[%s22792_s5 + $0x998] ss:$24 sps:$4 sm:$0xff]  }
 0x479   : > { %v5027_v9 = vshll.u32 %v20080_v35, 16  ;;  %v5025_v28 = vshrl.u32 %v20080_v35, 16  ;;  %v16855_v44 = vld [vmem:[%s22792_s5 + $0x99c] ss:$24 sps:$4 sm:$0xff]   ;;  %v5034_v6 = vshll.u32 %v20078_v32, 16 }
 0x47a   : > { %v5022_v12 = vrot.slane %v5020_v36, 1  ;;  %v5041_v14 = vshll.u32 %v20082_v8, 16  ;;  %v5039_v18 = vshrl.u32 %v20082_v8, 16 }
 0x47b   : > { %v5029_v13 = vrot.slane %v5027_v9, 1  ;;  %v5036_v36 = vrot.slane %v5034_v6, 1  ;;  %v16858_v9 = vld [vmem:[%s22792_s5 + $0x4f4] ss:$24 sps:$4 sm:$0xff]   ;;  %v16919_v6 = vld [vmem:[%s22792_s5 + $0x1e8] ss:$24 sps:$4 sm:$0xff]  }
 0x47c   : > { %v5043_v17 = vrot.slane %v5041_v14, 1  ;;  %v20097_v61 = vor.u32 %v5022_v12, %v5018_v15  ;;  %v16861_v12 = vld [vmem:[%s22792_s5 + $0xc] ss:$24 sps:$4 sm:$0xff]   ;;  %v5032_v14 = vshrl.u32 %v20078_v32, 16  ;;  %v16859_v15 = vld [vmem:[%s22792_s5 + $0x8] ss:$24 sps:$4 sm:$0xff]  }
 0x47d   : > { %v20089_v39 = vor.u32 %v5029_v13, %v5025_v28  ;;  %v16856_v28 = vld [vmem:[%s22792_s5 + $0x4f0] ss:$24 sps:$4 sm:$0xff]  }
 0x47e   : > { %v20110_v62 = vor.u32 %v5043_v17, %v5039_v18  ;;  %v20229_v13 = vor.u32 %v5036_v36, %v5032_v14  ;;  %v16864_v17 = vld [vmem:[%s22792_s5 + $0x524] ss:$24 sps:$4 sm:$0xff]   ;;  %v16865_v18 = vld [vmem:[%s22792_s5 + $0x38] ss:$24 sps:$4 sm:$0xff]  }
 0x47f   : > { %5864 = vmatprep.mubr.bf16.mxu1 %v20089_v39  ;;  %5950 = vmatprep.mubr.bf16.mxu0 %v20089_v39  ;;  %v16922_v36 = vld [vmem:[%s22792_s5 + $0x700] ss:$24 sps:$4 sm:$0xff]   ;;  %v16933_v14 = vld [vmem:[%s22792_s5 + $0x24c] ss:$24 sps:$4 sm:$0xff]  }
 0x480   : > { %5865 = vmatmul.mubr.bf16.vlgmr.msra.gmra.mrb[48].mxu1 %v20097_v61  ;;  %5951 = vmatmul.mubr.bf16.vlgmr.msra.gmra.mrb[32].mxu0 %v20097_v61 }
 0x481   : > { %5876 = vmatpush1.bf16.msra.mxu1 %v16796_v34  ;;  %5962 = vmatpush1.bf16.msra.mxu0 %v16799_v55  ;;  %v16867_v34 = vld [vmem:[%s22792_s5 + $0x3c] ss:$24 sps:$4 sm:$0xff]   ;;  %v16862_v55 = vld [vmem:[%s22792_s5 + $0x520] ss:$24 sps:$4 sm:$0xff]  }
 0x482   : > { %12487 = vmatprep.mubr.msk.bf16.mxu1 %vm5828_vm9, %v20110_v62  ;;  %12488 = vmatprep.mubr.msk.bf16.mxu0 %vm5828_vm9, %v20110_v62 }
 0x483   : > { %5877 = vmatprep.subr.bf16.mxu1 %v16804_v43  ;;  %5963 = vmatprep.subr.bf16.mxu0 %v16807_v19  ;;  %v16870_v43 = vld [vmem:[%s22792_s5 + $0x554] ss:$24 sps:$4 sm:$0xff]   ;;  %v16868_v19 = vld [vmem:[%s22792_s5 + $0x550] ss:$24 sps:$4 sm:$0xff]  }
 0x485   : > { %5878 = vmatpush1.bf16.msra.mxu1 %v16802_v26  ;;  %5964 = vmatpush1.bf16.msra.mxu0 %v16805_v27  ;;  %v16871_v26 = vld [vmem:[%s22792_s5 + $0x68] ss:$24 sps:$4 sm:$0xff]   ;;  %v16876_v27 = vld [vmem:[%s22792_s5 + $0x584] ss:$24 sps:$4 sm:$0xff]  }
 0x486   : > { %5879 = vmatprep.subr.bf16.mxu1 %v16810_v0  ;;  %5965 = vmatprep.subr.bf16.mxu0 %v16813_v1  ;;  %v16879_v0 = vld [vmem:[%s22792_s5 + $0x9c] ss:$24 sps:$4 sm:$0xff]   ;;  %v16874_v1 = vld [vmem:[%s22792_s5 + $0x580] ss:$24 sps:$4 sm:$0xff]  }
 0x489   : > { %5880 = vmatpush1.bf16.msra.mxu1 %v16808_v30  ;;  %5966 = vmatpush1.bf16.msra.mxu0 %v16811_v22  ;;  %v16877_v30 = vld [vmem:[%s22792_s5 + $0x98] ss:$24 sps:$4 sm:$0xff]   ;;  %v16882_v22 = vld [vmem:[%s22792_s5 + $0x5b4] ss:$24 sps:$4 sm:$0xff]  }
 0x48a   : > { %5881 = vmatprep.subr.bf16.mxu1 %v16816_v37  ;;  %5967 = vmatprep.subr.bf16.mxu0 %v16819_v56  ;;  %v16885_v37 = vld [vmem:[%s22792_s5 + $0xcc] ss:$24 sps:$4 sm:$0xff]   ;;  %v16880_v56 = vld [vmem:[%s22792_s5 + $0x5b0] ss:$24 sps:$4 sm:$0xff]  }
 0x48d   : > { %5882 = vmatpush1.bf16.msra.mxu1 %v16814_v38  ;;  %5968 = vmatpush1.bf16.msra.mxu0 %v16817_v16  ;;  %v16883_v38 = vld [vmem:[%s22792_s5 + $0xc8] ss:$24 sps:$4 sm:$0xff]   ;;  %v16888_v16 = vld [vmem:[%s22792_s5 + $0x5e4] ss:$24 sps:$4 sm:$0xff]  }
 0x48e   : > { %5883 = vmatprep.subr.bf16.mxu1 %v16822_v40  ;;  %5969 = vmatprep.subr.bf16.mxu0 %v16825_v20  ;;  %v16891_v40 = vld [vmem:[%s22792_s5 + $0xfc] ss:$24 sps:$4 sm:$0xff]   ;;  %v16886_v20 = vld [vmem:[%s22792_s5 + $0x5e0] ss:$24 sps:$4 sm:$0xff]  }
 0x491   : > { %5884 = vmatpush1.bf16.msra.mxu1 %v16820_v50  ;;  %5970 = vmatpush1.bf16.msra.mxu0 %v16823_v29  ;;  %v16889_v50 = vld [vmem:[%s22792_s5 + $0xf8] ss:$24 sps:$4 sm:$0xff]   ;;  %v16894_v29 = vld [vmem:[%s22792_s5 + $0x614] ss:$24 sps:$4 sm:$0xff]  }
 0x492   : > { %5885 = vmatprep.subr.bf16.mxu1 %v16828_v41  ;;  %5971 = vmatprep.subr.bf16.mxu0 %v16831_v42  ;;  %v16897_v41 = vld [vmem:[%s22792_s5 + $0x12c] ss:$24 sps:$4 sm:$0xff]   ;;  %v16892_v42 = vld [vmem:[%s22792_s5 + $0x610] ss:$24 sps:$4 sm:$0xff]  }
 0x495   : > { %5886 = vmatpush1.bf16.msra.mxu1 %v16826_v45  ;;  %5972 = vmatpush1.bf16.msra.mxu0 %v16829_v46  ;;  %v16895_v45 = vld [vmem:[%s22792_s5 + $0x128] ss:$24 sps:$4 sm:$0xff]   ;;  %v16900_v46 = vld [vmem:[%s22792_s5 + $0x644] ss:$24 sps:$4 sm:$0xff]  }
 0x496   : > { %5887 = vmatprep.subr.bf16.mxu1 %v16834_v49  ;;  %5973 = vmatprep.subr.bf16.mxu0 %v16837_v51  ;;  %v16903_v49 = vld [vmem:[%s22792_s5 + $0x15c] ss:$24 sps:$4 sm:$0xff]   ;;  %v16898_v51 = vld [vmem:[%s22792_s5 + $0x640] ss:$24 sps:$4 sm:$0xff]  }
 0x499   : > { %5888 = vmatpush1.bf16.msra.mxu1 %v16832_v57  ;;  %5974 = vmatpush1.bf16.msra.mxu0 %v16835_v58  ;;  %v16901_v57 = vld [vmem:[%s22792_s5 + $0x158] ss:$24 sps:$4 sm:$0xff]   ;;  %v16906_v58 = vld [vmem:[%s22792_s5 + $0x674] ss:$24 sps:$4 sm:$0xff]  }
 0x49a   : > { %5889 = vmatprep.subr.bf16.mxu1 %v16840_v59  ;;  %5975 = vmatprep.subr.bf16.mxu0 %v16843_v60  ;;  %v16909_v59 = vld [vmem:[%s22792_s5 + $0x18c] ss:$24 sps:$4 sm:$0xff]   ;;  %v16904_v60 = vld [vmem:[%s22792_s5 + $0x670] ss:$24 sps:$4 sm:$0xff]  }
 0x49d   : > { %5890 = vmatpush1.bf16.msra.mxu1 %v16838_v63  ;;  %5976 = vmatpush1.bf16.msra.mxu0 %v16841_v3  ;;  %v16907_v63 = vld [vmem:[%s22792_s5 + $0x188] ss:$24 sps:$4 sm:$0xff]   ;;  %v16912_v3 = vld [vmem:[%s22792_s5 + $0x6a4] ss:$24 sps:$4 sm:$0xff]  }
 0x49e   : > { %5891 = vmatprep.subr.bf16.mxu1 %v16846_v25  ;;  %5977 = vmatprep.subr.bf16.mxu0 %v16849_v52  ;;  %v16915_v25 = vld [vmem:[%s22792_s5 + $0x1bc] ss:$24 sps:$4 sm:$0xff]   ;;  %v16910_v52 = vld [vmem:[%s22792_s5 + $0x6a0] ss:$24 sps:$4 sm:$0xff]  }
 0x4a1   : > { %5892 = vmatpush1.bf16.msra.mxu1 %v16844_v4  ;;  %5978 = vmatpush1.bf16.msra.mxu0 %v16847_v5  ;;  %v16913_v4 = vld [vmem:[%s22792_s5 + $0x1b8] ss:$24 sps:$4 sm:$0xff]   ;;  %v16918_v5 = vld [vmem:[%s22792_s5 + $0x6d4] ss:$24 sps:$4 sm:$0xff]  }
 0x4a2   : > { %5893 = vmatprep.subr.bf16.mxu1 %v16852_v33  ;;  %5979 = vmatprep.subr.bf16.mxu0 %v16855_v44  ;;  %v16921_v33 = vld [vmem:[%s22792_s5 + $0x1ec] ss:$24 sps:$4 sm:$0xff]   ;;  %v16916_v44 = vld [vmem:[%s22792_s5 + $0x6d0] ss:$24 sps:$4 sm:$0xff]  }
 0x4a5   : > { %5894 = vmatpush1.bf16.msra.mxu1 %v16850_v11  ;;  %5980 = vmatpush1.bf16.msra.mxu0 %v16853_v7  ;;  %v16924_v11 = vld [vmem:[%s22792_s5 + $0x704] ss:$24 sps:$4 sm:$0xff]  }
 0x4a6   : > { %6004 = vmatprep.subr.bf16.mxu1 %v16858_v9  ;;  %6958 = vmatprep.subr.bf16.mxu0 %v16861_v12  ;;  %v16927_v7 = vld [vmem:[%s22792_s5 + $0x21c] ss:$24 sps:$4 sm:$0xff]   ;;  %v16925_v9 = vld [vmem:[%s22792_s5 + $0x218] ss:$24 sps:$4 sm:$0xff]  }
 0x4a7   : > { %v16930_v12 = vld [vmem:[%s22792_s5 + $0x734] ss:$24 sps:$4 sm:$0xff]  }
 0x4a8   : > { %5908 = vmatmul.mubr.bf16.vlgmr.msra.gmra.mrb[48].mxu1 %v20229_v13  ;;  %5994 = vmatmul.mubr.bf16.vlgmr.msra.gmra.mrb[32].mxu0 %v20229_v13 }
 0x4a9   : > { %6005 = vmatpush1.bf16.msra.mxu1 %v16856_v28  ;;  %6036 = vmatprep.mubr.bf16.mxu1 %v20089_v39  ;;  %v16873_v39 = vld [vmem:[%s22792_s5 + $0x6c] ss:$24 sps:$4 sm:$0xff]   ;;  %v16928_v28 = vld [vmem:[%s22792_s5 + $0x730] ss:$24 sps:$4 sm:$0xff]  }
 0x4aa   : > { %6959 = vmatpush1.bf16.msra.mxu0 %v16859_v15  ;;  %6990 = vmatprep.mubr.bf16.mxu0 %v20080_v35  ;;  %v16931_v15 = vld [vmem:[%s22792_s5 + $0x248] ss:$24 sps:$4 sm:$0xff]  }
 0x4ab   : > { %6006 = vmatprep.subr.bf16.mxu1 %v16864_v17  ;;  %6960 = vmatprep.subr.bf16.mxu0 %v16867_v34  ;;  %v16936_v17 = vld [vmem:[%s22792_s5 + $0x764] ss:$24 sps:$4 sm:$0xff]  }
 0x4ac   : > { %v16939_v34 = vld [vmem:[%s22792_s5 + $0x27c] ss:$24 sps:$4 sm:$0xff]  }
 0x4ad   : > { %6007 = vmatpush1.bf16.msra.mxu1 %v16862_v55  ;;  %v16934_v55 = vld [vmem:[%s22792_s5 + $0x760] ss:$24 sps:$4 sm:$0xff]  }
 0x4ae   : > { %6961 = vmatpush1.bf16.msra.mxu0 %v16865_v18  ;;  %6008 = vmatprep.subr.bf16.mxu1 %v16870_v43  ;;  %v16937_v18 = vld [vmem:[%s22792_s5 + $0x278] ss:$24 sps:$4 sm:$0xff]   ;;  %v16942_v43 = vld [vmem:[%s22792_s5 + $0x794] ss:$24 sps:$4 sm:$0xff]  }
 0x4af   : > { %6962 = vmatprep.subr.bf16.mxu0 %v16873_v39  ;;  %v16945_v39 = vld [vmem:[%s22792_s5 + $0x2ac] ss:$24 sps:$4 sm:$0xff]  }
 0x4b1   : > { %6009 = vmatpush1.bf16.msra.mxu1 %v16868_v19  ;;  %v16940_v19 = vld [vmem:[%s22792_s5 + $0x790] ss:$24 sps:$4 sm:$0xff]  }
 0x4b2   : > { %6963 = vmatpush1.bf16.msra.mxu0 %v16871_v26  ;;  %6010 = vmatprep.subr.bf16.mxu1 %v16876_v27  ;;  %v16943_v26 = vld [vmem:[%s22792_s5 + $0x2a8] ss:$24 sps:$4 sm:$0xff]   ;;  %v16948_v27 = vld [vmem:[%s22792_s5 + $0x7c4] ss:$24 sps:$4 sm:$0xff]  }
 0x4b3   : > { %6964 = vmatprep.subr.bf16.mxu0 %v16879_v0  ;;  %v16951_v0 = vld [vmem:[%s22792_s5 + $0x2dc] ss:$24 sps:$4 sm:$0xff]  }
 0x4b5   : > { %6011 = vmatpush1.bf16.msra.mxu1 %v16874_v1  ;;  %v16946_v1 = vld [vmem:[%s22792_s5 + $0x7c0] ss:$24 sps:$4 sm:$0xff]  }
 0x4b6   : > { %6965 = vmatpush1.bf16.msra.mxu0 %v16877_v30  ;;  %6012 = vmatprep.subr.bf16.mxu1 %v16882_v22  ;;  %v16949_v30 = vld [vmem:[%s22792_s5 + $0x2d8] ss:$24 sps:$4 sm:$0xff]   ;;  %v16954_v22 = vld [vmem:[%s22792_s5 + $0x7f4] ss:$24 sps:$4 sm:$0xff]  }
 0x4b7   : > { %6966 = vmatprep.subr.bf16.mxu0 %v16885_v37  ;;  %v16957_v37 = vld [vmem:[%s22792_s5 + $0x30c] ss:$24 sps:$4 sm:$0xff]  }
 0x4b9   : > { %6013 = vmatpush1.bf16.msra.mxu1 %v16880_v56  ;;  %v16952_v56 = vld [vmem:[%s22792_s5 + $0x7f0] ss:$24 sps:$4 sm:$0xff]  }
 0x4ba   : > { %6967 = vmatpush1.bf16.msra.mxu0 %v16883_v38  ;;  %6014 = vmatprep.subr.bf16.mxu1 %v16888_v16  ;;  %v16955_v38 = vld [vmem:[%s22792_s5 + $0x308] ss:$24 sps:$4 sm:$0xff]   ;;  %v16960_v16 = vld [vmem:[%s22792_s5 + $0x824] ss:$24 sps:$4 sm:$0xff]  }
 0x4bb   : > { %6968 = vmatprep.subr.bf16.mxu0 %v16891_v40  ;;  %v16963_v40 = vld [vmem:[%s22792_s5 + $0x33c] ss:$24 sps:$4 sm:$0xff]  }
 0x4bd   : > { %6015 = vmatpush1.bf16.msra.mxu1 %v16886_v20  ;;  %v16958_v20 = vld [vmem:[%s22792_s5 + $0x820] ss:$24 sps:$4 sm:$0xff]  }
 0x4be   : > { %6969 = vmatpush1.bf16.msra.mxu0 %v16889_v50  ;;  %6016 = vmatprep.subr.bf16.mxu1 %v16894_v29  ;;  %v16961_v50 = vld [vmem:[%s22792_s5 + $0x338] ss:$24 sps:$4 sm:$0xff]   ;;  %v16969_v29 = vld [vmem:[%s22792_s5 + $0x36c] ss:$24 sps:$4 sm:$0xff]  }
 0x4bf   : > { %6970 = vmatprep.subr.bf16.mxu0 %v16897_v41  ;;  %v16967_v41 = vld [vmem:[%s22792_s5 + $0x368] ss:$24 sps:$4 sm:$0xff]  }
 0x4c1   : > { %6017 = vmatpush1.bf16.msra.mxu1 %v16892_v42  ;;  %v16972_v42 = vld [vmem:[%s22792_s5 + $0x884] ss:$24 sps:$4 sm:$0xff]  }
 0x4c2   : > { %6971 = vmatpush1.bf16.msra.mxu0 %v16895_v45  ;;  %6018 = vmatprep.subr.bf16.mxu1 %v16900_v46  ;;  %v16975_v45 = vld [vmem:[%s22792_s5 + $0x39c] ss:$24 sps:$4 sm:$0xff]   ;;  %v16970_v46 = vld [vmem:[%s22792_s5 + $0x880] ss:$24 sps:$4 sm:$0xff]  }
 0x4c3   : > { %6972 = vmatprep.subr.bf16.mxu0 %v16903_v49  ;;  %v16973_v49 = vld [vmem:[%s22792_s5 + $0x398] ss:$24 sps:$4 sm:$0xff]  }
 0x4c5   : > { %6019 = vmatpush1.bf16.msra.mxu1 %v16898_v51  ;;  %v16978_v51 = vld [vmem:[%s22792_s5 + $0x8b4] ss:$24 sps:$4 sm:$0xff]  }
 0x4c6   : > { %6973 = vmatpush1.bf16.msra.mxu0 %v16901_v57  ;;  %6020 = vmatprep.subr.bf16.mxu1 %v16906_v58  ;;  %v16981_v57 = vld [vmem:[%s22792_s5 + $0x3cc] ss:$24 sps:$4 sm:$0xff]   ;;  %v16976_v58 = vld [vmem:[%s22792_s5 + $0x8b0] ss:$24 sps:$4 sm:$0xff]  }
 0x4c7   : > { %6974 = vmatprep.subr.bf16.mxu0 %v16909_v59  ;;  %v16979_v59 = vld [vmem:[%s22792_s5 + $0x3c8] ss:$24 sps:$4 sm:$0xff]  }
 0x4c9   : > { %6021 = vmatpush1.bf16.msra.mxu1 %v16904_v60  ;;  %v16984_v60 = vld [vmem:[%s22792_s5 + $0x8e4] ss:$24 sps:$4 sm:$0xff]  }
 0x4ca   : > { %6975 = vmatpush1.bf16.msra.mxu0 %v16907_v63  ;;  %6022 = vmatprep.subr.bf16.mxu1 %v16912_v3  ;;  %v16987_v63 = vld [vmem:[%s22792_s5 + $0x3fc] ss:$24 sps:$4 sm:$0xff]   ;;  %v16982_v3 = vld [vmem:[%s22792_s5 + $0x8e0] ss:$24 sps:$4 sm:$0xff]  }
 0x4cb   : > { %6976 = vmatprep.subr.bf16.mxu0 %v16915_v25  ;;  %v16985_v25 = vld [vmem:[%s22792_s5 + $0x3f8] ss:$24 sps:$4 sm:$0xff]  }
 0x4cd   : > { %6023 = vmatpush1.bf16.msra.mxu1 %v16910_v52  ;;  %v16990_v52 = vld [vmem:[%s22792_s5 + $0x914] ss:$24 sps:$4 sm:$0xff]  }
 0x4ce   : > { %6977 = vmatpush1.bf16.msra.mxu0 %v16913_v4  ;;  %6024 = vmatprep.subr.bf16.mxu1 %v16918_v5  ;;  %v16993_v4 = vld [vmem:[%s22792_s5 + $0x42c] ss:$24 sps:$4 sm:$0xff]   ;;  %v16988_v5 = vld [vmem:[%s22792_s5 + $0x910] ss:$24 sps:$4 sm:$0xff]  }
 0x4cf   : > { %6978 = vmatprep.subr.bf16.mxu0 %v16921_v33  ;;  %v16991_v33 = vld [vmem:[%s22792_s5 + $0x428] ss:$24 sps:$4 sm:$0xff]  }
 0x4d1   : > { %6025 = vmatpush1.bf16.msra.mxu1 %v16916_v44  ;;  %v16996_v44 = vld [vmem:[%s22792_s5 + $0x944] ss:$24 sps:$4 sm:$0xff]  }
 0x4d2   : > { %6979 = vmatpush1.bf16.msra.mxu0 %v16919_v6  ;;  %6026 = vmatprep.subr.bf16.mxu1 %v16924_v11  ;;  %v16999_v6 = vld [vmem:[%s22792_s5 + $0x45c] ss:$24 sps:$4 sm:$0xff]   ;;  %v16994_v11 = vld [vmem:[%s22792_s5 + $0x940] ss:$24 sps:$4 sm:$0xff]  }
 0x4d3   : > { %6980 = vmatprep.subr.bf16.mxu0 %v16927_v7  ;;  %v16997_v7 = vld [vmem:[%s22792_s5 + $0x458] ss:$24 sps:$4 sm:$0xff]  }
 0x4d5   : > { %6027 = vmatpush1.bf16.msra.mxu1 %v16922_v36  ;;  %v17002_v36 = vld [vmem:[%s22792_s5 + $0x974] ss:$24 sps:$4 sm:$0xff]  }
 0x4d6   : > { %6981 = vmatpush1.bf16.msra.mxu0 %v16925_v9  ;;  %6028 = vmatprep.subr.bf16.mxu1 %v16930_v12  ;;  %v17005_v9 = vld [vmem:[%s22792_s5 + $0x48c] ss:$24 sps:$4 sm:$0xff]   ;;  %v17000_v12 = vld [vmem:[%s22792_s5 + $0x970] ss:$24 sps:$4 sm:$0xff]  }
 0x4d7   : > { %6982 = vmatprep.subr.bf16.mxu0 %v16933_v14  ;;  %v17003_v14 = vld [vmem:[%s22792_s5 + $0x488] ss:$24 sps:$4 sm:$0xff]  }
 0x4d9   : > { %6029 = vmatpush1.bf16.msra.mxu1 %v16928_v28  ;;  %v17008_v28 = vld [vmem:[%s22792_s5 + $0x9a4] ss:$24 sps:$4 sm:$0xff]  }
 0x4da   : > { %6983 = vmatpush1.bf16.msra.mxu0 %v16931_v15  ;;  %6030 = vmatprep.subr.bf16.mxu1 %v16936_v17  ;;  %v17011_v15 = vld [vmem:[%s22792_s5 + $0x4bc] ss:$24 sps:$4 sm:$0xff]   ;;  %v17006_v17 = vld [vmem:[%s22792_s5 + $0x9a0] ss:$24 sps:$4 sm:$0xff]  }
 0x4db   : > { %6984 = vmatprep.subr.bf16.mxu0 %v16939_v34  ;;  %v17009_v34 = vld [vmem:[%s22792_s5 + $0x4b8] ss:$24 sps:$4 sm:$0xff]  }
 0x4dd   : > { %6031 = vmatpush1.bf16.msra.mxu1 %v16934_v55  ;;  %v17014_v55 = vld [vmem:[%s22792_s5 + $0x4] ss:$24 sps:$4 sm:$0xff]  }
 0x4de   : > { %6985 = vmatpush1.bf16.msra.mxu0 %v16937_v18  ;;  %6032 = vmatprep.subr.bf16.mxu1 %v16942_v43  ;;  %v17017_v18 = vld [vmem:[%s22792_s5 + $0x9cc] ss:$24 sps:$4 sm:$0xff]   ;;  %v17012_v43 = vld [vmem:[%s22792_s5] ss:$24 sps:$4 sm:$0xff]  }
 0x4df   : > { %6986 = vmatprep.subr.bf16.mxu0 %v16945_v39  ;;  %v17015_v39 = vld [vmem:[%s22792_s5 + $0x9c8] ss:$24 sps:$4 sm:$0xff]  }
 0x4e1   : > { %6033 = vmatpush1.bf16.msra.mxu1 %v16940_v19  ;;  %v17020_v19 = vld [vmem:[%s22792_s5 + $0x34] ss:$24 sps:$4 sm:$0xff]  }
 0x4e2   : > { %6987 = vmatpush1.bf16.msra.mxu0 %v16943_v26  ;;  %6034 = vmatprep.subr.bf16.mxu1 %v16948_v27  ;;  %v17023_v26 = vld [vmem:[%s22792_s5 + $0x9fc] ss:$24 sps:$4 sm:$0xff]   ;;  %v20565_v27 = vrot.slane %v20080_v35, 1 }
 0x4e3   : > { %6988 = vmatprep.subr.bf16.mxu0 %v16951_v0  ;;  %v17018_v0 = vld [vmem:[%s22792_s5 + $0x30] ss:$24 sps:$4 sm:$0xff]  }
 0x4e5   : > { %6035 = vmatpush1.bf16.msra.mxu1 %v16946_v1  ;;  %v17026_v1 = vld [vmem:[%s22792_s5 + $0x64] ss:$24 sps:$4 sm:$0xff]  }
 0x4e6   : > { %6989 = vmatpush1.bf16.msra.mxu0 %v16949_v30  ;;  %6047 = vmatprep.subr.bf16.mxu1 %v16954_v22  ;;  %v17029_v30 = vld [vmem:[%s22792_s5 + $0xa2c] ss:$24 sps:$4 sm:$0xff]   ;;  %v17024_v22 = vld [vmem:[%s22792_s5 + $0x60] ss:$24 sps:$4 sm:$0xff]  }
 0x4e7   : > { %7001 = vmatprep.subr.bf16.mxu0 %v16957_v37  ;;  %v17027_v37 = vld [vmem:[%s22792_s5 + $0xa28] ss:$24 sps:$4 sm:$0xff]  }
 0x4e8   : > { %6037 = vmatmul.mubr.bf16.vlgmr.msra.gmra.mrb[52].mxu1 %v20097_v61  ;;  %v16966_v61 = vld [vmem:[%s22792_s5 + $0x854] ss:$24 sps:$4 sm:$0xff]  }
 0x4e9   : > { %6991 = vmatmul.mubr.bf16.vlgmr.msra.gmra.mrb[32].mxu0 %v20075_v31  ;;  %6048 = vmatpush1.bf16.msra.mxu1 %v16952_v56  ;;  %v17032_v56 = vld [vmem:[%s22792_s5 + $0x94] ss:$24 sps:$4 sm:$0xff]  }
 0x4ea   : > { %12489 = vmatprep.mubr.msk.bf16.mxu1 %vm5828_vm9, %v20110_v62  ;;  %7002 = vmatpush1.bf16.msra.mxu0 %v16955_v38  ;;  %v16964_v62 = vld [vmem:[%s22792_s5 + $0x850] ss:$24 sps:$4 sm:$0xff]   ;;  %v17035_v38 = vld [vmem:[%s22792_s5 + $0xa5c] ss:$24 sps:$4 sm:$0xff]  }
 0x4eb   : > { %12647 = vmatprep.mubr.msk.bf16.mxu0 %vm5828_vm9, %v20082_v8  ;;  %6049 = vmatprep.subr.bf16.mxu1 %v16960_v16  ;;  %v17030_v16 = vld [vmem:[%s22792_s5 + $0x90] ss:$24 sps:$4 sm:$0xff]  }
 0x4ec   : > { %7003 = vmatprep.subr.bf16.mxu0 %v16963_v40  ;;  %v17033_v40 = vld [vmem:[%s22792_s5 + $0xa58] ss:$24 sps:$4 sm:$0xff]  }
 0x4ed   : > { %6050 = vmatpush1.bf16.msra.mxu1 %v16958_v20  ;;  %v17038_v20 = vld [vmem:[%s22792_s5 + $0xc4] ss:$24 sps:$4 sm:$0xff]  }
 0x4ee   : > { %7004 = vmatpush1.bf16.msra.mxu0 %v16961_v50  ;;  %6051 = vmatprep.subr.bf16.mxu1 %v16966_v61  ;;  %v17041_v50 = vld [vmem:[%s22792_s5 + $0xa8c] ss:$24 sps:$4 sm:$0xff]   ;;  %v17036_v61 = vld [vmem:[%s22792_s5 + $0xc0] ss:$24 sps:$4 sm:$0xff]  }
 0x4ef   : > { %7005 = vmatprep.subr.bf16.mxu0 %v16969_v29  ;;  %v17039_v29 = vld [vmem:[%s22792_s5 + $0xa88] ss:$24 sps:$4 sm:$0xff]  }
 0x4f1   : > { %6052 = vmatpush1.bf16.msra.mxu1 %v16964_v62  ;;  %v17044_v62 = vld [vmem:[%s22792_s5 + $0xf4] ss:$24 sps:$4 sm:$0xff]  }
 0x4f2   : > { %7006 = vmatpush1.bf16.msra.mxu0 %v16967_v41  ;;  %6053 = vmatprep.subr.bf16.mxu1 %v16972_v42  ;;  %v17047_v41 = vld [vmem:[%s22792_s5 + $0xabc] ss:$24 sps:$4 sm:$0xff]   ;;  %v17042_v42 = vld [vmem:[%s22792_s5 + $0xf0] ss:$24 sps:$4 sm:$0xff]  }
 0x4f3   : > { %7007 = vmatprep.subr.bf16.mxu0 %v16975_v45  ;;  %v17045_v45 = vld [vmem:[%s22792_s5 + $0xab8] ss:$24 sps:$4 sm:$0xff]  }
 0x4f5   : > { %6054 = vmatpush1.bf16.msra.mxu1 %v16970_v46  ;;  %v17050_v46 = vld [vmem:[%s22792_s5 + $0x124] ss:$24 sps:$4 sm:$0xff]  }
 0x4f6   : > { %7008 = vmatpush1.bf16.msra.mxu0 %v16973_v49  ;;  %6055 = vmatprep.subr.bf16.mxu1 %v16978_v51  ;;  %v17053_v49 = vld [vmem:[%s22792_s5 + $0xaec] ss:$24 sps:$4 sm:$0xff]   ;;  %v17048_v51 = vld [vmem:[%s22792_s5 + $0x120] ss:$24 sps:$4 sm:$0xff]  }
 0x4f7   : > { %7009 = vmatprep.subr.bf16.mxu0 %v16981_v57  ;;  %v17051_v57 = vld [vmem:[%s22792_s5 + $0xae8] ss:$24 sps:$4 sm:$0xff]  }
 0x4f9   : > { %6056 = vmatpush1.bf16.msra.mxu1 %v16976_v58  ;;  %v17056_v58 = vld [vmem:[%s22792_s5 + $0x154] ss:$24 sps:$4 sm:$0xff]  }
 0x4fa   : > { %7010 = vmatpush1.bf16.msra.mxu0 %v16979_v59  ;;  %6057 = vmatprep.subr.bf16.mxu1 %v16984_v60  ;;  %v17059_v59 = vld [vmem:[%s22792_s5 + $0xb1c] ss:$24 sps:$4 sm:$0xff]   ;;  %v17054_v60 = vld [vmem:[%s22792_s5 + $0x150] ss:$24 sps:$4 sm:$0xff]  }
 0x4fb   : > { %7011 = vmatprep.subr.bf16.mxu0 %v16987_v63  ;;  %v17057_v63 = vld [vmem:[%s22792_s5 + $0xb18] ss:$24 sps:$4 sm:$0xff]  }
 0x4fd   : > { %6058 = vmatpush1.bf16.msra.mxu1 %v16982_v3  ;;  %v17062_v3 = vld [vmem:[%s22792_s5 + $0x184] ss:$24 sps:$4 sm:$0xff]  }
 0x4fe   : > { %7012 = vmatpush1.bf16.msra.mxu0 %v16985_v25  ;;  %6059 = vmatprep.subr.bf16.mxu1 %v16990_v52  ;;  %v17065_v25 = vld [vmem:[%s22792_s5 + $0xb4c] ss:$24 sps:$4 sm:$0xff]   ;;  %v17060_v52 = vld [vmem:[%s22792_s5 + $0x180] ss:$24 sps:$4 sm:$0xff]  }
 0x4ff   : > { %7013 = vmatprep.subr.bf16.mxu0 %v16993_v4  ;;  %v17063_v4 = vld [vmem:[%s22792_s5 + $0xb48] ss:$24 sps:$4 sm:$0xff]  }
 0x501   : > { %6060 = vmatpush1.bf16.msra.mxu1 %v16988_v5  ;;  %v17068_v5 = vld [vmem:[%s22792_s5 + $0x1b4] ss:$24 sps:$4 sm:$0xff]  }
 0x502   : > { %7014 = vmatpush1.bf16.msra.mxu0 %v16991_v33  ;;  %6061 = vmatprep.subr.bf16.mxu1 %v16996_v44  ;;  %v17071_v33 = vld [vmem:[%s22792_s5 + $0xb7c] ss:$24 sps:$4 sm:$0xff]   ;;  %v17066_v44 = vld [vmem:[%s22792_s5 + $0x1b0] ss:$24 sps:$4 sm:$0xff]  }
 0x503   : > { %7015 = vmatprep.subr.bf16.mxu0 %v16999_v6  ;;  %v17069_v6 = vld [vmem:[%s22792_s5 + $0xb78] ss:$24 sps:$4 sm:$0xff]  }
 0x505   : > { %6062 = vmatpush1.bf16.msra.mxu1 %v16994_v11  ;;  %v17074_v11 = vld [vmem:[%s22792_s5 + $0x1e4] ss:$24 sps:$4 sm:$0xff]  }
 0x506   : > { %7016 = vmatpush1.bf16.msra.mxu0 %v16997_v7  ;;  %6063 = vmatprep.subr.bf16.mxu1 %v17002_v36  ;;  %v17077_v7 = vld [vmem:[%s22792_s5 + $0xbac] ss:$24 sps:$4 sm:$0xff]   ;;  %v17072_v36 = vld [vmem:[%s22792_s5 + $0x1e0] ss:$24 sps:$4 sm:$0xff]  }
 0x507   : > { %7017 = vmatprep.subr.bf16.mxu0 %v17005_v9  ;;  %v17075_v9 = vld [vmem:[%s22792_s5 + $0xba8] ss:$24 sps:$4 sm:$0xff]  }
 0x509   : > { %6064 = vmatpush1.bf16.msra.mxu1 %v17000_v12  ;;  %v17080_v12 = vld [vmem:[%s22792_s5 + $0x214] ss:$24 sps:$4 sm:$0xff]  }
 0x50a   : > { %7018 = vmatpush1.bf16.msra.mxu0 %v17003_v14  ;;  %6065 = vmatprep.subr.bf16.mxu1 %v17008_v28  ;;  %v17083_v14 = vld [vmem:[%s22792_s5 + $0xbdc] ss:$24 sps:$4 sm:$0xff]   ;;  %v17078_v28 = vld [vmem:[%s22792_s5 + $0x210] ss:$24 sps:$4 sm:$0xff]  }
 0x50b   : > { %7019 = vmatprep.subr.bf16.mxu0 %v17011_v15  ;;  %v17081_v15 = vld [vmem:[%s22792_s5 + $0xbd8] ss:$24 sps:$4 sm:$0xff]  }
 0x50d   : > { %6066 = vmatpush1.bf16.msra.mxu1 %v17006_v17  ;;  %v17086_v17 = vld [vmem:[%s22792_s5 + $0x244] ss:$24 sps:$4 sm:$0xff]  }
 0x50e   : > { %7020 = vmatpush1.bf16.msra.mxu0 %v17009_v34  ;;  %6872 = vmatprep.subr.bf16.mxu1 %v17014_v55  ;;  %v17089_v34 = vld [vmem:[%s22792_s5 + $0xc0c] ss:$24 sps:$4 sm:$0xff]   ;;  %v17084_v55 = vld [vmem:[%s22792_s5 + $0x240] ss:$24 sps:$4 sm:$0xff]  }
 0x50f   : > { %8167 = vmatprep.subr.bf16.mxu0 %v17017_v18  ;;  %v17087_v18 = vld [vmem:[%s22792_s5 + $0xc08] ss:$24 sps:$4 sm:$0xff]  }
 0x510   : > { %6080 = vmatmul.mubr.bf16.vlgmr.msra.gmra.mrb[52].mxu1 %v20229_v13  ;;  %v17021_v13 = vld [vmem:[%s22792_s5 + $0x9f8] ss:$24 sps:$4 sm:$0xff]  }
 0x511   : > { %7034 = vmatmul.mubr.bf16.vlgmr.msra.gmra.mrb[32].mxu0 %v20078_v32  ;;  %6873 = vmatpush1.bf16.msra.mxu1 %v17012_v43  ;;  %v17092_v43 = vld [vmem:[%s22792_s5 + $0x274] ss:$24 sps:$4 sm:$0xff]  }
 0x512   : > { %6904 = vmatprep.mubr.bf16.mxu1 %v20080_v35  ;;  %8168 = vmatpush1.bf16.msra.mxu0 %v17015_v39  ;;  %v17095_v39 = vld [vmem:[%s22792_s5 + $0xc3c] ss:$24 sps:$4 sm:$0xff]  }
 0x513   : > { %8199 = vmatprep.mubr.bf16.mxu0 %v20565_v27  ;;  %6874 = vmatprep.subr.bf16.mxu1 %v17020_v19  ;;  %v17090_v19 = vld [vmem:[%s22792_s5 + $0x270] ss:$24 sps:$4 sm:$0xff]  }
 0x514   : > { %8169 = vmatprep.subr.bf16.mxu0 %v17023_v26  ;;  %v17093_v26 = vld [vmem:[%s22792_s5 + $0xc38] ss:$24 sps:$4 sm:$0xff]  }
 0x515   : > { %6875 = vmatpush1.bf16.msra.mxu1 %v17018_v0  ;;  %v17098_v0 = vld [vmem:[%s22792_s5 + $0x2a4] ss:$24 sps:$4 sm:$0xff]  }
 0x516   : > { %8170 = vmatpush1.bf16.msra.mxu0 %v17021_v13  ;;  %6876 = vmatprep.subr.bf16.mxu1 %v17026_v1  ;;  %v17101_v13 = vld [vmem:[%s22792_s5 + $0xc6c] ss:$24 sps:$4 sm:$0xff]   ;;  %v17096_v1 = vld [vmem:[%s22792_s5 + $0x2a0] ss:$24 sps:$4 sm:$0xff]  }
 0x517   : > { %8171 = vmatprep.subr.bf16.mxu0 %v17029_v30  ;;  %v17099_v30 = vld [vmem:[%s22792_s5 + $0xc68] ss:$24 sps:$4 sm:$0xff]  }
 0x519   : > { %6877 = vmatpush1.bf16.msra.mxu1 %v17024_v22  ;;  %v17104_v22 = vld [vmem:[%s22792_s5 + $0x2d4] ss:$24 sps:$4 sm:$0xff]  }
 0x51a   : > { %8172 = vmatpush1.bf16.msra.mxu0 %v17027_v37  ;;  %6878 = vmatprep.subr.bf16.mxu1 %v17032_v56  ;;  %v17107_v37 = vld [vmem:[%s22792_s5 + $0xc9c] ss:$24 sps:$4 sm:$0xff]   ;;  %v17102_v56 = vld [vmem:[%s22792_s5 + $0x2d0] ss:$24 sps:$4 sm:$0xff]  }
 0x51b   : > { %8173 = vmatprep.subr.bf16.mxu0 %v17035_v38  ;;  %v17105_v38 = vld [vmem:[%s22792_s5 + $0xc98] ss:$24 sps:$4 sm:$0xff]  }
 0x51d   : > { %6879 = vmatpush1.bf16.msra.mxu1 %v17030_v16  ;;  %v17110_v16 = vld [vmem:[%s22792_s5 + $0x304] ss:$24 sps:$4 sm:$0xff]  }
 0x51e   : > { %8174 = vmatpush1.bf16.msra.mxu0 %v17033_v40  ;;  %6880 = vmatprep.subr.bf16.mxu1 %v17038_v20  ;;  %v17113_v40 = vld [vmem:[%s22792_s5 + $0xccc] ss:$24 sps:$4 sm:$0xff]   ;;  %v17108_v20 = vld [vmem:[%s22792_s5 + $0x300] ss:$24 sps:$4 sm:$0xff]  }
 0x51f   : > { %8175 = vmatprep.subr.bf16.mxu0 %v17041_v50  ;;  %v17111_v50 = vld [vmem:[%s22792_s5 + $0xcc8] ss:$24 sps:$4 sm:$0xff]  }
 0x521   : > { %6881 = vmatpush1.bf16.msra.mxu1 %v17036_v61  ;;  %v20756_v61 = vrot.slane %v20075_v31, 1 }
 0x522   : > { %8176 = vmatpush1.bf16.msra.mxu0 %v17039_v29  ;;  %6882 = vmatprep.subr.bf16.mxu1 %v17044_v62  ;;  %v17116_v29 = vld [vmem:[%s22792_s5 + $0x334] ss:$24 sps:$4 sm:$0xff]  }
 0x523   : > { %8177 = vmatprep.subr.bf16.mxu0 %v17047_v41  ;;  %v17119_v62 = vld [vmem:[%s22792_s5 + $0xcfc] ss:$24 sps:$4 sm:$0xff]   ;;  %v20767_v41 = vrot.slane %v20082_v8, 1 }
 0x525   : > { %6883 = vmatpush1.bf16.msra.mxu1 %v17042_v42  ;;  %v17114_v42 = vld [vmem:[%s22792_s5 + $0x330] ss:$24 sps:$4 sm:$0xff]  }
 0x526   : > { %8178 = vmatpush1.bf16.msra.mxu0 %v17045_v45  ;;  %6884 = vmatprep.subr.bf16.mxu1 %v17050_v46  ;;  %v17117_v45 = vld [vmem:[%s22792_s5 + $0xcf8] ss:$24 sps:$4 sm:$0xff]   ;;  %v17122_v46 = vld [vmem:[%s22792_s5 + $0x364] ss:$24 sps:$4 sm:$0xff]  }
 0x527   : > { %8179 = vmatprep.subr.bf16.mxu0 %v17053_v49  ;;  %v17125_v49 = vld [vmem:[%s22792_s5 + $0xd2c] ss:$24 sps:$4 sm:$0xff]  }
 0x529   : > { %6885 = vmatpush1.bf16.msra.mxu1 %v17048_v51  ;;  %v17120_v51 = vld [vmem:[%s22792_s5 + $0x360] ss:$24 sps:$4 sm:$0xff]  }
 0x52a   : > { %8180 = vmatpush1.bf16.msra.mxu0 %v17051_v57  ;;  %6886 = vmatprep.subr.bf16.mxu1 %v17056_v58  ;;  %v17123_v57 = vld [vmem:[%s22792_s5 + $0xd28] ss:$24 sps:$4 sm:$0xff]   ;;  %v17128_v58 = vld [vmem:[%s22792_s5 + $0x394] ss:$24 sps:$4 sm:$0xff]  }
 0x52b   : > { %8181 = vmatprep.subr.bf16.mxu0 %v17059_v59  ;;  %v17131_v59 = vld [vmem:[%s22792_s5 + $0xd5c] ss:$24 sps:$4 sm:$0xff]  }
 0x52d   : > { %6887 = vmatpush1.bf16.msra.mxu1 %v17054_v60  ;;  %v17126_v60 = vld [vmem:[%s22792_s5 + $0x390] ss:$24 sps:$4 sm:$0xff]  }
 0x52e   : > { %8182 = vmatpush1.bf16.msra.mxu0 %v17057_v63  ;;  %6888 = vmatprep.subr.bf16.mxu1 %v17062_v3  ;;  %v17129_v63 = vld [vmem:[%s22792_s5 + $0xd58] ss:$24 sps:$4 sm:$0xff]   ;;  %v17134_v3 = vld [vmem:[%s22792_s5 + $0x3c4] ss:$24 sps:$4 sm:$0xff]  }
 0x52f   : > { %8183 = vmatprep.subr.bf16.mxu0 %v17065_v25  ;;  %v17137_v25 = vld [vmem:[%s22792_s5 + $0xd8c] ss:$24 sps:$4 sm:$0xff]  }
 0x531   : > { %6889 = vmatpush1.bf16.msra.mxu1 %v17060_v52  ;;  %v17132_v52 = vld [vmem:[%s22792_s5 + $0x3c0] ss:$24 sps:$4 sm:$0xff]  }
 0x532   : > { %8184 = vmatpush1.bf16.msra.mxu0 %v17063_v4  ;;  %6890 = vmatprep.subr.bf16.mxu1 %v17068_v5  ;;  %v17135_v4 = vld [vmem:[%s22792_s5 + $0xd88] ss:$24 sps:$4 sm:$0xff]   ;;  %v17140_v5 = vld [vmem:[%s22792_s5 + $0x3f4] ss:$24 sps:$4 sm:$0xff]  }
 0x533   : > { %8185 = vmatprep.subr.bf16.mxu0 %v17071_v33  ;;  %v17143_v33 = vld [vmem:[%s22792_s5 + $0xdbc] ss:$24 sps:$4 sm:$0xff]  }
 0x535   : > { %6891 = vmatpush1.bf16.msra.mxu1 %v17066_v44  ;;  %v17138_v44 = vld [vmem:[%s22792_s5 + $0x3f0] ss:$24 sps:$4 sm:$0xff]  }
 0x536   : > { %8186 = vmatpush1.bf16.msra.mxu0 %v17069_v6  ;;  %6892 = vmatprep.subr.bf16.mxu1 %v17074_v11  ;;  %v17141_v6 = vld [vmem:[%s22792_s5 + $0xdb8] ss:$24 sps:$4 sm:$0xff]   ;;  %v17146_v11 = vld [vmem:[%s22792_s5 + $0x424] ss:$24 sps:$4 sm:$0xff]  }
 0x537   : > { %8187 = vmatprep.subr.bf16.mxu0 %v17077_v7  ;;  %v17149_v7 = vld [vmem:[%s22792_s5 + $0xdec] ss:$24 sps:$4 sm:$0xff]  }
 0x539   : > { %6893 = vmatpush1.bf16.msra.mxu1 %v17072_v36  ;;  %v17144_v36 = vld [vmem:[%s22792_s5 + $0x420] ss:$24 sps:$4 sm:$0xff]  }
 0x53a   : > { %8188 = vmatpush1.bf16.msra.mxu0 %v17075_v9  ;;  %6894 = vmatprep.subr.bf16.mxu1 %v17080_v12  ;;  %v17147_v9 = vld [vmem:[%s22792_s5 + $0xde8] ss:$24 sps:$4 sm:$0xff]   ;;  %v17152_v12 = vld [vmem:[%s22792_s5 + $0x454] ss:$24 sps:$4 sm:$0xff]  }
 0x53b   : > { %8189 = vmatprep.subr.bf16.mxu0 %v17083_v14  ;;  %v17155_v14 = vld [vmem:[%s22792_s5 + $0xe1c] ss:$24 sps:$4 sm:$0xff]  }
 0x53d   : > { %6895 = vmatpush1.bf16.msra.mxu1 %v17078_v28  ;;  %v17150_v28 = vld [vmem:[%s22792_s5 + $0x450] ss:$24 sps:$4 sm:$0xff]  }
 0x53e   : > { %8190 = vmatpush1.bf16.msra.mxu0 %v17081_v15  ;;  %6896 = vmatprep.subr.bf16.mxu1 %v17086_v17  ;;  %v17153_v15 = vld [vmem:[%s22792_s5 + $0xe18] ss:$24 sps:$4 sm:$0xff]   ;;  %v17158_v17 = vld [vmem:[%s22792_s5 + $0x484] ss:$24 sps:$4 sm:$0xff]  }
 0x53f   : > { %8191 = vmatprep.subr.bf16.mxu0 %v17089_v34  ;;  %v17161_v34 = vld [vmem:[%s22792_s5 + $0xe4c] ss:$24 sps:$4 sm:$0xff]  }
 0x541   : > { %6897 = vmatpush1.bf16.msra.mxu1 %v17084_v55  ;;  %v17156_v55 = vld [vmem:[%s22792_s5 + $0x480] ss:$24 sps:$4 sm:$0xff]  }
 0x542   : > { %8192 = vmatpush1.bf16.msra.mxu0 %v17087_v18  ;;  %6898 = vmatprep.subr.bf16.mxu1 %v17092_v43  ;;  %v17159_v18 = vld [vmem:[%s22792_s5 + $0xe48] ss:$24 sps:$4 sm:$0xff]   ;;  %v17164_v43 = vld [vmem:[%s22792_s5 + $0x4b4] ss:$24 sps:$4 sm:$0xff]  }
 0x543   : > { %8193 = vmatprep.subr.bf16.mxu0 %v17095_v39  ;;  %v17167_v39 = vld [vmem:[%s22792_s5 + $0xe7c] ss:$24 sps:$4 sm:$0xff]  }
 0x545   : > { %6899 = vmatpush1.bf16.msra.mxu1 %v17090_v19  ;;  %v17162_v19 = vld [vmem:[%s22792_s5 + $0x4b0] ss:$24 sps:$4 sm:$0xff]  }
 0x546   : > { %8194 = vmatpush1.bf16.msra.mxu0 %v17093_v26  ;;  %6900 = vmatprep.subr.bf16.mxu1 %v17098_v0  ;;  %v17165_v26 = vld [vmem:[%s22792_s5 + $0xe78] ss:$24 sps:$4 sm:$0xff]   ;;  %v17170_v0 = vld [vmem:[%s22792_s5 + $0x14] ss:$24 sps:$4 sm:$0xff]  }
 0x547   : > { %8195 = vmatprep.subr.bf16.mxu0 %v17101_v13  ;;  %v17168_v13 = vld [vmem:[%s22792_s5 + $0x10] ss:$24 sps:$4 sm:$0xff]  }
 0x549   : > { %6901 = vmatpush1.bf16.msra.mxu1 %v17096_v1  ;;  %v17173_v1 = vld [vmem:[%s22792_s5 + $0x44] ss:$24 sps:$4 sm:$0xff]  }
 0x54a   : > { %8196 = vmatpush1.bf16.msra.mxu0 %v17099_v30  ;;  %6902 = vmatprep.subr.bf16.mxu1 %v17104_v22  ;;  %v20885_v30 = vrot.slane %v20078_v32, 1  ;;  %v17171_v22 = vld [vmem:[%s22792_s5 + $0x40] ss:$24 sps:$4 sm:$0xff]  }
 0x54b   : > { %8197 = vmatprep.subr.bf16.mxu0 %v17107_v37  ;;  %v17176_v37 = vld [vmem:[%s22792_s5 + $0x74] ss:$24 sps:$4 sm:$0xff]  }
 0x54d   : > { %6903 = vmatpush1.bf16.msra.mxu1 %v17102_v56  ;;  %v17174_v56 = vld [vmem:[%s22792_s5 + $0x70] ss:$24 sps:$4 sm:$0xff]  }
 0x54e   : > { %8198 = vmatpush1.bf16.msra.mxu0 %v17105_v38  ;;  %6915 = vmatprep.subr.bf16.mxu1 %v17110_v16  ;;  %v17179_v38 = vld [vmem:[%s22792_s5 + $0xa4] ss:$24 sps:$4 sm:$0xff]   ;;  %v17182_v16 = vld [vmem:[%s22792_s5 + $0xd4] ss:$24 sps:$4 sm:$0xff]  }
 0x54f   : > { %8210 = vmatprep.subr.bf16.mxu0 %v17113_v40  ;;  %v17180_v40 = vld [vmem:[%s22792_s5 + $0xd0] ss:$24 sps:$4 sm:$0xff]  }
 0x550   : > { %6905 = vmatmul.mubr.bf16.vlgmr.msra.gmra.mrb[48].mxu1 %v20075_v31 }
 0x551   : > { %8200 = vmatmul.mubr.bf16.vlgmr.msra.gmra.mrb[32].mxu0 %v20756_v61  ;;  %6916 = vmatpush1.bf16.msra.mxu1 %v17108_v20  ;;  %v17185_v20 = vld [vmem:[%s22792_s5 + $0x104] ss:$24 sps:$4 sm:$0xff]  }
 0x552   : > { %12646 = vmatprep.mubr.msk.bf16.mxu1 %vm5828_vm9, %v20082_v8  ;;  %8211 = vmatpush1.bf16.msra.mxu0 %v17111_v50  ;;  %v17183_v50 = vld [vmem:[%s22792_s5 + $0x100] ss:$24 sps:$4 sm:$0xff]  }
 0x553   : > { %12962 = vmatprep.mubr.msk.bf16.mxu0 %vm5828_vm9, %v20767_v41  ;;  %6917 = vmatprep.subr.bf16.mxu1 %v17116_v29  ;;  %v17188_v29 = vld [vmem:[%s22792_s5 + $0x134] ss:$24 sps:$4 sm:$0xff]  }
 0x554   : > { %8212 = vmatprep.subr.bf16.mxu0 %v17119_v62  ;;  %v17186_v62 = vld [vmem:[%s22792_s5 + $0x130] ss:$24 sps:$4 sm:$0xff]  }
 0x555   : > { %6918 = vmatpush1.bf16.msra.mxu1 %v17114_v42  ;;  %v17191_v42 = vld [vmem:[%s22792_s5 + $0x164] ss:$24 sps:$4 sm:$0xff]  }
 0x556   : > { %8213 = vmatpush1.bf16.msra.mxu0 %v17117_v45  ;;  %6919 = vmatprep.subr.bf16.mxu1 %v17122_v46  ;;  %v17189_v45 = vld [vmem:[%s22792_s5 + $0x160] ss:$24 sps:$4 sm:$0xff]   ;;  %v17194_v46 = vld [vmem:[%s22792_s5 + $0x194] ss:$24 sps:$4 sm:$0xff]  }
 0x557   : > { %8214 = vmatprep.subr.bf16.mxu0 %v17125_v49  ;;  %v17192_v49 = vld [vmem:[%s22792_s5 + $0x190] ss:$24 sps:$4 sm:$0xff]  }
 0x559   : > { %6920 = vmatpush1.bf16.msra.mxu1 %v17120_v51  ;;  %v17197_v51 = vld [vmem:[%s22792_s5 + $0x1c4] ss:$24 sps:$4 sm:$0xff]  }
 0x55a   : > { %8215 = vmatpush1.bf16.msra.mxu0 %v17123_v57  ;;  %6921 = vmatprep.subr.bf16.mxu1 %v17128_v58  ;;  %v17195_v57 = vld [vmem:[%s22792_s5 + $0x1c0] ss:$24 sps:$4 sm:$0xff]   ;;  %v17200_v58 = vld [vmem:[%s22792_s5 + $0x1f4] ss:$24 sps:$4 sm:$0xff]  }
 0x55b   : > { %8216 = vmatprep.subr.bf16.mxu0 %v17131_v59  ;;  %v17198_v59 = vld [vmem:[%s22792_s5 + $0x1f0] ss:$24 sps:$4 sm:$0xff]  }
 0x55d   : > { %6922 = vmatpush1.bf16.msra.mxu1 %v17126_v60  ;;  %v17203_v60 = vld [vmem:[%s22792_s5 + $0x224] ss:$24 sps:$4 sm:$0xff]  }
 0x55e   : > { %8217 = vmatpush1.bf16.msra.mxu0 %v17129_v63  ;;  %6923 = vmatprep.subr.bf16.mxu1 %v17134_v3  ;;  %v17201_v63 = vld [vmem:[%s22792_s5 + $0x220] ss:$24 sps:$4 sm:$0xff]   ;;  %v17206_v3 = vld [vmem:[%s22792_s5 + $0x254] ss:$24 sps:$4 sm:$0xff]  }
 0x55f   : > { %8218 = vmatprep.subr.bf16.mxu0 %v17137_v25  ;;  %v17204_v25 = vld [vmem:[%s22792_s5 + $0x250] ss:$24 sps:$4 sm:$0xff]  }
 0x561   : > { %6924 = vmatpush1.bf16.msra.mxu1 %v17132_v52  ;;  %v17209_v52 = vld [vmem:[%s22792_s5 + $0x284] ss:$24 sps:$4 sm:$0xff]  }
 0x562   : > { %8219 = vmatpush1.bf16.msra.mxu0 %v17135_v4  ;;  %6925 = vmatprep.subr.bf16.mxu1 %v17140_v5  ;;  %v17207_v4 = vld [vmem:[%s22792_s5 + $0x280] ss:$24 sps:$4 sm:$0xff]   ;;  %v17212_v5 = vld [vmem:[%s22792_s5 + $0x2b4] ss:$24 sps:$4 sm:$0xff]  }
 0x563   : > { %8220 = vmatprep.subr.bf16.mxu0 %v17143_v33  ;;  %v17210_v33 = vld [vmem:[%s22792_s5 + $0x2b0] ss:$24 sps:$4 sm:$0xff]  }
 0x565   : > { %6926 = vmatpush1.bf16.msra.mxu1 %v17138_v44  ;;  %v17215_v44 = vld [vmem:[%s22792_s5 + $0x2e4] ss:$24 sps:$4 sm:$0xff]  }
 0x566   : > { %8221 = vmatpush1.bf16.msra.mxu0 %v17141_v6  ;;  %6927 = vmatprep.subr.bf16.mxu1 %v17146_v11  ;;  %v17213_v6 = vld [vmem:[%s22792_s5 + $0x2e0] ss:$24 sps:$4 sm:$0xff]   ;;  %v17218_v11 = vld [vmem:[%s22792_s5 + $0x314] ss:$24 sps:$4 sm:$0xff]  }
 0x567   : > { %8222 = vmatprep.subr.bf16.mxu0 %v17149_v7  ;;  %v17216_v7 = vld [vmem:[%s22792_s5 + $0x310] ss:$24 sps:$4 sm:$0xff]  }
 0x569   : > { %6928 = vmatpush1.bf16.msra.mxu1 %v17144_v36  ;;  %v17221_v36 = vld [vmem:[%s22792_s5 + $0x344] ss:$24 sps:$4 sm:$0xff]  }
 0x56a   : > { %8223 = vmatpush1.bf16.msra.mxu0 %v17147_v9  ;;  %6929 = vmatprep.subr.bf16.mxu1 %v17152_v12  ;;  %v17219_v9 = vld [vmem:[%s22792_s5 + $0x340] ss:$24 sps:$4 sm:$0xff]   ;;  %v17224_v12 = vld [vmem:[%s22792_s5 + $0x374] ss:$24 sps:$4 sm:$0xff]  }
 0x56b   : > { %8224 = vmatprep.subr.bf16.mxu0 %v17155_v14  ;;  %v17222_v14 = vld [vmem:[%s22792_s5 + $0x370] ss:$24 sps:$4 sm:$0xff]  }
 0x56d   : > { %6930 = vmatpush1.bf16.msra.mxu1 %v17150_v28  ;;  %v17230_v28 = vld [vmem:[%s22792_s5 + $0x3d4] ss:$24 sps:$4 sm:$0xff]  }
 0x56e   : > { %8225 = vmatpush1.bf16.msra.mxu0 %v17153_v15  ;;  %6931 = vmatprep.subr.bf16.mxu1 %v17158_v17  ;;  %v17228_v15 = vld [vmem:[%s22792_s5 + $0x3d0] ss:$24 sps:$4 sm:$0xff]   ;;  %v17233_v17 = vld [vmem:[%s22792_s5 + $0x404] ss:$24 sps:$4 sm:$0xff]  }
 0x56f   : > { %8226 = vmatprep.subr.bf16.mxu0 %v17161_v34  ;;  %v17231_v34 = vld [vmem:[%s22792_s5 + $0x400] ss:$24 sps:$4 sm:$0xff]  }
 0x571   : > { %6932 = vmatpush1.bf16.msra.mxu1 %v17156_v55  ;;  %v17236_v55 = vld [vmem:[%s22792_s5 + $0x434] ss:$24 sps:$4 sm:$0xff]  }
 0x572   : > { %8227 = vmatpush1.bf16.msra.mxu0 %v17159_v18  ;;  %6933 = vmatprep.subr.bf16.mxu1 %v17164_v43  ;;  %v17234_v18 = vld [vmem:[%s22792_s5 + $0x430] ss:$24 sps:$4 sm:$0xff]   ;;  %v17239_v43 = vld [vmem:[%s22792_s5 + $0x464] ss:$24 sps:$4 sm:$0xff]  }
 0x573   : > { %8228 = vmatprep.subr.bf16.mxu0 %v17167_v39  ;;  %v17237_v39 = vld [vmem:[%s22792_s5 + $0x460] ss:$24 sps:$4 sm:$0xff]  }
 0x575   : > { %6934 = vmatpush1.bf16.msra.mxu1 %v17162_v19  ;;  %v17242_v19 = vld [vmem:[%s22792_s5 + $0x494] ss:$24 sps:$4 sm:$0xff]  }
 0x576   : > { %8229 = vmatpush1.bf16.msra.mxu0 %v17165_v26  ;;  %7044 = vmatprep.subr.bf16.mxu1 %v17170_v0  ;;  %v17240_v26 = vld [vmem:[%s22792_s5 + $0x490] ss:$24 sps:$4 sm:$0xff]   ;;  %v17245_v0 = vld [vmem:[%s22792_s5 + $0x4c4] ss:$24 sps:$4 sm:$0xff]  }
 0x578   : > { %6948 = vmatmul.mubr.bf16.vlgmr.msra.gmra.mrb[48].mxu1 %v20078_v32 }
 0x579   : > { %8243 = vmatmul.mubr.bf16.vlgmr.msra.gmra.mrb[32].mxu0 %v20885_v30  ;;  %7045 = vmatpush1.bf16.msra.mxu1 %v17168_v13  ;;  %v17243_v13 = vld [vmem:[%s22792_s5 + $0x4c0] ss:$24 sps:$4 sm:$0xff]  }
 0x57a   : > { %7076 = vmatprep.mubr.bf16.mxu1 %v20080_v35  ;;  %7046 = vmatprep.subr.bf16.mxu1 %v17173_v1  ;;  %v17177_v35 = vld [vmem:[%s22792_s5 + $0xa0] ss:$24 sps:$4 sm:$0xff]   ;;  %v17248_v1 = vld [vmem:[%s22792_s5 + $0x9c4] ss:$24 sps:$4 sm:$0xff]  }
 0x57b   : > { %8495 = vmatprep.mubr.f32.mxu0 %v18008_v10 }
 0x57d   : > { %7047 = vmatpush1.bf16.msra.mxu1 %v17171_v22  ;;  %v17246_v22 = vld [vmem:[%s22792_s5 + $0x9c0] ss:$24 sps:$4 sm:$0xff]  }
 0x57e   : > { %7048 = vmatprep.subr.bf16.mxu1 %v17176_v37  ;;  %v17251_v37 = vld [vmem:[%s22792_s5 + $0x9f4] ss:$24 sps:$4 sm:$0xff]  }
 0x581   : > { %7049 = vmatpush1.bf16.msra.mxu1 %v17174_v56  ;;  %v17249_v56 = vld [vmem:[%s22792_s5 + $0x9f0] ss:$24 sps:$4 sm:$0xff]  }
 0x582   : > { %7050 = vmatprep.subr.bf16.mxu1 %v17179_v38  ;;  %v17254_v38 = vld [vmem:[%s22792_s5 + $0xa24] ss:$24 sps:$4 sm:$0xff]  }
 0x585   : > { %7051 = vmatpush1.bf16.msra.mxu1 %v17177_v35  ;;  %v17252_v35 = vld [vmem:[%s22792_s5 + $0xa20] ss:$24 sps:$4 sm:$0xff]  }
 0x586   : > { %7052 = vmatprep.subr.bf16.mxu1 %v17182_v16  ;;  %v17255_v16 = vld [vmem:[%s22792_s5 + $0xa50] ss:$24 sps:$4 sm:$0xff]  }
 0x589   : > { %7053 = vmatpush1.bf16.msra.mxu1 %v17180_v40  ;;  %v17260_v40 = vld [vmem:[%s22792_s5 + $0xa84] ss:$24 sps:$4 sm:$0xff]  }
 0x58a   : > { %7054 = vmatprep.subr.bf16.mxu1 %v17185_v20  ;;  %v17258_v20 = vld [vmem:[%s22792_s5 + $0xa80] ss:$24 sps:$4 sm:$0xff]  }
 0x58d   : > { %7055 = vmatpush1.bf16.msra.mxu1 %v17183_v50  ;;  %v17263_v50 = vld [vmem:[%s22792_s5 + $0xab4] ss:$24 sps:$4 sm:$0xff]  }
 0x58e   : > { %7056 = vmatprep.subr.bf16.mxu1 %v17188_v29  ;;  %v17261_v29 = vld [vmem:[%s22792_s5 + $0xab0] ss:$24 sps:$4 sm:$0xff]  }
 0x591   : > { %7057 = vmatpush1.bf16.msra.mxu1 %v17186_v62  ;;  %v17266_v62 = vld [vmem:[%s22792_s5 + $0xae4] ss:$24 sps:$4 sm:$0xff]  }
 0x592   : > { %7058 = vmatprep.subr.bf16.mxu1 %v17191_v42  ;;  %v17264_v42 = vld [vmem:[%s22792_s5 + $0xae0] ss:$24 sps:$4 sm:$0xff]  }
 0x595   : > { %7059 = vmatpush1.bf16.msra.mxu1 %v17189_v45  ;;  %v17269_v45 = vld [vmem:[%s22792_s5 + $0xb14] ss:$24 sps:$4 sm:$0xff]  }
 0x596   : > { %7060 = vmatprep.subr.bf16.mxu1 %v17194_v46  ;;  %v17267_v46 = vld [vmem:[%s22792_s5 + $0xb10] ss:$24 sps:$4 sm:$0xff]  }
 0x599   : > { %7061 = vmatpush1.bf16.msra.mxu1 %v17192_v49  ;;  %v17272_v49 = vld [vmem:[%s22792_s5 + $0xb44] ss:$24 sps:$4 sm:$0xff]  }
 0x59a   : > { %7062 = vmatprep.subr.bf16.mxu1 %v17197_v51  ;;  %v17270_v51 = vld [vmem:[%s22792_s5 + $0xb40] ss:$24 sps:$4 sm:$0xff]  }
 0x59d   : > { %7063 = vmatpush1.bf16.msra.mxu1 %v17195_v57  ;;  %v17275_v57 = vld [vmem:[%s22792_s5 + $0xb74] ss:$24 sps:$4 sm:$0xff]  }
 0x59e   : > { %7064 = vmatprep.subr.bf16.mxu1 %v17200_v58  ;;  %v17273_v58 = vld [vmem:[%s22792_s5 + $0xb70] ss:$24 sps:$4 sm:$0xff]  }
 0x5a1   : > { %7065 = vmatpush1.bf16.msra.mxu1 %v17198_v59  ;;  %v17278_v59 = vld [vmem:[%s22792_s5 + $0xba4] ss:$24 sps:$4 sm:$0xff]  }
 0x5a2   : > { %7066 = vmatprep.subr.bf16.mxu1 %v17203_v60  ;;  %v17276_v60 = vld [vmem:[%s22792_s5 + $0xba0] ss:$24 sps:$4 sm:$0xff]  }
 0x5a5   : > { %7067 = vmatpush1.bf16.msra.mxu1 %v17201_v63  ;;  %v17281_v63 = vld [vmem:[%s22792_s5 + $0xbd4] ss:$24 sps:$4 sm:$0xff]  }
 0x5a6   : > { %7068 = vmatprep.subr.bf16.mxu1 %v17206_v3  ;;  %v17279_v3 = vld [vmem:[%s22792_s5 + $0xbd0] ss:$24 sps:$4 sm:$0xff]  }
 0x5a9   : > { %7069 = vmatpush1.bf16.msra.mxu1 %v17204_v25  ;;  %v17284_v25 = vld [vmem:[%s22792_s5 + $0xc04] ss:$24 sps:$4 sm:$0xff]  }
 0x5aa   : > { %7070 = vmatprep.subr.bf16.mxu1 %v17209_v52  ;;  %v17282_v52 = vld [vmem:[%s22792_s5 + $0xc00] ss:$24 sps:$4 sm:$0xff]  }
 0x5ad   : > { %7071 = vmatpush1.bf16.msra.mxu1 %v17207_v4  ;;  %v17287_v4 = vld [vmem:[%s22792_s5 + $0xc34] ss:$24 sps:$4 sm:$0xff]  }
 0x5ae   : > { %7072 = vmatprep.subr.bf16.mxu1 %v17212_v5  ;;  %v17285_v5 = vld [vmem:[%s22792_s5 + $0xc30] ss:$24 sps:$4 sm:$0xff]  }
 0x5b1   : > { %7073 = vmatpush1.bf16.msra.mxu1 %v17210_v33  ;;  %v17290_v33 = vld [vmem:[%s22792_s5 + $0xc64] ss:$24 sps:$4 sm:$0xff]  }
 0x5b2   : > { %7074 = vmatprep.subr.bf16.mxu1 %v17215_v44  ;;  %v17288_v44 = vld [vmem:[%s22792_s5 + $0xc60] ss:$24 sps:$4 sm:$0xff]  }
 0x5b5   : > { %7075 = vmatpush1.bf16.msra.mxu1 %v17213_v6  ;;  %v17293_v6 = vld [vmem:[%s22792_s5 + $0xc94] ss:$24 sps:$4 sm:$0xff]  }
 0x5b6   : > { %7087 = vmatprep.subr.bf16.mxu1 %v17218_v11  ;;  %v17291_v11 = vld [vmem:[%s22792_s5 + $0xc90] ss:$24 sps:$4 sm:$0xff]  }
 0x5b8   : > { %7077 = vmatmul.mubr.bf16.vlgmr.msra.gmra.mrb[52].mxu1 %v20075_v31  ;;  %v17227_v31 = vld [vmem:[%s22792_s5 + $0x3a4] ss:$24 sps:$4 sm:$0xff]  }
 0x5b9   : > { %7088 = vmatpush1.bf16.msra.mxu1 %v17216_v7  ;;  %12648 = vmatprep.mubr.msk.bf16.mxu1 %vm5828_vm9, %v20082_v8  ;;  %v17225_v8 = vld [vmem:[%s22792_s5 + $0x3a0] ss:$24 sps:$4 sm:$0xff]   ;;  %v17296_v7 = vld [vmem:[%s22792_s5 + $0xcc4] ss:$24 sps:$4 sm:$0xff]  }
 0x5ba   : > { %7089 = vmatprep.subr.bf16.mxu1 %v17221_v36  ;;  %v17294_v36 = vld [vmem:[%s22792_s5 + $0xcc0] ss:$24 sps:$4 sm:$0xff]  }
 0x5bd   : > { %7090 = vmatpush1.bf16.msra.mxu1 %v17219_v9  ;;  %v17299_v9 = vld [vmem:[%s22792_s5 + $0xcf4] ss:$24 sps:$4 sm:$0xff]  }
 0x5be   : > { %7091 = vmatprep.subr.bf16.mxu1 %v17224_v12  ;;  %v17297_v12 = vld [vmem:[%s22792_s5 + $0xcf0] ss:$24 sps:$4 sm:$0xff]  }
 0x5c1   : > { %7092 = vmatpush1.bf16.msra.mxu1 %v17222_v14  ;;  %v17302_v14 = vld [vmem:[%s22792_s5 + $0xd24] ss:$24 sps:$4 sm:$0xff]  }
 0x5c2   : > { %7093 = vmatprep.subr.bf16.mxu1 %v17227_v31  ;;  %v17300_v31 = vld [vmem:[%s22792_s5 + $0xd20] ss:$24 sps:$4 sm:$0xff]  }
 0x5c5   : > { %7094 = vmatpush1.bf16.msra.mxu1 %v17225_v8  ;;  %v17305_v8 = vld [vmem:[%s22792_s5 + $0xd54] ss:$24 sps:$4 sm:$0xff]  }
 0x5c6   : > { %7095 = vmatprep.subr.bf16.mxu1 %v17230_v28  ;;  %v17303_v28 = vld [vmem:[%s22792_s5 + $0xd50] ss:$24 sps:$4 sm:$0xff]  }
 0x5c9   : > { %7096 = vmatpush1.bf16.msra.mxu1 %v17228_v15  ;;  %v17308_v15 = vld [vmem:[%s22792_s5 + $0xd84] ss:$24 sps:$4 sm:$0xff]  }
 0x5ca   : > { %7097 = vmatprep.subr.bf16.mxu1 %v17233_v17  ;;  %v17306_v17 = vld [vmem:[%s22792_s5 + $0xd80] ss:$24 sps:$4 sm:$0xff]  }
 0x5cd   : > { %7098 = vmatpush1.bf16.msra.mxu1 %v17231_v34  ;;  %v17311_v34 = vld [vmem:[%s22792_s5 + $0xdb4] ss:$24 sps:$4 sm:$0xff]  }
 0x5ce   : > { %7099 = vmatprep.subr.bf16.mxu1 %v17236_v55  ;;  %v17309_v55 = vld [vmem:[%s22792_s5 + $0xdb0] ss:$24 sps:$4 sm:$0xff]  }
 0x5d1   : > { %7100 = vmatpush1.bf16.msra.mxu1 %v17234_v18  ;;  %v17314_v18 = vld [vmem:[%s22792_s5 + $0xde4] ss:$24 sps:$4 sm:$0xff]  }
 0x5d2   : > { %7101 = vmatprep.subr.bf16.mxu1 %v17239_v43  ;;  %v17312_v43 = vld [vmem:[%s22792_s5 + $0xde0] ss:$24 sps:$4 sm:$0xff]  }
 0x5d5   : > { %7102 = vmatpush1.bf16.msra.mxu1 %v17237_v39  ;;  %v17317_v39 = vld [vmem:[%s22792_s5 + $0xe14] ss:$24 sps:$4 sm:$0xff]  }
 0x5d6   : > { %7103 = vmatprep.subr.bf16.mxu1 %v17242_v19  ;;  %v17315_v19 = vld [vmem:[%s22792_s5 + $0xe10] ss:$24 sps:$4 sm:$0xff]  }
 0x5d9   : > { %7104 = vmatpush1.bf16.msra.mxu1 %v17240_v26  ;;  %v17320_v26 = vld [vmem:[%s22792_s5 + $0xe44] ss:$24 sps:$4 sm:$0xff]  }
 0x5da   : > { %7105 = vmatprep.subr.bf16.mxu1 %v17245_v0  ;;  %v17318_v0 = vld [vmem:[%s22792_s5 + $0xe40] ss:$24 sps:$4 sm:$0xff]  }
 0x5dd   : > { %7106 = vmatpush1.bf16.msra.mxu1 %v17243_v13  ;;  %v17323_v13 = vld [vmem:[%s22792_s5 + $0xe74] ss:$24 sps:$4 sm:$0xff]  }
 0x5de   : > { %8081 = vmatprep.subr.bf16.mxu1 %v17248_v1  ;;  %v17321_v1 = vld [vmem:[%s22792_s5 + $0xe70] ss:$24 sps:$4 sm:$0xff]  }
 0x5e0   : > { %7120 = vmatmul.mubr.bf16.vlgmr.msra.gmra.mrb[52].mxu1 %v20078_v32  ;;  %v17257_v32 = vld [vmem:[%s22792_s5 + $0xa54] ss:$24 sps:$4 sm:$0xff]  }
 0x5e1   : > { %8082 = vmatpush1.bf16.msra.mxu1 %v17246_v22  ;;  %8113 = vmatprep.mubr.bf16.mxu1 %v20565_v27  ;;  %v17326_v22 = vld [vmem:[%s22792_s5 + $0x9d4] ss:$24 sps:$4 sm:$0xff]  }
 0x5e2   : > { %8083 = vmatprep.subr.bf16.mxu1 %v17251_v37  ;;  %v17324_v37 = vld [vmem:[%s22792_s5 + $0x9d0] ss:$24 sps:$4 sm:$0xff]  }
 0x5e5   : > { %8084 = vmatpush1.bf16.msra.mxu1 %v17249_v56  ;;  %v21211_v56 = vld [vmem:[%s22793_s6] sm:$0x3f] }
 0x5e6   : > { %8085 = vmatprep.subr.bf16.mxu1 %v17254_v38  ;;  %v17329_v38 = vld [vmem:[%s22792_s5 + $0xa04] ss:$24 sps:$4 sm:$0xff]  }
 0x5e9   : > { %8086 = vmatpush1.bf16.msra.mxu1 %v17252_v35  ;;  %v8364_v35 = vrot.slane %v21211_v56, %v1457_v47  ;;  %v17330_v47 = vld [vmem:[%s22792_s5 + $0xa30] ss:$24 sps:$4 sm:$0xff]  }
 0x5ea   : > { %8087 = vmatprep.subr.bf16.mxu1 %v17257_v32  ;;  %v17327_v32 = vld [vmem:[%s22792_s5 + $0xa00] ss:$24 sps:$4 sm:$0xff]  }
 0x5ed   : > { %8088 = vmatpush1.bf16.msra.mxu1 %v17255_v16  ;;  %v8368_v16 = vrot.slane %v21211_v56, %v1461_v53  ;;  %v17335_v53 = vld [vmem:[%s22792_s5 + $0xa64] ss:$24 sps:$4 sm:$0xff]  }
 0x5ee   : > { %8089 = vmatprep.subr.bf16.mxu1 %v17260_v40  ;;  %v17332_v40 = vld [vmem:[%s22792_s5 + $0xa34] ss:$24 sps:$4 sm:$0xff]  }
 0x5f1   : > { %8090 = vmatpush1.bf16.msra.mxu1 %v17258_v20 }
 0x5f2   : > { %8091 = vmatprep.subr.bf16.mxu1 %v17263_v50 }
 0x5f5   : > { %8092 = vmatpush1.bf16.msra.mxu1 %v17261_v29 }
 0x5f6   : > { %8093 = vmatprep.subr.bf16.mxu1 %v17266_v62 }
 0x5f9   : > { %8094 = vmatpush1.bf16.msra.mxu1 %v17264_v42 }
 0x5fa   : > { %8095 = vmatprep.subr.bf16.mxu1 %v17269_v45 }
 0x5fd   : > { %8096 = vmatpush1.bf16.msra.mxu1 %v17267_v46 }
 0x5fe   : > { %8097 = vmatprep.subr.bf16.mxu1 %v17272_v49 }
 0x601   : > { %8098 = vmatpush1.bf16.msra.mxu1 %v17270_v51 }
 0x602   : > { %8099 = vmatprep.subr.bf16.mxu1 %v17275_v57  ;;  %v17333_v57 = vld [vmem:[%s22792_s5 + $0xa60] ss:$24 sps:$4 sm:$0xff]  }
 0x605   : > { %8100 = vmatpush1.bf16.msra.mxu1 %v17273_v58 }
 0x606   : > { %8101 = vmatprep.subr.bf16.mxu1 %v17278_v59 }
 0x609   : > { %8102 = vmatpush1.bf16.msra.mxu1 %v17276_v60  ;;  %v17338_v60 = vld [vmem:[%s22792_s5 + $0xa94] ss:$24 sps:$4 sm:$0xff]  }
 0x60a   : > { %8103 = vmatprep.subr.bf16.mxu1 %v17281_v63 }
 0x60d   : > { %8104 = vmatpush1.bf16.msra.mxu1 %v17279_v3 }
 0x60e   : > { %8105 = vmatprep.subr.bf16.mxu1 %v17284_v25  ;;  %v17336_v25 = vld [vmem:[%s22792_s5 + $0xa90] ss:$24 sps:$4 sm:$0xff]  }
 0x611   : > { %8106 = vmatpush1.bf16.msra.mxu1 %v17282_v52  ;;  %v17341_v52 = vld [vmem:[%s22792_s5 + $0xac4] ss:$24 sps:$4 sm:$0xff]  }
 0x612   : > { %8107 = vmatprep.subr.bf16.mxu1 %v17287_v4  ;;  %v17339_v4 = vld [vmem:[%s22792_s5 + $0xac0] ss:$24 sps:$4 sm:$0xff]  }
 0x615   : > { %8108 = vmatpush1.bf16.msra.mxu1 %v17285_v5  ;;  %v17344_v5 = vld [vmem:[%s22792_s5 + $0xaf4] ss:$24 sps:$4 sm:$0xff]  }
 0x616   : > { %8109 = vmatprep.subr.bf16.mxu1 %v17290_v33  ;;  %v17342_v33 = vld [vmem:[%s22792_s5 + $0xaf0] ss:$24 sps:$4 sm:$0xff]  }
 0x619   : > { %8110 = vmatpush1.bf16.msra.mxu1 %v17288_v44  ;;  %v17347_v44 = vld [vmem:[%s22792_s5 + $0xb24] ss:$24 sps:$4 sm:$0xff]  }
 0x61a   : > { %8111 = vmatprep.subr.bf16.mxu1 %v17293_v6  ;;  %v17345_v6 = vld [vmem:[%s22792_s5 + $0xb20] ss:$24 sps:$4 sm:$0xff]  }
 0x61d   : > { %8112 = vmatpush1.bf16.msra.mxu1 %v17291_v11  ;;  %v17350_v11 = vld [vmem:[%s22792_s5 + $0xb54] ss:$24 sps:$4 sm:$0xff]  }
 0x61e   : > { %8124 = vmatprep.subr.bf16.mxu1 %v17296_v7  ;;  %v17348_v7 = vld [vmem:[%s22792_s5 + $0xb50] ss:$24 sps:$4 sm:$0xff]  }
 0x620   : > { %8114 = vmatmul.mubr.bf16.vlgmr.msra.gmra.mrb[48].mxu1 %v20756_v61 }
 0x621   : > { %8125 = vmatpush1.bf16.msra.mxu1 %v17294_v36  ;;  %12961 = vmatprep.mubr.msk.bf16.mxu1 %vm5828_vm9, %v20767_v41  ;;  %v17353_v36 = vld [vmem:[%s22792_s5 + $0xb84] ss:$24 sps:$4 sm:$0xff]  }
 0x622   : > { %8126 = vmatprep.subr.bf16.mxu1 %v17299_v9  ;;  %v17351_v9 = vld [vmem:[%s22792_s5 + $0xb80] ss:$24 sps:$4 sm:$0xff]  }
 0x625   : > { %8127 = vmatpush1.bf16.msra.mxu1 %v17297_v12  ;;  %v17356_v12 = vld [vmem:[%s22792_s5 + $0xbb4] ss:$24 sps:$4 sm:$0xff]  }
 0x626   : > { %8128 = vmatprep.subr.bf16.mxu1 %v17302_v14  ;;  %v17354_v14 = vld [vmem:[%s22792_s5 + $0xbb0] ss:$24 sps:$4 sm:$0xff]  }
 0x629   : > { %8129 = vmatpush1.bf16.msra.mxu1 %v17300_v31  ;;  %v17359_v31 = vld [vmem:[%s22792_s5 + $0xbe4] ss:$24 sps:$4 sm:$0xff]  }
 0x62a   : > { %8130 = vmatprep.subr.bf16.mxu1 %v17305_v8  ;;  %v17357_v8 = vld [vmem:[%s22792_s5 + $0xbe0] ss:$24 sps:$4 sm:$0xff]  }
 0x62d   : > { %8131 = vmatpush1.bf16.msra.mxu1 %v17303_v28  ;;  %v17362_v28 = vld [vmem:[%s22792_s5 + $0xc14] ss:$24 sps:$4 sm:$0xff]  }
 0x62e   : > { %8132 = vmatprep.subr.bf16.mxu1 %v17308_v15  ;;  %v17360_v15 = vld [vmem:[%s22792_s5 + $0xc10] ss:$24 sps:$4 sm:$0xff]  }
 0x631   : > { %8133 = vmatpush1.bf16.msra.mxu1 %v17306_v17  ;;  %v17365_v17 = vld [vmem:[%s22792_s5 + $0xc44] ss:$24 sps:$4 sm:$0xff]  }
 0x632   : > { %8134 = vmatprep.subr.bf16.mxu1 %v17311_v34  ;;  %v17363_v34 = vld [vmem:[%s22792_s5 + $0xc40] ss:$24 sps:$4 sm:$0xff]  }
 0x635   : > { %8135 = vmatpush1.bf16.msra.mxu1 %v17309_v55  ;;  %v17368_v55 = vld [vmem:[%s22792_s5 + $0xc74] ss:$24 sps:$4 sm:$0xff]  }
 0x636   : > { %8136 = vmatprep.subr.bf16.mxu1 %v17314_v18  ;;  %v17366_v18 = vld [vmem:[%s22792_s5 + $0xc70] ss:$24 sps:$4 sm:$0xff]  }
 0x639   : > { %8137 = vmatpush1.bf16.msra.mxu1 %v17312_v43  ;;  %v17371_v43 = vld [vmem:[%s22792_s5 + $0xca4] ss:$24 sps:$4 sm:$0xff]  }
 0x63a   : > { %8138 = vmatprep.subr.bf16.mxu1 %v17317_v39  ;;  %v17369_v39 = vld [vmem:[%s22792_s5 + $0xca0] ss:$24 sps:$4 sm:$0xff]  }
 0x63d   : > { %8139 = vmatpush1.bf16.msra.mxu1 %v17315_v19  ;;  %v17374_v19 = vld [vmem:[%s22792_s5 + $0xcd4] ss:$24 sps:$4 sm:$0xff]  }
 0x63e   : > { %8140 = vmatprep.subr.bf16.mxu1 %v17320_v26  ;;  %v17372_v26 = vld [vmem:[%s22792_s5 + $0xcd0] ss:$24 sps:$4 sm:$0xff]  }
 0x641   : > { %8141 = vmatpush1.bf16.msra.mxu1 %v17318_v0  ;;  %v17377_v0 = vld [vmem:[%s22792_s5 + $0xd04] ss:$24 sps:$4 sm:$0xff]  }
 0x642   : > { %8142 = vmatprep.subr.bf16.mxu1 %v17323_v13  ;;  %v17375_v13 = vld [vmem:[%s22792_s5 + $0xd00] ss:$24 sps:$4 sm:$0xff]  }
 0x645   : > { %8143 = vmatpush1.bf16.msra.mxu1 %v17321_v1  ;;  %v17380_v1 = vld [vmem:[%s22792_s5 + $0xd34] ss:$24 sps:$4 sm:$0xff]  }
 0x646   : > { %8253 = vmatprep.subr.bf16.mxu1 %v17326_v22  ;;  %v17378_v22 = vld [vmem:[%s22792_s5 + $0xd30] ss:$24 sps:$4 sm:$0xff]  }
 0x648   : > { %8157 = vmatmul.mubr.bf16.vlgmr.msra.gmra.mrb[48].mxu1 %v20885_v30 }
 0x649   : > { %8254 = vmatpush1.bf16.msra.mxu1 %v17324_v37  ;;  %8285 = vmatprep.mubr.bf16.mxu1 %v20565_v27  ;;  %v17386_v37 = vld [vmem:[%s22792_s5 + $0xd94] ss:$24 sps:$4 sm:$0xff]  }
 0x64a   : > { %8255 = vmatprep.subr.bf16.mxu1 %v17329_v38  ;;  %v17384_v38 = vld [vmem:[%s22792_s5 + $0xd90] ss:$24 sps:$4 sm:$0xff]  }
 0x64c   : > { %v8244_v20 = vpop.f32.mrb[32].mxu0 }
 0x64d   : > { %v8385_v50 = vadd.f32 %v8364_v35, %v8244_v20  ;;  %v8246_v27 = vpop.f32.mrb[33].mxu0  ;;  %8256 = vmatpush1.bf16.msra.mxu1 %v17327_v32  ;;  %v17387_v32 = vld [vmem:[%s22792_s5 + $0xdc0] ss:$24 sps:$4 sm:$0xff]   ;;  %v17395_v20 = vld [vmem:[%s22792_s5 + $0xe24] ss:$24 sps:$4 sm:$0xff]  }
 0x64e   : > { %v8386_v29 = vadd.f32 %v8368_v16, %v8246_v27  ;;  %v8248_v62 = vpop.f32.mrb[34].mxu0  ;;  %8257 = vmatprep.subr.bf16.mxu1 %v17332_v40  ;;  %v17390_v40 = vld [vmem:[%s22792_s5 + $0xdf0] ss:$24 sps:$4 sm:$0xff]   ;;  %v17398_v27 = vld [vmem:[%s22792_s5 + $0xe54] ss:$24 sps:$4 sm:$0xff]  }
 0x64f   : > { %v8391_v42 = vadd.f32 %v8364_v35, %v8248_v62  ;;  %v8250_v45 = vpop.f32.mrb[35].mxu0  ;;  %v8397_v49 = vmax.f32 %v8385_v50, 0.0  ;;  %v17389_v35 = vld [vmem:[%s22792_s5 + $0xdc4] ss:$24 sps:$4 sm:$0xff]   ;;  %v17393_v50 = vld [vmem:[%s22792_s5 + $0xe20] ss:$24 sps:$4 sm:$0xff]  }
 0x650   : > { %v8392_v46 = vadd.f32 %v8368_v16, %v8250_v45  ;;  %v8398_v58 = vmax.f32 %v8386_v29, 0.0  ;;  %v17392_v16 = vld [vmem:[%s22792_s5 + $0xdf4] ss:$24 sps:$4 sm:$0xff]   ;;  %v17401_v29 = vld [vmem:[%s22792_s5 + $0xe84] ss:$24 sps:$4 sm:$0xff]  }
 0x651   : > { %v8403_v51 = vmax.f32 %v8391_v42, 0.0  ;;  %8258 = vmatpush1.bf16.msra.mxu1 %v17330_v47  ;;  %v17396_v47 = vld [vmem:[%s22792_s5 + $0xe50] ss:$24 sps:$4 sm:$0xff]   ;;  %v17399_v62 = vld [vmem:[%s22792_s5 + $0xe80] ss:$24 sps:$4 sm:$0xff]   ;;  %v8360_v42 = vrot.slane %v21211_v56, %v18365_v24 }
 0x652   : > { %v8404_v59 = vmax.f32 %v8392_v46, 0.0  ;;  %8259 = vmatprep.subr.bf16.mxu1 %v17335_v53  ;;  %v8356_v53 = vrot.slane %v21211_v56, %v18362_v23 }
 0x653   : > { %v21242_v63 = vpack.c.bf16 %v8403_v51, %v8397_v49 }
 0x654   : > { %v21244_v3 = vpack.c.bf16 %v8404_v59, %v8398_v58 }
 0x655   : > { %8260 = vmatpush1.bf16.msra.mxu1 %v17333_v57 }
 0x656   : > { %8261 = vmatprep.subr.bf16.mxu1 %v17338_v60  ;;  %v17405_v60 = vld [vmem:[%s22795_s8 + $0x424] ss:$12 sps:$4 sm:$0xff]  }
 0x659   : > { %8262 = vmatpush1.bf16.msra.mxu1 %v17336_v25 }
 0x65a   : > { %8263 = vmatprep.subr.bf16.mxu1 %v17341_v52 }
 0x65d   : > { %8264 = vmatpush1.bf16.msra.mxu1 %v17339_v4 }
 0x65e   : > { %8265 = vmatprep.subr.bf16.mxu1 %v17344_v5  ;;  %v17411_v5 = vld [vmem:[%s22795_s8 + $0x43c] ss:$12 sps:$4 sm:$0xff]  }
 0x661   : > { %8266 = vmatpush1.bf16.msra.mxu1 %v17342_v33 }
 0x662   : > { %8267 = vmatprep.subr.bf16.mxu1 %v17347_v44 }
 0x665   : > { %8268 = vmatpush1.bf16.msra.mxu1 %v17345_v6  ;;  %v17413_v6 = vld [vmem:[%s22795_s8 + $0x438] ss:$12 sps:$4 sm:$0xff]  }
 0x666   : > { %8269 = vmatprep.subr.bf16.mxu1 %v17350_v11 }
 0x669   : > { %8270 = vmatpush1.bf16.msra.mxu1 %v17348_v7  ;;  %v17450_v7 = vld [vmem:[%s22795_s8 + $0xc4] ss:$12 sps:$4 sm:$0xff]  }
 0x66a   : > { %8271 = vmatprep.subr.bf16.mxu1 %v17353_v36 }
 0x66d   : > { %8272 = vmatpush1.bf16.msra.mxu1 %v17351_v9  ;;  %v17417_v9 = vld [vmem:[%s22795_s8 + $0x454] ss:$12 sps:$4 sm:$0xff]  }
 0x66e   : > { %8273 = vmatprep.subr.bf16.mxu1 %v17356_v12  ;;  %v17419_v12 = vld [vmem:[%s22795_s8 + $0x450] ss:$12 sps:$4 sm:$0xff]  }
 0x671   : > { %8274 = vmatpush1.bf16.msra.mxu1 %v17354_v14  ;;  %v21419_v14 = vld [vmem:[%s22794_s7] sm:$0x1f] }
 0x672   : > { %8275 = vmatprep.subr.bf16.mxu1 %v17359_v31  ;;  %v17423_v31 = vld [vmem:[%s22795_s8 + $0x46c] ss:$12 sps:$4 sm:$0xff]  }
 0x675   : > { %8276 = vmatpush1.bf16.msra.mxu1 %v17357_v8  ;;  %v17425_v8 = vld [vmem:[%s22795_s8 + $0x468] ss:$12 sps:$4 sm:$0xff]  }
 0x676   : > { %8277 = vmatprep.subr.bf16.mxu1 %v17362_v28  ;;  %v17429_v28 = vld [vmem:[%s22795_s8 + $0x484] ss:$12 sps:$4 sm:$0xff]  }
 0x679   : > { %8278 = vmatpush1.bf16.msra.mxu1 %v17360_v15  ;;  %v17431_v15 = vld [vmem:[%s22795_s8 + $0x480] ss:$12 sps:$4 sm:$0xff]  }
 0x67a   : > { %8279 = vmatprep.subr.bf16.mxu1 %v17365_v17  ;;  %v17435_v17 = vld [vmem:[%s22795_s8 + $0x49c] ss:$12 sps:$4 sm:$0xff]  }
 0x67d   : > { %8280 = vmatpush1.bf16.msra.mxu1 %v17363_v34  ;;  %v17437_v34 = vld [vmem:[%s22795_s8 + $0x498] ss:$12 sps:$4 sm:$0xff]  }
 0x67e   : > { %8281 = vmatprep.subr.bf16.mxu1 %v17368_v55  ;;  %v17441_v55 = vld [vmem:[%s22795_s8 + $0x4b4] ss:$12 sps:$4 sm:$0xff]  }
 0x681   : > { %8282 = vmatpush1.bf16.msra.mxu1 %v17366_v18  ;;  %v17443_v18 = vld [vmem:[%s22795_s8 + $0x4b0] ss:$12 sps:$4 sm:$0xff]  }
 0x682   : > { %8283 = vmatprep.subr.bf16.mxu1 %v17371_v43  ;;  %v17447_v43 = vld [vmem:[%s22795_s8 + $0x4cc] ss:$12 sps:$4 sm:$0xff]  }
 0x685   : > { %8284 = vmatpush1.bf16.msra.mxu1 %v17369_v39  ;;  %v17449_v39 = vld [vmem:[%s22795_s8 + $0x4c8] ss:$12 sps:$4 sm:$0xff]  }
 0x686   : > { %8296 = vmatprep.subr.bf16.mxu1 %v17374_v19  ;;  %v17453_v19 = vld [vmem:[%s22795_s8 + $0x4e4] ss:$12 sps:$4 sm:$0xff]  }
 0x688   : > { %8286 = vmatmul.mubr.bf16.vlgmr.msra.gmra.mrb[52].mxu1 %v20756_v61  ;;  %v17383_v61 = vld [vmem:[%s22792_s5 + $0xd64] ss:$24 sps:$4 sm:$0xff]  }
 0x689   : > { %8297 = vmatpush1.bf16.msra.mxu1 %v17372_v26  ;;  %12963 = vmatprep.mubr.msk.bf16.mxu1 %vm5828_vm9, %v20767_v41  ;;  %v17381_v41 = vld [vmem:[%s22792_s5 + $0xd60] ss:$24 sps:$4 sm:$0xff]  }
 0x68a   : > { %8298 = vmatprep.subr.bf16.mxu1 %v17377_v0  ;;  %v17455_v26 = vld [vmem:[%s22795_s8 + $0x4e0] ss:$12 sps:$4 sm:$0xff]   ;;  %v17459_v0 = vld [vmem:[%s22795_s8 + $0x4fc] ss:$12 sps:$4 sm:$0xff]  }
 0x68d   : > { %8299 = vmatpush1.bf16.msra.mxu1 %v17375_v13  ;;  %v17461_v13 = vld [vmem:[%s22795_s8 + $0x4f8] ss:$12 sps:$4 sm:$0xff]  }
 0x68e   : > { %8300 = vmatprep.subr.bf16.mxu1 %v17380_v1  ;;  %v17465_v1 = vld [vmem:[%s22795_s8 + $0x514] ss:$12 sps:$4 sm:$0xff]  }
 0x691   : > { %8301 = vmatpush1.bf16.msra.mxu1 %v17378_v22  ;;  %v17467_v22 = vld [vmem:[%s22795_s8 + $0x510] ss:$12 sps:$4 sm:$0xff]  }
 0x692   : > { %8302 = vmatprep.subr.bf16.mxu1 %v17383_v61  ;;  %v17471_v61 = vld [vmem:[%s22795_s8 + $0x52c] ss:$12 sps:$4 sm:$0xff]  }
 0x695   : > { %8303 = vmatpush1.bf16.msra.mxu1 %v17381_v41  ;;  %v17473_v41 = vld [vmem:[%s22795_s8 + $0x528] ss:$12 sps:$4 sm:$0xff]  }
 0x696   : > { %8304 = vmatprep.subr.bf16.mxu1 %v17386_v37  ;;  %v17477_v37 = vld [vmem:[%s22795_s8 + $0x544] ss:$12 sps:$4 sm:$0xff]  }
 0x699   : > { %8305 = vmatpush1.bf16.msra.mxu1 %v17384_v38  ;;  %v17479_v38 = vld [vmem:[%s22795_s8 + $0x540] ss:$12 sps:$4 sm:$0xff]  }
 0x69a   : > { %8306 = vmatprep.subr.bf16.mxu1 %v17389_v35  ;;  %v8372_v35 = vrot.slane %v21211_v56, %v1465_v48 }
 0x69d   : > { %8307 = vmatpush1.bf16.msra.mxu1 %v17387_v32  ;;  %v17483_v32 = vld [vmem:[%s22795_s8 + $0x55c] ss:$12 sps:$4 sm:$0xff]  }
 0x69e   : > { %8308 = vmatprep.subr.bf16.mxu1 %v17392_v16  ;;  %v8376_v16 = vrot.slane %v21211_v56, %v1469_v54  ;;  %v12973_v56 = vld [vmem:[%s22794_s7 + $0x8] sm:$0x1f] }
 0x6a1   : > { %8309 = vmatpush1.bf16.msra.mxu1 %v17390_v40  ;;  %v17485_v40 = vld [vmem:[%s22795_s8 + $0x558] ss:$12 sps:$4 sm:$0xff]  }
 0x6a2   : > { %8310 = vmatprep.subr.bf16.mxu1 %v17395_v20 }
 0x6a5   : > { %8311 = vmatpush1.bf16.msra.mxu1 %v17393_v50 }
 0x6a6   : > { %8312 = vmatprep.subr.bf16.mxu1 %v17398_v27 }
 0x6a9   : > { %8313 = vmatpush1.bf16.msra.mxu1 %v17396_v47 }
 0x6aa   : > { %8314 = vmatprep.subr.bf16.mxu1 %v17401_v29 }
 0x6ad   : > { %8315 = vmatpush1.bf16.msra.mxu1 %v17399_v62 }
 0x6ae   : > { %14842 = vmatprep.subr.bf16.mxu1 %v17405_v60  ;;  %v17420_v60 = vld [vmem:[%s22795_s8 + $0x4c] ss:$12 sps:$4 sm:$0xff]  }
 0x6b0   : > { %8329 = vmatmul.mubr.bf16.vlgmr.msra.gmra.mrb[52].mxu1 %v20885_v30  ;;  %v17407_v30 = vld [vmem:[%s22795_s8 + $0x420] ss:$12 sps:$4 sm:$0xff]  }
 0x6b1   : > { %14844 = vmatpush1.bf16.msra.mxu1 %v17407_v30  ;;  %v17422_v30 = vld [vmem:[%s22795_s8 + $0x48] ss:$12 sps:$4 sm:$0xff]  }
 0x6b2   : > { %14846 = vmatprep.subr.bf16.mxu1 %v17411_v5  ;;  %v17434_v5 = vld [vmem:[%s22795_s8 + $0x78] ss:$12 sps:$4 sm:$0xff]  }
 0x6b5   : > { %14848 = vmatpush1.bf16.msra.mxu1 %v17413_v6  ;;  %v17444_v6 = vld [vmem:[%s22795_s8 + $0xac] ss:$12 sps:$4 sm:$0xff]  }
 0x6b6   : > { %14850 = vmatprep.subr.bf16.mxu1 %v17417_v9  ;;  %v17456_v9 = vld [vmem:[%s22795_s8 + $0xdc] ss:$12 sps:$4 sm:$0xff]  }
 0x6b9   : > { %14852 = vmatpush1.bf16.msra.mxu1 %v17419_v12  ;;  %v17458_v12 = vld [vmem:[%s22795_s8 + $0xd8] ss:$12 sps:$4 sm:$0xff]  }
 0x6ba   : > { %14854 = vmatprep.subr.bf16.mxu1 %v17423_v31  ;;  %v17464_v31 = vld [vmem:[%s22795_s8 + $0xf0] ss:$12 sps:$4 sm:$0xff]  }
 0x6bd   : > { %14856 = vmatpush1.bf16.msra.mxu1 %v17425_v8  ;;  %v17468_v8 = vld [vmem:[%s22795_s8 + $0x10c] ss:$12 sps:$4 sm:$0xff]  }
 0x6be   : > { %14858 = vmatprep.subr.bf16.mxu1 %v17429_v28  ;;  %v17470_v28 = vld [vmem:[%s22795_s8 + $0x108] ss:$12 sps:$4 sm:$0xff]  }
 0x6c1   : > { %14860 = vmatpush1.bf16.msra.mxu1 %v17431_v15  ;;  %v17474_v15 = vld [vmem:[%s22795_s8 + $0x124] ss:$12 sps:$4 sm:$0xff]  }
 0x6c2   : > { %14862 = vmatprep.subr.bf16.mxu1 %v17435_v17  ;;  %v17476_v17 = vld [vmem:[%s22795_s8 + $0x120] ss:$12 sps:$4 sm:$0xff]  }
 0x6c5   : > { %14864 = vmatpush1.bf16.msra.mxu1 %v17437_v34  ;;  %v17480_v34 = vld [vmem:[%s22795_s8 + $0x13c] ss:$12 sps:$4 sm:$0xff]  }
 0x6c6   : > { %14866 = vmatprep.subr.bf16.mxu1 %v17441_v55  ;;  %v17482_v55 = vld [vmem:[%s22795_s8 + $0x138] ss:$12 sps:$4 sm:$0xff]  }
 0x6c9   : > { %14868 = vmatpush1.bf16.msra.mxu1 %v17443_v18  ;;  %v17486_v18 = vld [vmem:[%s22795_s8 + $0x154] ss:$12 sps:$4 sm:$0xff]  }
 0x6ca   : > { %14870 = vmatprep.subr.bf16.mxu1 %v17447_v43  ;;  %v17488_v43 = vld [vmem:[%s22795_s8 + $0x150] ss:$12 sps:$4 sm:$0xff]  }
 0x6cd   : > { %14872 = vmatpush1.bf16.msra.mxu1 %v17449_v39  ;;  %v17489_v39 = vld [vmem:[%s22795_s8 + $0x574] ss:$12 sps:$4 sm:$0xff]  }
 0x6ce   : > { %14874 = vmatprep.subr.bf16.mxu1 %v17453_v19  ;;  %v17491_v19 = vld [vmem:[%s22795_s8 + $0x570] ss:$12 sps:$4 sm:$0xff]  }
 0x6d1   : > { %14876 = vmatpush1.bf16.msra.mxu1 %v17455_v26  ;;  %v17492_v26 = vld [vmem:[%s22795_s8 + $0x16c] ss:$12 sps:$4 sm:$0xff]  }
 0x6d2   : > { %14878 = vmatprep.subr.bf16.mxu1 %v17459_v0  ;;  %v17494_v0 = vld [vmem:[%s22795_s8 + $0x168] ss:$12 sps:$4 sm:$0xff]  }
 0x6d5   : > { %14880 = vmatpush1.bf16.msra.mxu1 %v17461_v13  ;;  %v17495_v13 = vld [vmem:[%s22795_s8 + $0x58c] ss:$12 sps:$4 sm:$0xff]  }
 0x6d6   : > { %14882 = vmatprep.subr.bf16.mxu1 %v17465_v1  ;;  %v17497_v1 = vld [vmem:[%s22795_s8 + $0x588] ss:$12 sps:$4 sm:$0xff]  }
 0x6d9   : > { %14884 = vmatpush1.bf16.msra.mxu1 %v17467_v22  ;;  %v17498_v22 = vld [vmem:[%s22795_s8 + $0x184] ss:$12 sps:$4 sm:$0xff]  }
 0x6da   : > { %14886 = vmatprep.subr.bf16.mxu1 %v17471_v61  ;;  %v17501_v61 = vld [vmem:[%s22795_s8 + $0x5a4] ss:$12 sps:$4 sm:$0xff]  }
 0x6dd   : > { %14888 = vmatpush1.bf16.msra.mxu1 %v17473_v41 }
 0x6de   : > { %14890 = vmatprep.subr.bf16.mxu1 %v17477_v37 }
 0x6e1   : > { %14892 = vmatpush1.bf16.msra.mxu1 %v17479_v38 }
 0x6e2   : > { %14894 = vmatprep.subr.bf16.mxu1 %v17483_v32 }
 0x6e5   : > { %14896 = vmatpush1.bf16.msra.mxu1 %v17485_v40 }
 0x6e6   : > { %14898 = vmatprep.subr.bf16.mxu1 %v17489_v39  ;;  %v17552_v39 = vld [vmem:[%s22795_s8 + $0x25c] ss:$12 sps:$4 sm:$0xff]  }
 0x6e9   : > { %14900 = vmatpush1.bf16.msra.mxu1 %v17491_v19  ;;  %v17555_v19 = vld [vmem:[%s22795_s8 + $0x67c] ss:$12 sps:$4 sm:$0xff]  }
 0x6ea   : > { %14902 = vmatprep.subr.bf16.mxu1 %v17495_v13  ;;  %v17558_v13 = vld [vmem:[%s22795_s8 + $0x274] ss:$12 sps:$4 sm:$0xff]  }
 0x6ed   : > { %14904 = vmatpush1.bf16.msra.mxu1 %v17497_v1  ;;  %v17561_v1 = vld [vmem:[%s22795_s8 + $0x694] ss:$12 sps:$4 sm:$0xff]  }
 0x6ee   : > { %14906 = vmatprep.subr.bf16.mxu1 %v17501_v61  ;;  %v17563_v61 = vld [vmem:[%s22795_s8 + $0x690] ss:$12 sps:$4 sm:$0xff]  }
 0x71b   : > { %v8158_v45 = vpop.f32.mrb[48].mxu1 }
 0x71c   : > { %v8383_v46 = vadd.f32 %v8356_v53, %v8158_v45  ;;  %v8160_v49 = vpop.f32.mrb[49].mxu1 }
 0x71d   : > { %v8384_v51 = vadd.f32 %v8360_v42, %v8160_v49  ;;  %v8162_v57 = vpop.f32.mrb[50].mxu1 }
 0x71e   : > { %v8389_v58 = vadd.f32 %v8356_v53, %v8162_v57  ;;  %v8164_v59 = vpop.f32.mrb[51].mxu1  ;;  %v8395_v52 = vmax.f32 %v8383_v46, 0.0  ;;  %v17410_v57 = vld [vmem:[%s22795_s8 + $0x18] ss:$12 sps:$4 sm:$0xff]  }
 0x71f   : > { %v8390_v25 = vadd.f32 %v8360_v42, %v8164_v59  ;;  %v8396_v33 = vmax.f32 %v8384_v51, 0.0  ;;  %v17402_v51 = vld [vmem:[%s22795_s8 + $0x4] ss:$12 sps:$4 sm:$0xff]  }
 0x720   : > { %v8401_v4 = vmax.f32 %v8389_v58, 0.0  ;;  %v17414_v58 = vld [vmem:[%s22795_s8 + $0x34] ss:$12 sps:$4 sm:$0xff]   ;;  %v17416_v59 = vld [vmem:[%s22795_s8 + $0x30] ss:$12 sps:$4 sm:$0xff]  }
 0x721   : > { %v8402_v44 = vmax.f32 %v8390_v25, 0.0  ;;  %v17426_v25 = vld [vmem:[%s22795_s8 + $0x64] ss:$12 sps:$4 sm:$0xff]  }
 0x722   : > { %v21395_v11 = vpack.c.bf16 %v8401_v4, %v8395_v52  ;;  %v17428_v52 = vld [vmem:[%s22795_s8 + $0x60] ss:$12 sps:$4 sm:$0xff]   ;;  %v17432_v4 = vld [vmem:[%s22795_s8 + $0x7c] ss:$12 sps:$4 sm:$0xff]  }
 0x723   : > { %v21402_v36 = vpack.c.bf16 %v8402_v44, %v8396_v33  ;;  %v17438_v33 = vld [vmem:[%s22795_s8 + $0x94] ss:$12 sps:$4 sm:$0xff]   ;;  %v17440_v44 = vld [vmem:[%s22795_s8 + $0x90] ss:$12 sps:$4 sm:$0xff]  }
 0x725   : > { %14531 = vmatprep.subr.msk.bf16.mxu0 %vm21398_vm11, %v21402_v36 }
 0x726   : > { %14534 = vmatpush1.bf16.msk.msra.mxu0 %vm21398_vm11, %v21395_v11 }
 0x727   : > { %14537 = vmatprep.subr.msk.bf16.mxu0 %vm21398_vm11, %v21244_v3 }
 0x729   : > { %12966 = vmatmul.mubr.msk.f32.vlgmr.msra.gmra.mrb[36].mxu0 %vm8408_vm12, %v21419_v14 }
 0x72a   : > { %14540 = vmatpush1.bf16.msk.msra.mxu0 %vm21398_vm11, %v21242_v63  ;;  %8566 = vmatprep.mubr.f32.mxu0 %v18008_v10 }
 0x72d   : > { %12969 = vmatmul.mubr.msk.f32.vlgmr.msra.gmra.mrb[38].mxu0 %vm8408_vm12, %v21419_v14 }
 0x72e   : > { %8637 = vmatprep.mubr.f32.mxu0 %v18008_v10 }
 0x783   : > { %v8330_v20 = vpop.f32.mrb[52].mxu1 }
 0x784   : > { %v8387_v50 = vadd.f32 %v8372_v35, %v8330_v20  ;;  %v8332_v27 = vpop.f32.mrb[53].mxu1 }
 0x785   : > { %v8388_v47 = vadd.f32 %v8376_v16, %v8332_v27  ;;  %v8334_v29 = vpop.f32.mrb[54].mxu1 }
 0x786   : > { %v8393_v48 = vadd.f32 %v8372_v35, %v8334_v29  ;;  %v8336_v62 = vpop.f32.mrb[55].mxu1  ;;  %v8399_v42 = vmax.f32 %v8387_v50, 0.0  ;;  %v17503_v29 = vld [vmem:[%s22795_s8 + $0x5a0] ss:$12 sps:$4 sm:$0xff]  }
 0x787   : > { %v8394_v53 = vadd.f32 %v8376_v16, %v8336_v62  ;;  %v8400_v46 = vmax.f32 %v8388_v47, 0.0  ;;  %v17500_v47 = vld [vmem:[%s22795_s8 + $0x180] ss:$12 sps:$4 sm:$0xff]   ;;  %v17507_v62 = vld [vmem:[%s22795_s8 + $0x5bc] ss:$12 sps:$4 sm:$0xff]  }
 0x788   : > { %v8405_v45 = vmax.f32 %v8393_v48, 0.0  ;;  %v17504_v48 = vld [vmem:[%s22795_s8 + $0x19c] ss:$12 sps:$4 sm:$0xff]  }
 0x789   : > { %v8406_v21 = vmax.f32 %v8394_v53, 0.0 }
 0x78a   : > { %v14544_v49 = vpack.c.bf16 %v8405_v45, %v8399_v42 }
 0x78b   : > { %v14541_v54 = vpack.c.bf16 %v8406_v21, %v8400_v46  ;;  %v17506_v21 = vld [vmem:[%s22795_s8 + $0x198] ss:$12 sps:$4 sm:$0xff]  }
 0x78d   : > { %14543 = vmatprep.subr.msk.bf16.mxu0 %vm21398_vm11, %v14541_v54 }
 0x78e   : > { %14546 = vmatpush1.bf16.msk.msra.mxu0 %vm21398_vm11, %v14544_v49 }
 0x78f   : > { %14549 = vmatprep.subr.msk.bf16.mxu0 %vm21398_vm11, %v21402_v36  ;;  %v17452_v36 = vld [vmem:[%s22795_s8 + $0xc0] ss:$12 sps:$4 sm:$0xff]  }
 0x791   : > { %12972 = vmatmul.mubr.msk.f32.vlgmr.msra.gmra.mrb[40].mxu0 %vm8408_vm12, %v21419_v14  ;;  %v17462_v14 = vld [vmem:[%s22795_s8 + $0xf4] ss:$12 sps:$4 sm:$0xff]  }
 0x792   : > { %14552 = vmatpush1.bf16.msk.msra.mxu0 %vm21398_vm11, %v21395_v11  ;;  %8713 = vmatprep.mubr.f32.mxu0 %v18008_v10  ;;  %v17446_v11 = vld [vmem:[%s22795_s8 + $0xa8] ss:$12 sps:$4 sm:$0xff]  }
 0x793   : > { %14555 = vmatprep.subr.msk.bf16.mxu0 %vm21398_vm11, %v21244_v3  ;;  %v17408_v3 = vld [vmem:[%s22795_s8 + $0x1c] ss:$12 sps:$4 sm:$0xff]  }
 0x795   : > { %12976 = vmatmul.mubr.msk.f32.vlgmr.msra.gmra.mrb[42].mxu0 %vm8408_vm12, %v12973_v56 }
 0x796   : > { %14558 = vmatpush1.bf16.msk.msra.mxu0 %vm21398_vm11, %v21242_v63  ;;  %8784 = vmatprep.mubr.f32.mxu0 %v18008_v10  ;;  %v17404_v63 = vld [vmem:[%s22795_s8] ss:$12 sps:$4 sm:$0xff]  }
 0x797   : > { %14561 = vmatprep.subr.msk.bf16.mxu0 %vm21398_vm11, %v14541_v54  ;;  %v17510_v54 = vld [vmem:[%s22795_s8 + $0x1b4] ss:$12 sps:$4 sm:$0xff]  }
 0x799   : > { %12979 = vmatmul.mubr.msk.f32.vlgmr.msra.gmra.mrb[44].mxu0 %vm8408_vm12, %v12973_v56 }
 0x79a   : > { %14564 = vmatpush1.bf16.msk.msra.mxu0 %vm21398_vm11, %v14544_v49  ;;  %8855 = vmatprep.mubr.f32.mxu0 %v18008_v10  ;;  %v17509_v49 = vld [vmem:[%s22795_s8 + $0x5b8] ss:$12 sps:$4 sm:$0xff]  }
 0x79b   : > { %14566 = vmatprep.subr.bf16.mxu0 %v17402_v51 }
 0x79d   : > { %12982 = vmatmul.mubr.msk.f32.vlgmr.msra.gmra.mrb[46].mxu0 %vm8408_vm12, %v12973_v56  ;;  %v17513_v56 = vld [vmem:[%s22795_s8 + $0x5d4] ss:$12 sps:$4 sm:$0xff]  }
 0x79e   : > { %14568 = vmatpush1.bf16.msra.mxu0 %v17404_v63 }
 0x79f   : > { %14570 = vmatprep.subr.bf16.mxu0 %v17408_v3 }
 0x7a2   : > { %14572 = vmatpush1.bf16.msra.mxu0 %v17410_v57 }
 0x7a3   : > { %14574 = vmatprep.subr.bf16.mxu0 %v17414_v58  ;;  %v17512_v58 = vld [vmem:[%s22795_s8 + $0x1b0] ss:$12 sps:$4 sm:$0xff]  }
 0x7a6   : > { %14576 = vmatpush1.bf16.msra.mxu0 %v17416_v59  ;;  %v17515_v59 = vld [vmem:[%s22795_s8 + $0x5d0] ss:$12 sps:$4 sm:$0xff]  }
 0x7a7   : > { %14578 = vmatprep.subr.bf16.mxu0 %v17420_v60  ;;  %v17516_v60 = vld [vmem:[%s22795_s8 + $0x1cc] ss:$12 sps:$4 sm:$0xff]  }
 0x7aa   : > { %14580 = vmatpush1.bf16.msra.mxu0 %v17422_v30  ;;  %v17519_v30 = vld [vmem:[%s22795_s8 + $0x5ec] ss:$12 sps:$4 sm:$0xff]  }
 0x7ab   : > { %14582 = vmatprep.subr.bf16.mxu0 %v17426_v25  ;;  %v17518_v25 = vld [vmem:[%s22795_s8 + $0x1c8] ss:$12 sps:$4 sm:$0xff]  }
 0x7ae   : > { %14584 = vmatpush1.bf16.msra.mxu0 %v17428_v52  ;;  %v17521_v52 = vld [vmem:[%s22795_s8 + $0x5e8] ss:$12 sps:$4 sm:$0xff]  }
 0x7af   : > { %14586 = vmatprep.subr.bf16.mxu0 %v17432_v4  ;;  %v17522_v4 = vld [vmem:[%s22795_s8 + $0x1e4] ss:$12 sps:$4 sm:$0xff]  }
 0x7b2   : > { %14588 = vmatpush1.bf16.msra.mxu0 %v17434_v5  ;;  %v17525_v5 = vld [vmem:[%s22795_s8 + $0x604] ss:$12 sps:$4 sm:$0xff]  }
 0x7b3   : > { %14590 = vmatprep.subr.bf16.mxu0 %v17438_v33  ;;  %v17524_v33 = vld [vmem:[%s22795_s8 + $0x1e0] ss:$12 sps:$4 sm:$0xff]  }
 0x7b6   : > { %14592 = vmatpush1.bf16.msra.mxu0 %v17440_v44  ;;  %v17527_v44 = vld [vmem:[%s22795_s8 + $0x600] ss:$12 sps:$4 sm:$0xff]  }
 0x7b7   : > { %14594 = vmatprep.subr.bf16.mxu0 %v17444_v6  ;;  %v17528_v6 = vld [vmem:[%s22795_s8 + $0x1fc] ss:$12 sps:$4 sm:$0xff]  }
 0x7ba   : > { %14596 = vmatpush1.bf16.msra.mxu0 %v17446_v11  ;;  %v17531_v11 = vld [vmem:[%s22795_s8 + $0x61c] ss:$12 sps:$4 sm:$0xff]  }
 0x7bb   : > { %14598 = vmatprep.subr.bf16.mxu0 %v17450_v7  ;;  %v17530_v7 = vld [vmem:[%s22795_s8 + $0x1f8] ss:$12 sps:$4 sm:$0xff]  }
 0x7be   : > { %14600 = vmatpush1.bf16.msra.mxu0 %v17452_v36  ;;  %v17533_v36 = vld [vmem:[%s22795_s8 + $0x618] ss:$12 sps:$4 sm:$0xff]  }
 0x7bf   : > { %14602 = vmatprep.subr.bf16.mxu0 %v17456_v9  ;;  %v17534_v9 = vld [vmem:[%s22795_s8 + $0x214] ss:$12 sps:$4 sm:$0xff]  }
 0x7c2   : > { %14604 = vmatpush1.bf16.msra.mxu0 %v17458_v12  ;;  %v17537_v12 = vld [vmem:[%s22795_s8 + $0x634] ss:$12 sps:$4 sm:$0xff]  }
 0x7c3   : > { %14606 = vmatprep.subr.bf16.mxu0 %v17462_v14  ;;  %v17536_v14 = vld [vmem:[%s22795_s8 + $0x210] ss:$12 sps:$4 sm:$0xff]  }
 0x7c6   : > { %14608 = vmatpush1.bf16.msra.mxu0 %v17464_v31  ;;  %v17539_v31 = vld [vmem:[%s22795_s8 + $0x630] ss:$12 sps:$4 sm:$0xff]  }
 0x7c7   : > { %14610 = vmatprep.subr.bf16.mxu0 %v17468_v8  ;;  %v17540_v8 = vld [vmem:[%s22795_s8 + $0x22c] ss:$12 sps:$4 sm:$0xff]  }
 0x7ca   : > { %14612 = vmatpush1.bf16.msra.mxu0 %v17470_v28  ;;  %v17543_v28 = vld [vmem:[%s22795_s8 + $0x64c] ss:$12 sps:$4 sm:$0xff]  }
 0x7cb   : > { %14614 = vmatprep.subr.bf16.mxu0 %v17474_v15  ;;  %v17542_v15 = vld [vmem:[%s22795_s8 + $0x228] ss:$12 sps:$4 sm:$0xff]  }
 0x7ce   : > { %14616 = vmatpush1.bf16.msra.mxu0 %v17476_v17  ;;  %v17545_v17 = vld [vmem:[%s22795_s8 + $0x648] ss:$12 sps:$4 sm:$0xff]  }
 0x7cf   : > { %14618 = vmatprep.subr.bf16.mxu0 %v17480_v34  ;;  %v17546_v34 = vld [vmem:[%s22795_s8 + $0x244] ss:$12 sps:$4 sm:$0xff]  }
 0x7d2   : > { %14620 = vmatpush1.bf16.msra.mxu0 %v17482_v55  ;;  %v17549_v55 = vld [vmem:[%s22795_s8 + $0x664] ss:$12 sps:$4 sm:$0xff]  }
 0x7d3   : > { %14622 = vmatprep.subr.bf16.mxu0 %v17486_v18  ;;  %v17548_v18 = vld [vmem:[%s22795_s8 + $0x240] ss:$12 sps:$4 sm:$0xff]  }
 0x7d6   : > { %14624 = vmatpush1.bf16.msra.mxu0 %v17488_v43  ;;  %v17551_v43 = vld [vmem:[%s22795_s8 + $0x660] ss:$12 sps:$4 sm:$0xff]  }
 0x7d7   : > { %14626 = vmatprep.subr.bf16.mxu0 %v17492_v26  ;;  %v17554_v26 = vld [vmem:[%s22795_s8 + $0x258] ss:$12 sps:$4 sm:$0xff]  }
 0x7da   : > { %14628 = vmatpush1.bf16.msra.mxu0 %v17494_v0  ;;  %v17557_v0 = vld [vmem:[%s22795_s8 + $0x678] ss:$12 sps:$4 sm:$0xff]  }
 0x7db   : > { %14630 = vmatprep.subr.bf16.mxu0 %v17498_v22  ;;  %v17560_v22 = vld [vmem:[%s22795_s8 + $0x270] ss:$12 sps:$4 sm:$0xff]  }
 0x7fc   : > { %v8497_v41 = vpop.f32.mrb[36].mxu0 }
 0x7fd   : > { %v8499_v37 = vpop.f32.mrb[37].mxu0 }
 0x800   : > { %v8568_v38 = vpop.f32.mrb[38].mxu0 }
 0x801   : > { %v8570_v35 = vpop.f32.mrb[39].mxu0 }
 0x864   : > { %v8639_v32 = vpop.f32.mrb[40].mxu0 }
 0x865   : > { %v8641_v16 = vpop.f32.mrb[41].mxu0 }
 0x868   : > { %v8715_v40 = vpop.f32.mrb[42].mxu0 }
 0x869   : > { %v21650_v20 = vmax.f32 %v8497_v41, %v8715_v40  ;;  %v8717_v50 = vpop.f32.mrb[43].mxu0  ;;  %v17564_v41 = vld [vmem:[%s22795_s8 + $0x28c] ss:$12 sps:$4 sm:$0xff]  }
 0x86a   : > { %v21652_v27 = vmax.f32 %v8499_v37, %v8717_v50  ;;  %v17567_v37 = vld [vmem:[%s22795_s8 + $0x6ac] ss:$12 sps:$4 sm:$0xff]  }
 0x86b   : > { %v17572_v40 = vld [vmem:[%s22795_s8 + $0x2a0] ss:$12 sps:$4 sm:$0xff]  }
 0x86c   : > { %v8786_v53 = vpop.f32.mrb[44].mxu0  ;;  %9375 = vmatprep.mubr.f32.mxu0 %v21652_v27  ;;  %10239 = vmatprep.mubr.f32.mxu1 %v21652_v27  ;;  %v17575_v50 = vld [vmem:[%s22795_s8 + $0x6c0] ss:$12 sps:$4 sm:$0xff]  }
 0x86d   : > { %v21668_v42 = vmax.f32 %v8568_v38, %v8786_v53  ;;  %v8788_v45 = vpop.f32.mrb[45].mxu0  ;;  %9376 = vmatmul.mubr.f32.vlgmr.msra.gmra.mrb[48].mxu0 %v21650_v20  ;;  %10240 = vmatmul.mubr.f32.vlgmr.msra.gmra.mrb[56].mxu1 %v21650_v20  ;;  %v17566_v38 = vld [vmem:[%s22795_s8 + $0x288] ss:$12 sps:$4 sm:$0xff]  }
 0x86e   : > { %v21672_v46 = vmax.f32 %v8570_v35, %v8788_v45  ;;  %14632 = vmatpush1.bf16.msra.mxu0 %v17500_v47  ;;  %14908 = vmatpush1.bf16.msra.mxu1 %v17503_v29  ;;  %v17569_v35 = vld [vmem:[%s22795_s8 + $0x6a8] ss:$12 sps:$4 sm:$0xff]  }
 0x86f   : > { %14634 = vmatprep.subr.bf16.mxu0 %v17504_v48  ;;  %14910 = vmatprep.subr.bf16.mxu1 %v17507_v62  ;;  %v17576_v47 = vld [vmem:[%s22795_s8 + $0x2bc] ss:$12 sps:$4 sm:$0xff]   ;;  %v17578_v48 = vld [vmem:[%s22795_s8 + $0x2b8] ss:$12 sps:$4 sm:$0xff]   ;;  %v17582_v53 = vld [vmem:[%s22795_s8 + $0x2d4] ss:$12 sps:$4 sm:$0xff]  }
 0x870   : > { %v8857_v51 = vpop.f32.mrb[46].mxu0  ;;  %9446 = vmatprep.mubr.f32.mxu0 %v21672_v46  ;;  %10310 = vmatprep.mubr.f32.mxu1 %v21672_v46  ;;  %v17579_v29 = vld [vmem:[%s22795_s8 + $0x6dc] ss:$12 sps:$4 sm:$0xff]   ;;  %v17581_v62 = vld [vmem:[%s22795_s8 + $0x6d8] ss:$12 sps:$4 sm:$0xff]  }
 0x871   : > { %v21688_v63 = vmax.f32 %v8639_v32, %v8857_v51  ;;  %v8859_v3 = vpop.f32.mrb[47].mxu0  ;;  %v17570_v32 = vld [vmem:[%s22795_s8 + $0x2a4] ss:$12 sps:$4 sm:$0xff]   ;;  %v17585_v45 = vld [vmem:[%s22795_s8 + $0x6f4] ss:$12 sps:$4 sm:$0xff]  }
 0x872   : > { %v21690_v57 = vmax.f32 %v8641_v16, %v8859_v3  ;;  %14636 = vmatpush1.bf16.msra.mxu0 %v17506_v21  ;;  %14912 = vmatpush1.bf16.msra.mxu1 %v17509_v49  ;;  %v17573_v16 = vld [vmem:[%s22795_s8 + $0x6c4] ss:$12 sps:$4 sm:$0xff]   ;;  %v17590_v51 = vld [vmem:[%s22795_s8 + $0x2e8] ss:$12 sps:$4 sm:$0xff]  }
 0x873   : > { %14638 = vmatprep.subr.bf16.mxu0 %v17510_v54  ;;  %14914 = vmatprep.subr.bf16.mxu1 %v17513_v56  ;;  %v17584_v21 = vld [vmem:[%s22795_s8 + $0x2d0] ss:$12 sps:$4 sm:$0xff]   ;;  %v17588_v54 = vld [vmem:[%s22795_s8 + $0x2ec] ss:$12 sps:$4 sm:$0xff]   ;;  %v17593_v3 = vld [vmem:[%s22795_s8 + $0x708] ss:$12 sps:$4 sm:$0xff]  }
 0x874   : > { %v17587_v49 = vld [vmem:[%s22795_s8 + $0x6f0] ss:$12 sps:$4 sm:$0xff]   ;;  %v17591_v56 = vld [vmem:[%s22795_s8 + $0x70c] ss:$12 sps:$4 sm:$0xff]  }
 0x876   : > { %14640 = vmatpush1.bf16.msra.mxu0 %v17512_v58  ;;  %14916 = vmatpush1.bf16.msra.mxu1 %v17515_v59  ;;  %v17594_v58 = vld [vmem:[%s22795_s8 + $0x304] ss:$12 sps:$4 sm:$0xff]  }
 0x877   : > { %14642 = vmatprep.subr.bf16.mxu0 %v17516_v60  ;;  %14918 = vmatprep.subr.bf16.mxu1 %v17519_v30  ;;  %v17597_v59 = vld [vmem:[%s22795_s8 + $0x724] ss:$12 sps:$4 sm:$0xff]   ;;  %v17596_v60 = vld [vmem:[%s22795_s8 + $0x300] ss:$12 sps:$4 sm:$0xff]  }
 0x878   : > { %v17599_v30 = vld [vmem:[%s22795_s8 + $0x720] ss:$12 sps:$4 sm:$0xff]  }
 0x87a   : > { %14644 = vmatpush1.bf16.msra.mxu0 %v17518_v25  ;;  %14920 = vmatpush1.bf16.msra.mxu1 %v17521_v52  ;;  %v17600_v25 = vld [vmem:[%s22795_s8 + $0x31c] ss:$12 sps:$4 sm:$0xff]  }
 0x87b   : > { %14646 = vmatprep.subr.bf16.mxu0 %v17522_v4  ;;  %14922 = vmatprep.subr.bf16.mxu1 %v17525_v5  ;;  %v17603_v52 = vld [vmem:[%s22795_s8 + $0x73c] ss:$12 sps:$4 sm:$0xff]   ;;  %v17602_v4 = vld [vmem:[%s22795_s8 + $0x318] ss:$12 sps:$4 sm:$0xff]  }
 0x87c   : > { %v17605_v5 = vld [vmem:[%s22795_s8 + $0x738] ss:$12 sps:$4 sm:$0xff]  }
 0x87e   : > { %14648 = vmatpush1.bf16.msra.mxu0 %v17524_v33  ;;  %14924 = vmatpush1.bf16.msra.mxu1 %v17527_v44  ;;  %v17606_v33 = vld [vmem:[%s22795_s8 + $0x334] ss:$12 sps:$4 sm:$0xff]  }
 0x87f   : > { %14650 = vmatprep.subr.bf16.mxu0 %v17528_v6  ;;  %14926 = vmatprep.subr.bf16.mxu1 %v17531_v11  ;;  %v17609_v44 = vld [vmem:[%s22795_s8 + $0x754] ss:$12 sps:$4 sm:$0xff]   ;;  %v17608_v6 = vld [vmem:[%s22795_s8 + $0x330] ss:$12 sps:$4 sm:$0xff]  }
 0x880   : > { %v17611_v11 = vld [vmem:[%s22795_s8 + $0x750] ss:$12 sps:$4 sm:$0xff]  }
 0x882   : > { %14652 = vmatpush1.bf16.msra.mxu0 %v17530_v7  ;;  %14928 = vmatpush1.bf16.msra.mxu1 %v17533_v36  ;;  %v17612_v7 = vld [vmem:[%s22795_s8 + $0x34c] ss:$12 sps:$4 sm:$0xff]  }
 0x883   : > { %14654 = vmatprep.subr.bf16.mxu0 %v17534_v9  ;;  %14930 = vmatprep.subr.bf16.mxu1 %v17537_v12  ;;  %v17615_v36 = vld [vmem:[%s22795_s8 + $0x76c] ss:$12 sps:$4 sm:$0xff]   ;;  %v17614_v9 = vld [vmem:[%s22795_s8 + $0x348] ss:$12 sps:$4 sm:$0xff]  }
 0x884   : > { %v17617_v12 = vld [vmem:[%s22795_s8 + $0x768] ss:$12 sps:$4 sm:$0xff]  }
 0x886   : > { %14656 = vmatpush1.bf16.msra.mxu0 %v17536_v14  ;;  %14932 = vmatpush1.bf16.msra.mxu1 %v17539_v31  ;;  %v17618_v14 = vld [vmem:[%s22795_s8 + $0x364] ss:$12 sps:$4 sm:$0xff]  }
 0x887   : > { %14658 = vmatprep.subr.bf16.mxu0 %v17540_v8  ;;  %14934 = vmatprep.subr.bf16.mxu1 %v17543_v28  ;;  %v17621_v31 = vld [vmem:[%s22795_s8 + $0x784] ss:$12 sps:$4 sm:$0xff]   ;;  %v17620_v8 = vld [vmem:[%s22795_s8 + $0x360] ss:$12 sps:$4 sm:$0xff]  }
 0x888   : > { %v17623_v28 = vld [vmem:[%s22795_s8 + $0x780] ss:$12 sps:$4 sm:$0xff]  }
 0x88a   : > { %14660 = vmatpush1.bf16.msra.mxu0 %v17542_v15  ;;  %14936 = vmatpush1.bf16.msra.mxu1 %v17545_v17  ;;  %v17624_v15 = vld [vmem:[%s22795_s8 + $0x37c] ss:$12 sps:$4 sm:$0xff]  }
 0x88b   : > { %14662 = vmatprep.subr.bf16.mxu0 %v17546_v34  ;;  %14938 = vmatprep.subr.bf16.mxu1 %v17549_v55  ;;  %v17627_v17 = vld [vmem:[%s22795_s8 + $0x79c] ss:$12 sps:$4 sm:$0xff]   ;;  %v17626_v34 = vld [vmem:[%s22795_s8 + $0x378] ss:$12 sps:$4 sm:$0xff]  }
 0x88c   : > { %v17629_v55 = vld [vmem:[%s22795_s8 + $0x798] ss:$12 sps:$4 sm:$0xff]  }
 0x88e   : > { %14664 = vmatpush1.bf16.msra.mxu0 %v17548_v18  ;;  %14940 = vmatpush1.bf16.msra.mxu1 %v17551_v43  ;;  %v17630_v18 = vld [vmem:[%s22795_s8 + $0x394] ss:$12 sps:$4 sm:$0xff]  }
 0x88f   : > { %14666 = vmatprep.subr.bf16.mxu0 %v17552_v39  ;;  %14942 = vmatprep.subr.bf16.mxu1 %v17555_v19  ;;  %v17633_v43 = vld [vmem:[%s22795_s8 + $0x7b4] ss:$12 sps:$4 sm:$0xff]   ;;  %v17632_v39 = vld [vmem:[%s22795_s8 + $0x390] ss:$12 sps:$4 sm:$0xff]  }
 0x890   : > { %v17635_v19 = vld [vmem:[%s22795_s8 + $0x7b0] ss:$12 sps:$4 sm:$0xff]  }
 0x892   : > { %14668 = vmatpush1.bf16.msra.mxu0 %v17554_v26  ;;  %14944 = vmatpush1.bf16.msra.mxu1 %v17557_v0  ;;  %v17636_v26 = vld [vmem:[%s22795_s8 + $0x3ac] ss:$12 sps:$4 sm:$0xff]  }
 0x893   : > { %14670 = vmatprep.subr.bf16.mxu0 %v17558_v13  ;;  %14946 = vmatprep.subr.bf16.mxu1 %v17561_v1  ;;  %v17639_v0 = vld [vmem:[%s22795_s8 + $0x7cc] ss:$12 sps:$4 sm:$0xff]   ;;  %v17638_v13 = vld [vmem:[%s22795_s8 + $0x3a8] ss:$12 sps:$4 sm:$0xff]  }
 0x894   : > { %v17641_v1 = vld [vmem:[%s22795_s8 + $0x7c8] ss:$12 sps:$4 sm:$0xff]  }
 0x896   : > { %14672 = vmatpush1.bf16.msra.mxu0 %v17560_v22  ;;  %14948 = vmatpush1.bf16.msra.mxu1 %v17563_v61  ;;  %v17642_v22 = vld [vmem:[%s22795_s8 + $0x3c4] ss:$12 sps:$4 sm:$0xff]  }
 0x897   : > { %14674 = vmatprep.subr.bf16.mxu0 %v17564_v41  ;;  %14950 = vmatprep.subr.bf16.mxu1 %v17567_v37  ;;  %v17645_v61 = vld [vmem:[%s22795_s8 + $0x7e4] ss:$12 sps:$4 sm:$0xff]   ;;  %v17644_v41 = vld [vmem:[%s22795_s8 + $0x3c0] ss:$12 sps:$4 sm:$0xff]  }
 0x898   : > { %v17647_v37 = vld [vmem:[%s22795_s8 + $0x7e0] ss:$12 sps:$4 sm:$0xff]  }
 0x89a   : > { %14676 = vmatpush1.bf16.msra.mxu0 %v17566_v38  ;;  %14952 = vmatpush1.bf16.msra.mxu1 %v17569_v35  ;;  %v17648_v38 = vld [vmem:[%s22795_s8 + $0x3dc] ss:$12 sps:$4 sm:$0xff]  }
 0x89b   : > { %14678 = vmatprep.subr.bf16.mxu0 %v17570_v32  ;;  %14954 = vmatprep.subr.bf16.mxu1 %v17573_v16  ;;  %v17651_v35 = vld [vmem:[%s22795_s8 + $0x7fc] ss:$12 sps:$4 sm:$0xff]   ;;  %v17650_v32 = vld [vmem:[%s22795_s8 + $0x3d8] ss:$12 sps:$4 sm:$0xff]  }
 0x89c   : > { %v17653_v16 = vld [vmem:[%s22795_s8 + $0x7f8] ss:$12 sps:$4 sm:$0xff]  }
 0x89e   : > { %14680 = vmatpush1.bf16.msra.mxu0 %v17572_v40  ;;  %14956 = vmatpush1.bf16.msra.mxu1 %v17575_v50  ;;  %v17654_v40 = vld [vmem:[%s22795_s8 + $0x3f4] ss:$12 sps:$4 sm:$0xff]  }
 0x89f   : > { %14682 = vmatprep.subr.bf16.mxu0 %v17576_v47  ;;  %14958 = vmatprep.subr.bf16.mxu1 %v17579_v29  ;;  %v17657_v50 = vld [vmem:[%s22795_s8 + $0x814] ss:$12 sps:$4 sm:$0xff]   ;;  %v17656_v47 = vld [vmem:[%s22795_s8 + $0x3f0] ss:$12 sps:$4 sm:$0xff]  }
 0x8a0   : > { %v17659_v29 = vld [vmem:[%s22795_s8 + $0x810] ss:$12 sps:$4 sm:$0xff]  }
 0x8a2   : > { %14684 = vmatpush1.bf16.msra.mxu0 %v17578_v48  ;;  %14960 = vmatpush1.bf16.msra.mxu1 %v17581_v62  ;;  %v17660_v48 = vld [vmem:[%s22795_s8 + $0x40c] ss:$12 sps:$4 sm:$0xff]  }
 0x8a3   : > { %14686 = vmatprep.subr.bf16.mxu0 %v17582_v53  ;;  %14962 = vmatprep.subr.bf16.mxu1 %v17585_v45  ;;  %v17663_v62 = vld [vmem:[%s22795_s8 + $0x82c] ss:$12 sps:$4 sm:$0xff]   ;;  %v17662_v53 = vld [vmem:[%s22795_s8 + $0x408] ss:$12 sps:$4 sm:$0xff]  }
 0x8a4   : > { %v17665_v45 = vld [vmem:[%s22795_s8 + $0x828] ss:$12 sps:$4 sm:$0xff]  }
 0x8a6   : > { %14688 = vmatpush1.bf16.msra.mxu0 %v17584_v21  ;;  %14964 = vmatpush1.bf16.msra.mxu1 %v17587_v49  ;;  %v17666_v21 = vld [vmem:[%s22795_s8 + $0xc8] ss:$12 sps:$4 sm:$0xff]  }
 0x8a7   : > { %14690 = vmatprep.subr.bf16.mxu0 %v17588_v54  ;;  %14966 = vmatprep.subr.bf16.mxu1 %v17591_v56  ;;  %v17667_v49 = vld [vmem:[%s22795_s8 + $0x8] ss:$12 sps:$4 sm:$0xff]   ;;  %v17668_v54 = vld [vmem:[%s22795_s8 + $0xe0] ss:$12 sps:$4 sm:$0xff]  }
 0x8a8   : > { %v17669_v56 = vld [vmem:[%s22795_s8 + $0x20] ss:$12 sps:$4 sm:$0xff]  }
 0x8aa   : > { %14692 = vmatpush1.bf16.msra.mxu0 %v17590_v51  ;;  %14968 = vmatpush1.bf16.msra.mxu1 %v17593_v3  ;;  %v17670_v51 = vld [vmem:[%s22795_s8 + $0xf8] ss:$12 sps:$4 sm:$0xff]  }
 0x8ab   : > { %14694 = vmatprep.subr.bf16.mxu0 %v17594_v58  ;;  %14970 = vmatprep.subr.bf16.mxu1 %v17597_v59  ;;  %v17671_v3 = vld [vmem:[%s22795_s8 + $0x38] ss:$12 sps:$4 sm:$0xff]   ;;  %v17672_v58 = vld [vmem:[%s22795_s8 + $0x110] ss:$12 sps:$4 sm:$0xff]  }
 0x8ac   : > { %v17673_v59 = vld [vmem:[%s22795_s8 + $0x50] ss:$12 sps:$4 sm:$0xff]  }
 0x8ad   : > { %9447 = vmatmul.mubr.f32.vlgmr.msra.gmra.mrb[48].mxu0 %v21668_v42  ;;  %10311 = vmatmul.mubr.f32.vlgmr.msra.gmra.mrb[56].mxu1 %v21668_v42 }
 0x8ae   : > { %14696 = vmatpush1.bf16.msra.mxu0 %v17596_v60  ;;  %12983 = vmatprep.mubr.msk.f32.mxu0 %vm2828_vm8, %v21690_v57  ;;  %v17674_v60 = vld [vmem:[%s22795_s8 + $0x128] ss:$12 sps:$4 sm:$0xff]  }
 0x8af   : > { %14972 = vmatpush1.bf16.msra.mxu1 %v17599_v30  ;;  %13161 = vmatprep.mubr.msk.f32.mxu1 %vm2828_vm8, %v21690_v57  ;;  %v17675_v30 = vld [vmem:[%s22795_s8 + $0x68] ss:$12 sps:$4 sm:$0xff]  }
 0x8b0   : > { %14698 = vmatprep.subr.bf16.mxu0 %v17600_v25  ;;  %14974 = vmatprep.subr.bf16.mxu1 %v17603_v52  ;;  %v17676_v25 = vld [vmem:[%s22795_s8 + $0x140] ss:$12 sps:$4 sm:$0xff]  }
 0x8b1   : > { %v17677_v52 = vld [vmem:[%s22795_s8 + $0x80] ss:$12 sps:$4 sm:$0xff]  }
 0x8b2   : > { %14700 = vmatpush1.bf16.msra.mxu0 %v17602_v4  ;;  %v17678_v4 = vld [vmem:[%s22795_s8 + $0x158] ss:$12 sps:$4 sm:$0xff]  }
 0x8b3   : > { %14976 = vmatpush1.bf16.msra.mxu1 %v17605_v5  ;;  %14702 = vmatprep.subr.bf16.mxu0 %v17606_v33  ;;  %v17679_v5 = vld [vmem:[%s22795_s8 + $0x98] ss:$12 sps:$4 sm:$0xff]   ;;  %v17680_v33 = vld [vmem:[%s22795_s8 + $0x170] ss:$12 sps:$4 sm:$0xff]  }
 0x8b4   : > { %14978 = vmatprep.subr.bf16.mxu1 %v17609_v44  ;;  %v17681_v44 = vld [vmem:[%s22795_s8 + $0xb0] ss:$12 sps:$4 sm:$0xff]  }
 0x8b6   : > { %14704 = vmatpush1.bf16.msra.mxu0 %v17608_v6  ;;  %v17682_v6 = vld [vmem:[%s22795_s8 + $0x248] ss:$12 sps:$4 sm:$0xff]  }
 0x8b7   : > { %14980 = vmatpush1.bf16.msra.mxu1 %v17611_v11  ;;  %14706 = vmatprep.subr.bf16.mxu0 %v17612_v7  ;;  %v17683_v11 = vld [vmem:[%s22795_s8 + $0x188] ss:$12 sps:$4 sm:$0xff]   ;;  %v17684_v7 = vld [vmem:[%s22795_s8 + $0x260] ss:$12 sps:$4 sm:$0xff]  }
 0x8b8   : > { %14982 = vmatprep.subr.bf16.mxu1 %v17615_v36  ;;  %v17685_v36 = vld [vmem:[%s22795_s8 + $0x1a0] ss:$12 sps:$4 sm:$0xff]  }
 0x8ba   : > { %14708 = vmatpush1.bf16.msra.mxu0 %v17614_v9  ;;  %v17686_v9 = vld [vmem:[%s22795_s8 + $0x278] ss:$12 sps:$4 sm:$0xff]  }
 0x8bb   : > { %14984 = vmatpush1.bf16.msra.mxu1 %v17617_v12  ;;  %14710 = vmatprep.subr.bf16.mxu0 %v17618_v14  ;;  %v17687_v12 = vld [vmem:[%s22795_s8 + $0x1b8] ss:$12 sps:$4 sm:$0xff]   ;;  %v17688_v14 = vld [vmem:[%s22795_s8 + $0x290] ss:$12 sps:$4 sm:$0xff]  }
 0x8bc   : > { %14986 = vmatprep.subr.bf16.mxu1 %v17621_v31  ;;  %v17689_v31 = vld [vmem:[%s22795_s8 + $0x1d0] ss:$12 sps:$4 sm:$0xff]  }
 0x8be   : > { %14712 = vmatpush1.bf16.msra.mxu0 %v17620_v8  ;;  %v17690_v8 = vld [vmem:[%s22795_s8 + $0x2a8] ss:$12 sps:$4 sm:$0xff]  }
 0x8bf   : > { %14988 = vmatpush1.bf16.msra.mxu1 %v17623_v28  ;;  %14714 = vmatprep.subr.bf16.mxu0 %v17624_v15  ;;  %v17691_v28 = vld [vmem:[%s22795_s8 + $0x1e8] ss:$12 sps:$4 sm:$0xff]   ;;  %v17692_v15 = vld [vmem:[%s22795_s8 + $0x2c0] ss:$12 sps:$4 sm:$0xff]  }
 0x8c0   : > { %14990 = vmatprep.subr.bf16.mxu1 %v17627_v17  ;;  %v17693_v17 = vld [vmem:[%s22795_s8 + $0x200] ss:$12 sps:$4 sm:$0xff]  }
 0x8c2   : > { %14716 = vmatpush1.bf16.msra.mxu0 %v17626_v34  ;;  %v17694_v34 = vld [vmem:[%s22795_s8 + $0x2d8] ss:$12 sps:$4 sm:$0xff]  }
 0x8c3   : > { %14992 = vmatpush1.bf16.msra.mxu1 %v17629_v55  ;;  %14718 = vmatprep.subr.bf16.mxu0 %v17630_v18  ;;  %v17695_v55 = vld [vmem:[%s22795_s8 + $0x218] ss:$12 sps:$4 sm:$0xff]   ;;  %v17696_v18 = vld [vmem:[%s22795_s8 + $0x2f0] ss:$12 sps:$4 sm:$0xff]  }
 0x8c4   : > { %14994 = vmatprep.subr.bf16.mxu1 %v17633_v43  ;;  %v17697_v43 = vld [vmem:[%s22795_s8 + $0x230] ss:$12 sps:$4 sm:$0xff]  }
 0x8c6   : > { %14720 = vmatpush1.bf16.msra.mxu0 %v17632_v39  ;;  %v17698_v39 = vld [vmem:[%s22795_s8 + $0x308] ss:$12 sps:$4 sm:$0xff]  }
 0x8c7   : > { %14996 = vmatpush1.bf16.msra.mxu1 %v17635_v19  ;;  %14722 = vmatprep.subr.bf16.mxu0 %v17636_v26  ;;  %v18010_v19 = vmov 0.0|0.0   ;;  %v17699_v26 = vld [vmem:[%s22795_s8 + $0x320] ss:$12 sps:$4 sm:$0xff]  }
 0x8c8   : > { %14998 = vmatprep.subr.bf16.mxu1 %v17639_v0  ;;  %v17700_v0 = vld [vmem:[%s22795_s8 + $0x338] ss:$12 sps:$4 sm:$0xff]  }
 0x8ca   : > { %14724 = vmatpush1.bf16.msra.mxu0 %v17638_v13  ;;  %v17701_v13 = vld [vmem:[%s22795_s8 + $0x350] ss:$12 sps:$4 sm:$0xff]  }
 0x8cb   : > { %15000 = vmatpush1.bf16.msra.mxu1 %v17641_v1  ;;  %14726 = vmatprep.subr.bf16.mxu0 %v17642_v22  ;;  %v17702_v1 = vld [vmem:[%s22795_s8 + $0x368] ss:$12 sps:$4 sm:$0xff]   ;;  %v17703_v22 = vld [vmem:[%s22795_s8 + $0x380] ss:$12 sps:$4 sm:$0xff]  }
 0x8cc   : > { %15002 = vmatprep.subr.bf16.mxu1 %v17645_v61  ;;  %v17704_v61 = vld [vmem:[%s22795_s8 + $0x398] ss:$12 sps:$4 sm:$0xff]  }
 0x8ce   : > { %14728 = vmatpush1.bf16.msra.mxu0 %v17644_v41  ;;  %v17705_v41 = vld [vmem:[%s22795_s8 + $0x3b0] ss:$12 sps:$4 sm:$0xff]  }
 0x8cf   : > { %15004 = vmatpush1.bf16.msra.mxu1 %v17647_v37  ;;  %14730 = vmatprep.subr.bf16.mxu0 %v17648_v38  ;;  %v17706_v37 = vld [vmem:[%s22795_s8 + $0x3c8] ss:$12 sps:$4 sm:$0xff]   ;;  %v17707_v38 = vld [vmem:[%s22795_s8 + $0x3e0] ss:$12 sps:$4 sm:$0xff]  }
 0x8d0   : > { %15006 = vmatprep.subr.bf16.mxu1 %v17651_v35  ;;  %v17708_v35 = vld [vmem:[%s22795_s8 + $0x3f8] ss:$12 sps:$4 sm:$0xff]  }
 0x8d2   : > { %14732 = vmatpush1.bf16.msra.mxu0 %v17650_v32  ;;  %v17709_v32 = vld [vmem:[%s22795_s8 + $0x410] ss:$12 sps:$4 sm:$0xff]  }
 0x8d3   : > { %15008 = vmatpush1.bf16.msra.mxu1 %v17653_v16  ;;  %14734 = vmatprep.subr.bf16.mxu0 %v17654_v40  ;;  %v17710_v16 = vld [vmem:[%s22795_s8 + $0x4e8] ss:$12 sps:$4 sm:$0xff]  }
 0x8d4   : > { %15010 = vmatprep.subr.bf16.mxu1 %v17657_v50  ;;  %v17711_v40 = vld [vmem:[%s22795_s8 + $0x428] ss:$12 sps:$4 sm:$0xff]   ;;  %v17712_v50 = vld [vmem:[%s22795_s8 + $0x500] ss:$12 sps:$4 sm:$0xff]  }
 0x8d6   : > { %14736 = vmatpush1.bf16.msra.mxu0 %v17656_v47  ;;  %v17713_v47 = vld [vmem:[%s22795_s8 + $0x440] ss:$12 sps:$4 sm:$0xff]  }
 0x8d7   : > { %15012 = vmatpush1.bf16.msra.mxu1 %v17659_v29  ;;  %14738 = vmatprep.subr.bf16.mxu0 %v17660_v48  ;;  %v17714_v29 = vld [vmem:[%s22795_s8 + $0x518] ss:$12 sps:$4 sm:$0xff]  }
 0x8d8   : > { %15014 = vmatprep.subr.bf16.mxu1 %v17663_v62  ;;  %v17715_v48 = vld [vmem:[%s22795_s8 + $0x458] ss:$12 sps:$4 sm:$0xff]   ;;  %v17716_v62 = vld [vmem:[%s22795_s8 + $0x530] ss:$12 sps:$4 sm:$0xff]  }
 0x8da   : > { %14740 = vmatpush1.bf16.msra.mxu0 %v17662_v53  ;;  %v17718_v53 = vld [vmem:[%s22795_s8 + $0x548] ss:$12 sps:$4 sm:$0xff]  }
 0x8db   : > { %15016 = vmatpush1.bf16.msra.mxu1 %v17665_v45  ;;  %14742 = vmatprep.subr.bf16.mxu0 %v17666_v21  ;;  %v17719_v45 = vld [vmem:[%s22795_s8 + $0x488] ss:$12 sps:$4 sm:$0xff]   ;;  %v17720_v21 = vld [vmem:[%s22795_s8 + $0x560] ss:$12 sps:$4 sm:$0xff]  }
 0x8dd   : > { %9518 = vmatmul.mubr.f32.vlgmr.msra.gmra.mrb[48].mxu0 %v21688_v63 }
 0x8de   : > { %10382 = vmatmul.mubr.f32.vlgmr.msra.gmra.mrb[56].mxu1 %v21688_v63  ;;  %14744 = vmatpush3.bf16.msra.mxu0 %v17667_v49  ;;  %v17721_v49 = vld [vmem:[%s22795_s8 + $0x4a0] ss:$12 sps:$4 sm:$0xff]  }
 0x8df   : > { %9588 = vmatprep.mubr.f32.mxu0 %v21652_v27  ;;  %14746 = vmatprep.subr.bf16.mxu0 %v17668_v54  ;;  %v17722_v54 = vld [vmem:[%s22795_s8 + $0x578] ss:$12 sps:$4 sm:$0xff]  }
 0x8e0   : > { %10984 = vmatprep.mubr.bf16.mxu1 %v18007_v2 }
 0x8e2   : > { %14748 = vmatpush3.bf16.msra.mxu0 %v17669_v56  ;;  %v17723_v56 = vld [vmem:[%s22795_s8 + $0x4b8] ss:$12 sps:$4 sm:$0xff]  }
 0x8e3   : > { %14750 = vmatprep.subr.bf16.mxu0 %v17670_v51  ;;  %v17724_v51 = vld [vmem:[%s22795_s8 + $0x590] ss:$12 sps:$4 sm:$0xff]  }
 0x8e6   : > { %14752 = vmatpush3.bf16.msra.mxu0 %v17671_v3  ;;  %v17725_v3 = vld [vmem:[%s22795_s8 + $0x4d0] ss:$12 sps:$4 sm:$0xff]  }
 0x8e7   : > { %14754 = vmatprep.subr.bf16.mxu0 %v17672_v58  ;;  %v17726_v58 = vld [vmem:[%s22795_s8 + $0x668] ss:$12 sps:$4 sm:$0xff]  }
 0x8ea   : > { %14756 = vmatpush3.bf16.msra.mxu0 %v17673_v59  ;;  %v17727_v59 = vld [vmem:[%s22795_s8 + $0x5a8] ss:$12 sps:$4 sm:$0xff]  }
 0x8eb   : > { %14758 = vmatprep.subr.bf16.mxu0 %v17674_v60  ;;  %v17728_v60 = vld [vmem:[%s22795_s8 + $0x680] ss:$12 sps:$4 sm:$0xff]  }
 0x8ee   : > { %14760 = vmatpush3.bf16.msra.mxu0 %v17675_v30  ;;  %v17729_v30 = vld [vmem:[%s22795_s8 + $0x5c0] ss:$12 sps:$4 sm:$0xff]  }
 0x8ef   : > { %14762 = vmatprep.subr.bf16.mxu0 %v17676_v25  ;;  %v17730_v25 = vld [vmem:[%s22795_s8 + $0x698] ss:$12 sps:$4 sm:$0xff]  }
 0x8f2   : > { %14764 = vmatpush3.bf16.msra.mxu0 %v17677_v52  ;;  %v17731_v52 = vld [vmem:[%s22795_s8 + $0x5d8] ss:$12 sps:$4 sm:$0xff]  }
 0x8f3   : > { %14766 = vmatprep.subr.bf16.mxu0 %v17678_v4  ;;  %v17734_v4 = vld [vmem:[%s22795_s8 + $0x6c8] ss:$12 sps:$4 sm:$0xff]  }
 0x8f6   : > { %14768 = vmatpush3.bf16.msra.mxu0 %v17679_v5  ;;  %v17735_v5 = vld [vmem:[%s22795_s8 + $0x608] ss:$12 sps:$4 sm:$0xff]  }
 0x8f7   : > { %14770 = vmatprep.subr.bf16.mxu0 %v17680_v33  ;;  %v17736_v33 = vld [vmem:[%s22795_s8 + $0x6e0] ss:$12 sps:$4 sm:$0xff]  }
 0x8fa   : > { %14772 = vmatpush3.bf16.msra.mxu0 %v17681_v44  ;;  %v17737_v44 = vld [vmem:[%s22795_s8 + $0x620] ss:$12 sps:$4 sm:$0xff]  }
 0x8fb   : > { %14774 = vmatprep.subr.bf16.mxu0 %v17682_v6  ;;  %v17738_v6 = vld [vmem:[%s22795_s8 + $0x6f8] ss:$12 sps:$4 sm:$0xff]  }
 0x8fd   : > { %9589 = vmatmul.mubr.f32.vlgmr.msra.gmra.mrb[50].mxu0 %v21650_v20 }
 0x8fe   : > { %14776 = vmatpush3.bf16.msra.mxu0 %v17683_v11  ;;  %9658 = vmatprep.mubr.f32.mxu0 %v21672_v46  ;;  %v17739_v11 = vld [vmem:[%s22795_s8 + $0x638] ss:$12 sps:$4 sm:$0xff]  }
 0x8ff   : > { %14778 = vmatprep.subr.bf16.mxu0 %v17684_v7  ;;  %v17740_v7 = vld [vmem:[%s22795_s8 + $0x710] ss:$12 sps:$4 sm:$0xff]  }
 0x902   : > { %14780 = vmatpush3.bf16.msra.mxu0 %v17685_v36  ;;  %v17741_v36 = vld [vmem:[%s22795_s8 + $0x650] ss:$12 sps:$4 sm:$0xff]  }
 0x903   : > { %14782 = vmatprep.subr.bf16.mxu0 %v17686_v9  ;;  %v17742_v9 = vld [vmem:[%s22795_s8 + $0x728] ss:$12 sps:$4 sm:$0xff]  }
 0x906   : > { %14784 = vmatpush3.bf16.msra.mxu0 %v17687_v12  ;;  %v17743_v12 = vld [vmem:[%s22795_s8 + $0x740] ss:$12 sps:$4 sm:$0xff]  }
 0x907   : > { %14786 = vmatprep.subr.bf16.mxu0 %v17688_v14  ;;  %v17744_v14 = vld [vmem:[%s22795_s8 + $0x758] ss:$12 sps:$4 sm:$0xff]  }
 0x90a   : > { %14788 = vmatpush3.bf16.msra.mxu0 %v17689_v31  ;;  %v17747_v31 = vld [vmem:[%s22795_s8 + $0x7a0] ss:$12 sps:$4 sm:$0xff]  }
 0x90b   : > { %14790 = vmatprep.subr.bf16.mxu0 %v17690_v8  ;;  %v17748_v8 = vld [vmem:[%s22795_s8 + $0x7b8] ss:$12 sps:$4 sm:$0xff]  }
 0x90e   : > { %14792 = vmatpush3.bf16.msra.mxu0 %v17691_v28  ;;  %v17749_v28 = vld [vmem:[%s22795_s8 + $0x7d0] ss:$12 sps:$4 sm:$0xff]  }
 0x90f   : > { %14794 = vmatprep.subr.bf16.mxu0 %v17692_v15  ;;  %v17750_v15 = vld [vmem:[%s22795_s8 + $0x7e8] ss:$12 sps:$4 sm:$0xff]  }
 0x912   : > { %14796 = vmatpush3.bf16.msra.mxu0 %v17693_v17  ;;  %v17751_v17 = vld [vmem:[%s22795_s8 + $0x800] ss:$12 sps:$4 sm:$0xff]  }
 0x913   : > { %14798 = vmatprep.subr.bf16.mxu0 %v17694_v34 }
 0x916   : > { %14800 = vmatpush3.bf16.msra.mxu0 %v17695_v55 }
 0x917   : > { %14802 = vmatprep.subr.bf16.mxu0 %v17696_v18 }
 0x91a   : > { %14804 = vmatpush3.bf16.msra.mxu0 %v17697_v43 }
 0x91b   : > { %14805 = vmatprep.subr.bf16.mxu0 %v18010_v19 }
 0x91d   : > { %9659 = vmatmul.mubr.f32.vlgmr.msra.gmra.mrb[52].mxu0 %v21668_v42 }
 0x91e   : > { %14807 = vmatpush1.bf16.msra.mxu0 %v17698_v39  ;;  %12984 = vmatprep.mubr.msk.f32.mxu0 %vm2828_vm8, %v21690_v57 }
 0x91f   : > { %14808 = vmatprep.subr.bf16.mxu0 %v18010_v19 }
 0x922   : > { %14810 = vmatpush1.bf16.msra.mxu0 %v17699_v26  ;;  %v17752_v26 = vld [vmem:[%s22795_s8 + $0x818] ss:$12 sps:$4 sm:$0xff]  }
 0x923   : > { %14811 = vmatprep.subr.bf16.mxu0 %v18010_v19 }
 0x926   : > { %14813 = vmatpush1.bf16.msra.mxu0 %v17700_v0 }
 0x927   : > { %14814 = vmatprep.subr.bf16.mxu0 %v18010_v19 }
 0x92a   : > { %14816 = vmatpush1.bf16.msra.mxu0 %v17701_v13 }
 0x92b   : > { %14817 = vmatprep.subr.bf16.mxu0 %v18010_v19 }
 0x92e   : > { %14819 = vmatpush1.bf16.msra.mxu0 %v17702_v1  ;;  %v17753_v1 = vld [vmem:[%s22795_s8 + $0x830] ss:$12 sps:$4 sm:$0xff]  }
 0x92f   : > { %14820 = vmatprep.subr.bf16.mxu0 %v18010_v19 }
 0x932   : > { %14822 = vmatpush1.bf16.msra.mxu0 %v17703_v22  ;;  %v17756_v22 = vld [vmem:[%s22796_s9 + $0x1e4] ss:$12 sps:$4 sm:$0xff]  }
 0x933   : > { %14823 = vmatprep.subr.bf16.mxu0 %v18010_v19 }
 0x936   : > { %14825 = vmatpush1.bf16.msra.mxu0 %v17704_v61 }
 0x937   : > { %14826 = vmatprep.subr.bf16.mxu0 %v18010_v19 }
 0x93a   : > { %14828 = vmatpush1.bf16.msra.mxu0 %v17705_v41 }
 0x93b   : > { %14829 = vmatprep.subr.bf16.mxu0 %v18010_v19 }
 0x93e   : > { %14831 = vmatpush1.bf16.msra.mxu0 %v17706_v37  ;;  %v17754_v37 = vld [vmem:[%s22796_s9 + $0x1e0] ss:$12 sps:$4 sm:$0xff]  }
 0x93f   : > { %14832 = vmatprep.subr.bf16.mxu0 %v18010_v19 }
 0x942   : > { %14834 = vmatpush1.bf16.msra.mxu0 %v17707_v38 }
 0x943   : > { %14835 = vmatprep.subr.bf16.mxu0 %v18010_v19 }
 0x946   : > { %14837 = vmatpush1.bf16.msra.mxu0 %v17708_v35  ;;  %v17759_v35 = vld [vmem:[%s22796_s9 + $0x1fc] ss:$12 sps:$4 sm:$0xff]  }
 0x947   : > { %14838 = vmatprep.subr.bf16.mxu0 %v18010_v19 }
 0x94a   : > { %14840 = vmatpush1.bf16.msra.mxu0 %v17709_v32  ;;  %v17757_v32 = vld [vmem:[%s22796_s9 + $0x1f8] ss:$12 sps:$4 sm:$0xff]  }
 0x94b   : > { %15018 = vmatprep.subr.bf16.mxu0 %v17710_v16  ;;  %v17762_v16 = vld [vmem:[%s22796_s9 + $0x214] ss:$12 sps:$4 sm:$0xff]  }
 0x94d   : > { %9729 = vmatmul.mubr.f32.vlgmr.msra.gmra.mrb[54].mxu0 %v21688_v63 }
 0x94e   : > { %15020 = vmatpush3.bf16.msra.mxu0 %v17711_v40  ;;  %10452 = vmatprep.mubr.f32.mxu0 %v21652_v27  ;;  %v17717_v27 = vld [vmem:[%s22795_s8 + $0x470] ss:$12 sps:$4 sm:$0xff]  }
 0x94f   : > { %15022 = vmatprep.subr.bf16.mxu0 %v17712_v50  ;;  %v17760_v40 = vld [vmem:[%s22796_s9 + $0x210] ss:$12 sps:$4 sm:$0xff]   ;;  %v17763_v50 = vld [vmem:[%s22796_s9 + $0x228] ss:$12 sps:$4 sm:$0xff]  }
 0x952   : > { %15024 = vmatpush3.bf16.msra.mxu0 %v17713_v47  ;;  %v17768_v47 = vld [vmem:[%s22796_s9 + $0x244] ss:$12 sps:$4 sm:$0xff]  }
 0x953   : > { %15026 = vmatprep.subr.bf16.mxu0 %v17714_v29  ;;  %v17766_v29 = vld [vmem:[%s22796_s9 + $0x240] ss:$12 sps:$4 sm:$0xff]  }
 0x956   : > { %15028 = vmatpush3.bf16.msra.mxu0 %v17715_v48  ;;  %v17771_v48 = vld [vmem:[%s22796_s9 + $0x25c] ss:$12 sps:$4 sm:$0xff]  }
 0x957   : > { %15030 = vmatprep.subr.bf16.mxu0 %v17716_v62  ;;  %v17769_v62 = vld [vmem:[%s22796_s9 + $0x258] ss:$12 sps:$4 sm:$0xff]  }
 0x95a   : > { %15032 = vmatpush3.bf16.msra.mxu0 %v17717_v27  ;;  %v17774_v27 = vld [vmem:[%s22796_s9 + $0x274] ss:$12 sps:$4 sm:$0xff]  }
 0x95b   : > { %15034 = vmatprep.subr.bf16.mxu0 %v17718_v53 }
 0x95e   : > { %15036 = vmatpush3.bf16.msra.mxu0 %v17719_v45 }
 0x95f   : > { %15038 = vmatprep.subr.bf16.mxu0 %v17720_v21 }
 0x962   : > { %15040 = vmatpush3.bf16.msra.mxu0 %v17721_v49  ;;  %v17772_v49 = vld [vmem:[%s22796_s9 + $0x270] ss:$12 sps:$4 sm:$0xff]  }
 0x963   : > { %15042 = vmatprep.subr.bf16.mxu0 %v17722_v54  ;;  %v17777_v54 = vld [vmem:[%s22796_s9 + $0x28c] ss:$12 sps:$4 sm:$0xff]  }
 0x966   : > { %15044 = vmatpush3.bf16.msra.mxu0 %v17723_v56  ;;  %v17775_v56 = vld [vmem:[%s22796_s9 + $0x288] ss:$12 sps:$4 sm:$0xff]  }
 0x967   : > { %15046 = vmatprep.subr.bf16.mxu0 %v17724_v51  ;;  %v17780_v51 = vld [vmem:[%s22796_s9 + $0x2a4] ss:$12 sps:$4 sm:$0xff]  }
 0x96a   : > { %15048 = vmatpush3.bf16.msra.mxu0 %v17725_v3  ;;  %v17778_v3 = vld [vmem:[%s22796_s9 + $0x2a0] ss:$12 sps:$4 sm:$0xff]  }
 0x96b   : > { %15050 = vmatprep.subr.bf16.mxu0 %v17726_v58  ;;  %v17783_v58 = vld [vmem:[%s22796_s9 + $0x2bc] ss:$12 sps:$4 sm:$0xff]  }
 0x96d   : > { %10453 = vmatmul.mubr.f32.vlgmr.msra.gmra.mrb[56].mxu0 %v21650_v20  ;;  %v17732_v20 = vld [vmem:[%s22795_s8 + $0x6b0] ss:$12 sps:$4 sm:$0xff]  }
 0x96e   : > { %15052 = vmatpush3.bf16.msra.mxu0 %v17727_v59  ;;  %10522 = vmatprep.mubr.f32.mxu0 %v21672_v46  ;;  %v17733_v46 = vld [vmem:[%s22795_s8 + $0x5f0] ss:$12 sps:$4 sm:$0xff]   ;;  %v17781_v59 = vld [vmem:[%s22796_s9 + $0x2b8] ss:$12 sps:$4 sm:$0xff]  }
 0x96f   : > { %15054 = vmatprep.subr.bf16.mxu0 %v17728_v60  ;;  %v17786_v60 = vld [vmem:[%s22796_s9 + $0x2d4] ss:$12 sps:$4 sm:$0xff]  }
 0x972   : > { %15056 = vmatpush3.bf16.msra.mxu0 %v17729_v30  ;;  %v17784_v30 = vld [vmem:[%s22796_s9 + $0x2d0] ss:$12 sps:$4 sm:$0xff]  }
 0x973   : > { %15058 = vmatprep.subr.bf16.mxu0 %v17730_v25  ;;  %v17853_v25 = vld [vmem:[%s22796_s9 + $0x360] ss:$12 sps:$4 sm:$0xff]  }
 0x976   : > { %15060 = vmatpush3.bf16.msra.mxu0 %v17731_v52  ;;  %v17789_v52 = vld [vmem:[%s22796_s9 + $0x2ec] ss:$12 sps:$4 sm:$0xff]  }
 0x977   : > { %15062 = vmatprep.subr.bf16.mxu0 %v17732_v20  ;;  %v17855_v20 = vld [vmem:[%s22796_s9 + $0x364] ss:$12 sps:$4 sm:$0xff]  }
 0x978   : > { %10952 = vmatprep.subr.bf16.mxu1 %v17855_v20  ;;  %v17849_v20 = vld [vmem:[%s22796_s9 + $0x16c] ss:$12 sps:$4 sm:$0xff]  }
 0x979   : > { %10953 = vmatpush1.bf16.msra.mxu1 %v17853_v25  ;;  %v17846_v25 = vld [vmem:[%s22796_s9 + $0x154] ss:$12 sps:$4 sm:$0xff]  }
 0x97a   : > { %15064 = vmatpush3.bf16.msra.mxu0 %v17733_v46  ;;  %v17787_v46 = vld [vmem:[%s22796_s9 + $0x2e8] ss:$12 sps:$4 sm:$0xff]  }
 0x97b   : > { %15066 = vmatprep.subr.bf16.mxu0 %v17734_v4  ;;  %v17792_v4 = vld [vmem:[%s22796_s9 + $0x304] ss:$12 sps:$4 sm:$0xff]  }
 0x97e   : > { %15068 = vmatpush3.bf16.msra.mxu0 %v17735_v5  ;;  %v17790_v5 = vld [vmem:[%s22796_s9 + $0x300] ss:$12 sps:$4 sm:$0xff]  }
 0x97f   : > { %15070 = vmatprep.subr.bf16.mxu0 %v17736_v33  ;;  %v17795_v33 = vld [vmem:[%s22796_s9 + $0x31c] ss:$12 sps:$4 sm:$0xff]  }
 0x982   : > { %15072 = vmatpush3.bf16.msra.mxu0 %v17737_v44  ;;  %v17793_v44 = vld [vmem:[%s22796_s9 + $0x318] ss:$12 sps:$4 sm:$0xff]  }
 0x983   : > { %15074 = vmatprep.subr.bf16.mxu0 %v17738_v6 }
 0x986   : > { %15076 = vmatpush3.bf16.msra.mxu0 %v17739_v11  ;;  %v17798_v11 = vld [vmem:[%s22796_s9 + $0x334] ss:$12 sps:$4 sm:$0xff]  }
 0x987   : > { %15078 = vmatprep.subr.bf16.mxu0 %v17740_v7 }
 0x98a   : > { %15080 = vmatpush3.bf16.msra.mxu0 %v17741_v36 }
 0x98b   : > { %15081 = vmatprep.subr.bf16.mxu0 %v18010_v19 }
 0x98d   : > { %10523 = vmatmul.mubr.f32.vlgmr.msra.gmra.mrb[58].mxu0 %v21668_v42  ;;  %v17745_v42 = vld [vmem:[%s22795_s8 + $0x770] ss:$12 sps:$4 sm:$0xff]  }
 0x98e   : > { %15083 = vmatpush1.bf16.msra.mxu0 %v17742_v9  ;;  %13162 = vmatprep.mubr.msk.f32.mxu0 %vm2828_vm8, %v21690_v57  ;;  %v17746_v57 = vld [vmem:[%s22795_s8 + $0x788] ss:$12 sps:$4 sm:$0xff]  }
 0x98f   : > { %15084 = vmatprep.subr.bf16.mxu0 %v18010_v19 }
 0x992   : > { %15086 = vmatpush1.bf16.msra.mxu0 %v17743_v12  ;;  %v17796_v12 = vld [vmem:[%s22796_s9 + $0x330] ss:$12 sps:$4 sm:$0xff]  }
 0x993   : > { %15087 = vmatprep.subr.bf16.mxu0 %v18010_v19 }
 0x996   : > { %15089 = vmatpush1.bf16.msra.mxu0 %v17744_v14 }
 0x997   : > { %15090 = vmatprep.subr.bf16.mxu0 %v18010_v19 }
 0x99a   : > { %15092 = vmatpush1.bf16.msra.mxu0 %v17745_v42  ;;  %v17801_v42 = vld [vmem:[%s22796_s9 + $0x34c] ss:$12 sps:$4 sm:$0xff]  }
 0x99b   : > { %15093 = vmatprep.subr.bf16.mxu0 %v18010_v19 }
 0x99e   : > { %15095 = vmatpush1.bf16.msra.mxu0 %v17746_v57 }
 0x99f   : > { %15096 = vmatprep.subr.bf16.mxu0 %v18010_v19 }
 0x9a2   : > { %15098 = vmatpush1.bf16.msra.mxu0 %v17747_v31  ;;  %v17799_v31 = vld [vmem:[%s22796_s9 + $0x348] ss:$12 sps:$4 sm:$0xff]  }
 0x9a3   : > { %15099 = vmatprep.subr.bf16.mxu0 %v18010_v19 }
 0x9a6   : > { %15101 = vmatpush1.bf16.msra.mxu0 %v17748_v8 }
 0x9a7   : > { %15102 = vmatprep.subr.bf16.mxu0 %v18010_v19 }
 0x9aa   : > { %15104 = vmatpush1.bf16.msra.mxu0 %v17749_v28  ;;  %v17804_v28 = vld [vmem:[%s22796_s9 + $0x4] ss:$12 sps:$4 sm:$0xff]  }
 0x9ab   : > { %15105 = vmatprep.subr.bf16.mxu0 %v18010_v19 }
 0x9ae   : > { %15107 = vmatpush1.bf16.msra.mxu0 %v17750_v15 }
 0x9af   : > { %15108 = vmatprep.subr.bf16.mxu0 %v18010_v19 }
 0x9b0   : > { %v9519_v34 = vpop.f32.mrb[48].mxu0 }
 0x9b1   : > { %v10383_v55 = vpop.f32.mrb[56].mxu1  ;;  %v9521_v18 = vpop.f32.mrb[49].mxu0 }
 0x9b2   : > { %v22300_v43 = vmax.f32 %v9519_v34, %v10383_v55  ;;  %v10385_v39 = vpop.f32.mrb[57].mxu1  ;;  %15110 = vmatpush1.bf16.msra.mxu0 %v17751_v17  ;;  %v17802_v17 = vld [vmem:[%s22796_s9] ss:$12 sps:$4 sm:$0xff]   ;;  %v17807_v55 = vld [vmem:[%s22796_s9 + $0x1c] ss:$12 sps:$4 sm:$0xff]  }
 0x9b3   : > { %v10599_v0 = vmax.f32 %v9521_v18, %v10385_v39  ;;  %15111 = vmatprep.subr.bf16.mxu0 %v18010_v19  ;;  %v17805_v18 = vld [vmem:[%s22796_s9 + $0x18] ss:$12 sps:$4 sm:$0xff]   ;;  %v17808_v39 = vld [vmem:[%s22796_s9 + $0x30] ss:$12 sps:$4 sm:$0xff]  }
 0x9b4   : > { %v22407_v6 = vpack.c.bf16 %v22300_v43, %v22300_v43  ;;  %v17810_v43 = vld [vmem:[%s22796_s9 + $0x34] ss:$12 sps:$4 sm:$0xff]  }
 0x9b5   : > { %v22306_v13 = vpack.c.bf16 %v10599_v0, %v10599_v0  ;;  %v17811_v0 = vld [vmem:[%s22796_s9 + $0x48] ss:$12 sps:$4 sm:$0xff]  }
 0x9b6   : > { %15113 = vmatpush1.bf16.msra.mxu0 %v17752_v26  ;;  %v10688_v14 = vshll.u32 %v22407_v6, 16  ;;  %v10686_v15 = vshrl.u32 %v22407_v6, 16  ;;  %v17813_v26 = vld [vmem:[%s22796_s9 + $0x4c] ss:$12 sps:$4 sm:$0xff]  }
 0x9b7   : > { %15114 = vmatprep.subr.bf16.mxu0 %v18010_v19  ;;  %v10695_v61 = vshll.u32 %v22306_v13, 16  ;;  %v10693_v38 = vshrl.u32 %v22306_v13, 16 }
 0x9b8   : > { %v10690_v8 = vrot.slane %v10688_v14, 1  ;;  %v17870_v14 = vld [vmem:[%s22796_s9 + $0x58c] ss:$12 sps:$4 sm:$0xff]  }
 0x9b9   : > { %v10697_v41 = vrot.slane %v10695_v61, 1  ;;  %v17819_v61 = vld [vmem:[%s22796_s9 + $0x7c] ss:$12 sps:$4 sm:$0xff]  }
 0x9ba   : > { %15116 = vmatpush1.bf16.msra.mxu0 %v17753_v1  ;;  %v10691_v34 = vor.u32 %v10690_v8, %v10686_v15  ;;  %v17816_v1 = vld [vmem:[%s22796_s9 + $0x64] ss:$12 sps:$4 sm:$0xff]  }
 0x9bb   : > { %10911 = vmatprep.subr.bf16.mxu0 %v17756_v22  ;;  %v10698_v19 = vor.u32 %v10697_v41, %v10693_v38  ;;  %v17814_v22 = vld [vmem:[%s22796_s9 + $0x60] ss:$12 sps:$4 sm:$0xff]   ;;  %v17817_v41 = vld [vmem:[%s22796_s9 + $0x78] ss:$12 sps:$4 sm:$0xff]   ;;  %v17861_v38 = vld [vmem:[%s22796_s9 + $0x37c] ss:$12 sps:$4 sm:$0xff]  }
 0x9bc   : > { %10954 = vmatprep.subr.bf16.mxu1 %v17861_v38  ;;  %v17880_v38 = vld [vmem:[%s22796_s9 + $0x1b0] ss:$12 sps:$4 sm:$0xff]  }
 0x9bd   : > { %10593 = vmatmul.mubr.f32.vlgmr.msra.gmra.mrb[60].mxu0 %v21688_v63  ;;  %v17765_v63 = vld [vmem:[%s22796_s9 + $0x22c] ss:$12 sps:$4 sm:$0xff]  }
 0x9be   : > { %10912 = vmatpush1.bf16.msra.mxu0 %v17754_v37  ;;  %10943 = vmatprep.mubr.bf16.mxu0 %v10698_v19  ;;  %v17822_v37 = vld [vmem:[%s22796_s9 + $0x94] ss:$12 sps:$4 sm:$0xff]   ;;  %v17820_v19 = vld [vmem:[%s22796_s9 + $0x90] ss:$12 sps:$4 sm:$0xff]  }
 0x9bf   : > { %10913 = vmatprep.subr.bf16.mxu0 %v17759_v35  ;;  %v17859_v35 = vld [vmem:[%s22796_s9 + $0x378] ss:$12 sps:$4 sm:$0xff]  }
 0x9c0   : > { %10955 = vmatpush1.bf16.msra.mxu1 %v17859_v35  ;;  %v17885_v35 = vld [vmem:[%s22796_s9 + $0x1cc] ss:$12 sps:$4 sm:$0xff]  }
 0x9c2   : > { %10914 = vmatpush1.bf16.msra.mxu0 %v17757_v32  ;;  %v17825_v32 = vld [vmem:[%s22796_s9 + $0xac] ss:$12 sps:$4 sm:$0xff]  }
 0x9c3   : > { %10915 = vmatprep.subr.bf16.mxu0 %v17762_v16  ;;  %v17867_v16 = vld [vmem:[%s22796_s9 + $0x394] ss:$12 sps:$4 sm:$0xff]  }
 0x9c4   : > { %10956 = vmatprep.subr.bf16.mxu1 %v17867_v16  ;;  %v17891_v16 = vld [vmem:[%s22796_s9 + $0x3dc] ss:$12 sps:$4 sm:$0xff]  }
 0x9c6   : > { %10916 = vmatpush1.bf16.msra.mxu0 %v17760_v40  ;;  %v17865_v40 = vld [vmem:[%s22796_s9 + $0x390] ss:$12 sps:$4 sm:$0xff]  }
 0x9c7   : > { %10917 = vmatprep.subr.bf16.mxu0 %v17765_v63  ;;  %v17823_v63 = vld [vmem:[%s22796_s9 + $0xa8] ss:$12 sps:$4 sm:$0xff]   ;;  %10957 = vmatpush1.bf16.msra.mxu1 %v17865_v40  ;;  %v11322_v40 = vrot.slane %v22306_v13, 1 }
 0x9ca   : > { %10918 = vmatpush1.bf16.msra.mxu0 %v17763_v50  ;;  %v17828_v50 = vld [vmem:[%s22796_s9 + $0xc4] ss:$12 sps:$4 sm:$0xff]  }
 0x9cb   : > { %10919 = vmatprep.subr.bf16.mxu0 %v17768_v47  ;;  %v17873_v47 = vld [vmem:[%s22796_s9 + $0x3ac] ss:$12 sps:$4 sm:$0xff]  }
 0x9cc   : > { %10958 = vmatprep.subr.bf16.mxu1 %v17873_v47  ;;  %v17892_v47 = vld [vmem:[%s22796_s9 + $0x3f0] ss:$12 sps:$4 sm:$0xff]  }
 0x9ce   : > { %10920 = vmatpush1.bf16.msra.mxu0 %v17766_v29  ;;  %v17871_v29 = vld [vmem:[%s22796_s9 + $0x3a8] ss:$12 sps:$4 sm:$0xff]  }
 0x9cf   : > { %10921 = vmatprep.subr.bf16.mxu0 %v17771_v48  ;;  %v17876_v48 = vld [vmem:[%s22796_s9 + $0x184] ss:$12 sps:$4 sm:$0xff]   ;;  %10959 = vmatpush1.bf16.msra.mxu1 %v17871_v29  ;;  %v17895_v29 = vld [vmem:[%s22796_s9 + $0x408] ss:$12 sps:$4 sm:$0xff]  }
 0x9d0   : > { %v13434_v53 = vpop.f32.mrb[50].mxu0  ;;  %11236 = vmatprep.subr.bf16.mxu1 %v17876_v48  ;;  %v17900_v48 = vld [vmem:[%s22796_s9 + $0x424] ss:$12 sps:$4 sm:$0xff]  }
 0x9d1   : > { %v13435_v45 = vpop.f32.mrb[51].mxu0 }
 0x9d2   : > { %v13436_v21 = vadd.f32 %v13435_v45, %v13434_v53  ;;  %10922 = vmatpush1.bf16.msra.mxu0 %v17769_v62  ;;  %v17826_v62 = vld [vmem:[%s22796_s9 + $0xc0] ss:$12 sps:$4 sm:$0xff]   ;;  %v17829_v53 = vld [vmem:[%s22796_s9 + $0xd8] ss:$12 sps:$4 sm:$0xff]  }
 0x9d3   : > { %10923 = vmatprep.subr.bf16.mxu0 %v17774_v27  ;;  %v17831_v27 = vld [vmem:[%s22796_s9 + $0xdc] ss:$12 sps:$4 sm:$0xff]   ;;  %v17834_v45 = vld [vmem:[%s22796_s9 + $0xf4] ss:$12 sps:$4 sm:$0xff]  }
 0x9d6   : > { %10924 = vmatpush1.bf16.msra.mxu0 %v17772_v49 }
 0x9d7   : > { %10925 = vmatprep.subr.bf16.mxu0 %v17777_v54 }
 0x9da   : > { %10926 = vmatpush1.bf16.msra.mxu0 %v17775_v56  ;;  %v17832_v56 = vld [vmem:[%s22796_s9 + $0xf0] ss:$12 sps:$4 sm:$0xff]  }
 0x9db   : > { %10927 = vmatprep.subr.bf16.mxu0 %v17780_v51  ;;  %v17837_v51 = vld [vmem:[%s22796_s9 + $0x10c] ss:$12 sps:$4 sm:$0xff]  }
 0x9de   : > { %10928 = vmatpush1.bf16.msra.mxu0 %v17778_v3  ;;  %v17835_v3 = vld [vmem:[%s22796_s9 + $0x108] ss:$12 sps:$4 sm:$0xff]  }
 0x9df   : > { %10929 = vmatprep.subr.bf16.mxu0 %v17783_v58  ;;  %v17840_v58 = vld [vmem:[%s22796_s9 + $0x124] ss:$12 sps:$4 sm:$0xff]  }
 0x9e2   : > { %10930 = vmatpush1.bf16.msra.mxu0 %v17781_v59  ;;  %v17838_v59 = vld [vmem:[%s22796_s9 + $0x120] ss:$12 sps:$4 sm:$0xff]  }
 0x9e3   : > { %10931 = vmatprep.subr.bf16.mxu0 %v17786_v60  ;;  %v17843_v60 = vld [vmem:[%s22796_s9 + $0x13c] ss:$12 sps:$4 sm:$0xff]  }
 0x9e6   : > { %10932 = vmatpush1.bf16.msra.mxu0 %v17784_v30  ;;  %v17841_v30 = vld [vmem:[%s22796_s9 + $0x138] ss:$12 sps:$4 sm:$0xff]  }
 0x9e7   : > { %10933 = vmatprep.subr.bf16.mxu0 %v17789_v52  ;;  %v17844_v52 = vld [vmem:[%s22796_s9 + $0x150] ss:$12 sps:$4 sm:$0xff]  }
 0x9ea   : > { %10934 = vmatpush1.bf16.msra.mxu0 %v17787_v46  ;;  %v17847_v46 = vld [vmem:[%s22796_s9 + $0x168] ss:$12 sps:$4 sm:$0xff]  }
 0x9eb   : > { %10935 = vmatprep.subr.bf16.mxu0 %v17792_v4  ;;  %v17852_v4 = vld [vmem:[%s22796_s9 + $0x544] ss:$12 sps:$4 sm:$0xff]  }
 0x9ee   : > { %10936 = vmatpush1.bf16.msra.mxu0 %v17790_v5  ;;  %v17850_v5 = vld [vmem:[%s22796_s9 + $0x540] ss:$12 sps:$4 sm:$0xff]  }
 0x9ef   : > { %10937 = vmatprep.subr.bf16.mxu0 %v17795_v33  ;;  %v17858_v33 = vld [vmem:[%s22796_s9 + $0x55c] ss:$12 sps:$4 sm:$0xff]  }
 0x9f0   : > { %v13469_v7 = vpop.f32.mrb[52].mxu0 }
 0x9f1   : > { %v13470_v36 = vpop.f32.mrb[53].mxu0 }
 0x9f2   : > { %v13471_v9 = vadd.f32 %v13470_v36, %v13469_v7  ;;  %10938 = vmatpush1.bf16.msra.mxu0 %v17793_v44  ;;  %v17856_v44 = vld [vmem:[%s22796_s9 + $0x558] ss:$12 sps:$4 sm:$0xff]  }
 0x9f3   : > { %10939 = vmatprep.subr.bf16.mxu0 %v17798_v11  ;;  %v17864_v11 = vld [vmem:[%s22796_s9 + $0x574] ss:$12 sps:$4 sm:$0xff]  }
 0x9f4   : > { %v22419_v57 = vadd.f32 %v13471_v9, %v13436_v21 }
 0x9f6   : > { %10940 = vmatpush1.bf16.msra.mxu0 %v17796_v12  ;;  %v17862_v12 = vld [vmem:[%s22796_s9 + $0x570] ss:$12 sps:$4 sm:$0xff]  }
 0x9f7   : > { %10941 = vmatprep.subr.bf16.mxu0 %v17801_v42  ;;  %v17868_v42 = vld [vmem:[%s22796_s9 + $0x588] ss:$12 sps:$4 sm:$0xff]  }
 0x9fa   : > { %10942 = vmatpush1.bf16.msra.mxu0 %v17799_v31 }
 0x9fb   : > { %11195 = vmatprep.subr.bf16.mxu0 %v17804_v28 }
 0x9fd   : > { %10944 = vmatmul.mubr.bf16.vlgmr.msra.gmra.mrb[64].mxu0 %v10691_v34 }
 0x9fe   : > { %11196 = vmatpush1.bf16.msra.mxu0 %v17802_v17  ;;  %11227 = vmatprep.mubr.bf16.mxu0 %v22306_v13  ;;  %v17897_v13 = vld [vmem:[%s22796_s9 + $0x40c] ss:$12 sps:$4 sm:$0xff]  }
 0x9ff   : > { %11197 = vmatprep.subr.bf16.mxu0 %v17807_v55 }
 0xa02   : > { %11198 = vmatpush1.bf16.msra.mxu0 %v17805_v18 }
 0xa03   : > { %11199 = vmatprep.subr.bf16.mxu0 %v17810_v43 }
 0xa06   : > { %11200 = vmatpush1.bf16.msra.mxu0 %v17808_v39 }
 0xa07   : > { %11201 = vmatprep.subr.bf16.mxu0 %v17813_v26 }
 0xa0a   : > { %11202 = vmatpush1.bf16.msra.mxu0 %v17811_v0 }
 0xa0b   : > { %11203 = vmatprep.subr.bf16.mxu0 %v17816_v1  ;;  %v17874_v1 = vld [vmem:[%s22796_s9 + $0x180] ss:$12 sps:$4 sm:$0xff]  }
 0xa0e   : > { %11204 = vmatpush1.bf16.msra.mxu0 %v17814_v22 }
 0xa0f   : > { %11205 = vmatprep.subr.bf16.mxu0 %v17819_v61  ;;  %v17879_v61 = vld [vmem:[%s22796_s9 + $0x19c] ss:$12 sps:$4 sm:$0xff]  }
 0xa12   : > { %11206 = vmatpush1.bf16.msra.mxu0 %v17817_v41  ;;  %v17877_v41 = vld [vmem:[%s22796_s9 + $0x198] ss:$12 sps:$4 sm:$0xff]  }
 0xa13   : > { %11207 = vmatprep.subr.bf16.mxu0 %v17822_v37  ;;  %v17882_v37 = vld [vmem:[%s22796_s9 + $0x1b4] ss:$12 sps:$4 sm:$0xff]  }
 0xa16   : > { %11208 = vmatpush1.bf16.msra.mxu0 %v17820_v19  ;;  %v17888_v19 = vld [vmem:[%s22796_s9 + $0x3c4] ss:$12 sps:$4 sm:$0xff]  }
 0xa17   : > { %11209 = vmatprep.subr.bf16.mxu0 %v17825_v32  ;;  %v17886_v32 = vld [vmem:[%s22796_s9 + $0x3c0] ss:$12 sps:$4 sm:$0xff]  }
 0xa1a   : > { %11210 = vmatpush1.bf16.msra.mxu0 %v17823_v63  ;;  %v17889_v63 = vld [vmem:[%s22796_s9 + $0x3d8] ss:$12 sps:$4 sm:$0xff]  }
 0xa1b   : > { %11211 = vmatprep.subr.bf16.mxu0 %v17828_v50  ;;  %v17894_v50 = vld [vmem:[%s22796_s9 + $0x3f4] ss:$12 sps:$4 sm:$0xff]  }
 0xa1e   : > { %11212 = vmatpush1.bf16.msra.mxu0 %v17826_v62  ;;  %v17898_v62 = vld [vmem:[%s22796_s9 + $0x420] ss:$12 sps:$4 sm:$0xff]  }
 0xa1f   : > { %11213 = vmatprep.subr.bf16.mxu0 %v17831_v27  ;;  %v17903_v27 = vld [vmem:[%s22796_s9 + $0x43c] ss:$12 sps:$4 sm:$0xff]  }
 0xa20   : > { %v9730_v21 = vpop.f32.mrb[54].mxu0 }
 0xa21   : > { %v9731_v49 = vadd.f32 %v9730_v21, %v22419_v57  ;;  %v9732_v54 = vpop.f32.mrb[55].mxu0  ;;  %v17904_v21 = vld [vmem:[%s22796_s9 + $0x450] ss:$12 sps:$4 sm:$0xff]  }
 0xa22   : > { %11214 = vmatpush1.bf16.msra.mxu0 %v17829_v53  ;;  %v17901_v53 = vld [vmem:[%s22796_s9 + $0x438] ss:$12 sps:$4 sm:$0xff]   ;;  %v17907_v54 = vld [vmem:[%s22796_s9 + $0x468] ss:$12 sps:$4 sm:$0xff]  }
 0xa23   : > { %11215 = vmatprep.subr.bf16.mxu0 %v17834_v45  ;;  %v17906_v45 = vld [vmem:[%s22796_s9 + $0x454] ss:$12 sps:$4 sm:$0xff]  }
 0xa26   : > { %11216 = vmatpush1.bf16.msra.mxu0 %v17832_v56  ;;  %v17912_v56 = vld [vmem:[%s22796_s9 + $0x484] ss:$12 sps:$4 sm:$0xff]  }
 0xa27   : > { %11217 = vmatprep.subr.bf16.mxu0 %v17837_v51  ;;  %v17910_v51 = vld [vmem:[%s22796_s9 + $0x480] ss:$12 sps:$4 sm:$0xff]  }
 0xa2a   : > { %11218 = vmatpush1.bf16.msra.mxu0 %v17835_v3  ;;  %v17915_v3 = vld [vmem:[%s22796_s9 + $0x49c] ss:$12 sps:$4 sm:$0xff]  }
 0xa2b   : > { %11219 = vmatprep.subr.bf16.mxu0 %v17840_v58  ;;  %v17913_v58 = vld [vmem:[%s22796_s9 + $0x498] ss:$12 sps:$4 sm:$0xff]  }
 0xa2e   : > { %11220 = vmatpush1.bf16.msra.mxu0 %v17838_v59  ;;  %v17918_v59 = vld [vmem:[%s22796_s9 + $0x4b4] ss:$12 sps:$4 sm:$0xff]  }
 0xa2f   : > { %11221 = vmatprep.subr.bf16.mxu0 %v17843_v60 }
 0xa32   : > { %11222 = vmatpush1.bf16.msra.mxu0 %v17841_v30 }
 0xa33   : > { %11223 = vmatprep.subr.bf16.mxu0 %v17846_v25 }
 0xa36   : > { %11224 = vmatpush1.bf16.msra.mxu0 %v17844_v52  ;;  %v17916_v52 = vld [vmem:[%s22796_s9 + $0x4b0] ss:$12 sps:$4 sm:$0xff]  }
 0xa37   : > { %11225 = vmatprep.subr.bf16.mxu0 %v17849_v20 }
 0xa3a   : > { %11226 = vmatpush1.bf16.msra.mxu0 %v17847_v46  ;;  %v17921_v46 = vld [vmem:[%s22796_s9 + $0x4cc] ss:$12 sps:$4 sm:$0xff]  }
 0xa3b   : > { %11570 = vmatprep.subr.bf16.mxu0 %v17852_v4  ;;  %v17919_v4 = vld [vmem:[%s22796_s9 + $0x4c8] ss:$12 sps:$4 sm:$0xff]  }
 0xa3d   : > { %11228 = vmatmul.mubr.bf16.vlgmr.msra.gmra.mrb[68].mxu0 %v22407_v6 }
 0xa3e   : > { %11571 = vmatpush1.bf16.msra.mxu0 %v17850_v5  ;;  %11602 = vmatprep.mubr.bf16.mxu0 %v18007_v2  ;;  %v17924_v5 = vld [vmem:[%s22796_s9 + $0x4e4] ss:$12 sps:$4 sm:$0xff]  }
 0xa3f   : > { %11572 = vmatprep.subr.bf16.mxu0 %v17858_v33  ;;  %v17922_v33 = vld [vmem:[%s22796_s9 + $0x4e0] ss:$12 sps:$4 sm:$0xff]  }
 0xa40   : > { %v13504_v7 = vpop.f32.mrb[56].mxu0 }
 0xa41   : > { %v13505_v36 = vpop.f32.mrb[57].mxu0 }
 0xa42   : > { %v13506_v9 = vadd.f32 %v13505_v36, %v13504_v7  ;;  %11573 = vmatpush1.bf16.msra.mxu0 %v17856_v44  ;;  %v17927_v44 = vld [vmem:[%s22796_s9 + $0x4fc] ss:$12 sps:$4 sm:$0xff]   ;;  %v17930_v7 = vld [vmem:[%s22796_s9 + $0x514] ss:$12 sps:$4 sm:$0xff]  }
 0xa43   : > { %11574 = vmatprep.subr.bf16.mxu0 %v17864_v11  ;;  %v17925_v11 = vld [vmem:[%s22796_s9 + $0x4f8] ss:$12 sps:$4 sm:$0xff]   ;;  %v17928_v36 = vld [vmem:[%s22796_s9 + $0x510] ss:$12 sps:$4 sm:$0xff]  }
 0xa46   : > { %11575 = vmatpush1.bf16.msra.mxu0 %v17862_v12  ;;  %v17931_v12 = vld [vmem:[%s22796_s9 + $0x528] ss:$12 sps:$4 sm:$0xff]  }
 0xa47   : > { %11576 = vmatprep.subr.bf16.mxu0 %v17870_v14  ;;  %v11321_v14 = vrot.slane %v22407_v6, 1  ;;  %v17937_v6 = vld [vmem:[%s22798_s11 + $0x18] sm:$0xff]  }
 0xa4a   : > { %11577 = vmatpush1.bf16.msra.mxu0 %v17868_v42  ;;  %v17934_v42 = vld [vmem:[%s22798_s11] sm:$0xff]  }
 0xa4b   : > { %13597 = vmatprep.subr.bf16.mxu0 %v18008_v10 }
 0xa60   : > { %v13539_v57 = vpop.f32.mrb[58].mxu0 }
 0xa61   : > { %v13540_v31 = vpop.f32.mrb[59].mxu0 }
 0xa62   : > { %v13541_v8 = vadd.f32 %v13540_v31, %v13539_v57  ;;  %v17935_v57 = vld [vmem:[%s22798_s11 + $0x8] sm:$0xff]   ;;  %v17936_v31 = vld [vmem:[%s22798_s11 + $0x10] sm:$0xff]  }
 0xa64   : > { %v10525_v28 = vadd.f32 %v13541_v8, %v13506_v9  ;;  %v17933_v9 = vld [vmem:[%s22796_s9 + $0x52c] ss:$12 sps:$4 sm:$0xff]  }
 0xa90   : > { %v10594_v15 = vpop.f32.mrb[60].mxu0 }
 0xa91   : > { %v10595_v17 = vadd.f32 %v10594_v15, %v10525_v28  ;;  %v10596_v34 = vpop.f32.mrb[61].mxu0 }
 0xa92   : > { %v17938_v34 = vld [vmem:[%s22798_s11 + $0x20] sm:$0xff]  }
 0xa93   : > { %v10600_v55 = vmax.f32 %v9731_v49, %v10595_v17  ;;  %v17909_v49 = vld [vmem:[%s22796_s9 + $0x46c] ss:$12 sps:$4 sm:$0xff]  }
 0xa95   : > { %v10603_v18 = vpack.c.bf16 %v10600_v55, %v10600_v55  ;;  %v17939_v55 = vld [vmem:[%s22798_s11 + $0x28] sm:$0xff]  }
 0xa97   : > { %v10702_v43 = vshll.u32 %v10603_v18, 16  ;;  %v11323_v39 = vrot.slane %v10603_v18, 1  ;;  %v10700_v26 = vshrl.u32 %v10603_v18, 16 }
 0xa99   : > { %v10704_v0 = vrot.slane %v10702_v43, 1  ;;  %13365 = vmatmul.mubr.msk.bf16.vlgmr.msra.gmra.mrb[72].mxu0 %vm2828_vm8, %v11323_v39  ;;  %v17941_v43 = vld [vmem:[%s22798_s11 + $0x38] sm:$0xff]  }
 0xa9a   : > { %13598 = vmatpush3.bf16.msra.mxu0 %v17934_v42  ;;  %13613 = vmatprep.mubr.msk.bf16.mxu0 %vm18011_vm13, %v18008_v10 }
 0xa9b   : > { %v10705_v22 = vor.u32 %v10704_v0, %v10700_v26  ;;  %13599 = vmatprep.subr.bf16.mxu0 %v18008_v10 }
 0xa9d   : > { %13243 = vmatmul.mubr.msk.bf16.vlgmr.msra.gmra.mrb[60].mxu1 %vm2828_vm8, %v10705_v22 }
 0xa9e   : > { %11237 = vmatpush1.bf16.msra.mxu1 %v17874_v1  ;;  %11268 = vmatprep.mubr.bf16.mxu1 %v18007_v2  ;;  %v17883_v2 = vld [vmem:[%s22796_s9 + $0x1c8] ss:$12 sps:$4 sm:$0xff]  }
 0xa9f   : > { %11238 = vmatprep.subr.bf16.mxu1 %v17879_v61  ;;  %13600 = vmatpush3.bf16.msra.mxu0 %v17935_v57 }
 0xaa0   : > { %13601 = vmatprep.subr.bf16.mxu0 %v18008_v10 }
 0xaa2   : > { %11239 = vmatpush1.bf16.msra.mxu1 %v17877_v41 }
 0xaa3   : > { %11240 = vmatprep.subr.bf16.mxu1 %v17882_v37  ;;  %13602 = vmatpush3.bf16.msra.mxu0 %v17936_v31 }
 0xaa4   : > { %13603 = vmatprep.subr.bf16.mxu0 %v18008_v10 }
 0xaa6   : > { %11241 = vmatpush1.bf16.msra.mxu1 %v17880_v38 }
 0xaa7   : > { %11242 = vmatprep.subr.bf16.mxu1 %v17885_v35  ;;  %13604 = vmatpush3.bf16.msra.mxu0 %v17937_v6 }
 0xaa8   : > { %13605 = vmatprep.subr.bf16.mxu0 %v18008_v10 }
 0xaaa   : > { %11243 = vmatpush1.bf16.msra.mxu1 %v17883_v2 }
 0xaab   : > { %11529 = vmatprep.subr.bf16.mxu1 %v17888_v19  ;;  %13606 = vmatpush3.bf16.msra.mxu0 %v17938_v34 }
 0xaac   : > { %13607 = vmatprep.subr.bf16.mxu0 %v18008_v10 }
 0xaad   : > { %13284 = vmatmul.mubr.msk.bf16.vlgmr.msra.gmra.mrb[64].mxu1 %vm2828_vm8, %v10603_v18  ;;  %v17940_v18 = vld [vmem:[%s22798_s11 + $0x30] sm:$0xff]  }
 0xaae   : > { %11530 = vmatpush1.bf16.msra.mxu1 %v17886_v32  ;;  %11561 = vmatprep.mubr.bf16.mxu1 %v11322_v40 }
 0xaaf   : > { %11531 = vmatprep.subr.bf16.mxu1 %v17891_v16  ;;  %13608 = vmatpush3.bf16.msra.mxu0 %v17939_v55 }
 0xab0   : > { %13609 = vmatprep.subr.bf16.mxu0 %v18008_v10 }
 0xab2   : > { %11532 = vmatpush1.bf16.msra.mxu1 %v17889_v63 }
 0xab3   : > { %11533 = vmatprep.subr.bf16.mxu1 %v17894_v50  ;;  %13610 = vmatpush3.bf16.msra.mxu0 %v17940_v18 }
 0xab4   : > { %13611 = vmatprep.subr.bf16.mxu0 %v18008_v10 }
 0xab6   : > { %11534 = vmatpush1.bf16.msra.mxu1 %v17892_v47  ;;  %v11613_v47 = vld [vmem:[%s22797_s10] sm:$0x7] }
 0xab7   : > { %11535 = vmatprep.subr.bf16.mxu1 %v17897_v13  ;;  %13612 = vmatpush3.bf16.msra.mxu0 %v17941_v43 }
 0xaba   : > { %11536 = vmatpush1.bf16.msra.mxu1 %v17895_v29 }
 0xabb   : > { %11537 = vmatprep.subr.bf16.mxu1 %v17900_v48  ;;  %v11618_v48 = vrot.slane %v11613_v47, %v18362_v23 }
 0xabe   : > { %11538 = vmatpush1.bf16.msra.mxu1 %v17898_v62 }
 0xabf   : > { %11539 = vmatprep.subr.bf16.mxu1 %v17903_v27 }
 0xac2   : > { %11540 = vmatpush1.bf16.msra.mxu1 %v17901_v53  ;;  %v11622_v53 = vrot.slane %v11613_v47, %v18365_v24  ;;  %v11655_v24 = vld [vmem:[%s22799_s12] sm:$0x1] }
 0xac3   : > { %11541 = vmatprep.subr.bf16.mxu1 %v17906_v45 }
 0xac6   : > { %11542 = vmatpush1.bf16.msra.mxu1 %v17904_v21 }
 0xac7   : > { %11543 = vmatprep.subr.bf16.mxu1 %v17909_v49 }
 0xaca   : > { %11544 = vmatpush1.bf16.msra.mxu1 %v17907_v54 }
 0xacb   : > { %11545 = vmatprep.subr.bf16.mxu1 %v17912_v56 }
 0xace   : > { %11546 = vmatpush1.bf16.msra.mxu1 %v17910_v51 }
 0xacf   : > { %11547 = vmatprep.subr.bf16.mxu1 %v17915_v3 }
 0xad0   : > { %v22660_v60 = vpop.f32.mrb[64].mxu0 }
 0xad1   : > { %v22662_v30 = vpop.f32.mrb[65].mxu0 }
 0xad2   : > { %11548 = vmatpush1.bf16.msra.mxu1 %v17913_v58  ;;  %v10949_v25 = vpop.f32.mrb[66].mxu0 }
 0xad3   : > { %v10950_v20 = vpop.f32.mrb[67].mxu0  ;;  %11549 = vmatprep.subr.bf16.mxu1 %v17918_v59 }
 0xad6   : > { %11550 = vmatpush1.bf16.msra.mxu1 %v17916_v52 }
 0xad7   : > { %11551 = vmatprep.subr.bf16.mxu1 %v17921_v46 }
 0xada   : > { %11552 = vmatpush1.bf16.msra.mxu1 %v17919_v4 }
 0xadb   : > { %11553 = vmatprep.subr.bf16.mxu1 %v17924_v5 }
 0xade   : > { %11554 = vmatpush1.bf16.msra.mxu1 %v17922_v33 }
 0xadf   : > { %11555 = vmatprep.subr.bf16.mxu1 %v17927_v44 }
 0xae2   : > { %11556 = vmatpush1.bf16.msra.mxu1 %v17925_v11 }
 0xae3   : > { %11557 = vmatprep.subr.bf16.mxu1 %v17930_v7 }
 0xae6   : > { %11558 = vmatpush1.bf16.msra.mxu1 %v17928_v36 }
 0xae7   : > { %11559 = vmatprep.subr.bf16.mxu1 %v17933_v9 }
 0xaea   : > { %11560 = vmatpush1.bf16.msra.mxu1 %v17931_v12 }
 0xaed   : > { %11562 = vmatmul.mubr.bf16.vlgmr.msra.gmra.mrb[68].mxu1 %v11321_v14 }
 0xb10   : > { %v11229_v8 = vpop.f32.mrb[68].mxu0 }
 0xb11   : > { %v11231_v28 = vpop.f32.mrb[69].mxu0 }
 0xb12   : > { %v11233_v15 = vpop.f32.mrb[70].mxu0 }
 0xb13   : > { %v11234_v17 = vpop.f32.mrb[71].mxu0 }
 0xb6c   : > { %v11604_v39 = vpop.f32.mrb[72].mxu0 }
 0xb6d   : > { %v11606_v26 = vpop.f32.mrb[73].mxu0 }
 0xb6e   : > { %v11608_v0 = vpop.f32.mrb[74].mxu0 }
 0xb6f   : > { %v11609_v1 = vpop.f32.mrb[75].mxu0 }
 0xb70   : > { %v10986_v22 = vpop.f32.mrb[60].mxu1 }
 0xb71   : > { %v10987_v61 = vadd.f32 %v10986_v22, %v22660_v60  ;;  %v10988_v41 = vpop.f32.mrb[61].mxu1 }
 0xb72   : > { %v10989_v37 = vadd.f32 %v10988_v41, %v22662_v30  ;;  %v10990_v38 = vpop.f32.mrb[62].mxu1 }
 0xb73   : > { %v10991_v35 = vpop.f32.mrb[63].mxu1  ;;  %v11230_v2 = vadd.f32 %v11229_v8, %v10987_v61 }
 0xb74   : > { %v11232_v19 = vadd.f32 %v11231_v28, %v10989_v37 }
 0xb80   : > { %v11270_v32 = vpop.f32.mrb[64].mxu1 }
 0xb81   : > { %v11271_v16 = vadd.f32 %v11270_v32, %v11230_v2  ;;  %v11272_v40 = vpop.f32.mrb[65].mxu1 }
 0xb82   : > { %v11273_v63 = vadd.f32 %v11272_v40, %v11232_v19  ;;  %v11274_v10 = vpop.f32.mrb[66].mxu1 }
 0xb83   : > { %v11275_v50 = vpop.f32.mrb[67].mxu1 }
 0xbc0   : > { %v11563_v13 = vpop.f32.mrb[68].mxu1 }
 0xbc1   : > { %v11605_v29 = vadd.f32 %v11604_v39, %v11563_v13  ;;  %v11565_v62 = vpop.f32.mrb[69].mxu1 }
 0xbc2   : > { %v11607_v27 = vadd.f32 %v11606_v26, %v11565_v62  ;;  %v11567_v45 = vpop.f32.mrb[70].mxu1 }
 0xbc3   : > { %v11611_v21 = vadd.f32 %v11605_v29, %v11271_v16  ;;  %v11568_v49 = vpop.f32.mrb[71].mxu1 }
 0xbc4   : > { %v11612_v54 = vadd.f32 %v11607_v27, %v11273_v63 }
 0xbc5   : > { %v11625_v56 = vadd.f32 %v11618_v48, %v11611_v21 }
 0xbc6   : > { %v11626_v51 = vadd.f32 %v11622_v53, %v11612_v54 }
 0xbc7   : > { %v11627_v3 = vmax.f32 %v11625_v56, 0.0 }
 0xbc8   : > { %v11628_v58 = vmax.f32 %v11626_v51, 0.0 }
 0xbc9   : > { %v11631_v59 = vrot.slane %v11627_v3, 1 }
 0xbca   : > { %v11632_v60 = vrot.slane %v11628_v58, 1 }
 0xbcb   : > { %v11635_v30 = vmax.f32 %v11627_v3, %v11631_v59 }
 0xbcc   : > { %v11636_v25 = vmax.f32 %v11628_v58, %v11632_v60 }
 0xbce   : > { %v11637_v52 = vmax.f32 %v11635_v30, %v11636_v25 }
 0xbd0   : > { %v11638_v23 = vpack.c.bf16 %v11637_v52, %v11637_v52 }
 0xbd2   : > { %13614 = vmatmul.mubr.bf16.vlgmr.msra.gmra.mrb[76].mxu0 %v11638_v23 }
 0xca5   : > { %v11738_v20 = vpop.f32.mrb[76].mxu0 }
 0xca6   : > { %v11739_v46 = vadd.f32 %v11738_v20, %v11655_v24  ;;  %v13615_v4 = vpop.f32.mrb[77].mxu0 }
 0xca7   : > { %v11741_v5 = vpop.f32.mrb[78].mxu0 }
 0xca8   : > { %v13616_v33 = vpop.f32.mrb[79].mxu0  ;;  %11745 = vst.msk [vmem:[%s432_s30] sm:$0x1] %vm11744_vm14, %v11739_v46 }
 0xca9   : > { %17956 = shalt.err (!%p17953_p3)
}
 0xcaa   : > { %s17957_s17 = scalar_lea.hbm %s22745_s21, 16  ;;  %s17961_s30 = scalar_lea.hbm %s22800_s13, 32 }
 0xcab   : > { %p17958_p4 = scmp.ne.s32.totalorder %s22745_s21, %s17957_s17  ;;  %p17962_p9 = scmp.lt.u32.totalorder %s22745_s21, %s22800_s13 }
 0xcac   : > { %p17963_p10 = scmp.lt.u32.totalorder %s17961_s30, %s17957_s17  ;;  %p17965_p12 = scmp.lt.u32.totalorder %s17957_s17, %s22745_s21 }
 0xcad   : > { %p17959_p7 = pnand %p17958_p4, %p18121_p5 }
 0xcae   : > { %p17964_p11 = por %p17963_p10, %p17962_p9 }
 0xcaf   : > { %p17960_p8 = pneg %p17959_p7 }
 0xcb0   : > { %p17966_p13 = por %p17965_p12, %p17964_p11 }
 0xcb2   : > { %p17967_p0 = pnand %p17966_p13, %p17960_p8 }
 0xcb4   : > { %17970 = shalt.err (!%p17967_p0)
}
 0xcb5   : > { %15972 = dma.vmem_to_hbm [thread:$0]  (%p18121_p5), %s22747_s15, 16, %s22745_s21, %s11747_s29  }
 0xcb6 PF: > { %p15978_p1 = scmp.ge.s32.totalorder %s18005_s28, 2  ;;  %s11771_s22 = sand.u32 1, %s17993_s25  }
 0xcb7   : > { %s11772_s0 = scalar_lea.sflag [#allocation3], %s11771_s22 }
 0xcb8   : > { %p15975_p2 = pnand %p15978_p1, %p18125_p6 }
 0xcba   : > { %17988 = dma.done.wait (!%p15975_p2), %s11772_s0, 16  }
 0xcbb   : > { %17990 = vsyncadd (!%p15975_p2), %s11772_s0, 4294967280  ;;  %s22815_s28 = sld [smem:[#allocation6_spill]]  ;;  %s22816_s23 = sld [smem:[#allocation5_spill]] }
 0xcbc   : > { %s22817_s27 = sld [smem:[#allocation7_spill]]  ;;  %s22818_s25 = smov %s17997_s26 }
 0xcc1   : > { %p23_p3 = scmp.ge.s32.totalorder %s22815_s28, 4   ;;  %s22819_s26 = smov %s22816_s23 }
 0xcc3   :  { %25 = sbr.rel (!%p23_p3) target bundleno = 5 (0x5), region = 117 }
 0xcca   :  { %11776 = vsyncpa [#allocation3], 1 }
 0xccb   :  { %11778 = vsyncpa [#allocation3 + $0x1], 1 }

</bundles_post_ra>
